<compile_context>
chip_gen: v7x
topology: tpu7x:2x2x1
jax: 0.10.0
libtpu: 0.0.40
codegen_flags: <defaults>
</compile_context>

<pallas_src>
import jax
import jax.numpy as jnp
from jax import lax
from jax.experimental import pallas as pl
from jax.experimental.pallas import tpu as pltpu


def _round_up(x, m):
    return (x + m - 1) // m * m


def _pick_tile(dim, candidates):
    for c in candidates:
        if dim % c == 0:
            return c
    return dim  # full-extent block (always a legal block shape)


# --------------------------------- Pallas kernels ---------------------------------
def _matmul_lrelu_kernel(a_ref, b_ref, o_ref, acc_ref):
    """o = leaky_relu(A @ B, 0.2); grid = (M tiles, N tiles, K tiles)."""
    @pl.when(pl.program_id(2) == 0)
    def _():
        acc_ref[...] = jnp.zeros_like(acc_ref)

    acc_ref[...] += jnp.dot(a_ref[...], b_ref[...],
                            preferred_element_type=jnp.float32)

    @pl.when(pl.program_id(2) == pl.num_programs(2) - 1)
    def _():
        y = acc_ref[...]
        o_ref[...] = jnp.where(y >= 0, y, 0.2 * y).astype(o_ref.dtype)


def _matmul_stats_kernel(a_ref, b_ref, o_ref, sum_ref, sq_ref, acc_ref):
    """o = A @ B (f32) plus per-M-tile column sum / sum-of-squares (for BatchNorm)."""
    @pl.when(pl.program_id(2) == 0)
    def _():
        acc_ref[...] = jnp.zeros_like(acc_ref)

    acc_ref[...] += jnp.dot(a_ref[...], b_ref[...],
                            preferred_element_type=jnp.float32)

    @pl.when(pl.program_id(2) == pl.num_programs(2) - 1)
    def _():
        y = acc_ref[...]
        o_ref[...] = y.astype(o_ref.dtype)
        sum_ref[...] = jnp.sum(y, axis=0, keepdims=True)[None]        # (1, 1, tn)
        sq_ref[...] = jnp.sum(y * y, axis=0, keepdims=True)[None]     # (1, 1, tn)


def _affine_lrelu_kernel(x_ref, s_ref, t_ref, o_ref):
    """o = leaky_relu(x * s + t, 0.2); per-channel s/t.  f32 math, cast on store."""
    y = x_ref[...] * s_ref[...] + t_ref[...]
    o_ref[...] = jnp.where(y >= 0, y, 0.2 * y).astype(o_ref.dtype)


def _final_dot_sigmoid_kernel(a_ref, w_ref, o_ref):
    """o[m, 0] = sigmoid(sum_k a[m, k] * w[0, k]) — tiny C_out=1 final conv."""
    a = a_ref[...].astype(jnp.float32)
    s = jnp.sum(a * w_ref[...], axis=1, keepdims=True)
    o_ref[...] = 1.0 / (1.0 + jnp.exp(-s))


# --------------------------------- kernel wrappers ---------------------------------
_MM_SEMANTICS = pltpu.CompilerParams(
    dimension_semantics=("parallel", "parallel", "arbitrary"))


def _matmul_specs(M, N, K):
    tm = _pick_tile(M, (256, 128))        # favor 2+ M blocks for megacore splitting
    tn = _pick_tile(N, (256, 128))        # 256 feeds the full v6e/v7x MXU width
    tk = _pick_tile(K, (512, 256, 128))
    grid = (M // tm, N // tn, K // tk)
    a_spec = pl.BlockSpec((tm, tk), lambda i, j, k: (i, k))
    b_spec = pl.BlockSpec((tk, tn), lambda i, j, k: (k, j))
    o_spec = pl.BlockSpec((tm, tn), lambda i, j, k: (i, j))
    return grid, (tm, tn, tk), a_spec, b_spec, o_spec


def pallas_matmul_lrelu(a, b, out_dtype=jnp.bfloat16):
    """(M,K)@(K,N) bf16 MXU matmul with LeakyReLU(0.2) fused into the epilogue."""
    M, K = a.shape
    K2, N = b.shape
    assert K == K2
    grid, (tm, tn, tk), a_spec, b_spec, o_spec = _matmul_specs(M, N, K)
    return pl.pallas_call(
        _matmul_lrelu_kernel,
        out_shape=jax.ShapeDtypeStruct((M, N), out_dtype),
        grid_spec=pltpu.PrefetchScalarGridSpec(
            num_scalar_prefetch=0,
            grid=grid,
            in_specs=[a_spec, b_spec],
            out_specs=o_spec,
            scratch_shapes=[pltpu.VMEM((tm, tn), jnp.float32)],
        ),
        compiler_params=_MM_SEMANTICS,
    )(a, b)


def pallas_matmul_stats(a, b):
    """(M,K)@(K,N) bf16 MXU matmul (f32 out) that also emits per-M-tile column
    sums / sums-of-squares so BatchNorm stats never re-read the activation."""
    M, K = a.shape
    K2, N = b.shape
    assert K == K2
    grid, (tm, tn, tk), a_spec, b_spec, o_spec = _matmul_specs(M, N, K)
    num_i = grid[0]
    stats_spec = pl.BlockSpec((1, 1, tn), lambda i, j, k: (i, 0, j))
    y, sums, sqs = pl.pallas_call(
        _matmul_stats_kernel,
        out_shape=(jax.ShapeDtypeStruct((M, N), jnp.float32),
                   jax.ShapeDtypeStruct((num_i, 1, N), jnp.float32),
                   jax.ShapeDtypeStruct((num_i, 1, N), jnp.float32)),
        grid_spec=pltpu.PrefetchScalarGridSpec(
            num_scalar_prefetch=0,
            grid=grid,
            in_specs=[a_spec, b_spec],
            out_specs=(o_spec, stats_spec, stats_spec),
            scratch_shapes=[pltpu.VMEM((tm, tn), jnp.float32)],
        ),
        compiler_params=_MM_SEMANTICS,
    )(a, b)
    return y, sums, sqs


def pallas_affine_lrelu(x, scale, shift, out_dtype=jnp.bfloat16):
    """leaky_relu(x * scale + shift, 0.2); x (M,C) f32, scale/shift (C,) f32."""
    M, C = x.shape
    assert C % 128 == 0 and M % 8 == 0
    tm = M if M <= 2048 else _pick_tile(M, (2048, 1024, 512, 256))
    grid = (M // tm,)
    return pl.pallas_call(
        _affine_lrelu_kernel,
        out_shape=jax.ShapeDtypeStruct((M, C), out_dtype),
        grid_spec=pltpu.PrefetchScalarGridSpec(
            num_scalar_prefetch=0,
            grid=grid,
            in_specs=[pl.BlockSpec((tm, C), lambda i: (i, 0)),
                      pl.BlockSpec((1, C), lambda i: (0, 0)),
                      pl.BlockSpec((1, C), lambda i: (0, 0))],
            out_specs=pl.BlockSpec((tm, C), lambda i: (i, 0)),
        ),
        compiler_params=pltpu.CompilerParams(dimension_semantics=("parallel",)),
    )(x, scale.reshape(1, C), shift.reshape(1, C))


# ----------------------------- glue (patch extraction) -----------------------------
def adaptive_avg_pool_64(x):
    # nn.AdaptiveAvgPool2d((64, 64)) for H, W divisible by 64 (uniform windows).
    # TODO(synk): general adaptive pooling with non-divisible input sizes not implemented.
    N, C, H, W = x.shape
    assert H % 64 == 0 and W % 64 == 0
    fh, fw = H // 64, W // 64
    return x.reshape(N, C, 64, fh, 64, fw).mean(axis=(3, 5))


def _im2col(x, ksize, stride, pad):
    """Patches (N*Ho*Wo, C*K*K); rows ordered (n, ho, wo), features (c, kh, kw),
    matching PyTorch's weight.reshape(C_out, C_in*K*K)."""
    N, C, H, W = x.shape
    Ho = (H + 2 * pad - ksize) // stride + 1
    Wo = (W + 2 * pad - ksize) // stride + 1
    p = lax.conv_general_dilated_patches(
        x, filter_shape=(ksize, ksize), window_strides=(stride, stride),
        padding=((pad, pad), (pad, pad)),
        dimension_numbers=("NCHW", "OIHW", "NCHW"))          # (N, C*K*K, Ho, Wo)
    patches = p.transpose(0, 2, 3, 1).reshape(N * Ho * Wo, C * ksize * ksize)
    return patches, Ho, Wo


def _to_nchw(y, N, Ho, Wo, C):
    return y.reshape(N, Ho, Wo, C).transpose(0, 3, 1, 2)


# ----------------------------------- layers -----------------------------------
def conv_lrelu(x, w, stride, pad):
    """Conv2d(bias=False) + LeakyReLU(0.2); LeakyReLU fused into the matmul epilogue."""
    C_out, C_in, K, _ = w.shape
    N = x.shape[0]
    patches, Ho, Wo = _im2col(x.astype(jnp.bfloat16), K, stride, pad)
    w_mat = w.reshape(C_out, C_in * K * K).T.astype(jnp.bfloat16)
    y = pallas_matmul_lrelu(patches, w_mat)                 # (N*Ho*Wo, C_out) bf16
    return _to_nchw(y, N, Ho, Wo, C_out)


def conv_bn_lrelu(x, w, gamma, beta, stride, pad):
    """Conv2d(bias=False) + BatchNorm2d (training-mode batch stats) + LeakyReLU(0.2)."""
    C_out, C_in, K, _ = w.shape
    N = x.shape[0]
    patches, Ho, Wo = _im2col(x.astype(jnp.bfloat16), K, stride, pad)
    w_mat = w.reshape(C_out, C_in * K * K).T.astype(jnp.bfloat16)
    y, sums, sqs = pallas_matmul_stats(patches, w_mat)      # y: (M, C_out) f32
    M = y.shape[0]
    total = jnp.sum(sums, axis=(0, 1))                      # (C_out,)
    total_sq = jnp.sum(sqs, axis=(0, 1))
    mean = total / M
    var = jnp.maximum(total_sq / M - mean * mean, 0.0)      # biased batch variance
    inv = gamma * lax.rsqrt(var + 1e-5)
    shift = beta - mean * inv
    y = pallas_affine_lrelu(y, inv, shift)                  # (M, C_out) bf16
    return _to_nchw(y, N, Ho, Wo, C_out)


def final_conv_sigmoid(x, w):
    """Conv2d(512 -> 1, 4, 1, 0, bias=False) + Sigmoid as a single tiny VPU kernel."""
    C_out, C_in, K, _ = w.shape
    N = x.shape[0]
    patches, Ho, Wo = _im2col(x, K, 1, 0)                   # (N*Ho*Wo, C_in*K*K)
    M, Kdim = patches.shape
    Mp = max(8, _round_up(M, 8))
    a_p = jnp.zeros((Mp, Kdim), patches.dtype).at[:M].set(patches)
    w_row = w.reshape(C_out, Kdim).astype(jnp.float32)      # (1, Kdim)
    out = pl.pallas_call(
        _final_dot_sigmoid_kernel,
        out_shape=jax.ShapeDtypeStruct((Mp, 1), jnp.float32),
        grid=(1,),
        in_specs=[pl.BlockSpec((Mp, Kdim), lambda i: (0, 0)),
                  pl.BlockSpec((1, Kdim), lambda i: (0, 0))],
        out_specs=pl.BlockSpec((Mp, 1), lambda i: (0, 0)),
    )(a_p, w_row)
    return _to_nchw(out[:M], N, Ho, Wo, 1)


# ----------------------------- Discriminator forward -----------------------------
def discriminator_forward(x, params):
    x = adaptive_avg_pool_64(x)
    x = conv_lrelu(x, params["w1"], 2, 1)                                  # 1   -> 64
    x = conv_bn_lrelu(x, params["w2"], params["g2"], params["b2"], 2, 1)   # 64  -> 128
    x = conv_bn_lrelu(x, params["w3"], params["g3"], params["b3"], 2, 1)   # 128 -> 256
    x = conv_bn_lrelu(x, params["w4"], params["g4"], params["b4"], 2, 1)   # 256 -> 512
    return final_conv_sigmoid(x, params["w5"])                             # 512 -> 1


def init_params(key, in_channels=1):
    ks = jax.random.split(key, 5)

    def conv_w(k, c_out, c_in, ksize):
        return 0.02 * jax.random.normal(k, (c_out, c_in, ksize, ksize), jnp.float32)

    return {
        "w1": conv_w(ks[0], 64, in_channels, 4),
        "w2": conv_w(ks[1], 128, 64, 4),
        "w3": conv_w(ks[2], 256, 128, 4),
        "w4": conv_w(ks[3], 512, 256, 4),
        "w5": conv_w(ks[4], 1, 512, 4),
        # BatchNorm default init: weight=1, bias=0
        "g2": jnp.ones((128,), jnp.float32), "b2": jnp.zeros((128,), jnp.float32),
        "g3": jnp.ones((256,), jnp.float32), "b3": jnp.zeros((256,), jnp.float32),
        "g4": jnp.ones((512,), jnp.float32), "b4": jnp.zeros((512,), jnp.float32),
    }


if __name__ == "__main__":
    key = jax.random.PRNGKey(0)
    pkey, xkey = jax.random.split(key)
    params = init_params(pkey, in_channels=1)
    x = jax.random.normal(xkey, (2, 1, 64, 64), jnp.float32)   # NCHW, like PyTorch

    fwd = jax.jit(discriminator_forward)
    out = jax.block_until_ready(fwd(x, params))

    assert out.shape == (2, 1, 1, 1), out.shape
    assert bool(jnp.all(jnp.isfinite(out)))
    assert bool(jnp.all((out >= 0.0) & (out <= 1.0)))
    print("KERNEL_OK")
</pallas_src>

<mosaic_0001>
module attributes {stable_mosaic.version = 11 : i64} {
  func.func @_matmul_lrelu_kernel(%arg0: i32, %arg1: i32, %arg2: i32, %arg3: memref<256x16xbf16, #tpu.memory_space<vmem>>, %arg4: memref<16x64xbf16, #tpu.memory_space<vmem>>, %arg5: memref<256x64xbf16, #tpu.memory_space<vmem>>, %arg6: memref<256x64xf32, #tpu.memory_space<vmem>>) attributes {dimension_semantics = [#tpu.dimension_semantics<parallel>, #tpu.dimension_semantics<parallel>, #tpu.dimension_semantics<arbitrary>], iteration_bounds = array<i64: 8, 1, 1>, scalar_prefetch = 0 : i64, scratch_operands = 1 : i64, tpu.core_type = #tpu.core_type<tc>, window_params = [{transform_indices = @transform_0, window_bounds = array<i64: 256, 16>}, {transform_indices = @transform_1, window_bounds = array<i64: 16, 64>}, {transform_indices = @transform_2, window_bounds = array<i64: 256, 64>}]} {
    %c0_i32 = arith.constant 0 : i32
    %0 = arith.cmpi eq, %arg2, %c0_i32 : i32
    %1 = arith.extui %0 : i1 to i32
    %c0_i32_0 = arith.constant 0 : i32
    %2 = arith.cmpi ne, %1, %c0_i32_0 : i32
    scf.if %2 {
      %cst_10 = arith.constant 0.000000e+00 : f32
      %12 = vector.broadcast %cst_10 : f32 to vector<256x64xf32>
      %c0_11 = arith.constant 0 : index
      %c0_12 = arith.constant 0 : index
      %13 = vector.load %arg6[%c0_11, %c0_12] : memref<256x64xf32, #tpu.memory_space<vmem>>, vector<256x64xf32>
      tpu.vector_store %arg6[%c0_11, %c0_12], %12 {strides = array<i32>} : memref<256x64xf32, #tpu.memory_space<vmem>>, vector<256x64xf32>,
    } else {
    }
    %c0 = arith.constant 0 : index
    %c0_1 = arith.constant 0 : index
    %3 = vector.load %arg6[%c0, %c0_1] : memref<256x64xf32, #tpu.memory_space<vmem>>, vector<256x64xf32>
    %c0_2 = arith.constant 0 : index
    %c0_3 = arith.constant 0 : index
    %4 = vector.load %arg3[%c0_2, %c0_3] : memref<256x16xbf16, #tpu.memory_space<vmem>>, vector<256x16xbf16>
    %c0_4 = arith.constant 0 : index
    %c0_5 = arith.constant 0 : index
    %5 = vector.load %arg4[%c0_4, %c0_5] : memref<16x64xbf16, #tpu.memory_space<vmem>>, vector<16x64xbf16>
    %cst = arith.constant dense<0.000000e+00> : vector<256x64xf32>
    %6 = tpu.matmul %4, %5, %cst {dimension_numbers = #tpu.dot_dimension_numbers<[1], [0], [0], [1], [0, 0, 1, 1], [], []>} : vector<256x16xbf16>, vector<16x64xbf16>, vector<256x64xf32> -> vector<256x64xf32>
    %7 = arith.addf %3, %6 : vector<256x64xf32>
    %c0_6 = arith.constant 0 : index
    %c0_7 = arith.constant 0 : index
    %8 = vector.load %arg6[%c0_6, %c0_7] : memref<256x64xf32, #tpu.memory_space<vmem>>, vector<256x64xf32>
    tpu.vector_store %arg6[%c0_6, %c0_7], %7 {strides = array<i32>} : memref<256x64xf32, #tpu.memory_space<vmem>>, vector<256x64xf32>,
    %c0_i32_8 = arith.constant 0 : i32
    %9 = arith.cmpi eq, %arg2, %c0_i32_8 : i32
    %10 = arith.extui %9 : i1 to i32
    %c0_i32_9 = arith.constant 0 : i32
    %11 = arith.cmpi ne, %10, %c0_i32_9 : i32
    scf.if %11 {
      %c0_10 = arith.constant 0 : index
      %c0_11 = arith.constant 0 : index
      %12 = vector.load %arg6[%c0_10, %c0_11] : memref<256x64xf32, #tpu.memory_space<vmem>>, vector<256x64xf32>
      %cst_12 = arith.constant 0.000000e+00 : f32
      %13 = vector.broadcast %cst_12 : f32 to vector<256x64xf32>
      %14 = arith.cmpf oge, %12, %13 : vector<256x64xf32>
      %cst_13 = arith.constant 2.000000e-01 : f32
      %15 = vector.broadcast %cst_13 : f32 to vector<256x64xf32>
      %16 = arith.mulf %15, %12 : vector<256x64xf32>
      %17 = arith.select %14, %12, %16 : vector<256x64xi1>, vector<256x64xf32>
      %18 = arith.truncf %17 : vector<256x64xf32> to vector<256x64xbf16>
      %c0_14 = arith.constant 0 : index
      %c0_15 = arith.constant 0 : index
      %19 = vector.load %arg5[%c0_14, %c0_15] : memref<256x64xbf16, #tpu.memory_space<vmem>>, vector<256x64xbf16>
      tpu.vector_store %arg5[%c0_14, %c0_15], %18 {strides = array<i32>} : memref<256x64xbf16, #tpu.memory_space<vmem>>, vector<256x64xbf16>,
    } else {
    }
    return
  }
  func.func @transform_0(%arg0: i32, %arg1: i32, %arg2: i32) -> (i32, i32) {
    %c0_i32 = arith.constant 0 : i32
    return %arg0, %arg2 : i32, i32
  }
  func.func @transform_1(%arg0: i32, %arg1: i32, %arg2: i32) -> (i32, i32) {
    %c0_i32 = arith.constant 0 : i32
    return %arg2, %arg1 : i32, i32
  }
  func.func @transform_2(%arg0: i32, %arg1: i32, %arg2: i32) -> (i32, i32) {
    %c0_i32 = arith.constant 0 : i32
    return %arg0, %arg1 : i32, i32
  }
}

module attributes {stable_mosaic.version = 11 : i64} {
  func.func @_matmul_stats_kernel(%arg0: i32, %arg1: i32, %arg2: i32, %arg3: memref<256x512xbf16, #tpu.memory_space<vmem>>, %arg4: memref<512x128xbf16, #tpu.memory_space<vmem>>, %arg5: memref<256x128xf32, #tpu.memory_space<vmem>>, %arg6: memref<1x1x128xf32, #tpu.memory_space<vmem>>, %arg7: memref<1x1x128xf32, #tpu.memory_space<vmem>>, %arg8: memref<256x128xf32, #tpu.memory_space<vmem>>) attributes {dimension_semantics = [#tpu.dimension_semantics<parallel>, #tpu.dimension_semantics<parallel>, #tpu.dimension_semantics<arbitrary>], iteration_bounds = array<i64: 2, 1, 2>, scalar_prefetch = 0 : i64, scratch_operands = 1 : i64, tpu.core_type = #tpu.core_type<tc>, window_params = [{transform_indices = @transform_0, window_bounds = array<i64: 256, 512>}, {transform_indices = @transform_1, window_bounds = array<i64: 512, 128>}, {transform_indices = @transform_2, window_bounds = array<i64: 256, 128>}, {transform_indices = @transform_3, window_bounds = array<i64: 1, 1, 128>}, {transform_indices = @transform_4, window_bounds = array<i64: 1, 1, 128>}]} {
    %c0_i32 = arith.constant 0 : i32
    %0 = arith.cmpi eq, %arg2, %c0_i32 : i32
    %1 = arith.extui %0 : i1 to i32
    %c0_i32_0 = arith.constant 0 : i32
    %2 = arith.cmpi ne, %1, %c0_i32_0 : i32
    scf.if %2 {
      %cst_9 = arith.constant 0.000000e+00 : f32
      %12 = vector.broadcast %cst_9 : f32 to vector<256x128xf32>
      %c0_10 = arith.constant 0 : index
      %c0_11 = arith.constant 0 : index
      %13 = vector.load %arg8[%c0_10, %c0_11] : memref<256x128xf32, #tpu.memory_space<vmem>>, vector<256x128xf32>
      tpu.vector_store %arg8[%c0_10, %c0_11], %12 {strides = array<i32>} : memref<256x128xf32, #tpu.memory_space<vmem>>, vector<256x128xf32>,
    } else {
    }
    %c0 = arith.constant 0 : index
    %c0_1 = arith.constant 0 : index
    %3 = vector.load %arg8[%c0, %c0_1] : memref<256x128xf32, #tpu.memory_space<vmem>>, vector<256x128xf32>
    %c0_2 = arith.constant 0 : index
    %c0_3 = arith.constant 0 : index
    %4 = vector.load %arg3[%c0_2, %c0_3] : memref<256x512xbf16, #tpu.memory_space<vmem>>, vector<256x512xbf16>
    %c0_4 = arith.constant 0 : index
    %c0_5 = arith.constant 0 : index
    %5 = vector.load %arg4[%c0_4, %c0_5] : memref<512x128xbf16, #tpu.memory_space<vmem>>, vector<512x128xbf16>
    %cst = arith.constant dense<0.000000e+00> : vector<256x128xf32>
    %6 = tpu.matmul %4, %5, %cst {dimension_numbers = #tpu.dot_dimension_numbers<[1], [0], [0], [1], [0, 0, 1, 1], [], []>} : vector<256x512xbf16>, vector<512x128xbf16>, vector<256x128xf32> -> vector<256x128xf32>
    %7 = arith.addf %3, %6 : vector<256x128xf32>
    %c0_6 = arith.constant 0 : index
    %c0_7 = arith.constant 0 : index
    %8 = vector.load %arg8[%c0_6, %c0_7] : memref<256x128xf32, #tpu.memory_space<vmem>>, vector<256x128xf32>
    tpu.vector_store %arg8[%c0_6, %c0_7], %7 {strides = array<i32>} : memref<256x128xf32, #tpu.memory_space<vmem>>, vector<256x128xf32>,
    %c1_i32 = arith.constant 1 : i32
    %9 = arith.cmpi eq, %arg2, %c1_i32 : i32
    %10 = arith.extui %9 : i1 to i32
    %c0_i32_8 = arith.constant 0 : i32
    %11 = arith.cmpi ne, %10, %c0_i32_8 : i32
    scf.if %11 {
      %c0_9 = arith.constant 0 : index
      %c0_10 = arith.constant 0 : index
      %12 = vector.load %arg8[%c0_9, %c0_10] : memref<256x128xf32, #tpu.memory_space<vmem>>, vector<256x128xf32>
      %c0_11 = arith.constant 0 : index
      %c0_12 = arith.constant 0 : index
      %13 = vector.load %arg5[%c0_11, %c0_12] : memref<256x128xf32, #tpu.memory_space<vmem>>, vector<256x128xf32>
      tpu.vector_store %arg5[%c0_11, %c0_12], %12 {strides = array<i32>} : memref<256x128xf32, #tpu.memory_space<vmem>>, vector<256x128xf32>,
      %cst_13 = arith.constant dense<0.000000e+00> : vector<128xf32>
      %14 = vector.multi_reduction <add>, %12, %cst_13 [0] : vector<256x128xf32> to vector<128xf32>
      %15 = vector.shape_cast %14 : vector<128xf32> to vector<1x128xf32>
      %16 = vector.shape_cast %15 : vector<1x128xf32> to vector<1x1x128xf32>
      %c0_14 = arith.constant 0 : index
      %c0_15 = arith.constant 0 : index
      %c0_16 = arith.constant 0 : index
      %17 = vector.load %arg6[%c0_14, %c0_15, %c0_16] : memref<1x1x128xf32, #tpu.memory_space<vmem>>, vector<1x1x128xf32>
      tpu.vector_store %arg6[%c0_14, %c0_15, %c0_16], %16 {strides = array<i32>} : memref<1x1x128xf32, #tpu.memory_space<vmem>>, vector<1x1x128xf32>,
      %18 = arith.mulf %12, %12 : vector<256x128xf32>
      %cst_17 = arith.constant dense<0.000000e+00> : vector<128xf32>
      %19 = vector.multi_reduction <add>, %18, %cst_17 [0] : vector<256x128xf32> to vector<128xf32>
      %20 = vector.shape_cast %19 : vector<128xf32> to vector<1x128xf32>
      %21 = vector.shape_cast %20 : vector<1x128xf32> to vector<1x1x128xf32>
      %c0_18 = arith.constant 0 : index
      %c0_19 = arith.constant 0 : index
      %c0_20 = arith.constant 0 : index
      %22 = vector.load %arg7[%c0_18, %c0_19, %c0_20] : memref<1x1x128xf32, #tpu.memory_space<vmem>>, vector<1x1x128xf32>
      tpu.vector_store %arg7[%c0_18, %c0_19, %c0_20], %21 {strides = array<i32>} : memref<1x1x128xf32, #tpu.memory_space<vmem>>, vector<1x1x128xf32>,
    } else {
    }
    return
  }
  func.func @transform_0(%arg0: i32, %arg1: i32, %arg2: i32) -> (i32, i32) {
    %c0_i32 = arith.constant 0 : i32
    return %arg0, %arg2 : i32, i32
  }
  func.func @transform_1(%arg0: i32, %arg1: i32, %arg2: i32) -> (i32, i32) {
    %c0_i32 = arith.constant 0 : i32
    return %arg2, %arg1 : i32, i32
  }
  func.func @transform_2(%arg0: i32, %arg1: i32, %arg2: i32) -> (i32, i32) {
    %c0_i32 = arith.constant 0 : i32
    return %arg0, %arg1 : i32, i32
  }
  func.func @transform_3(%arg0: i32, %arg1: i32, %arg2: i32) -> (i32, i32, i32) {
    %c0_i32 = arith.constant 0 : i32
    %c0_i32_0 = arith.constant 0 : i32
    return %arg0, %c0_i32, %arg1 : i32, i32, i32
  }
  func.func @transform_4(%arg0: i32, %arg1: i32, %arg2: i32) -> (i32, i32, i32) {
    %c0_i32 = arith.constant 0 : i32
    %c0_i32_0 = arith.constant 0 : i32
    return %arg0, %c0_i32, %arg1 : i32, i32, i32
  }
}

module attributes {stable_mosaic.version = 11 : i64} {
  func.func @_affine_lrelu_kernel(%arg0: i32, %arg1: memref<512x128xf32, #tpu.memory_space<vmem>>, %arg2: memref<1x128xf32, #tpu.memory_space<vmem>>, %arg3: memref<1x128xf32, #tpu.memory_space<vmem>>, %arg4: memref<512x128xbf16, #tpu.memory_space<vmem>>) attributes {dimension_semantics = [#tpu.dimension_semantics<parallel>], iteration_bounds = array<i64: 1>, scalar_prefetch = 0 : i64, scratch_operands = 0 : i64, tpu.core_type = #tpu.core_type<tc>, window_params = [{transform_indices = @transform_0, window_bounds = array<i64: 512, 128>}, {pipeline_mode = #tpu.pipeline_mode<synchronous>, transform_indices = @transform_1, window_bounds = array<i64: 1, 128>}, {pipeline_mode = #tpu.pipeline_mode<synchronous>, transform_indices = @transform_2, window_bounds = array<i64: 1, 128>}, {transform_indices = @transform_3, window_bounds = array<i64: 512, 128>}]} {
    %c0 = arith.constant 0 : index
    %c0_0 = arith.constant 0 : index
    %0 = vector.load %arg1[%c0, %c0_0] : memref<512x128xf32, #tpu.memory_space<vmem>>, vector<512x128xf32>
    %c0_1 = arith.constant 0 : index
    %c0_2 = arith.constant 0 : index
    %1 = vector.load %arg2[%c0_1, %c0_2] : memref<1x128xf32, #tpu.memory_space<vmem>>, vector<1x128xf32>
    %2 = vector.broadcast %1 : vector<1x128xf32> to vector<512x128xf32>
    %3 = arith.mulf %0, %2 : vector<512x128xf32>
    %c0_3 = arith.constant 0 : index
    %c0_4 = arith.constant 0 : index
    %4 = vector.load %arg3[%c0_3, %c0_4] : memref<1x128xf32, #tpu.memory_space<vmem>>, vector<1x128xf32>
    %5 = vector.broadcast %4 : vector<1x128xf32> to vector<512x128xf32>
    %6 = arith.addf %3, %5 : vector<512x128xf32>
    %cst = arith.constant 0.000000e+00 : f32
    %7 = vector.broadcast %cst : f32 to vector<512x128xf32>
    %8 = arith.cmpf oge, %6, %7 : vector<512x128xf32>
    %cst_5 = arith.constant 2.000000e-01 : f32
    %9 = vector.broadcast %cst_5 : f32 to vector<512x128xf32>
    %10 = arith.mulf %9, %6 : vector<512x128xf32>
    %11 = arith.select %8, %6, %10 : vector<512x128xi1>, vector<512x128xf32>
    %12 = arith.truncf %11 : vector<512x128xf32> to vector<512x128xbf16>
    %c0_6 = arith.constant 0 : index
    %c0_7 = arith.constant 0 : index
    %13 = vector.load %arg4[%c0_6, %c0_7] : memref<512x128xbf16, #tpu.memory_space<vmem>>, vector<512x128xbf16>
    tpu.vector_store %arg4[%c0_6, %c0_7], %12 {strides = array<i32>} : memref<512x128xbf16, #tpu.memory_space<vmem>>, vector<512x128xbf16>,
    return
  }
  func.func @transform_0(%arg0: i32) -> (i32, i32) {
    %c0_i32 = arith.constant 0 : i32
    %c0_i32_0 = arith.constant 0 : i32
    return %arg0, %c0_i32 : i32, i32
  }
  func.func @transform_1(%arg0: i32) -> (i32, i32) {
    %c0_i32 = arith.constant 0 : i32
    %c0_i32_0 = arith.constant 0 : i32
    %c0_i32_1 = arith.constant 0 : i32
    return %c0_i32, %c0_i32_0 : i32, i32
  }
  func.func @transform_2(%arg0: i32) -> (i32, i32) {
    %c0_i32 = arith.constant 0 : i32
    %c0_i32_0 = arith.constant 0 : i32
    %c0_i32_1 = arith.constant 0 : i32
    return %c0_i32, %c0_i32_0 : i32, i32
  }
  func.func @transform_3(%arg0: i32) -> (i32, i32) {
    %c0_i32 = arith.constant 0 : i32
    %c0_i32_0 = arith.constant 0 : i32
    return %arg0, %c0_i32 : i32, i32
  }
}

module attributes {stable_mosaic.version = 11 : i64} {
  func.func @_matmul_stats_kernel(%arg0: i32, %arg1: i32, %arg2: i32, %arg3: memref<128x512xbf16, #tpu.memory_space<vmem>>, %arg4: memref<512x256xbf16, #tpu.memory_space<vmem>>, %arg5: memref<128x256xf32, #tpu.memory_space<vmem>>, %arg6: memref<1x1x256xf32, #tpu.memory_space<vmem>>, %arg7: memref<1x1x256xf32, #tpu.memory_space<vmem>>, %arg8: memref<128x256xf32, #tpu.memory_space<vmem>>) attributes {dimension_semantics = [#tpu.dimension_semantics<parallel>, #tpu.dimension_semantics<parallel>, #tpu.dimension_semantics<arbitrary>], iteration_bounds = array<i64: 1, 1, 4>, scalar_prefetch = 0 : i64, scratch_operands = 1 : i64, tpu.core_type = #tpu.core_type<tc>, window_params = [{transform_indices = @transform_0, window_bounds = array<i64: 128, 512>}, {transform_indices = @transform_1, window_bounds = array<i64: 512, 256>}, {transform_indices = @transform_2, window_bounds = array<i64: 128, 256>}, {transform_indices = @transform_3, window_bounds = array<i64: 1, 1, 256>}, {transform_indices = @transform_4, window_bounds = array<i64: 1, 1, 256>}]} {
    %c0_i32 = arith.constant 0 : i32
    %0 = arith.cmpi eq, %arg2, %c0_i32 : i32
    %1 = arith.extui %0 : i1 to i32
    %c0_i32_0 = arith.constant 0 : i32
    %2 = arith.cmpi ne, %1, %c0_i32_0 : i32
    scf.if %2 {
      %cst_9 = arith.constant 0.000000e+00 : f32
      %12 = vector.broadcast %cst_9 : f32 to vector<128x256xf32>
      %c0_10 = arith.constant 0 : index
      %c0_11 = arith.constant 0 : index
      %13 = vector.load %arg8[%c0_10, %c0_11] : memref<128x256xf32, #tpu.memory_space<vmem>>, vector<128x256xf32>
      tpu.vector_store %arg8[%c0_10, %c0_11], %12 {strides = array<i32>} : memref<128x256xf32, #tpu.memory_space<vmem>>, vector<128x256xf32>,
    } else {
    }
    %c0 = arith.constant 0 : index
    %c0_1 = arith.constant 0 : index
    %3 = vector.load %arg8[%c0, %c0_1] : memref<128x256xf32, #tpu.memory_space<vmem>>, vector<128x256xf32>
    %c0_2 = arith.constant 0 : index
    %c0_3 = arith.constant 0 : index
    %4 = vector.load %arg3[%c0_2, %c0_3] : memref<128x512xbf16, #tpu.memory_space<vmem>>, vector<128x512xbf16>
    %c0_4 = arith.constant 0 : index
    %c0_5 = arith.constant 0 : index
    %5 = vector.load %arg4[%c0_4, %c0_5] : memref<512x256xbf16, #tpu.memory_space<vmem>>, vector<512x256xbf16>
    %cst = arith.constant dense<0.000000e+00> : vector<128x256xf32>
    %6 = tpu.matmul %4, %5, %cst {dimension_numbers = #tpu.dot_dimension_numbers<[1], [0], [0], [1], [0, 0, 1, 1], [], []>} : vector<128x512xbf16>, vector<512x256xbf16>, vector<128x256xf32> -> vector<128x256xf32>
    %7 = arith.addf %3, %6 : vector<128x256xf32>
    %c0_6 = arith.constant 0 : index
    %c0_7 = arith.constant 0 : index
    %8 = vector.load %arg8[%c0_6, %c0_7] : memref<128x256xf32, #tpu.memory_space<vmem>>, vector<128x256xf32>
    tpu.vector_store %arg8[%c0_6, %c0_7], %7 {strides = array<i32>} : memref<128x256xf32, #tpu.memory_space<vmem>>, vector<128x256xf32>,
    %c3_i32 = arith.constant 3 : i32
    %9 = arith.cmpi eq, %arg2, %c3_i32 : i32
    %10 = arith.extui %9 : i1 to i32
    %c0_i32_8 = arith.constant 0 : i32
    %11 = arith.cmpi ne, %10, %c0_i32_8 : i32
    scf.if %11 {
      %c0_9 = arith.constant 0 : index
      %c0_10 = arith.constant 0 : index
      %12 = vector.load %arg8[%c0_9, %c0_10] : memref<128x256xf32, #tpu.memory_space<vmem>>, vector<128x256xf32>
      %c0_11 = arith.constant 0 : index
      %c0_12 = arith.constant 0 : index
      %13 = vector.load %arg5[%c0_11, %c0_12] : memref<128x256xf32, #tpu.memory_space<vmem>>, vector<128x256xf32>
      tpu.vector_store %arg5[%c0_11, %c0_12], %12 {strides = array<i32>} : memref<128x256xf32, #tpu.memory_space<vmem>>, vector<128x256xf32>,
      %cst_13 = arith.constant dense<0.000000e+00> : vector<256xf32>
      %14 = vector.multi_reduction <add>, %12, %cst_13 [0] : vector<128x256xf32> to vector<256xf32>
      %15 = vector.shape_cast %14 : vector<256xf32> to vector<1x256xf32>
      %16 = vector.shape_cast %15 : vector<1x256xf32> to vector<1x1x256xf32>
      %c0_14 = arith.constant 0 : index
      %c0_15 = arith.constant 0 : index
      %c0_16 = arith.constant 0 : index
      %17 = vector.load %arg6[%c0_14, %c0_15, %c0_16] : memref<1x1x256xf32, #tpu.memory_space<vmem>>, vector<1x1x256xf32>
      tpu.vector_store %arg6[%c0_14, %c0_15, %c0_16], %16 {strides = array<i32>} : memref<1x1x256xf32, #tpu.memory_space<vmem>>, vector<1x1x256xf32>,
      %18 = arith.mulf %12, %12 : vector<128x256xf32>
      %cst_17 = arith.constant dense<0.000000e+00> : vector<256xf32>
      %19 = vector.multi_reduction <add>, %18, %cst_17 [0] : vector<128x256xf32> to vector<256xf32>
      %20 = vector.shape_cast %19 : vector<256xf32> to vector<1x256xf32>
      %21 = vector.shape_cast %20 : vector<1x256xf32> to vector<1x1x256xf32>
      %c0_18 = arith.constant 0 : index
      %c0_19 = arith.constant 0 : index
      %c0_20 = arith.constant 0 : index
      %22 = vector.load %arg7[%c0_18, %c0_19, %c0_20] : memref<1x1x256xf32, #tpu.memory_space<vmem>>, vector<1x1x256xf32>
      tpu.vector_store %arg7[%c0_18, %c0_19, %c0_20], %21 {strides = array<i32>} : memref<1x1x256xf32, #tpu.memory_space<vmem>>, vector<1x1x256xf32>,
    } else {
    }
    return
  }
  func.func @transform_0(%arg0: i32, %arg1: i32, %arg2: i32) -> (i32, i32) {
    %c0_i32 = arith.constant 0 : i32
    return %arg0, %arg2 : i32, i32
  }
  func.func @transform_1(%arg0: i32, %arg1: i32, %arg2: i32) -> (i32, i32) {
    %c0_i32 = arith.constant 0 : i32
    return %arg2, %arg1 : i32, i32
  }
  func.func @transform_2(%arg0: i32, %arg1: i32, %arg2: i32) -> (i32, i32) {
    %c0_i32 = arith.constant 0 : i32
    return %arg0, %arg1 : i32, i32
  }
  func.func @transform_3(%arg0: i32, %arg1: i32, %arg2: i32) -> (i32, i32, i32) {
    %c0_i32 = arith.constant 0 : i32
    %c0_i32_0 = arith.constant 0 : i32
    return %arg0, %c0_i32, %arg1 : i32, i32, i32
  }
  func.func @transform_4(%arg0: i32, %arg1: i32, %arg2: i32) -> (i32, i32, i32) {
    %c0_i32 = arith.constant 0 : i32
    %c0_i32_0 = arith.constant 0 : i32
    return %arg0, %c0_i32, %arg1 : i32, i32, i32
  }
}

module attributes {stable_mosaic.version = 11 : i64} {
  func.func @_affine_lrelu_kernel(%arg0: i32, %arg1: memref<128x256xf32, #tpu.memory_space<vmem>>, %arg2: memref<1x256xf32, #tpu.memory_space<vmem>>, %arg3: memref<1x256xf32, #tpu.memory_space<vmem>>, %arg4: memref<128x256xbf16, #tpu.memory_space<vmem>>) attributes {dimension_semantics = [#tpu.dimension_semantics<parallel>], iteration_bounds = array<i64: 1>, scalar_prefetch = 0 : i64, scratch_operands = 0 : i64, tpu.core_type = #tpu.core_type<tc>, window_params = [{transform_indices = @transform_0, window_bounds = array<i64: 128, 256>}, {pipeline_mode = #tpu.pipeline_mode<synchronous>, transform_indices = @transform_1, window_bounds = array<i64: 1, 256>}, {pipeline_mode = #tpu.pipeline_mode<synchronous>, transform_indices = @transform_2, window_bounds = array<i64: 1, 256>}, {transform_indices = @transform_3, window_bounds = array<i64: 128, 256>}]} {
    %c0 = arith.constant 0 : index
    %c0_0 = arith.constant 0 : index
    %0 = vector.load %arg1[%c0, %c0_0] : memref<128x256xf32, #tpu.memory_space<vmem>>, vector<128x256xf32>
    %c0_1 = arith.constant 0 : index
    %c0_2 = arith.constant 0 : index
    %1 = vector.load %arg2[%c0_1, %c0_2] : memref<1x256xf32, #tpu.memory_space<vmem>>, vector<1x256xf32>
    %2 = vector.broadcast %1 : vector<1x256xf32> to vector<128x256xf32>
    %3 = arith.mulf %0, %2 : vector<128x256xf32>
    %c0_3 = arith.constant 0 : index
    %c0_4 = arith.constant 0 : index
    %4 = vector.load %arg3[%c0_3, %c0_4] : memref<1x256xf32, #tpu.memory_space<vmem>>, vector<1x256xf32>
    %5 = vector.broadcast %4 : vector<1x256xf32> to vector<128x256xf32>
    %6 = arith.addf %3, %5 : vector<128x256xf32>
    %cst = arith.constant 0.000000e+00 : f32
    %7 = vector.broadcast %cst : f32 to vector<128x256xf32>
    %8 = arith.cmpf oge, %6, %7 : vector<128x256xf32>
    %cst_5 = arith.constant 2.000000e-01 : f32
    %9 = vector.broadcast %cst_5 : f32 to vector<128x256xf32>
    %10 = arith.mulf %9, %6 : vector<128x256xf32>
    %11 = arith.select %8, %6, %10 : vector<128x256xi1>, vector<128x256xf32>
    %12 = arith.truncf %11 : vector<128x256xf32> to vector<128x256xbf16>
    %c0_6 = arith.constant 0 : index
    %c0_7 = arith.constant 0 : index
    %13 = vector.load %arg4[%c0_6, %c0_7] : memref<128x256xbf16, #tpu.memory_space<vmem>>, vector<128x256xbf16>
    tpu.vector_store %arg4[%c0_6, %c0_7], %12 {strides = array<i32>} : memref<128x256xbf16, #tpu.memory_space<vmem>>, vector<128x256xbf16>,
    return
  }
  func.func @transform_0(%arg0: i32) -> (i32, i32) {
    %c0_i32 = arith.constant 0 : i32
    %c0_i32_0 = arith.constant 0 : i32
    return %arg0, %c0_i32 : i32, i32
  }
  func.func @transform_1(%arg0: i32) -> (i32, i32) {
    %c0_i32 = arith.constant 0 : i32
    %c0_i32_0 = arith.constant 0 : i32
    %c0_i32_1 = arith.constant 0 : i32
    return %c0_i32, %c0_i32_0 : i32, i32
  }
  func.func @transform_2(%arg0: i32) -> (i32, i32) {
    %c0_i32 = arith.constant 0 : i32
    %c0_i32_0 = arith.constant 0 : i32
    %c0_i32_1 = arith.constant 0 : i32
    return %c0_i32, %c0_i32_0 : i32, i32
  }
  func.func @transform_3(%arg0: i32) -> (i32, i32) {
    %c0_i32 = arith.constant 0 : i32
    %c0_i32_0 = arith.constant 0 : i32
    return %arg0, %c0_i32 : i32, i32
  }
}

module attributes {stable_mosaic.version = 11 : i64} {
  func.func @_matmul_stats_kernel(%arg0: i32, %arg1: i32, %arg2: i32, %arg3: memref<32x512xbf16, #tpu.memory_space<vmem>>, %arg4: memref<512x256xbf16, #tpu.memory_space<vmem>>, %arg5: memref<32x256xf32, #tpu.memory_space<vmem>>, %arg6: memref<1x1x256xf32, #tpu.memory_space<vmem>>, %arg7: memref<1x1x256xf32, #tpu.memory_space<vmem>>, %arg8: memref<32x256xf32, #tpu.memory_space<vmem>>) attributes {dimension_semantics = [#tpu.dimension_semantics<parallel>, #tpu.dimension_semantics<parallel>, #tpu.dimension_semantics<arbitrary>], iteration_bounds = array<i64: 1, 2, 8>, scalar_prefetch = 0 : i64, scratch_operands = 1 : i64, tpu.core_type = #tpu.core_type<tc>, window_params = [{transform_indices = @transform_0, window_bounds = array<i64: 32, 512>}, {transform_indices = @transform_1, window_bounds = array<i64: 512, 256>}, {transform_indices = @transform_2, window_bounds = array<i64: 32, 256>}, {transform_indices = @transform_3, window_bounds = array<i64: 1, 1, 256>}, {transform_indices = @transform_4, window_bounds = array<i64: 1, 1, 256>}]} {
    %c0_i32 = arith.constant 0 : i32
    %0 = arith.cmpi eq, %arg2, %c0_i32 : i32
    %1 = arith.extui %0 : i1 to i32
    %c0_i32_0 = arith.constant 0 : i32
    %2 = arith.cmpi ne, %1, %c0_i32_0 : i32
    scf.if %2 {
      %cst_9 = arith.constant 0.000000e+00 : f32
      %12 = vector.broadcast %cst_9 : f32 to vector<32x256xf32>
      %c0_10 = arith.constant 0 : index
      %c0_11 = arith.constant 0 : index
      %13 = vector.load %arg8[%c0_10, %c0_11] : memref<32x256xf32, #tpu.memory_space<vmem>>, vector<32x256xf32>
      tpu.vector_store %arg8[%c0_10, %c0_11], %12 {strides = array<i32>} : memref<32x256xf32, #tpu.memory_space<vmem>>, vector<32x256xf32>,
    } else {
    }
    %c0 = arith.constant 0 : index
    %c0_1 = arith.constant 0 : index
    %3 = vector.load %arg8[%c0, %c0_1] : memref<32x256xf32, #tpu.memory_space<vmem>>, vector<32x256xf32>
    %c0_2 = arith.constant 0 : index
    %c0_3 = arith.constant 0 : index
    %4 = vector.load %arg3[%c0_2, %c0_3] : memref<32x512xbf16, #tpu.memory_space<vmem>>, vector<32x512xbf16>
    %c0_4 = arith.constant 0 : index
    %c0_5 = arith.constant 0 : index
    %5 = vector.load %arg4[%c0_4, %c0_5] : memref<512x256xbf16, #tpu.memory_space<vmem>>, vector<512x256xbf16>
    %cst = arith.constant dense<0.000000e+00> : vector<32x256xf32>
    %6 = tpu.matmul %4, %5, %cst {dimension_numbers = #tpu.dot_dimension_numbers<[1], [0], [0], [1], [0, 0, 1, 1], [], []>} : vector<32x512xbf16>, vector<512x256xbf16>, vector<32x256xf32> -> vector<32x256xf32>
    %7 = arith.addf %3, %6 : vector<32x256xf32>
    %c0_6 = arith.constant 0 : index
    %c0_7 = arith.constant 0 : index
    %8 = vector.load %arg8[%c0_6, %c0_7] : memref<32x256xf32, #tpu.memory_space<vmem>>, vector<32x256xf32>
    tpu.vector_store %arg8[%c0_6, %c0_7], %7 {strides = array<i32>} : memref<32x256xf32, #tpu.memory_space<vmem>>, vector<32x256xf32>,
    %c7_i32 = arith.constant 7 : i32
    %9 = arith.cmpi eq, %arg2, %c7_i32 : i32
    %10 = arith.extui %9 : i1 to i32
    %c0_i32_8 = arith.constant 0 : i32
    %11 = arith.cmpi ne, %10, %c0_i32_8 : i32
    scf.if %11 {
      %c0_9 = arith.constant 0 : index
      %c0_10 = arith.constant 0 : index
      %12 = vector.load %arg8[%c0_9, %c0_10] : memref<32x256xf32, #tpu.memory_space<vmem>>, vector<32x256xf32>
      %c0_11 = arith.constant 0 : index
      %c0_12 = arith.constant 0 : index
      %13 = vector.load %arg5[%c0_11, %c0_12] : memref<32x256xf32, #tpu.memory_space<vmem>>, vector<32x256xf32>
      tpu.vector_store %arg5[%c0_11, %c0_12], %12 {strides = array<i32>} : memref<32x256xf32, #tpu.memory_space<vmem>>, vector<32x256xf32>,
      %cst_13 = arith.constant dense<0.000000e+00> : vector<256xf32>
      %14 = vector.multi_reduction <add>, %12, %cst_13 [0] : vector<32x256xf32> to vector<256xf32>
      %15 = vector.shape_cast %14 : vector<256xf32> to vector<1x256xf32>
      %16 = vector.shape_cast %15 : vector<1x256xf32> to vector<1x1x256xf32>
      %c0_14 = arith.constant 0 : index
      %c0_15 = arith.constant 0 : index
      %c0_16 = arith.constant 0 : index
      %17 = vector.load %arg6[%c0_14, %c0_15, %c0_16] : memref<1x1x256xf32, #tpu.memory_space<vmem>>, vector<1x1x256xf32>
      tpu.vector_store %arg6[%c0_14, %c0_15, %c0_16], %16 {strides = array<i32>} : memref<1x1x256xf32, #tpu.memory_space<vmem>>, vector<1x1x256xf32>,
      %18 = arith.mulf %12, %12 : vector<32x256xf32>
      %cst_17 = arith.constant dense<0.000000e+00> : vector<256xf32>
      %19 = vector.multi_reduction <add>, %18, %cst_17 [0] : vector<32x256xf32> to vector<256xf32>
      %20 = vector.shape_cast %19 : vector<256xf32> to vector<1x256xf32>
      %21 = vector.shape_cast %20 : vector<1x256xf32> to vector<1x1x256xf32>
      %c0_18 = arith.constant 0 : index
      %c0_19 = arith.constant 0 : index
      %c0_20 = arith.constant 0 : index
      %22 = vector.load %arg7[%c0_18, %c0_19, %c0_20] : memref<1x1x256xf32, #tpu.memory_space<vmem>>, vector<1x1x256xf32>
      tpu.vector_store %arg7[%c0_18, %c0_19, %c0_20], %21 {strides = array<i32>} : memref<1x1x256xf32, #tpu.memory_space<vmem>>, vector<1x1x256xf32>,
    } else {
    }
    return
  }
  func.func @transform_0(%arg0: i32, %arg1: i32, %arg2: i32) -> (i32, i32) {
    %c0_i32 = arith.constant 0 : i32
    return %arg0, %arg2 : i32, i32
  }
  func.func @transform_1(%arg0: i32, %arg1: i32, %arg2: i32) -> (i32, i32) {
    %c0_i32 = arith.constant 0 : i32
    return %arg2, %arg1 : i32, i32
  }
  func.func @transform_2(%arg0: i32, %arg1: i32, %arg2: i32) -> (i32, i32) {
    %c0_i32 = arith.constant 0 : i32
    return %arg0, %arg1 : i32, i32
  }
  func.func @transform_3(%arg0: i32, %arg1: i32, %arg2: i32) -> (i32, i32, i32) {
    %c0_i32 = arith.constant 0 : i32
    %c0_i32_0 = arith.constant 0 : i32
    return %arg0, %c0_i32, %arg1 : i32, i32, i32
  }
  func.func @transform_4(%arg0: i32, %arg1: i32, %arg2: i32) -> (i32, i32, i32) {
    %c0_i32 = arith.constant 0 : i32
    %c0_i32_0 = arith.constant 0 : i32
    return %arg0, %c0_i32, %arg1 : i32, i32, i32
  }
}

module attributes {stable_mosaic.version = 11 : i64} {
  func.func @_affine_lrelu_kernel(%arg0: i32, %arg1: memref<32x512xf32, #tpu.memory_space<vmem>>, %arg2: memref<1x512xf32, #tpu.memory_space<vmem>>, %arg3: memref<1x512xf32, #tpu.memory_space<vmem>>, %arg4: memref<32x512xbf16, #tpu.memory_space<vmem>>) attributes {dimension_semantics = [#tpu.dimension_semantics<parallel>], iteration_bounds = array<i64: 1>, scalar_prefetch = 0 : i64, scratch_operands = 0 : i64, tpu.core_type = #tpu.core_type<tc>, window_params = [{transform_indices = @transform_0, window_bounds = array<i64: 32, 512>}, {pipeline_mode = #tpu.pipeline_mode<synchronous>, transform_indices = @transform_1, window_bounds = array<i64: 1, 512>}, {pipeline_mode = #tpu.pipeline_mode<synchronous>, transform_indices = @transform_2, window_bounds = array<i64: 1, 512>}, {transform_indices = @transform_3, window_bounds = array<i64: 32, 512>}]} {
    %c0 = arith.constant 0 : index
    %c0_0 = arith.constant 0 : index
    %0 = vector.load %arg1[%c0, %c0_0] : memref<32x512xf32, #tpu.memory_space<vmem>>, vector<32x512xf32>
    %c0_1 = arith.constant 0 : index
    %c0_2 = arith.constant 0 : index
    %1 = vector.load %arg2[%c0_1, %c0_2] : memref<1x512xf32, #tpu.memory_space<vmem>>, vector<1x512xf32>
    %2 = vector.broadcast %1 : vector<1x512xf32> to vector<32x512xf32>
    %3 = arith.mulf %0, %2 : vector<32x512xf32>
    %c0_3 = arith.constant 0 : index
    %c0_4 = arith.constant 0 : index
    %4 = vector.load %arg3[%c0_3, %c0_4] : memref<1x512xf32, #tpu.memory_space<vmem>>, vector<1x512xf32>
    %5 = vector.broadcast %4 : vector<1x512xf32> to vector<32x512xf32>
    %6 = arith.addf %3, %5 : vector<32x512xf32>
    %cst = arith.constant 0.000000e+00 : f32
    %7 = vector.broadcast %cst : f32 to vector<32x512xf32>
    %8 = arith.cmpf oge, %6, %7 : vector<32x512xf32>
    %cst_5 = arith.constant 2.000000e-01 : f32
    %9 = vector.broadcast %cst_5 : f32 to vector<32x512xf32>
    %10 = arith.mulf %9, %6 : vector<32x512xf32>
    %11 = arith.select %8, %6, %10 : vector<32x512xi1>, vector<32x512xf32>
    %12 = arith.truncf %11 : vector<32x512xf32> to vector<32x512xbf16>
    %c0_6 = arith.constant 0 : index
    %c0_7 = arith.constant 0 : index
    %13 = vector.load %arg4[%c0_6, %c0_7] : memref<32x512xbf16, #tpu.memory_space<vmem>>, vector<32x512xbf16>
    tpu.vector_store %arg4[%c0_6, %c0_7], %12 {strides = array<i32>} : memref<32x512xbf16, #tpu.memory_space<vmem>>, vector<32x512xbf16>,
    return
  }
  func.func @transform_0(%arg0: i32) -> (i32, i32) {
    %c0_i32 = arith.constant 0 : i32
    %c0_i32_0 = arith.constant 0 : i32
    return %arg0, %c0_i32 : i32, i32
  }
  func.func @transform_1(%arg0: i32) -> (i32, i32) {
    %c0_i32 = arith.constant 0 : i32
    %c0_i32_0 = arith.constant 0 : i32
    %c0_i32_1 = arith.constant 0 : i32
    return %c0_i32, %c0_i32_0 : i32, i32
  }
  func.func @transform_2(%arg0: i32) -> (i32, i32) {
    %c0_i32 = arith.constant 0 : i32
    %c0_i32_0 = arith.constant 0 : i32
    %c0_i32_1 = arith.constant 0 : i32
    return %c0_i32, %c0_i32_0 : i32, i32
  }
  func.func @transform_3(%arg0: i32) -> (i32, i32) {
    %c0_i32 = arith.constant 0 : i32
    %c0_i32_0 = arith.constant 0 : i32
    return %arg0, %c0_i32 : i32, i32
  }
}

module attributes {stable_mosaic.version = 11 : i64} {
  func.func @_final_dot_sigmoid_kernel(%arg0: i32, %arg1: memref<8x8192xbf16, #tpu.memory_space<vmem>>, %arg2: memref<1x8192xf32, #tpu.memory_space<vmem>>, %arg3: memref<8x1xf32, #tpu.memory_space<vmem>>) attributes {dimension_semantics = [#tpu.dimension_semantics<arbitrary>], iteration_bounds = array<i64: 1>, scalar_prefetch = 0 : i64, scratch_operands = 0 : i64, tpu.core_type = #tpu.core_type<tc>, window_params = [{pipeline_mode = #tpu.pipeline_mode<synchronous>, transform_indices = @transform_0, window_bounds = array<i64: 8, 8192>}, {pipeline_mode = #tpu.pipeline_mode<synchronous>, transform_indices = @transform_1, window_bounds = array<i64: 1, 8192>}, {pipeline_mode = #tpu.pipeline_mode<synchronous>, transform_indices = @transform_2, window_bounds = array<i64: 8, 1>}]} {
    %c0 = arith.constant 0 : index
    %c0_0 = arith.constant 0 : index
    %0 = vector.load %arg1[%c0, %c0_0] : memref<8x8192xbf16, #tpu.memory_space<vmem>>, vector<8x8192xbf16>
    %1 = arith.extf %0 : vector<8x8192xbf16> to vector<8x8192xf32>
    %c0_1 = arith.constant 0 : index
    %c0_2 = arith.constant 0 : index
    %2 = vector.load %arg2[%c0_1, %c0_2] : memref<1x8192xf32, #tpu.memory_space<vmem>>, vector<1x8192xf32>
    %3 = vector.broadcast %2 : vector<1x8192xf32> to vector<8x8192xf32>
    %4 = arith.mulf %1, %3 : vector<8x8192xf32>
    %cst = arith.constant dense<0.000000e+00> : vector<8xf32>
    %5 = vector.multi_reduction <add>, %4, %cst [1] : vector<8x8192xf32> to vector<8xf32>
    %6 = vector.shape_cast %5 : vector<8xf32> to vector<8x1xf32>
    %cst_3 = arith.constant 0.000000e+00 : f32
    %7 = vector.broadcast %cst_3 : f32 to vector<8x1xf32>
    %8 = arith.subf %7, %6 : vector<8x1xf32>
    %9 = math.exp %8 : vector<8x1xf32>
    %cst_4 = arith.constant 1.000000e+00 : f32
    %10 = vector.broadcast %cst_4 : f32 to vector<8x1xf32>
    %11 = arith.addf %10, %9 : vector<8x1xf32>
    %cst_5 = arith.constant 1.000000e+00 : f32
    %12 = vector.broadcast %cst_5 : f32 to vector<8x1xf32>
    %13 = arith.divf %12, %11 : vector<8x1xf32>
    %c0_6 = arith.constant 0 : index
    %c0_7 = arith.constant 0 : index
    %14 = vector.load %arg3[%c0_6, %c0_7] : memref<8x1xf32, #tpu.memory_space<vmem>>, vector<8x1xf32>
    tpu.vector_store %arg3[%c0_6, %c0_7], %13 {strides = array<i32>} : memref<8x1xf32, #tpu.memory_space<vmem>>, vector<8x1xf32>,
    return
  }
  func.func @transform_0(%arg0: i32) -> (i32, i32) {
    %c0_i32 = arith.constant 0 : i32
    %c0_i32_0 = arith.constant 0 : i32
    %c0_i32_1 = arith.constant 0 : i32
    return %c0_i32, %c0_i32_0 : i32, i32
  }
  func.func @transform_1(%arg0: i32) -> (i32, i32) {
    %c0_i32 = arith.constant 0 : i32
    %c0_i32_0 = arith.constant 0 : i32
    %c0_i32_1 = arith.constant 0 : i32
    return %c0_i32, %c0_i32_0 : i32, i32
  }
  func.func @transform_2(%arg0: i32) -> (i32, i32) {
    %c0_i32 = arith.constant 0 : i32
    %c0_i32_0 = arith.constant 0 : i32
    %c0_i32_1 = arith.constant 0 : i32
    return %c0_i32, %c0_i32_0 : i32, i32
  }
}

</mosaic_0001>

<bundles_post_ra>
// kernel: discriminator_forward.8
= control target key start
LH: loop header
LB: loop body
LE: loop exit
PB: predicated region body
PF: predicated region fallthrough
CT: control target
= control target key end

     0   :  { %s1318_s9 = smov 0   ;;  %s1320_s10 = smov 0   ;;  %s1568_s0 = inlined_call_operand.vmem [shape: bf16[2048,16], index: 0, kind: input, shape index: {}]   ;;  %s1569_s1 = inlined_call_operand.vmem [shape: bf16[16,64], index: 1, kind: input, shape index: {}]   ;;  %s1570_s2 = inlined_call_operand.vmem [shape: bf16[2048,64], index: 2, kind: output, shape index: {}]  }
   0x1   :  { %s1322_s11 = smov 0  }
   0x2 LB: > { %s31_s12 = sadd.s32 1, %s1296_s10  ;;  %p1079_p0 = scmp.ge.s32.totalorder %s1300_s11, 1  ;;  %s1300_s11 = sphi %s1322_s11, %s12_s11   ;;  %s1296_s10 = sphi %s1320_s10, %s1573_s10   ;;  %s1292_s9 = sphi %s1318_s9, %s1572_s9  }
   0x3   : > { %p33_p1 = scmp.ge.s32.totalorder %s31_s12, 8  ;;  %p155_p2 = scmp.lt.s32.totalorder %s1300_s11, 9 }
   0x5   : > { %s1575_s12 = smov (%p33_p1, %s31_s12), 0  ;;  %p156_p3 = pnand %p1079_p0, %p155_p2 }
   0x6   : > { %v1261_v0 = vld [vmem:[%s1569_s1] sm:$0xff] (!%p156_p3)   ;;  %s1080_s15 = sshll.u32 (!%p156_p3), %s1292_s9, 5  ;;  %vm223_vm0 = vcmask (!%p156_p3), 523264   ;;  %v1302_v1 = vmov (!%p156_p3), 0.0   ;;  %vm408_vm1 = vcmask (!%p156_p3), 130048   ;;  %vm942_vm5 = vcmask (!%p156_p3), 519168  }
   0x7   : > { %159 = sbr.rel (%p156_p3) target bundleno = 292 (0x124), region = 28  ;;  %p1344_p4 = scmp.lt.s32.totalorder (!%p156_p3), %s1080_s15, 255  ;;  %1200 = vmatprep.subr.bf16.mxu0 (!%p156_p3), %v1261_v0  ;;  %1234 = vmatprep.subr.bf16.mxu1 (!%p156_p3), %v1261_v0  ;;  %226 = vst.msk [vmem:[#allocation2 + $0x10] sm:$0xff] (!%p156_p3), %vm223_vm0, %v1302_v1  ;;  %224 = vst.msk [vmem:[#allocation2] sm:$0xff] (!%p156_p3), %vm223_vm0, %v1302_v1 }
   0x8   : > { %225 = vst.msk [vmem:[#allocation2 + $0x8] sm:$0xff] (!%p156_p3), %vm223_vm0, %v1302_v1  ;;  %227 = vst.msk [vmem:[#allocation2 + $0x18] sm:$0xff] (!%p156_p3), %vm223_vm0, %v1302_v1  ;;  %1201 = vmatpush3.bf16.msra.mxu0 (!%p156_p3), %v1261_v0  ;;  %1235 = vmatpush3.bf16.msra.mxu1 (!%p156_p3), %v1261_v0 }
   0x9   : > { %228 = vst.msk [vmem:[#allocation2 + $0x20] sm:$0xff] (!%p156_p3), %vm223_vm0, %v1302_v1  ;;  %229 = vst.msk [vmem:[#allocation2 + $0x28] sm:$0xff] (!%p156_p3), %vm223_vm0, %v1302_v1 }
   0xa   : > { %230 = vst.msk [vmem:[#allocation2 + $0x30] sm:$0xff] (!%p156_p3), %vm223_vm0, %v1302_v1  ;;  %231 = vst.msk [vmem:[#allocation2 + $0x38] sm:$0xff] (!%p156_p3), %vm223_vm0, %v1302_v1 }
   0xb   : > { %232 = vst.msk [vmem:[#allocation2 + $0x40] sm:$0xff] (!%p156_p3), %vm223_vm0, %v1302_v1  ;;  %233 = vst.msk [vmem:[#allocation2 + $0x48] sm:$0xff] (!%p156_p3), %vm223_vm0, %v1302_v1 }
   0xc   : > { %234 = vst.msk [vmem:[#allocation2 + $0x50] sm:$0xff] (!%p156_p3), %vm223_vm0, %v1302_v1  ;;  %235 = vst.msk [vmem:[#allocation2 + $0x58] sm:$0xff] (!%p156_p3), %vm223_vm0, %v1302_v1 }
   0xd   : > { %236 = vst.msk [vmem:[#allocation2 + $0x60] sm:$0xff] (!%p156_p3), %vm223_vm0, %v1302_v1  ;;  %237 = vst.msk [vmem:[#allocation2 + $0x68] sm:$0xff] (!%p156_p3), %vm223_vm0, %v1302_v1 }
   0xe   : > { %238 = vst.msk [vmem:[#allocation2 + $0x70] sm:$0xff] %vm223_vm0, %v1302_v1  ;;  %239 = vst.msk [vmem:[#allocation2 + $0x78] sm:$0xff] %vm223_vm0, %v1302_v1  ;;  %s1577_s15 = smov (!%p1344_p4, %s1080_s15), 255  ;;  %v258_v18 = vld [vmem:[#allocation2 + $0x10] sm:$0xff]  ;;  %v256_v20 = vld [vmem:[#allocation2] sm:$0xff] }
   0xf   : > { %240 = vst.msk [vmem:[#allocation2 + $0x80] sm:$0xff] %vm223_vm0, %v1302_v1  ;;  %241 = vst.msk [vmem:[#allocation2 + $0x88] sm:$0xff] %vm223_vm0, %v1302_v1  ;;  %s1081_s17 = sshll.u32 %s1577_s15, 2  ;;  %v259_v23 = vld [vmem:[#allocation2 + $0x18] sm:$0xff]  ;;  %v257_v28 = vld [vmem:[#allocation2 + $0x8] sm:$0xff] }
  0x10   : > { %242 = vst.msk [vmem:[#allocation2 + $0x90] sm:$0xff] %vm223_vm0, %v1302_v1  ;;  %243 = vst.msk [vmem:[#allocation2 + $0x98] sm:$0xff] %vm223_vm0, %v1302_v1  ;;  %s1392_s20 = scalar_lea.vmem %s1568_s0, %s1081_s17  ;;  %v260_v44 = vld [vmem:[#allocation2 + $0x20] sm:$0xff]  ;;  %s1442_s23 = scalar_lea.vmem %s1570_s2, %s1081_s17 }
  0x11   : > { %244 = vst.msk [vmem:[#allocation2 + $0xa0] sm:$0xff] %vm223_vm0, %v1302_v1  ;;  %245 = vst.msk [vmem:[#allocation2 + $0xa8] sm:$0xff] %vm223_vm0, %v1302_v1  ;;  %v1262_v2 = vld [vmem:[%s1392_s20] sm:$0xff]   ;;  %v1264_v4 = vld [vmem:[%s1392_s20 + $0x8] sm:$0xff]  }
  0x12   : > { %246 = vst.msk [vmem:[#allocation2 + $0xb0] sm:$0xff] %vm223_vm0, %v1302_v1  ;;  %247 = vst.msk [vmem:[#allocation2 + $0xb8] sm:$0xff] %vm223_vm0, %v1302_v1  ;;  %v1263_v3 = vld [vmem:[%s1392_s20 + $0x40] sm:$0xff]   ;;  %1202 = vmatprep.mubr.msk.bf16.mxu0 %vm408_vm1, %v1262_v2  ;;  %v1265_v5 = vld [vmem:[%s1392_s20 + $0x48] sm:$0xff]  }
  0x13   : > { %248 = vst.msk [vmem:[#allocation2 + $0xc0] sm:$0xff] %vm223_vm0, %v1302_v1  ;;  %249 = vst.msk [vmem:[#allocation2 + $0xc8] sm:$0xff] %vm223_vm0, %v1302_v1  ;;  %1218 = vmatprep.mubr.msk.bf16.mxu1 %vm408_vm1, %v1263_v3  ;;  %1203 = vmatmul.mubr.msk.bf16.vlgmr.msra.gmra.mrb[0].mxu0 %vm408_vm1, %v1264_v4  ;;  %v1266_v6 = vld [vmem:[%s1392_s20 + $0x10] sm:$0xff]   ;;  %v1268_v8 = vld [vmem:[%s1392_s20 + $0x18] sm:$0xff]  }
  0x14   : > { %250 = vst.msk [vmem:[#allocation2 + $0xd0] sm:$0xff] %vm223_vm0, %v1302_v1  ;;  %251 = vst.msk [vmem:[#allocation2 + $0xd8] sm:$0xff] %vm223_vm0, %v1302_v1  ;;  %1219 = vmatmul.mubr.msk.bf16.vlgmr.msra.gmra.mrb[0].mxu1 %vm408_vm1, %v1265_v5  ;;  %v1267_v7 = vld [vmem:[%s1392_s20 + $0x50] sm:$0xff]   ;;  %1206 = vmatprep.mubr.msk.bf16.mxu0 %vm408_vm1, %v1266_v6  ;;  %v1269_v9 = vld [vmem:[%s1392_s20 + $0x58] sm:$0xff]  }
  0x15   : > { %252 = vst.msk [vmem:[#allocation2 + $0xe0] sm:$0xff] %vm223_vm0, %v1302_v1  ;;  %253 = vst.msk [vmem:[#allocation2 + $0xe8] sm:$0xff] %vm223_vm0, %v1302_v1  ;;  %1222 = vmatprep.mubr.msk.bf16.mxu1 %vm408_vm1, %v1267_v7  ;;  %v1270_v10 = vld [vmem:[%s1392_s20 + $0x20] sm:$0xff]   ;;  %v1272_v12 = vld [vmem:[%s1392_s20 + $0x28] sm:$0xff]  }
  0x16   : > { %254 = vst.msk [vmem:[#allocation2 + $0xf0] sm:$0xff] %vm223_vm0, %v1302_v1  ;;  %255 = vst.msk [vmem:[#allocation2 + $0xf8] sm:$0xff] %vm223_vm0, %v1302_v1  ;;  %v1271_v11 = vld [vmem:[%s1392_s20 + $0x60] sm:$0xff]   ;;  %v1273_v13 = vld [vmem:[%s1392_s20 + $0x68] sm:$0xff]  }
  0x17   : > { %v1274_v14 = vld [vmem:[%s1392_s20 + $0x30] sm:$0xff]   ;;  %v1276_v16 = vld [vmem:[%s1392_s20 + $0x38] sm:$0xff]   ;;  %v272_v22 = vld [vmem:[#allocation2 + $0x80] sm:$0xff] }
  0x18   : > { %v1275_v15 = vld [vmem:[%s1392_s20 + $0x70] sm:$0xff]   ;;  %v1277_v17 = vld [vmem:[%s1392_s20 + $0x78] sm:$0xff]   ;;  %v273_v33 = vld [vmem:[#allocation2 + $0x88] sm:$0xff] }
  0x19   : > { %v274_v19 = vld [vmem:[#allocation2 + $0x90] sm:$0xff]  ;;  %v275_v27 = vld [vmem:[#allocation2 + $0x98] sm:$0xff]  ;;  %v276_v46 = vld [vmem:[#allocation2 + $0xa0] sm:$0xff] }
  0x1a   : > { %v262_v42 = vld [vmem:[#allocation2 + $0x30] sm:$0xff]  ;;  %v263_v47 = vld [vmem:[#allocation2 + $0x38] sm:$0xff] }
  0x1b   : > { %1207 = vmatmul.mubr.msk.bf16.gmra.mrb[4].mxu0 %vm408_vm1, %v1268_v8  ;;  %v278_v43 = vld [vmem:[#allocation2 + $0xb0] sm:$0xff]  ;;  %v279_v56 = vld [vmem:[#allocation2 + $0xb8] sm:$0xff] }
  0x1c   : > { %1223 = vmatmul.mubr.msk.bf16.gmra.mrb[4].mxu1 %vm408_vm1, %v1269_v9  ;;  %1210 = vmatprep.mubr.msk.bf16.mxu0 %vm408_vm1, %v1270_v10 }
  0x1d   : > { %1226 = vmatprep.mubr.msk.bf16.mxu1 %vm408_vm1, %v1271_v11 }
  0x23   : > { %1211 = vmatmul.mubr.msk.bf16.gmra.mrb[8].mxu0 %vm408_vm1, %v1272_v12 }
  0x24   : > { %1227 = vmatmul.mubr.msk.bf16.gmra.mrb[8].mxu1 %vm408_vm1, %v1273_v13  ;;  %1214 = vmatprep.mubr.msk.bf16.mxu0 %vm408_vm1, %v1274_v14 }
  0x25   : > { %1230 = vmatprep.mubr.msk.bf16.mxu1 %vm408_vm1, %v1275_v15 }
  0x2b   : > { %1215 = vmatmul.mubr.msk.bf16.gmra.mrb[12].mxu0 %vm408_vm1, %v1276_v16  ;;  %v261_v16 = vld [vmem:[#allocation2 + $0x28] sm:$0xff] }
  0x2c   : > { %1231 = vmatmul.mubr.msk.bf16.gmra.mrb[12].mxu1 %vm408_vm1, %v1277_v17 }
  0xe6   : > { %v1204_v21 = vpop.f32.mrb[0].mxu0 }
  0xe7   : > { %v620_v24 = vadd.f32 %v1204_v21, %v258_v18  ;;  %v1220_v25 = vpop.f32.mrb[0].mxu1  ;;  %v491_v26 = vpop.f32.mrb[1].mxu0 }
  0xe8   : > { %v636_v29 = vadd.f32 %v1220_v25, %v274_v19  ;;  %v618_v30 = vadd.f32 %v491_v26, %v256_v20  ;;  %v555_v31 = vpop.f32.mrb[1].mxu1  ;;  %v1205_v32 = vpop.f32.mrb[2].mxu0 }
  0xe9   : > { %653 = vst.msk [vmem:[#allocation2 + $0x10] sm:$0xff] %vm223_vm0, %v620_v24  ;;  %v634_v34 = vadd.f32 %v555_v31, %v272_v22  ;;  %v621_v35 = vadd.f32 %v1205_v32, %v259_v23  ;;  %v1221_v36 = vpop.f32.mrb[2].mxu1  ;;  %v494_v37 = vpop.f32.mrb[3].mxu0 }
  0xea   : > { %669 = vst.msk [vmem:[#allocation2 + $0x90] sm:$0xff] %vm223_vm0, %v636_v29  ;;  %651 = vst.msk [vmem:[#allocation2] sm:$0xff] %vm223_vm0, %v618_v30  ;;  %v637_v38 = vadd.f32 %v1221_v36, %v275_v27  ;;  %v619_v39 = vadd.f32 %v494_v37, %v257_v28  ;;  %v558_v40 = vpop.f32.mrb[3].mxu1 }
  0xeb   : > { %667 = vst.msk [vmem:[#allocation2 + $0x80] sm:$0xff] %vm223_vm0, %v634_v34  ;;  %654 = vst.msk [vmem:[#allocation2 + $0x18] sm:$0xff] %vm223_vm0, %v621_v35  ;;  %v635_v41 = vadd.f32 %v558_v40, %v273_v33 }
  0xec   : > { %670 = vst.msk [vmem:[#allocation2 + $0x98] sm:$0xff] %vm223_vm0, %v637_v38  ;;  %652 = vst.msk [vmem:[#allocation2 + $0x8] sm:$0xff] %vm223_vm0, %v619_v39 }
  0xed   : > { %668 = vst.msk [vmem:[#allocation2 + $0x88] sm:$0xff] %vm223_vm0, %v635_v41 }
  0xee   : > { %v1208_v45 = vpop.f32.mrb[4].mxu0 }
  0xef   : > { %v624_v48 = vadd.f32 %v1208_v45, %v262_v42  ;;  %v1224_v49 = vpop.f32.mrb[4].mxu1  ;;  %v507_v50 = vpop.f32.mrb[5].mxu0 }
  0xf0   : > { %v688_v51 = vld [vmem:[#allocation2 + $0x10] sm:$0xff]  ;;  %v640_v52 = vadd.f32 %v1224_v49, %v278_v43  ;;  %v622_v53 = vadd.f32 %v507_v50, %v260_v44  ;;  %v571_v54 = vpop.f32.mrb[5].mxu1  ;;  %v1209_v55 = vpop.f32.mrb[6].mxu0  ;;  %v277_v43 = vld [vmem:[#allocation2 + $0xa8] sm:$0xff] }
  0xf1   : > { %vm720_vm2 = vcmp.ge.f32.partialorder %v688_v51, 0.0  ;;  %v752_v57 = vmul.f32 0.2, %v688_v51  ;;  %v704_v58 = vld [vmem:[#allocation2 + $0x90] sm:$0xff]  ;;  %v686_v59 = vld [vmem:[#allocation2] sm:$0xff]  ;;  %657 = vst.msk [vmem:[#allocation2 + $0x30] sm:$0xff] %vm223_vm0, %v624_v48  ;;  %v638_v60 = vadd.f32 %v571_v54, %v276_v46  ;;  %v625_v61 = vadd.f32 %v1209_v55, %v263_v47 }
  0xf2   : > { %v1225_v62 = vpop.f32.mrb[6].mxu1  ;;  %vm736_vm3 = vcmp.ge.f32.partialorder %v704_v58, 0.0  ;;  %v768_v63 = vmul.f32 0.2, %v704_v58  ;;  %vm718_vm4 = vcmp.ge.f32.partialorder %v686_v59, 0.0  ;;  %673 = vst.msk [vmem:[#allocation2 + $0xb0] sm:$0xff] %vm223_vm0, %v640_v52 }
  0xf3   : > { %v750_v0 = vmul.f32 0.2, %v686_v59  ;;  %655 = vst.msk [vmem:[#allocation2 + $0x20] sm:$0xff] %vm223_vm0, %v622_v53  ;;  %v784_v1 = vsel %vm720_vm2, %v688_v51, %v752_v57  ;;  %v702_v2 = vld [vmem:[#allocation2 + $0x80] sm:$0xff]  ;;  %v689_v3 = vld [vmem:[#allocation2 + $0x18] sm:$0xff]  ;;  %671 = vst.msk [vmem:[#allocation2 + $0xa0] sm:$0xff] %vm223_vm0, %v638_v60  ;;  %v641_v5 = vadd.f32 %v1225_v62, %v279_v56 }
  0xf4   : > { %v705_v4 = vld [vmem:[#allocation2 + $0x98] sm:$0xff]  ;;  %658 = vst.msk [vmem:[#allocation2 + $0x38] sm:$0xff] %vm223_vm0, %v625_v61  ;;  %v510_v6 = vpop.f32.mrb[7].mxu0  ;;  %v1446_v7 = vpop.f32.mrb[7].mxu1  ;;  %v1153_v8 = vpack.c.bf16 %v784_v1, %v784_v1  ;;  %v800_v9 = vsel %vm736_vm3, %v704_v58, %v768_v63  ;;  %vm734_vm6 = vcmp.ge.f32.partialorder %v702_v2, 0.0  ;;  %v687_v11 = vld [vmem:[#allocation2 + $0x8] sm:$0xff] }
  0xf5   : > { %v782_v10 = vsel %vm718_vm4, %v686_v59, %v750_v0  ;;  %v703_v12 = vld [vmem:[#allocation2 + $0x88] sm:$0xff]  ;;  %v1169_v13 = vpack.c.bf16 %v800_v9, %v800_v9  ;;  %v766_v15 = vmul.f32 0.2, %v702_v2  ;;  %vm721_vm7 = vcmp.ge.f32.partialorder %v689_v3, 0.0  ;;  %674 = vst.msk [vmem:[#allocation2 + $0xb8] sm:$0xff] %vm223_vm0, %v641_v5  ;;  %v266_v47 = vld [vmem:[#allocation2 + $0x50] sm:$0xff] }
  0xf6   : > { %v1151_v14 = vpack.c.bf16 %v782_v10, %v782_v10  ;;  %945 = vst.msk [vmem:[%s1442_s23 + $0x8] sm:$0xf] %vm942_vm5, %v1153_v8  ;;  %v753_v17 = vmul.f32 0.2, %v689_v3  ;;  %vm737_vm8 = vcmp.ge.f32.partialorder %v705_v4, 0.0  ;;  %vm719_vm9 = vcmp.ge.f32.partialorder %v687_v11, 0.0 }
  0xf7   : > { %v769_v18 = vmul.f32 0.2, %v705_v4  ;;  %961 = vst.msk [vmem:[%s1442_s23 + $0x48] sm:$0xf] %vm942_vm5, %v1169_v13  ;;  %v798_v19 = vsel %vm734_vm6, %v702_v2, %v766_v15  ;;  %v751_v20 = vmul.f32 0.2, %v687_v11  ;;  %v623_v27 = vadd.f32 %v510_v6, %v261_v16 }
  0xf8   : > { %943 = vst.msk [vmem:[%s1442_s23] sm:$0xf] %vm942_vm5, %v1151_v14  ;;  %vm735_vm10 = vcmp.ge.f32.partialorder %v703_v12, 0.0  ;;  %v767_v21 = vmul.f32 0.2, %v703_v12  ;;  %v1458_v22 = vpop.f32.mrb[8].mxu0  ;;  %v1167_v23 = vpack.c.bf16 %v798_v19, %v798_v19  ;;  %v785_v24 = vsel %vm721_vm7, %v689_v3, %v753_v17 }
  0xf9   : > { %v801_v25 = vsel %vm737_vm8, %v705_v4, %v769_v18  ;;  %v692_v26 = vld [vmem:[#allocation2 + $0x30] sm:$0xff]  ;;  %v1461_v28 = vpop.f32.mrb[8].mxu1  ;;  %v1463_v29 = vpop.f32.mrb[9].mxu0  ;;  %v1154_v30 = vpack.c.bf16 %v785_v24, %v785_v24  ;;  %v783_v32 = vsel %vm719_vm9, %v687_v11, %v751_v20  ;;  %656 = vst.msk [vmem:[#allocation2 + $0x28] sm:$0xff] %vm223_vm0, %v623_v27  ;;  %v264_v57 = vld [vmem:[#allocation2 + $0x40] sm:$0xff]  ;;  %v267_v63 = vld [vmem:[#allocation2 + $0x58] sm:$0xff]  ;;  %v639_v6 = vadd.f32 %v1446_v7, %v277_v43 }
  0xfa   : > { %v1170_v31 = vpack.c.bf16 %v801_v25, %v801_v25  ;;  %v799_v33 = vsel %vm735_vm10, %v703_v12, %v767_v21  ;;  %v708_v34 = vld [vmem:[#allocation2 + $0xb0] sm:$0xff]  ;;  %v690_v35 = vld [vmem:[#allocation2 + $0x20] sm:$0xff]  ;;  %v1466_v36 = vpop.f32.mrb[9].mxu1  ;;  %v1468_v37 = vpop.f32.mrb[10].mxu0  ;;  %959 = vst.msk [vmem:[%s1442_s23 + $0x40] sm:$0xf] %vm942_vm5, %v1167_v23  ;;  %v1152_v38 = vpack.c.bf16 %v783_v32, %v783_v32  ;;  %v628_v13 = vadd.f32 %v1458_v22, %v266_v47 }
  0xfb   : > { %v1168_v39 = vpack.c.bf16 %v799_v33, %v799_v33  ;;  %vm724_vm11 = vcmp.ge.f32.partialorder %v692_v26, 0.0  ;;  %v756_v40 = vmul.f32 0.2, %v692_v26  ;;  %v706_v41 = vld [vmem:[#allocation2 + $0xa0] sm:$0xff]  ;;  %v693_v42 = vld [vmem:[#allocation2 + $0x38] sm:$0xff]  ;;  %v1229_v44 = vpop.f32.mrb[10].mxu1  ;;  %v626_v15 = vadd.f32 %v1463_v29, %v264_v57 }
  0xfc   : > { %946 = vst.msk [vmem:[%s1442_s23 + $0xc] sm:$0xf] %vm942_vm5, %v1154_v30  ;;  %962 = vst.msk [vmem:[%s1442_s23 + $0x4c] sm:$0xf] %vm942_vm5, %v1170_v31  ;;  %vm740_vm12 = vcmp.ge.f32.partialorder %v708_v34, 0.0  ;;  %vm722_vm13 = vcmp.ge.f32.partialorder %v690_v35, 0.0  ;;  %v629_v22 = vadd.f32 %v1468_v37, %v267_v63 }
  0xfd   : > { %v772_v45 = vmul.f32 0.2, %v708_v34  ;;  %v754_v46 = vmul.f32 0.2, %v690_v35  ;;  %944 = vst.msk [vmem:[%s1442_s23 + $0x4] sm:$0xf] %vm942_vm5, %v1152_v38  ;;  %v788_v48 = vsel %vm724_vm11, %v692_v26, %v756_v40 }
  0xfe   : > { %960 = vst.msk [vmem:[%s1442_s23 + $0x44] sm:$0xf] %vm942_vm5, %v1168_v39  ;;  %vm738_vm14 = vcmp.ge.f32.partialorder %v706_v41, 0.0  ;;  %v770_v49 = vmul.f32 0.2, %v706_v41  ;;  %vm725_vm15 = vcmp.ge.f32.partialorder %v693_v42, 0.0  ;;  %v1157_v52 = vpack.c.bf16 %v788_v48, %v788_v48 }
  0xff   : > { %v709_v50 = vld [vmem:[#allocation2 + $0xb8] sm:$0xff]  ;;  %v526_v51 = vpop.f32.mrb[11].mxu0  ;;  %v804_v53 = vsel %vm740_vm12, %v708_v34, %v772_v45  ;;  %v786_v54 = vsel %vm722_vm13, %v690_v35, %v754_v46  ;;  %v757_v55 = vmul.f32 0.2, %v693_v42  ;;  %v282_v56 = vld [vmem:[#allocation2 + $0xd0] sm:$0xff]  ;;  %v280_v58 = vld [vmem:[#allocation2 + $0xc0] sm:$0xff] }
 0x100   : > { %v590_v59 = vpop.f32.mrb[11].mxu1  ;;  %v1173_v60 = vpack.c.bf16 %v804_v53, %v804_v53  ;;  %v1155_v61 = vpack.c.bf16 %v786_v54, %v786_v54  ;;  %v802_v62 = vsel %vm738_vm14, %v706_v41, %v770_v49  ;;  %vm741_vm1 = vcmp.ge.f32.partialorder %v709_v50, 0.0  ;;  %v283_v0 = vld [vmem:[#allocation2 + $0xd8] sm:$0xff]  ;;  %v265_v1 = vld [vmem:[#allocation2 + $0x48] sm:$0xff]  ;;  %v1216_v2 = vpop.f32.mrb[12].mxu0  ;;  %v270_v9 = vld [vmem:[#allocation2 + $0x70] sm:$0xff] }
 0x101   : > { %949 = vst.msk [vmem:[%s1442_s23 + $0x18] sm:$0xf] %vm942_vm5, %v1157_v52  ;;  %v1171_v3 = vpack.c.bf16 %v802_v62, %v802_v62  ;;  %v789_v4 = vsel %vm725_vm15, %v693_v42, %v757_v55  ;;  %v773_v5 = vmul.f32 0.2, %v709_v50  ;;  %v281_v8 = vld [vmem:[#allocation2 + $0xc8] sm:$0xff]  ;;  %v1232_v10 = vpop.f32.mrb[12].mxu1  ;;  %v644_v14 = vadd.f32 %v1461_v28, %v282_v56 }
 0x102   : > { %v539_v11 = vpop.f32.mrb[13].mxu0  ;;  %965 = vst.msk [vmem:[%s1442_s23 + $0x58] sm:$0xf] %vm942_vm5, %v1173_v60  ;;  %947 = vst.msk [vmem:[%s1442_s23 + $0x10] sm:$0xf] %vm942_vm5, %v1155_v61  ;;  %v1158_v12 = vpack.c.bf16 %v789_v4, %v789_v4  ;;  %v286_v16 = vld [vmem:[#allocation2 + $0xf0] sm:$0xff]  ;;  %v642_v23 = vadd.f32 %v1466_v36, %v280_v58  ;;  %v645_v24 = vadd.f32 %v1229_v44, %v283_v0 }
 0x103   : > { %v268_v17 = vld [vmem:[#allocation2 + $0x60] sm:$0xff]  ;;  %v603_v18 = vpop.f32.mrb[13].mxu1  ;;  %v1217_v19 = vpop.f32.mrb[14].mxu0  ;;  %963 = vst.msk [vmem:[%s1442_s23 + $0x50] sm:$0xf] %vm942_vm5, %v1171_v3  ;;  %v805_v20 = vsel %vm741_vm1, %v709_v50, %v773_v5  ;;  %v691_v21 = vld [vmem:[#allocation2 + $0x28] sm:$0xff]  ;;  %v627_v31 = vadd.f32 %v526_v51, %v265_v1  ;;  %v643_v35 = vadd.f32 %v590_v59, %v281_v8  ;;  %v632_v36 = vadd.f32 %v1216_v2, %v270_v9 }
 0x104   : > { %v284_v7 = vld [vmem:[#allocation2 + $0xe0] sm:$0xff]  ;;  %672 = vst.msk [vmem:[#allocation2 + $0xa8] sm:$0xff] %vm223_vm0, %v639_v6  ;;  %v271_v25 = vld [vmem:[#allocation2 + $0x78] sm:$0xff]  ;;  %v1233_v27 = vpop.f32.mrb[14].mxu1  ;;  %v542_v28 = vpop.f32.mrb[15].mxu0  ;;  %v1174_v29 = vpack.c.bf16 %v805_v20, %v805_v20  ;;  %vm723_vm2 = vcmp.ge.f32.partialorder %v691_v21, 0.0  ;;  %v648_v37 = vadd.f32 %v1232_v10, %v286_v16  ;;  %v630_v38 = vadd.f32 %v539_v11, %v268_v17 }
 0x105   : > { %v287_v26 = vld [vmem:[#allocation2 + $0xf8] sm:$0xff]  ;;  %950 = vst.msk [vmem:[%s1442_s23 + $0x1c] sm:$0xf] %vm942_vm5, %v1158_v12  ;;  %v755_v30 = vmul.f32 0.2, %v691_v21  ;;  %v269_v32 = vld [vmem:[#allocation2 + $0x68] sm:$0xff]  ;;  %v646_v40 = vadd.f32 %v603_v18, %v284_v7  ;;  %v633_v41 = vadd.f32 %v1217_v19, %v271_v25 }
 0x106   : > { %661 = vst.msk [vmem:[#allocation2 + $0x50] sm:$0xff] %vm223_vm0, %v628_v13  ;;  %677 = vst.msk [vmem:[#allocation2 + $0xd0] sm:$0xff] %vm223_vm0, %v644_v14  ;;  %v285_v33 = vld [vmem:[#allocation2 + $0xe8] sm:$0xff]  ;;  %v606_v34 = vpop.f32.mrb[15].mxu1  ;;  %v649_v42 = vadd.f32 %v1233_v27, %v287_v26  ;;  %v631_v44 = vadd.f32 %v542_v28, %v269_v32 }
 0x107   : > { %659 = vst.msk [vmem:[#allocation2 + $0x40] sm:$0xff] %vm223_vm0, %v626_v15  ;;  %675 = vst.msk [vmem:[#allocation2 + $0xc0] sm:$0xff] %vm223_vm0, %v642_v23  ;;  %v787_v39 = vsel %vm723_vm2, %v691_v21, %v755_v30  ;;  %v647_v45 = vadd.f32 %v606_v34, %v285_v33 }
 0x108   : > { %662 = vst.msk [vmem:[#allocation2 + $0x58] sm:$0xff] %vm223_vm0, %v629_v22  ;;  %678 = vst.msk [vmem:[#allocation2 + $0xd8] sm:$0xff] %vm223_vm0, %v645_v24  ;;  %v1156_v43 = vpack.c.bf16 %v787_v39, %v787_v39 }
 0x109   : > { %966 = vst.msk [vmem:[%s1442_s23 + $0x5c] sm:$0xf] %vm942_vm5, %v1174_v29 }
 0x10a   : > { %660 = vst.msk [vmem:[#allocation2 + $0x48] sm:$0xff] %vm223_vm0, %v627_v31  ;;  %676 = vst.msk [vmem:[#allocation2 + $0xc8] sm:$0xff] %vm223_vm0, %v643_v35 }
 0x10b   : > { %665 = vst.msk [vmem:[#allocation2 + $0x70] sm:$0xff] %vm223_vm0, %v632_v36  ;;  %681 = vst.msk [vmem:[#allocation2 + $0xf0] sm:$0xff] %vm223_vm0, %v648_v37  ;;  %v707_v46 = vld [vmem:[#allocation2 + $0xa8] sm:$0xff] }
 0x10c   : > { %663 = vst.msk [vmem:[#allocation2 + $0x60] sm:$0xff] %vm223_vm0, %v630_v38  ;;  %679 = vst.msk [vmem:[#allocation2 + $0xe0] sm:$0xff] %vm223_vm0, %v646_v40  ;;  %vm739_vm3 = vcmp.ge.f32.partialorder %v707_v46, 0.0  ;;  %v771_v47 = vmul.f32 0.2, %v707_v46 }
 0x10d   : > { %666 = vst.msk [vmem:[#allocation2 + $0x78] sm:$0xff] %vm223_vm0, %v633_v41  ;;  %682 = vst.msk [vmem:[#allocation2 + $0xf8] sm:$0xff] %vm223_vm0, %v649_v42  ;;  %v696_v48 = vld [vmem:[#allocation2 + $0x50] sm:$0xff] }
 0x10e   : > { %948 = vst.msk [vmem:[%s1442_s23 + $0x14] sm:$0xf] %vm942_vm5, %v1156_v43  ;;  %v712_v49 = vld [vmem:[#allocation2 + $0xd0] sm:$0xff]  ;;  %v694_v50 = vld [vmem:[#allocation2 + $0x40] sm:$0xff]  ;;  %vm728_vm4 = vcmp.ge.f32.partialorder %v696_v48, 0.0  ;;  %v803_v53 = vsel %vm739_vm3, %v707_v46, %v771_v47 }
 0x10f   : > { %664 = vst.msk [vmem:[#allocation2 + $0x68] sm:$0xff] %vm223_vm0, %v631_v44  ;;  %680 = vst.msk [vmem:[#allocation2 + $0xe8] sm:$0xff] %vm223_vm0, %v647_v45  ;;  %v760_v51 = vmul.f32 0.2, %v696_v48  ;;  %vm744_vm6 = vcmp.ge.f32.partialorder %v712_v49, 0.0  ;;  %vm726_vm7 = vcmp.ge.f32.partialorder %v694_v50, 0.0  ;;  %v1172_v58 = vpack.c.bf16 %v803_v53, %v803_v53 }
 0x110   : > { %v776_v52 = vmul.f32 0.2, %v712_v49  ;;  %v758_v54 = vmul.f32 0.2, %v694_v50  ;;  %v710_v55 = vld [vmem:[#allocation2 + $0xc0] sm:$0xff]  ;;  %v697_v56 = vld [vmem:[#allocation2 + $0x58] sm:$0xff] }
 0x111   : > { %v713_v57 = vld [vmem:[#allocation2 + $0xd8] sm:$0xff]  ;;  %v792_v59 = vsel %vm728_vm4, %v696_v48, %v760_v51  ;;  %vm742_vm0 = vcmp.ge.f32.partialorder %v710_v55, 0.0  ;;  %v695_v61 = vld [vmem:[#allocation2 + $0x48] sm:$0xff]  ;;  %v774_v1 = vmul.f32 0.2, %v710_v55  ;;  %vm729_vm8 = vcmp.ge.f32.partialorder %v697_v56, 0.0 }
 0x112   : > { %v808_v60 = vsel %vm744_vm6, %v712_v49, %v776_v52  ;;  %v1161_v62 = vpack.c.bf16 %v792_v59, %v792_v59  ;;  %v790_v0 = vsel %vm726_vm7, %v694_v50, %v758_v54  ;;  %v711_v2 = vld [vmem:[#allocation2 + $0xc8] sm:$0xff]  ;;  %964 = vst.msk [vmem:[%s1442_s23 + $0x54] sm:$0xf] %vm942_vm5, %v1172_v58  ;;  %v761_v4 = vmul.f32 0.2, %v697_v56  ;;  %v700_v5 = vld [vmem:[#allocation2 + $0x70] sm:$0xff] }
 0x113   : > { %v1177_v63 = vpack.c.bf16 %v808_v60, %v808_v60  ;;  %v1159_v3 = vpack.c.bf16 %v790_v0, %v790_v0  ;;  %vm745_vm9 = vcmp.ge.f32.partialorder %v713_v57, 0.0  ;;  %v806_v6 = vsel %vm742_vm0, %v710_v55, %v774_v1  ;;  %v716_v13 = vld [vmem:[#allocation2 + $0xf0] sm:$0xff]  ;;  %v698_v14 = vld [vmem:[#allocation2 + $0x60] sm:$0xff] }
 0x114   : > { %953 = vst.msk [vmem:[%s1442_s23 + $0x28] sm:$0xf] %vm942_vm5, %v1161_v62  ;;  %v777_v8 = vmul.f32 0.2, %v713_v57  ;;  %vm727_vm10 = vcmp.ge.f32.partialorder %v695_v61, 0.0  ;;  %v1175_v10 = vpack.c.bf16 %v806_v6, %v806_v6  ;;  %v793_v11 = vsel %vm729_vm8, %v697_v56, %v761_v4  ;;  %v714_v7 = vld [vmem:[#allocation2 + $0xe0] sm:$0xff] }
 0x115   : > { %969 = vst.msk [vmem:[%s1442_s23 + $0x68] sm:$0xf] %vm942_vm5, %v1177_v63  ;;  %v759_v9 = vmul.f32 0.2, %v695_v61  ;;  %951 = vst.msk [vmem:[%s1442_s23 + $0x20] sm:$0xf] %vm942_vm5, %v1159_v3  ;;  %v1162_v15 = vpack.c.bf16 %v793_v11, %v793_v11 }
 0x116   : > { %vm743_vm11 = vcmp.ge.f32.partialorder %v711_v2, 0.0  ;;  %v775_v12 = vmul.f32 0.2, %v711_v2  ;;  %v809_v16 = vsel %vm745_vm9, %v713_v57, %v777_v8  ;;  %vm732_vm12 = vcmp.ge.f32.partialorder %v700_v5, 0.0  ;;  %967 = vst.msk [vmem:[%s1442_s23 + $0x60] sm:$0xf] %vm942_vm5, %v1175_v10 }
 0x117   : > { %v791_v17 = vsel %vm727_vm10, %v695_v61, %v759_v9  ;;  %v1178_v18 = vpack.c.bf16 %v809_v16, %v809_v16  ;;  %v764_v21 = vmul.f32 0.2, %v700_v5  ;;  %v701_v23 = vld [vmem:[#allocation2 + $0x78] sm:$0xff]  ;;  %954 = vst.msk [vmem:[%s1442_s23 + $0x2c] sm:$0xf] %vm942_vm5, %v1162_v15  ;;  %vm748_vm13 = vcmp.ge.f32.partialorder %v716_v13, 0.0 }
 0x118   : > { %v1160_v19 = vpack.c.bf16 %v791_v17, %v791_v17  ;;  %v807_v20 = vsel %vm743_vm11, %v711_v2, %v775_v12  ;;  %v780_v24 = vmul.f32 0.2, %v716_v13  ;;  %vm730_vm14 = vcmp.ge.f32.partialorder %v698_v14, 0.0  ;;  %v717_v25 = vld [vmem:[#allocation2 + $0xf8] sm:$0xff]  ;;  %v699_v32 = vld [vmem:[#allocation2 + $0x68] sm:$0xff] }
 0x119   : > { %v1176_v22 = vpack.c.bf16 %v807_v20, %v807_v20  ;;  %970 = vst.msk [vmem:[%s1442_s23 + $0x6c] sm:$0xf] %vm942_vm5, %v1178_v18  ;;  %v796_v26 = vsel %vm732_vm12, %v700_v5, %v764_v21  ;;  %v762_v27 = vmul.f32 0.2, %v698_v14  ;;  %vm746_vm15 = vcmp.ge.f32.partialorder %v714_v7, 0.0  ;;  %v715_v33 = vld [vmem:[#allocation2 + $0xe8] sm:$0xff] }
 0x11a   : > { %952 = vst.msk [vmem:[%s1442_s23 + $0x24] sm:$0xf] %vm942_vm5, %v1160_v19  ;;  %v778_v28 = vmul.f32 0.2, %v714_v7  ;;  %v1165_v29 = vpack.c.bf16 %v796_v26, %v796_v26  ;;  %v812_v30 = vsel %vm748_vm13, %v716_v13, %v780_v24  ;;  %vm733_vm1 = vcmp.ge.f32.partialorder %v701_v23, 0.0 }
 0x11b   : > { %968 = vst.msk [vmem:[%s1442_s23 + $0x64] sm:$0xf] %vm942_vm5, %v1176_v22  ;;  %v765_v31 = vmul.f32 0.2, %v701_v23  ;;  %v1181_v34 = vpack.c.bf16 %v812_v30, %v812_v30  ;;  %v794_v35 = vsel %vm730_vm14, %v698_v14, %v762_v27  ;;  %vm749_vm2 = vcmp.ge.f32.partialorder %v717_v25, 0.0 }
 0x11c   : > { %v810_v36 = vsel %vm746_vm15, %v714_v7, %v778_v28  ;;  %957 = vst.msk [vmem:[%s1442_s23 + $0x38] sm:$0xf] %vm942_vm5, %v1165_v29  ;;  %v1163_v37 = vpack.c.bf16 %v794_v35, %v794_v35  ;;  %v781_v40 = vmul.f32 0.2, %v717_v25  ;;  %vm731_vm3 = vcmp.ge.f32.partialorder %v699_v32, 0.0 }
 0x11d   : > { %v1179_v38 = vpack.c.bf16 %v810_v36, %v810_v36  ;;  %v797_v39 = vsel %vm733_vm1, %v701_v23, %v765_v31  ;;  %973 = vst.msk [vmem:[%s1442_s23 + $0x78] sm:$0xf] %vm942_vm5, %v1181_v34  ;;  %v763_v42 = vmul.f32 0.2, %v699_v32  ;;  %vm747_vm4 = vcmp.ge.f32.partialorder %v715_v33, 0.0 }
 0x11e   : > { %v1166_v41 = vpack.c.bf16 %v797_v39, %v797_v39  ;;  %955 = vst.msk [vmem:[%s1442_s23 + $0x30] sm:$0xf] %vm942_vm5, %v1163_v37  ;;  %v813_v43 = vsel %vm749_vm2, %v717_v25, %v781_v40  ;;  %v779_v44 = vmul.f32 0.2, %v715_v33 }
 0x11f   : > { %971 = vst.msk [vmem:[%s1442_s23 + $0x70] sm:$0xf] %vm942_vm5, %v1179_v38  ;;  %v1182_v45 = vpack.c.bf16 %v813_v43, %v813_v43  ;;  %v795_v46 = vsel %vm731_vm3, %v699_v32, %v763_v42 }
 0x120   : > { %958 = vst.msk [vmem:[%s1442_s23 + $0x3c] sm:$0xf] %vm942_vm5, %v1166_v41  ;;  %v1164_v47 = vpack.c.bf16 %v795_v46, %v795_v46  ;;  %v811_v48 = vsel %vm747_vm4, %v715_v33, %v779_v44 }
 0x121   : > { %974 = vst.msk [vmem:[%s1442_s23 + $0x7c] sm:$0xf] %vm942_vm5, %v1182_v45  ;;  %v1180_v49 = vpack.c.bf16 %v811_v48, %v811_v48 }
 0x122   : > { %956 = vst.msk [vmem:[%s1442_s23 + $0x34] sm:$0xf] %vm942_vm5, %v1164_v47 }
 0x123   : > { %972 = vst.msk [vmem:[%s1442_s23 + $0x74] sm:$0xf] %vm942_vm5, %v1180_v49 }
 0x124 PF: > { %s12_s11 = sadd.s32 1, %s1300_s11   ;;  %s1572_s9 = smov %s1296_s10 }
 0x125   : > { %p9_p5 = scmp.ge.s32.totalorder %s12_s11, 10   ;;  %s1573_s10 = smov %s1575_s12 }
 0x127   :  { %11 = sbr.rel (!%p9_p5) target bundleno = 2 (0x2), region = 69 }

// kernel: discriminator_forward.9
= control target key start
LH: loop header
LB: loop body
LE: loop exit
PB: predicated region body
PF: predicated region fallthrough
CT: control target
= control target key end

     0   :  { %s2498_s15 = smov 0   ;;  %s2500_s16 = smov 0   ;;  %s3036_s0 = inlined_call_operand.vmem [shape: bf16[512,1024], index: 0, kind: input, shape index: {}]   ;;  %s3037_s1 = inlined_call_operand.vmem [shape: bf16[1024,128], index: 1, kind: input, shape index: {}]   ;;  %s3038_s2 = inlined_call_operand.vmem [shape: f32[512,128], index: 2, kind: output, shape index: {0}]   ;;  %s3039_s3 = inlined_call_operand.vmem [shape: f32[2,1,128], index: 3, kind: output, shape index: {1}]   ;;  %s3040_s4 = inlined_call_operand.vmem [shape: f32[2,1,128], index: 4, kind: output, shape index: {2}]  }
   0x1   :  { %s2502_s17 = smov 0   ;;  %s2504_s18 = smov 0  }
   0x2   :  { %s2506_s19 = smov 0   ;;  %s2508_s20 = smov 0  }
   0x3   :  { %s2510_s21 = smov 0  }
   0x4 LB: > { %s27_s22 = sadd.s32 1, %s2462_s19  ;;  %s34_s23 = sadd.s32 1, %s2466_s20  ;;  %s2470_s21 = sphi %s2510_s21, %s15_s21   ;;  %s2466_s20 = sphi %s2508_s20, %s3046_s20   ;;  %s2462_s19 = sphi %s2506_s19, %s3045_s19   ;;  %s2458_s18 = sphi %s2504_s18, %s3044_s18   ;;  %s2454_s17 = sphi %s2502_s17, %s3043_s17   ;;  %s2450_s16 = sphi %s2500_s16, %s3042_s16   ;;  %s2446_s15 = sphi %s2498_s15, %s3041_s15  }
   0x5   : > { %p28_p0 = scmp.ge.s32.totalorder %s27_s22, 2  ;;  %p50_p1 = scmp.ne.s32.totalorder %s2450_s16, %s2446_s15 }
   0x6   : > { %p51_p2 = scmp.eq.s32.totalorder %s2470_s21, 0  ;;  %s43_s27 = sadd.s32 1, %s2450_s16 }
   0x7   : > { %s3048_s22 = smov (%p28_p0, %s27_s22), 0  ;;  %s3050_s23 = smov (!%p28_p0, %s34_s23), %s2466_s20 }
   0x8   : > { %p52_p3 = por %p51_p2, %p50_p1  ;;  %p36_p4 = scmp.ge.s32.totalorder %s3050_s23, 2 }
   0x9   : > { %s39_s24 = ssub.s32 %s2462_s19, %s3048_s22  ;;  %p1894_p6 = scmp.ge.s32.totalorder %s2470_s21, 4 }
   0xa   : > { %s3052_s23 = smov (%p36_p4, %s3050_s23), 0 }
   0xb   : > { %s38_s25 = ssub.s32 %s2466_s20, %s3052_s23  ;;  %188 = sbr.rel (%p1894_p6) target bundleno = 57 (0x39), region = 16 }
   0xc   : > { %s40_s26 = sor.u32 %s39_s24, %s38_s25 }
   0xd   : > { %p41_p5 = scmp.eq.s32.totalorder %s40_s26, 0 }
   0xf   : > { %s2549_s28 = scalar_select %p41_p5, %s2450_s16, %s43_s27  }
  0x12   : > { %191 = sbr.rel (!%p52_p3) target bundleno = 57 (0x39), region = 20  ;;  %s193_s29 = sand.u32 (%p52_p3), 1, %s2450_s16  }
  0x13   : > { %s1897_s30 = sshll.u32 (%p52_p3), %s2462_s19, 2  ;;  %s1895_s5 = sshll.u32 (%p52_p3), %s193_s29, 9 }
  0x14   : > { %s2006_s6 = sshll.u32 (%p52_p3), %s2466_s20, 8  ;;  %s2563_s12 = scalar_lea.vmem (%p52_p3), [#allocation3], %s1895_s5 }
  0x15   : > { %s199_s7 = sadd.s32 (%p52_p3), %s2006_s6, %s1897_s30 }
  0x16   : > { %s1899_s8 = sshll.u32 (%p52_p3), %s199_s7, 2 }
  0x17   : > { %s2558_s11 = scalar_lea.vmem (%p52_p3), %s3036_s0, %s1899_s8 }
  0x18   : > { %v214_v0 = vld [vmem:[%s2558_s11] sm:$0xff] (%p52_p3)  ;;  %v216_v1 = vld [vmem:[%s2558_s11 + $0x8] sm:$0xff] (%p52_p3) }
  0x19   : > { %v218_v2 = vld [vmem:[%s2558_s11 + $0x20] sm:$0xff]  ;;  %215 = vst [vmem:[%s2563_s12] sm:$0xff] %v214_v0  ;;  %217 = vst [vmem:[%s2563_s12 + $0x8] sm:$0xff] %v216_v1  ;;  %v220_v3 = vld [vmem:[%s2558_s11 + $0x28] sm:$0xff] }
  0x1a   : > { %219 = vst [vmem:[%s2563_s12 + $0x10] sm:$0xff] %v218_v2  ;;  %v222_v4 = vld [vmem:[%s2558_s11 + $0x40] sm:$0xff]  ;;  %v224_v5 = vld [vmem:[%s2558_s11 + $0x48] sm:$0xff]  ;;  %221 = vst [vmem:[%s2563_s12 + $0x18] sm:$0xff] %v220_v3 }
  0x1b   : > { %223 = vst [vmem:[%s2563_s12 + $0x20] sm:$0xff] %v222_v4  ;;  %225 = vst [vmem:[%s2563_s12 + $0x28] sm:$0xff] %v224_v5  ;;  %v226_v6 = vld [vmem:[%s2558_s11 + $0x60] sm:$0xff]  ;;  %v228_v7 = vld [vmem:[%s2558_s11 + $0x68] sm:$0xff] }
  0x1c   : > { %v230_v8 = vld [vmem:[%s2558_s11 + $0x80] sm:$0xff]  ;;  %227 = vst [vmem:[%s2563_s12 + $0x30] sm:$0xff] %v226_v6  ;;  %229 = vst [vmem:[%s2563_s12 + $0x38] sm:$0xff] %v228_v7  ;;  %v232_v9 = vld [vmem:[%s2558_s11 + $0x88] sm:$0xff] }
  0x1d   : > { %231 = vst [vmem:[%s2563_s12 + $0x40] sm:$0xff] %v230_v8  ;;  %v234_v10 = vld [vmem:[%s2558_s11 + $0xa0] sm:$0xff]  ;;  %v236_v11 = vld [vmem:[%s2558_s11 + $0xa8] sm:$0xff]  ;;  %233 = vst [vmem:[%s2563_s12 + $0x48] sm:$0xff] %v232_v9 }
  0x1e   : > { %235 = vst [vmem:[%s2563_s12 + $0x50] sm:$0xff] %v234_v10  ;;  %237 = vst [vmem:[%s2563_s12 + $0x58] sm:$0xff] %v236_v11  ;;  %v238_v12 = vld [vmem:[%s2558_s11 + $0xc0] sm:$0xff]  ;;  %v240_v13 = vld [vmem:[%s2558_s11 + $0xc8] sm:$0xff] }
  0x1f   : > { %v242_v14 = vld [vmem:[%s2558_s11 + $0xe0] sm:$0xff]  ;;  %239 = vst [vmem:[%s2563_s12 + $0x60] sm:$0xff] %v238_v12  ;;  %241 = vst [vmem:[%s2563_s12 + $0x68] sm:$0xff] %v240_v13  ;;  %v244_v15 = vld [vmem:[%s2558_s11 + $0xe8] sm:$0xff] }
  0x20   : > { %243 = vst [vmem:[%s2563_s12 + $0x70] sm:$0xff] %v242_v14  ;;  %v246_v16 = vld [vmem:[%s2558_s11 + $0x100] sm:$0xff]  ;;  %v248_v17 = vld [vmem:[%s2558_s11 + $0x108] sm:$0xff]  ;;  %245 = vst [vmem:[%s2563_s12 + $0x78] sm:$0xff] %v244_v15 }
  0x21   : > { %247 = vst [vmem:[%s2563_s12 + $0x80] sm:$0xff] %v246_v16  ;;  %249 = vst [vmem:[%s2563_s12 + $0x88] sm:$0xff] %v248_v17  ;;  %v250_v18 = vld [vmem:[%s2558_s11 + $0x120] sm:$0xff]  ;;  %v252_v19 = vld [vmem:[%s2558_s11 + $0x128] sm:$0xff] }
  0x22   : > { %v254_v20 = vld [vmem:[%s2558_s11 + $0x140] sm:$0xff]  ;;  %251 = vst [vmem:[%s2563_s12 + $0x90] sm:$0xff] %v250_v18  ;;  %253 = vst [vmem:[%s2563_s12 + $0x98] sm:$0xff] %v252_v19  ;;  %v256_v21 = vld [vmem:[%s2558_s11 + $0x148] sm:$0xff] }
  0x23   : > { %255 = vst [vmem:[%s2563_s12 + $0xa0] sm:$0xff] %v254_v20  ;;  %v258_v22 = vld [vmem:[%s2558_s11 + $0x160] sm:$0xff]  ;;  %v260_v23 = vld [vmem:[%s2558_s11 + $0x168] sm:$0xff]  ;;  %257 = vst [vmem:[%s2563_s12 + $0xa8] sm:$0xff] %v256_v21 }
  0x24   : > { %259 = vst [vmem:[%s2563_s12 + $0xb0] sm:$0xff] %v258_v22  ;;  %261 = vst [vmem:[%s2563_s12 + $0xb8] sm:$0xff] %v260_v23  ;;  %v262_v24 = vld [vmem:[%s2558_s11 + $0x180] sm:$0xff]  ;;  %v264_v25 = vld [vmem:[%s2558_s11 + $0x188] sm:$0xff] }
  0x25   : > { %v266_v26 = vld [vmem:[%s2558_s11 + $0x1a0] sm:$0xff]  ;;  %263 = vst [vmem:[%s2563_s12 + $0xc0] sm:$0xff] %v262_v24  ;;  %265 = vst [vmem:[%s2563_s12 + $0xc8] sm:$0xff] %v264_v25  ;;  %v268_v27 = vld [vmem:[%s2558_s11 + $0x1a8] sm:$0xff] }
  0x26   : > { %267 = vst [vmem:[%s2563_s12 + $0xd0] sm:$0xff] %v266_v26  ;;  %v270_v28 = vld [vmem:[%s2558_s11 + $0x1c0] sm:$0xff]  ;;  %v272_v29 = vld [vmem:[%s2558_s11 + $0x1c8] sm:$0xff]  ;;  %269 = vst [vmem:[%s2563_s12 + $0xd8] sm:$0xff] %v268_v27 }
  0x27   : > { %271 = vst [vmem:[%s2563_s12 + $0xe0] sm:$0xff] %v270_v28  ;;  %273 = vst [vmem:[%s2563_s12 + $0xe8] sm:$0xff] %v272_v29  ;;  %v274_v30 = vld [vmem:[%s2558_s11 + $0x1e0] sm:$0xff]  ;;  %v276_v31 = vld [vmem:[%s2558_s11 + $0x1e8] sm:$0xff] }
  0x28   : > { %v278_v32 = vld [vmem:[%s2558_s11 + $0x200] sm:$0xff]  ;;  %275 = vst [vmem:[%s2563_s12 + $0xf0] sm:$0xff] %v274_v30  ;;  %277 = vst [vmem:[%s2563_s12 + $0xf8] sm:$0xff] %v276_v31  ;;  %v280_v33 = vld [vmem:[%s2558_s11 + $0x208] sm:$0xff] }
  0x29   : > { %279 = vst [vmem:[%s2563_s12 + $0x100] sm:$0xff] %v278_v32  ;;  %v282_v34 = vld [vmem:[%s2558_s11 + $0x220] sm:$0xff]  ;;  %v284_v35 = vld [vmem:[%s2558_s11 + $0x228] sm:$0xff]  ;;  %281 = vst [vmem:[%s2563_s12 + $0x108] sm:$0xff] %v280_v33 }
  0x2a   : > { %283 = vst [vmem:[%s2563_s12 + $0x110] sm:$0xff] %v282_v34  ;;  %285 = vst [vmem:[%s2563_s12 + $0x118] sm:$0xff] %v284_v35  ;;  %v286_v36 = vld [vmem:[%s2558_s11 + $0x240] sm:$0xff]  ;;  %v288_v37 = vld [vmem:[%s2558_s11 + $0x248] sm:$0xff] }
  0x2b   : > { %v290_v38 = vld [vmem:[%s2558_s11 + $0x260] sm:$0xff]  ;;  %287 = vst [vmem:[%s2563_s12 + $0x120] sm:$0xff] %v286_v36  ;;  %289 = vst [vmem:[%s2563_s12 + $0x128] sm:$0xff] %v288_v37  ;;  %v292_v39 = vld [vmem:[%s2558_s11 + $0x268] sm:$0xff] }
  0x2c   : > { %291 = vst [vmem:[%s2563_s12 + $0x130] sm:$0xff] %v290_v38  ;;  %v294_v40 = vld [vmem:[%s2558_s11 + $0x280] sm:$0xff]  ;;  %v296_v41 = vld [vmem:[%s2558_s11 + $0x288] sm:$0xff]  ;;  %293 = vst [vmem:[%s2563_s12 + $0x138] sm:$0xff] %v292_v39 }
  0x2d   : > { %295 = vst [vmem:[%s2563_s12 + $0x140] sm:$0xff] %v294_v40  ;;  %297 = vst [vmem:[%s2563_s12 + $0x148] sm:$0xff] %v296_v41  ;;  %v298_v42 = vld [vmem:[%s2558_s11 + $0x2a0] sm:$0xff]  ;;  %v300_v43 = vld [vmem:[%s2558_s11 + $0x2a8] sm:$0xff] }
  0x2e   : > { %v302_v44 = vld [vmem:[%s2558_s11 + $0x2c0] sm:$0xff]  ;;  %299 = vst [vmem:[%s2563_s12 + $0x150] sm:$0xff] %v298_v42  ;;  %301 = vst [vmem:[%s2563_s12 + $0x158] sm:$0xff] %v300_v43  ;;  %v304_v45 = vld [vmem:[%s2558_s11 + $0x2c8] sm:$0xff] }
  0x2f   : > { %303 = vst [vmem:[%s2563_s12 + $0x160] sm:$0xff] %v302_v44  ;;  %v306_v46 = vld [vmem:[%s2558_s11 + $0x2e0] sm:$0xff]  ;;  %v308_v47 = vld [vmem:[%s2558_s11 + $0x2e8] sm:$0xff]  ;;  %305 = vst [vmem:[%s2563_s12 + $0x168] sm:$0xff] %v304_v45 }
  0x30   : > { %307 = vst [vmem:[%s2563_s12 + $0x170] sm:$0xff] %v306_v46  ;;  %309 = vst [vmem:[%s2563_s12 + $0x178] sm:$0xff] %v308_v47  ;;  %v310_v48 = vld [vmem:[%s2558_s11 + $0x300] sm:$0xff]  ;;  %v312_v49 = vld [vmem:[%s2558_s11 + $0x308] sm:$0xff] }
  0x31   : > { %v314_v50 = vld [vmem:[%s2558_s11 + $0x320] sm:$0xff]  ;;  %311 = vst [vmem:[%s2563_s12 + $0x180] sm:$0xff] %v310_v48  ;;  %313 = vst [vmem:[%s2563_s12 + $0x188] sm:$0xff] %v312_v49  ;;  %v316_v51 = vld [vmem:[%s2558_s11 + $0x328] sm:$0xff] }
  0x32   : > { %315 = vst [vmem:[%s2563_s12 + $0x190] sm:$0xff] %v314_v50  ;;  %v318_v52 = vld [vmem:[%s2558_s11 + $0x340] sm:$0xff]  ;;  %v320_v53 = vld [vmem:[%s2558_s11 + $0x348] sm:$0xff]  ;;  %317 = vst [vmem:[%s2563_s12 + $0x198] sm:$0xff] %v316_v51 }
  0x33   : > { %319 = vst [vmem:[%s2563_s12 + $0x1a0] sm:$0xff] %v318_v52  ;;  %321 = vst [vmem:[%s2563_s12 + $0x1a8] sm:$0xff] %v320_v53  ;;  %v322_v54 = vld [vmem:[%s2558_s11 + $0x360] sm:$0xff]  ;;  %v324_v55 = vld [vmem:[%s2558_s11 + $0x368] sm:$0xff] }
  0x34   : > { %v326_v56 = vld [vmem:[%s2558_s11 + $0x380] sm:$0xff]  ;;  %323 = vst [vmem:[%s2563_s12 + $0x1b0] sm:$0xff] %v322_v54  ;;  %325 = vst [vmem:[%s2563_s12 + $0x1b8] sm:$0xff] %v324_v55  ;;  %v328_v57 = vld [vmem:[%s2558_s11 + $0x388] sm:$0xff] }
  0x35   : > { %327 = vst [vmem:[%s2563_s12 + $0x1c0] sm:$0xff] %v326_v56  ;;  %v330_v58 = vld [vmem:[%s2558_s11 + $0x3a0] sm:$0xff]  ;;  %v332_v59 = vld [vmem:[%s2558_s11 + $0x3a8] sm:$0xff]  ;;  %329 = vst [vmem:[%s2563_s12 + $0x1c8] sm:$0xff] %v328_v57 }
  0x36   : > { %331 = vst [vmem:[%s2563_s12 + $0x1d0] sm:$0xff] %v330_v58  ;;  %333 = vst [vmem:[%s2563_s12 + $0x1d8] sm:$0xff] %v332_v59  ;;  %v334_v60 = vld [vmem:[%s2558_s11 + $0x3c0] sm:$0xff]  ;;  %v336_v61 = vld [vmem:[%s2558_s11 + $0x3c8] sm:$0xff] }
  0x37   : > { %v338_v62 = vld [vmem:[%s2558_s11 + $0x3e0] sm:$0xff]  ;;  %335 = vst [vmem:[%s2563_s12 + $0x1e0] sm:$0xff] %v334_v60  ;;  %337 = vst [vmem:[%s2563_s12 + $0x1e8] sm:$0xff] %v336_v61  ;;  %v340_v63 = vld [vmem:[%s2558_s11 + $0x3e8] sm:$0xff] }
  0x38   : > { %339 = vst [vmem:[%s2563_s12 + $0x1f0] sm:$0xff] %v338_v62  ;;  %341 = vst [vmem:[%s2563_s12 + $0x1f8] sm:$0xff] %v340_v63 }
  0x39 PF: > { %p1900_p7 = scmp.ge.s32.totalorder %s2470_s21, 1  ;;  %p358_p8 = scmp.lt.s32.totalorder %s2470_s21, 5 }
  0x3b   : > { %p359_p9 = pnand %p1900_p7, %p358_p8 }
  0x3c   : > { %s365_s13 = sand.u32 (!%p359_p9), 1, %s2446_s15   ;;  %s1902_s14 = sshll.u32 (!%p359_p9), %s2454_s17, 6 }
  0x3d   : > { %362 = sbr.rel (%p359_p9) target bundleno = 521 (0x209), region = 47  ;;  %s1901_s24 = sshll.u32 (!%p359_p9), %s365_s13, 9 }
  0x3e   : > { %p416_p10 = scmp.lt.s32.totalorder (!%p359_p9), %s1902_s14, 127  ;;  %s1904_s25 = sshll.u32 (!%p359_p9), %s2458_s18, 5 }
  0x3f   : > { %p425_p11 = scmp.lt.s32.totalorder (!%p359_p9), %s1904_s25, 63  ;;  %p433_p12 = scmp.lt.s32.totalorder (!%p359_p9), %s2458_s18, 1 }
  0x40   : > { %p1906_p13 = scmp.ne.s32.totalorder (!%p359_p9), %s2454_s17, 0 }
  0x44   : > { %s3054_s14 = smov (!%p416_p10, %s1902_s14), 127  ;;  %s3056_s25 = smov (!%p425_p11, %s1904_s25), 63 }
  0x45   : > { %s1903_s26 = sshll.u32 %s3054_s14, 2  ;;  %s3058_s18 = smov (!%p433_p12, %s2458_s18), 1  ;;  %v2472_v0 = vmov (!%p1906_p13), 0.0  }
  0x46   : > { %s2699_s30 = scalar_lea.vmem %s3037_s1, %s1903_s26  ;;  %s1905_s5 = sshll.u32 %s3056_s25, 3  ;;  %450 = vst [vmem:[#allocation2] sm:$0xff] (!%p1906_p13), %v2472_v0  ;;  %451 = vst [vmem:[#allocation2 + $0x8] sm:$0xff] (!%p1906_p13), %v2472_v0 }
  0x47   : > { %s2707_s7 = scalar_lea.vmem %s3038_s2, %s1905_s5  ;;  %s438_s10 = scalar_lea.vmem %s3039_s3, %s3058_s18  ;;  %452 = vst [vmem:[#allocation2 + $0x10] sm:$0xff] (!%p1906_p13), %v2472_v0  ;;  %453 = vst [vmem:[#allocation2 + $0x18] sm:$0xff] (!%p1906_p13), %v2472_v0 }
  0x48   : > { %s444_s13 = scalar_lea.vmem %s3040_s4, %s3058_s18  ;;  %s2717_s14 = scalar_lea.vmem [#allocation3], %s1901_s24  ;;  %454 = vst [vmem:[#allocation2 + $0x20] sm:$0xff] (!%p1906_p13), %v2472_v0  ;;  %455 = vst [vmem:[#allocation2 + $0x28] sm:$0xff] (!%p1906_p13), %v2472_v0 }
  0x49   : > { %449 = sbr.rel (%p1906_p13) target bundleno = 86 (0x56), region = 55  ;;  %456 = vst [vmem:[#allocation2 + $0x30] sm:$0xff] (!%p1906_p13), %v2472_v0  ;;  %457 = vst [vmem:[#allocation2 + $0x38] sm:$0xff] (!%p1906_p13), %v2472_v0 }
  0x4a   : > { %458 = vst [vmem:[#allocation2 + $0x40] sm:$0xff] (!%p1906_p13), %v2472_v0  ;;  %459 = vst [vmem:[#allocation2 + $0x48] sm:$0xff] (!%p1906_p13), %v2472_v0 }
  0x4b   : > { %460 = vst [vmem:[#allocation2 + $0x50] sm:$0xff] (!%p1906_p13), %v2472_v0  ;;  %461 = vst [vmem:[#allocation2 + $0x58] sm:$0xff] (!%p1906_p13), %v2472_v0 }
  0x4c   : > { %462 = vst [vmem:[#allocation2 + $0x60] sm:$0xff] (!%p1906_p13), %v2472_v0  ;;  %463 = vst [vmem:[#allocation2 + $0x68] sm:$0xff] (!%p1906_p13), %v2472_v0 }
  0x4d   : > { %464 = vst [vmem:[#allocation2 + $0x70] sm:$0xff] (!%p1906_p13), %v2472_v0  ;;  %465 = vst [vmem:[#allocation2 + $0x78] sm:$0xff] (!%p1906_p13), %v2472_v0 }
  0x4e   : > { %466 = vst [vmem:[#allocation2 + $0x80] sm:$0xff] (!%p1906_p13), %v2472_v0  ;;  %467 = vst [vmem:[#allocation2 + $0x88] sm:$0xff] (!%p1906_p13), %v2472_v0 }
  0x4f   : > { %468 = vst [vmem:[#allocation2 + $0x90] sm:$0xff] (!%p1906_p13), %v2472_v0  ;;  %469 = vst [vmem:[#allocation2 + $0x98] sm:$0xff] (!%p1906_p13), %v2472_v0 }
  0x50   : > { %470 = vst [vmem:[#allocation2 + $0xa0] sm:$0xff] %v2472_v0  ;;  %471 = vst [vmem:[#allocation2 + $0xa8] sm:$0xff] %v2472_v0 }
  0x51   : > { %472 = vst [vmem:[#allocation2 + $0xb0] sm:$0xff] %v2472_v0  ;;  %473 = vst [vmem:[#allocation2 + $0xb8] sm:$0xff] %v2472_v0 }
  0x52   : > { %474 = vst [vmem:[#allocation2 + $0xc0] sm:$0xff] %v2472_v0  ;;  %475 = vst [vmem:[#allocation2 + $0xc8] sm:$0xff] %v2472_v0 }
  0x53   : > { %476 = vst [vmem:[#allocation2 + $0xd0] sm:$0xff] %v2472_v0  ;;  %477 = vst [vmem:[#allocation2 + $0xd8] sm:$0xff] %v2472_v0 }
  0x54   : > { %478 = vst [vmem:[#allocation2 + $0xe0] sm:$0xff] %v2472_v0  ;;  %479 = vst [vmem:[#allocation2 + $0xe8] sm:$0xff] %v2472_v0 }
  0x55   : > { %480 = vst [vmem:[#allocation2 + $0xf0] sm:$0xff] %v2472_v0  ;;  %481 = vst [vmem:[#allocation2 + $0xf8] sm:$0xff] %v2472_v0 }
  0x56 PF: > { %v2288_v1 = vld [vmem:[%s2699_s30 + $0x40] sm:$0xff]   ;;  %v2292_v5 = vld [vmem:[%s2699_s30 + $0x48] sm:$0xff]   ;;  %v2296_v9 = vld [vmem:[%s2699_s30 + $0x50] sm:$0xff]   ;;  %p2003_p0 = scmp.ne.s32.totalorder %s2454_s17, 1 }
  0x57   : > { %v2289_v2 = vld [vmem:[%s2699_s30 + $0xc0] sm:$0xff]   ;;  %2007 = vmatprep.subr.bf16.mxu0 %v2288_v1  ;;  %v2293_v6 = vld [vmem:[%s2699_s30 + $0xc8] sm:$0xff]   ;;  %v2297_v10 = vld [vmem:[%s2699_s30 + $0xd0] sm:$0xff]  }
  0x58   : > { %v2290_v3 = vld [vmem:[%s2699_s30] sm:$0xff]   ;;  %2119 = vmatprep.subr.bf16.mxu1 %v2289_v2  ;;  %v2294_v7 = vld [vmem:[%s2699_s30 + $0x8] sm:$0xff]   ;;  %v2298_v11 = vld [vmem:[%s2699_s30 + $0x10] sm:$0xff]  }
  0x59   : > { %v2291_v4 = vld [vmem:[%s2699_s30 + $0x80] sm:$0xff]   ;;  %2008 = vmatpush3.bf16.msra.mxu0 %v2290_v3  ;;  %v2295_v8 = vld [vmem:[%s2699_s30 + $0x88] sm:$0xff]   ;;  %v2299_v12 = vld [vmem:[%s2699_s30 + $0x90] sm:$0xff]  }
  0x5a   : > { %2120 = vmatpush3.bf16.msra.mxu1 %v2291_v4  ;;  %2009 = vmatprep.subr.bf16.mxu0 %v2292_v5  ;;  %v2300_v13 = vld [vmem:[%s2699_s30 + $0x58] sm:$0xff]   ;;  %v2304_v17 = vld [vmem:[%s2699_s30 + $0x60] sm:$0xff]   ;;  %v2308_v21 = vld [vmem:[%s2699_s30 + $0x68] sm:$0xff]  }
  0x5b   : > { %2121 = vmatprep.subr.bf16.mxu1 %v2293_v6  ;;  %v2301_v14 = vld [vmem:[%s2699_s30 + $0xd8] sm:$0xff]   ;;  %v2305_v18 = vld [vmem:[%s2699_s30 + $0xe0] sm:$0xff]   ;;  %v2309_v22 = vld [vmem:[%s2699_s30 + $0xe8] sm:$0xff]  }
  0x5c   : > { %v2302_v15 = vld [vmem:[%s2699_s30 + $0x18] sm:$0xff]   ;;  %v2306_v19 = vld [vmem:[%s2699_s30 + $0x20] sm:$0xff]   ;;  %v2310_v23 = vld [vmem:[%s2699_s30 + $0x28] sm:$0xff]  }
  0x5d   : > { %2010 = vmatpush3.bf16.msra.mxu0 %v2294_v7  ;;  %v2303_v16 = vld [vmem:[%s2699_s30 + $0x98] sm:$0xff]   ;;  %v2307_v20 = vld [vmem:[%s2699_s30 + $0xa0] sm:$0xff]   ;;  %v2311_v24 = vld [vmem:[%s2699_s30 + $0xa8] sm:$0xff]  }
  0x5e   : > { %2122 = vmatpush3.bf16.msra.mxu1 %v2295_v8  ;;  %2011 = vmatprep.subr.bf16.mxu0 %v2296_v9  ;;  %v2312_v25 = vld [vmem:[%s2699_s30 + $0x70] sm:$0xff]   ;;  %v2316_v29 = vld [vmem:[%s2699_s30 + $0x78] sm:$0xff]  }
  0x5f   : > { %2123 = vmatprep.subr.bf16.mxu1 %v2297_v10  ;;  %v2313_v26 = vld [vmem:[%s2699_s30 + $0xf0] sm:$0xff]   ;;  %v2317_v30 = vld [vmem:[%s2699_s30 + $0xf8] sm:$0xff]  }
  0x60   : > { %v2314_v27 = vld [vmem:[%s2699_s30 + $0x30] sm:$0xff]   ;;  %v2318_v31 = vld [vmem:[%s2699_s30 + $0x38] sm:$0xff]  }
  0x61   : > { %2012 = vmatpush3.bf16.msra.mxu0 %v2298_v11  ;;  %v2315_v28 = vld [vmem:[%s2699_s30 + $0xb0] sm:$0xff]   ;;  %v2319_v32 = vld [vmem:[%s2699_s30 + $0xb8] sm:$0xff]  }
  0x62   : > { %2124 = vmatpush3.bf16.msra.mxu1 %v2299_v12  ;;  %2013 = vmatprep.subr.bf16.mxu0 %v2300_v13  ;;  %v2320_v33 = vld [vmem:[%s2717_s14] ss:$16 sps:$4 sm:$0xff]   ;;  %v2322_v34 = vld [vmem:[%s2717_s14 + $0x4] ss:$16 sps:$4 sm:$0xff]   ;;  %v2323_v35 = vld [vmem:[%s2717_s14 + $0x8] ss:$16 sps:$4 sm:$0xff]  }
  0x63   : > { %2125 = vmatprep.subr.bf16.mxu1 %v2301_v14  ;;  %v2325_v36 = vld [vmem:[%s2717_s14 + $0xc] ss:$16 sps:$4 sm:$0xff]   ;;  %1186 = vmatprep.mubr.bf16.mxu0 %v2322_v34  ;;  %v2326_v37 = vld [vmem:[%s2717_s14 + $0x24] ss:$16 sps:$4 sm:$0xff]   ;;  %v2330_v39 = vld [vmem:[%s2717_s14 + $0x20] ss:$16 sps:$4 sm:$0xff]  }
  0x64   : > { %1347 = vmatprep.mubr.bf16.mxu1 %v2325_v36  ;;  %v2328_v38 = vld [vmem:[%s2717_s14 + $0x2c] ss:$16 sps:$4 sm:$0xff]   ;;  %v2331_v40 = vld [vmem:[%s2717_s14 + $0x28] ss:$16 sps:$4 sm:$0xff]   ;;  %v2332_v41 = vld [vmem:[%s2717_s14 + $0x44] ss:$16 sps:$4 sm:$0xff]  }
  0x65   : > { %2014 = vmatpush3.bf16.msra.mxu0 %v2302_v15  ;;  %v2334_v42 = vld [vmem:[%s2717_s14 + $0x4c] ss:$16 sps:$4 sm:$0xff]   ;;  %v2336_v43 = vld [vmem:[%s2717_s14 + $0x40] ss:$16 sps:$4 sm:$0xff]   ;;  %v2337_v44 = vld [vmem:[%s2717_s14 + $0x48] ss:$16 sps:$4 sm:$0xff]  }
  0x66   : > { %2126 = vmatpush3.bf16.msra.mxu1 %v2303_v16  ;;  %2015 = vmatprep.subr.bf16.mxu0 %v2304_v17  ;;  %v2338_v45 = vld [vmem:[%s2717_s14 + $0x64] ss:$16 sps:$4 sm:$0xff]   ;;  %v2340_v46 = vld [vmem:[%s2717_s14 + $0x6c] ss:$16 sps:$4 sm:$0xff]   ;;  %v2342_v47 = vld [vmem:[%s2717_s14 + $0x60] ss:$16 sps:$4 sm:$0xff]  }
  0x67   : > { %2127 = vmatprep.subr.bf16.mxu1 %v2305_v18  ;;  %v2343_v48 = vld [vmem:[%s2717_s14 + $0x68] ss:$16 sps:$4 sm:$0xff]   ;;  %v2344_v49 = vld [vmem:[%s2717_s14 + $0x84] ss:$16 sps:$4 sm:$0xff]   ;;  %v2346_v50 = vld [vmem:[%s2717_s14 + $0x8c] ss:$16 sps:$4 sm:$0xff]  }
  0x68   : > { %v2348_v51 = vld [vmem:[%s2717_s14 + $0x80] ss:$16 sps:$4 sm:$0xff]   ;;  %v2349_v52 = vld [vmem:[%s2717_s14 + $0x88] ss:$16 sps:$4 sm:$0xff]   ;;  %v2350_v53 = vld [vmem:[%s2717_s14 + $0xa4] ss:$16 sps:$4 sm:$0xff]  }
  0x69   : > { %2016 = vmatpush3.bf16.msra.mxu0 %v2306_v19  ;;  %v2352_v54 = vld [vmem:[%s2717_s14 + $0xac] ss:$16 sps:$4 sm:$0xff]   ;;  %v2354_v55 = vld [vmem:[%s2717_s14 + $0xa0] ss:$16 sps:$4 sm:$0xff]   ;;  %v2355_v56 = vld [vmem:[%s2717_s14 + $0xa8] ss:$16 sps:$4 sm:$0xff]  }
  0x6a   : > { %2128 = vmatpush3.bf16.msra.mxu1 %v2307_v20  ;;  %2017 = vmatprep.subr.bf16.mxu0 %v2308_v21  ;;  %v2356_v57 = vld [vmem:[%s2717_s14 + $0xc4] ss:$16 sps:$4 sm:$0xff]   ;;  %v2358_v58 = vld [vmem:[%s2717_s14 + $0xcc] ss:$16 sps:$4 sm:$0xff]   ;;  %v2360_v59 = vld [vmem:[%s2717_s14 + $0xc0] ss:$16 sps:$4 sm:$0xff]  }
  0x6b   : > { %2129 = vmatprep.subr.bf16.mxu1 %v2309_v22  ;;  %v2361_v60 = vld [vmem:[%s2717_s14 + $0xc8] ss:$16 sps:$4 sm:$0xff]   ;;  %v2362_v61 = vld [vmem:[%s2717_s14 + $0xe4] ss:$16 sps:$4 sm:$0xff]   ;;  %v2364_v62 = vld [vmem:[%s2717_s14 + $0xec] ss:$16 sps:$4 sm:$0xff]  }
  0x6c   : > { %v2366_v63 = vld [vmem:[%s2717_s14 + $0xe0] ss:$16 sps:$4 sm:$0xff]   ;;  %v2367_v0 = vld [vmem:[%s2717_s14 + $0xe8] ss:$16 sps:$4 sm:$0xff]   ;;  %v2368_v1 = vld [vmem:[%s2717_s14 + $0x104] ss:$16 sps:$4 sm:$0xff]  }
  0x6d   : > { %2018 = vmatpush3.bf16.msra.mxu0 %v2310_v23  ;;  %v2370_v2 = vld [vmem:[%s2717_s14 + $0x10c] ss:$16 sps:$4 sm:$0xff]   ;;  %v2372_v3 = vld [vmem:[%s2717_s14 + $0x100] ss:$16 sps:$4 sm:$0xff]   ;;  %v2373_v4 = vld [vmem:[%s2717_s14 + $0x108] ss:$16 sps:$4 sm:$0xff]  }
  0x6e   : > { %2130 = vmatpush3.bf16.msra.mxu1 %v2311_v24  ;;  %2019 = vmatprep.subr.bf16.mxu0 %v2312_v25  ;;  %v2374_v5 = vld [vmem:[%s2717_s14 + $0x124] ss:$16 sps:$4 sm:$0xff]   ;;  %v2376_v6 = vld [vmem:[%s2717_s14 + $0x12c] ss:$16 sps:$4 sm:$0xff]   ;;  %v2378_v7 = vld [vmem:[%s2717_s14 + $0x120] ss:$16 sps:$4 sm:$0xff]  }
  0x6f   : > { %2131 = vmatprep.subr.bf16.mxu1 %v2313_v26  ;;  %v2379_v8 = vld [vmem:[%s2717_s14 + $0x128] ss:$16 sps:$4 sm:$0xff]   ;;  %v2380_v9 = vld [vmem:[%s2717_s14 + $0x144] ss:$16 sps:$4 sm:$0xff]   ;;  %v2382_v10 = vld [vmem:[%s2717_s14 + $0x14c] ss:$16 sps:$4 sm:$0xff]  }
  0x70   : > { %v2384_v11 = vld [vmem:[%s2717_s14 + $0x140] ss:$16 sps:$4 sm:$0xff]   ;;  %v2385_v12 = vld [vmem:[%s2717_s14 + $0x148] ss:$16 sps:$4 sm:$0xff]   ;;  %v2386_v13 = vld [vmem:[%s2717_s14 + $0x164] ss:$16 sps:$4 sm:$0xff]  }
  0x71   : > { %2020 = vmatpush3.bf16.msra.mxu0 %v2314_v27  ;;  %v2388_v14 = vld [vmem:[%s2717_s14 + $0x16c] ss:$16 sps:$4 sm:$0xff]   ;;  %v2390_v15 = vld [vmem:[%s2717_s14 + $0x160] ss:$16 sps:$4 sm:$0xff]   ;;  %v2391_v16 = vld [vmem:[%s2717_s14 + $0x168] ss:$16 sps:$4 sm:$0xff]  }
  0x72   : > { %2132 = vmatpush3.bf16.msra.mxu1 %v2315_v28  ;;  %2021 = vmatprep.subr.bf16.mxu0 %v2316_v29  ;;  %v2392_v17 = vld [vmem:[%s2717_s14 + $0x184] ss:$16 sps:$4 sm:$0xff]   ;;  %v2394_v18 = vld [vmem:[%s2717_s14 + $0x18c] ss:$16 sps:$4 sm:$0xff]   ;;  %v2396_v19 = vld [vmem:[%s2717_s14 + $0x180] ss:$16 sps:$4 sm:$0xff]  }
  0x73   : > { %2133 = vmatprep.subr.bf16.mxu1 %v2317_v30  ;;  %v2397_v20 = vld [vmem:[%s2717_s14 + $0x188] ss:$16 sps:$4 sm:$0xff]   ;;  %v2398_v21 = vld [vmem:[%s2717_s14 + $0x1a4] ss:$16 sps:$4 sm:$0xff]   ;;  %v2400_v22 = vld [vmem:[%s2717_s14 + $0x1ac] ss:$16 sps:$4 sm:$0xff]  }
  0x74   : > { %v2402_v23 = vld [vmem:[%s2717_s14 + $0x1a0] ss:$16 sps:$4 sm:$0xff]   ;;  %v2403_v24 = vld [vmem:[%s2717_s14 + $0x1a8] ss:$16 sps:$4 sm:$0xff]   ;;  %v2404_v25 = vld [vmem:[%s2717_s14 + $0x1c4] ss:$16 sps:$4 sm:$0xff]  }
  0x75   : > { %2022 = vmatpush3.bf16.msra.mxu0 %v2318_v31  ;;  %v2406_v26 = vld [vmem:[%s2717_s14 + $0x1cc] ss:$16 sps:$4 sm:$0xff]   ;;  %v2408_v27 = vld [vmem:[%s2717_s14 + $0x1c0] ss:$16 sps:$4 sm:$0xff]   ;;  %v2409_v28 = vld [vmem:[%s2717_s14 + $0x1c8] ss:$16 sps:$4 sm:$0xff]  }
  0x76   : > { %2134 = vmatpush3.bf16.msra.mxu1 %v2319_v32  ;;  %v2410_v29 = vld [vmem:[%s2717_s14 + $0x1e4] ss:$16 sps:$4 sm:$0xff]   ;;  %v2412_v30 = vld [vmem:[%s2717_s14 + $0x1ec] ss:$16 sps:$4 sm:$0xff]   ;;  %v2414_v31 = vld [vmem:[%s2717_s14 + $0x1e0] ss:$16 sps:$4 sm:$0xff]  }
  0x77   : > { %v2415_v32 = vld [vmem:[%s2717_s14 + $0x1e8] ss:$16 sps:$4 sm:$0xff]  }
  0x78   : > { %1187 = vmatmul.mubr.bf16.vlgmr.msra.gmra.mrb[0].mxu0 %v2320_v33 }
  0x79   : > { %1348 = vmatmul.mubr.bf16.vlgmr.msra.gmra.mrb[0].mxu1 %v2323_v35  ;;  %1194 = vmatprep.mubr.bf16.mxu0 %v2326_v37 }
  0x7a   : > { %1355 = vmatprep.mubr.bf16.mxu1 %v2328_v38 }
  0x80   : > { %1195 = vmatmul.mubr.bf16.gmra.mrb[4].mxu0 %v2330_v39 }
  0x81   : > { %1356 = vmatmul.mubr.bf16.gmra.mrb[4].mxu1 %v2331_v40  ;;  %1202 = vmatprep.mubr.bf16.mxu0 %v2332_v41 }
  0x82   : > { %1363 = vmatprep.mubr.bf16.mxu1 %v2334_v42  ;;  %v482_v42 = vld [vmem:[#allocation2] sm:$0xff] }
  0x88   : > { %1203 = vmatmul.mubr.bf16.gmra.mrb[8].mxu0 %v2336_v43 }
  0x89   : > { %1364 = vmatmul.mubr.bf16.gmra.mrb[8].mxu1 %v2337_v44  ;;  %1210 = vmatprep.mubr.bf16.mxu0 %v2338_v45 }
  0x8a   : > { %1371 = vmatprep.mubr.bf16.mxu1 %v2340_v46 }
  0x90   : > { %1211 = vmatmul.mubr.bf16.gmra.mrb[12].mxu0 %v2342_v47  ;;  %v483_v47 = vld [vmem:[#allocation2 + $0x8] sm:$0xff] }
  0x91   : > { %1372 = vmatmul.mubr.bf16.gmra.mrb[12].mxu1 %v2343_v48  ;;  %1218 = vmatprep.mubr.bf16.mxu0 %v2344_v49 }
  0x92   : > { %1379 = vmatprep.mubr.bf16.mxu1 %v2346_v50 }
  0x98   : > { %1219 = vmatmul.mubr.bf16.gmra.mrb[16].mxu0 %v2348_v51 }
  0x99   : > { %1380 = vmatmul.mubr.bf16.gmra.mrb[16].mxu1 %v2349_v52  ;;  %1226 = vmatprep.mubr.bf16.mxu0 %v2350_v53 }
  0x9a   : > { %1387 = vmatprep.mubr.bf16.mxu1 %v2352_v54 }
  0xa0   : > { %1227 = vmatmul.mubr.bf16.gmra.mrb[20].mxu0 %v2354_v55 }
  0xa1   : > { %1388 = vmatmul.mubr.bf16.gmra.mrb[20].mxu1 %v2355_v56  ;;  %1234 = vmatprep.mubr.bf16.mxu0 %v2356_v57 }
  0xa2   : > { %1395 = vmatprep.mubr.bf16.mxu1 %v2358_v58 }
  0xa8   : > { %1235 = vmatmul.mubr.bf16.gmra.mrb[24].mxu0 %v2360_v59 }
  0xa9   : > { %1396 = vmatmul.mubr.bf16.gmra.mrb[24].mxu1 %v2361_v60  ;;  %1242 = vmatprep.mubr.bf16.mxu0 %v2362_v61  ;;  %v484_v60 = vld [vmem:[#allocation2 + $0x10] sm:$0xff] }
  0xaa   : > { %1403 = vmatprep.mubr.bf16.mxu1 %v2364_v62 }
  0xb0   : > { %1243 = vmatmul.mubr.bf16.gmra.mrb[28].mxu0 %v2366_v63 }
  0xb1   : > { %1404 = vmatmul.mubr.bf16.gmra.mrb[28].mxu1 %v2367_v0  ;;  %1250 = vmatprep.mubr.bf16.mxu0 %v2368_v1  ;;  %v485_v1 = vld [vmem:[#allocation2 + $0x18] sm:$0xff] }
  0xb2   : > { %1411 = vmatprep.mubr.bf16.mxu1 %v2370_v2 }
  0xb8   : > { %1251 = vmatmul.mubr.bf16.gmra.mrb[32].mxu0 %v2372_v3 }
  0xb9   : > { %1412 = vmatmul.mubr.bf16.gmra.mrb[32].mxu1 %v2373_v4  ;;  %1258 = vmatprep.mubr.bf16.mxu0 %v2374_v5 }
  0xba   : > { %1419 = vmatprep.mubr.bf16.mxu1 %v2376_v6 }
  0xc0   : > { %1259 = vmatmul.mubr.bf16.gmra.mrb[36].mxu0 %v2378_v7 }
  0xc1   : > { %1420 = vmatmul.mubr.bf16.gmra.mrb[36].mxu1 %v2379_v8  ;;  %1266 = vmatprep.mubr.bf16.mxu0 %v2380_v9 }
  0xc2   : > { %1427 = vmatprep.mubr.bf16.mxu1 %v2382_v10 }
  0xc8   : > { %1267 = vmatmul.mubr.bf16.gmra.mrb[40].mxu0 %v2384_v11 }
  0xc9   : > { %1428 = vmatmul.mubr.bf16.gmra.mrb[40].mxu1 %v2385_v12  ;;  %1274 = vmatprep.mubr.bf16.mxu0 %v2386_v13 }
  0xca   : > { %1435 = vmatprep.mubr.bf16.mxu1 %v2388_v14  ;;  %v486_v14 = vld [vmem:[#allocation2 + $0x20] sm:$0xff] }
  0xd0   : > { %1275 = vmatmul.mubr.bf16.gmra.mrb[44].mxu0 %v2390_v15 }
  0xd1   : > { %1436 = vmatmul.mubr.bf16.gmra.mrb[44].mxu1 %v2391_v16  ;;  %1282 = vmatprep.mubr.bf16.mxu0 %v2392_v17 }
  0xd2   : > { %1443 = vmatprep.mubr.bf16.mxu1 %v2394_v18 }
  0xd8   : > { %1283 = vmatmul.mubr.bf16.gmra.mrb[48].mxu0 %v2396_v19  ;;  %v487_v19 = vld [vmem:[#allocation2 + $0x28] sm:$0xff] }
  0xd9   : > { %1444 = vmatmul.mubr.bf16.gmra.mrb[48].mxu1 %v2397_v20  ;;  %1290 = vmatprep.mubr.bf16.mxu0 %v2398_v21 }
  0xda   : > { %1451 = vmatprep.mubr.bf16.mxu1 %v2400_v22 }
  0xe0   : > { %1291 = vmatmul.mubr.bf16.gmra.mrb[52].mxu0 %v2402_v23 }
  0xe1   : > { %1452 = vmatmul.mubr.bf16.gmra.mrb[52].mxu1 %v2403_v24  ;;  %1298 = vmatprep.mubr.bf16.mxu0 %v2404_v25 }
  0xe2   : > { %1459 = vmatprep.mubr.bf16.mxu1 %v2406_v26 }
  0xe8   : > { %1299 = vmatmul.mubr.bf16.gmra.mrb[56].mxu0 %v2408_v27 }
  0xe9   : > { %1460 = vmatmul.mubr.bf16.gmra.mrb[56].mxu1 %v2409_v28  ;;  %1306 = vmatprep.mubr.bf16.mxu0 %v2410_v29 }
  0xea   : > { %1467 = vmatprep.mubr.bf16.mxu1 %v2412_v30 }
  0xf0   : > { %1307 = vmatmul.mubr.bf16.gmra.mrb[60].mxu0 %v2414_v31 }
  0xf1   : > { %1468 = vmatmul.mubr.bf16.gmra.mrb[60].mxu1 %v2415_v32  ;;  %v488_v32 = vld [vmem:[#allocation2 + $0x30] sm:$0xff] }
 0x14b   : > { %v2023_v33 = vpop.f32.mrb[0].mxu0 }
 0x14c   : > { %v2135_v34 = vpop.f32.mrb[0].mxu1  ;;  %v2024_v35 = vpop.f32.mrb[1].mxu0 }
 0x14d   : > { %v2025_v36 = vadd.f32 %v2024_v35, %v2023_v33  ;;  %v2136_v37 = vpop.f32.mrb[1].mxu1  ;;  %v2026_v38 = vpop.f32.mrb[2].mxu0 }
 0x14e   : > { %v2137_v39 = vadd.f32 %v2136_v37, %v2135_v34  ;;  %v2138_v40 = vpop.f32.mrb[2].mxu1  ;;  %v2027_v41 = vpop.f32.mrb[3].mxu0  ;;  %v489_v37 = vld [vmem:[#allocation2 + $0x38] sm:$0xff] }
 0x14f   : > { %v2028_v43 = vadd.f32 %v2027_v41, %v2026_v38  ;;  %v2139_v44 = vpop.f32.mrb[3].mxu1 }
 0x150   : > { %v1350_v45 = vadd.f32 %v2137_v39, %v2025_v36  ;;  %v2140_v46 = vadd.f32 %v2139_v44, %v2138_v40 }
 0x152   : > { %v1476_v48 = vadd.f32 %v1350_v45, %v482_v42  ;;  %v1353_v49 = vadd.f32 %v2140_v46, %v2028_v43 }
 0x153   : > { %v2029_v50 = vpop.f32.mrb[4].mxu0 }
 0x154   : > { %1508 = vst [vmem:[#allocation2] sm:$0xff] %v1476_v48  ;;  %v1477_v51 = vadd.f32 %v1353_v49, %v483_v47  ;;  %v2141_v52 = vpop.f32.mrb[4].mxu1  ;;  %v2030_v53 = vpop.f32.mrb[5].mxu0 }
 0x155   : > { %v2031_v54 = vadd.f32 %v2030_v53, %v2029_v50  ;;  %v2142_v55 = vpop.f32.mrb[5].mxu1  ;;  %v2032_v56 = vpop.f32.mrb[6].mxu0  ;;  %v490_v50 = vld [vmem:[#allocation2 + $0x40] sm:$0xff] }
 0x156   : > { %1509 = vst [vmem:[#allocation2 + $0x8] sm:$0xff] %v1477_v51  ;;  %v2143_v57 = vadd.f32 %v2142_v55, %v2141_v52  ;;  %v2144_v58 = vpop.f32.mrb[6].mxu1  ;;  %v2033_v59 = vpop.f32.mrb[7].mxu0  ;;  %v491_v55 = vld [vmem:[#allocation2 + $0x48] sm:$0xff] }
 0x157   : > { %v2034_v61 = vadd.f32 %v2033_v59, %v2032_v56  ;;  %v2145_v62 = vpop.f32.mrb[7].mxu1 }
 0x158   : > { %v1358_v63 = vadd.f32 %v2143_v57, %v2031_v54  ;;  %v2146_v0 = vadd.f32 %v2145_v62, %v2144_v58 }
 0x15a   : > { %v1478_v2 = vadd.f32 %v1358_v63, %v484_v60  ;;  %v1361_v3 = vadd.f32 %v2146_v0, %v2034_v61 }
 0x15b   : > { %v2035_v4 = vpop.f32.mrb[8].mxu0 }
 0x15c   : > { %1510 = vst [vmem:[#allocation2 + $0x10] sm:$0xff] %v1478_v2  ;;  %v1479_v5 = vadd.f32 %v1361_v3, %v485_v1  ;;  %v2147_v6 = vpop.f32.mrb[8].mxu1  ;;  %v2036_v7 = vpop.f32.mrb[9].mxu0 }
 0x15d   : > { %v2037_v8 = vadd.f32 %v2036_v7, %v2035_v4  ;;  %v2148_v9 = vpop.f32.mrb[9].mxu1  ;;  %v2038_v10 = vpop.f32.mrb[10].mxu0  ;;  %v492_v4 = vld [vmem:[#allocation2 + $0x50] sm:$0xff] }
 0x15e   : > { %1511 = vst [vmem:[#allocation2 + $0x18] sm:$0xff] %v1479_v5  ;;  %v2149_v11 = vadd.f32 %v2148_v9, %v2147_v6  ;;  %v2150_v12 = vpop.f32.mrb[10].mxu1  ;;  %v2039_v13 = vpop.f32.mrb[11].mxu0  ;;  %v493_v9 = vld [vmem:[#allocation2 + $0x58] sm:$0xff] }
 0x15f   : > { %v2040_v15 = vadd.f32 %v2039_v13, %v2038_v10  ;;  %v2151_v16 = vpop.f32.mrb[11].mxu1 }
 0x160   : > { %v1366_v17 = vadd.f32 %v2149_v11, %v2037_v8  ;;  %v2152_v18 = vadd.f32 %v2151_v16, %v2150_v12 }
 0x162   : > { %v1480_v20 = vadd.f32 %v1366_v17, %v486_v14  ;;  %v1369_v21 = vadd.f32 %v2152_v18, %v2040_v15 }
 0x163   : > { %v2041_v22 = vpop.f32.mrb[12].mxu0 }
 0x164   : > { %1512 = vst [vmem:[#allocation2 + $0x20] sm:$0xff] %v1480_v20  ;;  %v1481_v23 = vadd.f32 %v1369_v21, %v487_v19  ;;  %v2153_v24 = vpop.f32.mrb[12].mxu1  ;;  %v2042_v25 = vpop.f32.mrb[13].mxu0 }
 0x165   : > { %v2043_v26 = vadd.f32 %v2042_v25, %v2041_v22  ;;  %v2154_v27 = vpop.f32.mrb[13].mxu1  ;;  %v2044_v28 = vpop.f32.mrb[14].mxu0  ;;  %v494_v22 = vld [vmem:[#allocation2 + $0x60] sm:$0xff] }
 0x166   : > { %1513 = vst [vmem:[#allocation2 + $0x28] sm:$0xff] %v1481_v23  ;;  %v2155_v29 = vadd.f32 %v2154_v27, %v2153_v24  ;;  %v2156_v30 = vpop.f32.mrb[14].mxu1  ;;  %v2045_v31 = vpop.f32.mrb[15].mxu0  ;;  %v495_v27 = vld [vmem:[#allocation2 + $0x68] sm:$0xff] }
 0x167   : > { %v2046_v33 = vadd.f32 %v2045_v31, %v2044_v28  ;;  %v2157_v34 = vpop.f32.mrb[15].mxu1 }
 0x168   : > { %v1374_v35 = vadd.f32 %v2155_v29, %v2043_v26  ;;  %v2158_v36 = vadd.f32 %v2157_v34, %v2156_v30 }
 0x16a   : > { %v1482_v38 = vadd.f32 %v1374_v35, %v488_v32  ;;  %v1377_v39 = vadd.f32 %v2158_v36, %v2046_v33 }
 0x16b   : > { %v2047_v40 = vpop.f32.mrb[16].mxu0 }
 0x16c   : > { %1514 = vst [vmem:[#allocation2 + $0x30] sm:$0xff] %v1482_v38  ;;  %v1483_v41 = vadd.f32 %v1377_v39, %v489_v37  ;;  %v2159_v42 = vpop.f32.mrb[16].mxu1  ;;  %v2048_v43 = vpop.f32.mrb[17].mxu0 }
 0x16d   : > { %v2049_v44 = vadd.f32 %v2048_v43, %v2047_v40  ;;  %v2160_v45 = vpop.f32.mrb[17].mxu1  ;;  %v2050_v46 = vpop.f32.mrb[18].mxu0  ;;  %v496_v40 = vld [vmem:[#allocation2 + $0x70] sm:$0xff] }
 0x16e   : > { %1515 = vst [vmem:[#allocation2 + $0x38] sm:$0xff] %v1483_v41  ;;  %v2161_v47 = vadd.f32 %v2160_v45, %v2159_v42  ;;  %v2162_v48 = vpop.f32.mrb[18].mxu1  ;;  %v2051_v49 = vpop.f32.mrb[19].mxu0  ;;  %v497_v45 = vld [vmem:[#allocation2 + $0x78] sm:$0xff] }
 0x16f   : > { %v2052_v51 = vadd.f32 %v2051_v49, %v2050_v46  ;;  %v2163_v52 = vpop.f32.mrb[19].mxu1 }
 0x170   : > { %v1382_v53 = vadd.f32 %v2161_v47, %v2049_v44  ;;  %v2164_v54 = vadd.f32 %v2163_v52, %v2162_v48 }
 0x172   : > { %v1484_v56 = vadd.f32 %v1382_v53, %v490_v50  ;;  %v1385_v57 = vadd.f32 %v2164_v54, %v2052_v51 }
 0x173   : > { %v2053_v58 = vpop.f32.mrb[20].mxu0 }
 0x174   : > { %1516 = vst [vmem:[#allocation2 + $0x40] sm:$0xff] %v1484_v56  ;;  %v1485_v59 = vadd.f32 %v1385_v57, %v491_v55  ;;  %v2165_v60 = vpop.f32.mrb[20].mxu1  ;;  %v2054_v61 = vpop.f32.mrb[21].mxu0 }
 0x175   : > { %v2055_v62 = vadd.f32 %v2054_v61, %v2053_v58  ;;  %v2166_v63 = vpop.f32.mrb[21].mxu1  ;;  %v2056_v0 = vpop.f32.mrb[22].mxu0  ;;  %v498_v58 = vld [vmem:[#allocation2 + $0x80] sm:$0xff] }
 0x176   : > { %1517 = vst [vmem:[#allocation2 + $0x48] sm:$0xff] %v1485_v59  ;;  %v2167_v1 = vadd.f32 %v2166_v63, %v2165_v60  ;;  %v2168_v2 = vpop.f32.mrb[22].mxu1  ;;  %v2057_v3 = vpop.f32.mrb[23].mxu0  ;;  %v499_v63 = vld [vmem:[#allocation2 + $0x88] sm:$0xff] }
 0x177   : > { %v2058_v5 = vadd.f32 %v2057_v3, %v2056_v0  ;;  %v2169_v6 = vpop.f32.mrb[23].mxu1 }
 0x178   : > { %v1390_v7 = vadd.f32 %v2167_v1, %v2055_v62  ;;  %v2170_v8 = vadd.f32 %v2169_v6, %v2168_v2 }
 0x17a   : > { %v1486_v10 = vadd.f32 %v1390_v7, %v492_v4  ;;  %v1393_v11 = vadd.f32 %v2170_v8, %v2058_v5 }
 0x17b   : > { %v2059_v12 = vpop.f32.mrb[24].mxu0 }
 0x17c   : > { %1518 = vst [vmem:[#allocation2 + $0x50] sm:$0xff] %v1486_v10  ;;  %v1487_v13 = vadd.f32 %v1393_v11, %v493_v9  ;;  %v2171_v14 = vpop.f32.mrb[24].mxu1  ;;  %v2060_v15 = vpop.f32.mrb[25].mxu0 }
 0x17d   : > { %v2061_v16 = vadd.f32 %v2060_v15, %v2059_v12  ;;  %v2172_v17 = vpop.f32.mrb[25].mxu1  ;;  %v2062_v18 = vpop.f32.mrb[26].mxu0  ;;  %v500_v12 = vld [vmem:[#allocation2 + $0x90] sm:$0xff] }
 0x17e   : > { %1519 = vst [vmem:[#allocation2 + $0x58] sm:$0xff] %v1487_v13  ;;  %v2173_v19 = vadd.f32 %v2172_v17, %v2171_v14  ;;  %v2174_v20 = vpop.f32.mrb[26].mxu1  ;;  %v2063_v21 = vpop.f32.mrb[27].mxu0  ;;  %v501_v17 = vld [vmem:[#allocation2 + $0x98] sm:$0xff] }
 0x17f   : > { %v2064_v23 = vadd.f32 %v2063_v21, %v2062_v18  ;;  %v2175_v24 = vpop.f32.mrb[27].mxu1 }
 0x180   : > { %v1398_v25 = vadd.f32 %v2173_v19, %v2061_v16  ;;  %v2176_v26 = vadd.f32 %v2175_v24, %v2174_v20 }
 0x182   : > { %v1488_v28 = vadd.f32 %v1398_v25, %v494_v22  ;;  %v1401_v29 = vadd.f32 %v2176_v26, %v2064_v23 }
 0x183   : > { %v2065_v30 = vpop.f32.mrb[28].mxu0 }
 0x184   : > { %1520 = vst [vmem:[#allocation2 + $0x60] sm:$0xff] %v1488_v28  ;;  %v1489_v31 = vadd.f32 %v1401_v29, %v495_v27  ;;  %v2177_v32 = vpop.f32.mrb[28].mxu1  ;;  %v2066_v33 = vpop.f32.mrb[29].mxu0 }
 0x185   : > { %v2067_v34 = vadd.f32 %v2066_v33, %v2065_v30  ;;  %v2178_v35 = vpop.f32.mrb[29].mxu1  ;;  %v2068_v36 = vpop.f32.mrb[30].mxu0  ;;  %v502_v30 = vld [vmem:[#allocation2 + $0xa0] sm:$0xff] }
 0x186   : > { %1521 = vst [vmem:[#allocation2 + $0x68] sm:$0xff] %v1489_v31  ;;  %v2179_v37 = vadd.f32 %v2178_v35, %v2177_v32  ;;  %v2180_v38 = vpop.f32.mrb[30].mxu1  ;;  %v2069_v39 = vpop.f32.mrb[31].mxu0  ;;  %v503_v35 = vld [vmem:[#allocation2 + $0xa8] sm:$0xff] }
 0x187   : > { %v2070_v41 = vadd.f32 %v2069_v39, %v2068_v36  ;;  %v2181_v42 = vpop.f32.mrb[31].mxu1 }
 0x188   : > { %v1406_v43 = vadd.f32 %v2179_v37, %v2067_v34  ;;  %v2182_v44 = vadd.f32 %v2181_v42, %v2180_v38 }
 0x18a   : > { %v1490_v46 = vadd.f32 %v1406_v43, %v496_v40  ;;  %v1409_v47 = vadd.f32 %v2182_v44, %v2070_v41 }
 0x18b   : > { %v2071_v48 = vpop.f32.mrb[32].mxu0 }
 0x18c   : > { %1522 = vst [vmem:[#allocation2 + $0x70] sm:$0xff] %v1490_v46  ;;  %v1491_v49 = vadd.f32 %v1409_v47, %v497_v45  ;;  %v2183_v50 = vpop.f32.mrb[32].mxu1  ;;  %v2072_v51 = vpop.f32.mrb[33].mxu0 }
 0x18d   : > { %v2073_v52 = vadd.f32 %v2072_v51, %v2071_v48  ;;  %v2184_v53 = vpop.f32.mrb[33].mxu1  ;;  %v2074_v54 = vpop.f32.mrb[34].mxu0  ;;  %v504_v48 = vld [vmem:[#allocation2 + $0xb0] sm:$0xff] }
 0x18e   : > { %1523 = vst [vmem:[#allocation2 + $0x78] sm:$0xff] %v1491_v49  ;;  %v2185_v55 = vadd.f32 %v2184_v53, %v2183_v50  ;;  %v2186_v56 = vpop.f32.mrb[34].mxu1  ;;  %v2075_v57 = vpop.f32.mrb[35].mxu0  ;;  %v505_v53 = vld [vmem:[#allocation2 + $0xb8] sm:$0xff] }
 0x18f   : > { %v2076_v59 = vadd.f32 %v2075_v57, %v2074_v54  ;;  %v2187_v60 = vpop.f32.mrb[35].mxu1 }
 0x190   : > { %v1414_v61 = vadd.f32 %v2185_v55, %v2073_v52  ;;  %v2188_v62 = vadd.f32 %v2187_v60, %v2186_v56 }
 0x192   : > { %v1492_v0 = vadd.f32 %v1414_v61, %v498_v58  ;;  %v1417_v1 = vadd.f32 %v2188_v62, %v2076_v59 }
 0x193   : > { %v2077_v2 = vpop.f32.mrb[36].mxu0 }
 0x194   : > { %1524 = vst [vmem:[#allocation2 + $0x80] sm:$0xff] %v1492_v0  ;;  %v1493_v3 = vadd.f32 %v1417_v1, %v499_v63  ;;  %v2189_v4 = vpop.f32.mrb[36].mxu1  ;;  %v2078_v5 = vpop.f32.mrb[37].mxu0 }
 0x195   : > { %v2079_v6 = vadd.f32 %v2078_v5, %v2077_v2  ;;  %v2190_v7 = vpop.f32.mrb[37].mxu1  ;;  %v2080_v8 = vpop.f32.mrb[38].mxu0  ;;  %v506_v2 = vld [vmem:[#allocation2 + $0xc0] sm:$0xff] }
 0x196   : > { %1525 = vst [vmem:[#allocation2 + $0x88] sm:$0xff] %v1493_v3  ;;  %v2191_v9 = vadd.f32 %v2190_v7, %v2189_v4  ;;  %v2192_v10 = vpop.f32.mrb[38].mxu1  ;;  %v2081_v11 = vpop.f32.mrb[39].mxu0  ;;  %v507_v7 = vld [vmem:[#allocation2 + $0xc8] sm:$0xff] }
 0x197   : > { %v2082_v13 = vadd.f32 %v2081_v11, %v2080_v8  ;;  %v2193_v14 = vpop.f32.mrb[39].mxu1 }
 0x198   : > { %v1422_v15 = vadd.f32 %v2191_v9, %v2079_v6  ;;  %v2194_v16 = vadd.f32 %v2193_v14, %v2192_v10 }
 0x19a   : > { %v1494_v18 = vadd.f32 %v1422_v15, %v500_v12  ;;  %v1425_v19 = vadd.f32 %v2194_v16, %v2082_v13 }
 0x19b   : > { %v2083_v20 = vpop.f32.mrb[40].mxu0 }
 0x19c   : > { %1526 = vst [vmem:[#allocation2 + $0x90] sm:$0xff] %v1494_v18  ;;  %v1495_v21 = vadd.f32 %v1425_v19, %v501_v17  ;;  %v2195_v22 = vpop.f32.mrb[40].mxu1  ;;  %v2084_v23 = vpop.f32.mrb[41].mxu0 }
 0x19d   : > { %v2085_v24 = vadd.f32 %v2084_v23, %v2083_v20  ;;  %v2196_v25 = vpop.f32.mrb[41].mxu1  ;;  %v2086_v26 = vpop.f32.mrb[42].mxu0  ;;  %v508_v20 = vld [vmem:[#allocation2 + $0xd0] sm:$0xff] }
 0x19e   : > { %1527 = vst [vmem:[#allocation2 + $0x98] sm:$0xff] %v1495_v21  ;;  %v2197_v27 = vadd.f32 %v2196_v25, %v2195_v22  ;;  %v2198_v28 = vpop.f32.mrb[42].mxu1  ;;  %v2087_v29 = vpop.f32.mrb[43].mxu0  ;;  %v509_v25 = vld [vmem:[#allocation2 + $0xd8] sm:$0xff] }
 0x19f   : > { %v2088_v31 = vadd.f32 %v2087_v29, %v2086_v26  ;;  %v2199_v32 = vpop.f32.mrb[43].mxu1 }
 0x1a0   : > { %v1430_v33 = vadd.f32 %v2197_v27, %v2085_v24  ;;  %v2200_v34 = vadd.f32 %v2199_v32, %v2198_v28 }
 0x1a2   : > { %v1496_v36 = vadd.f32 %v1430_v33, %v502_v30  ;;  %v1433_v37 = vadd.f32 %v2200_v34, %v2088_v31 }
 0x1a3   : > { %v2089_v38 = vpop.f32.mrb[44].mxu0 }
 0x1a4   : > { %1528 = vst [vmem:[#allocation2 + $0xa0] sm:$0xff] %v1496_v36  ;;  %v1497_v39 = vadd.f32 %v1433_v37, %v503_v35  ;;  %v2201_v40 = vpop.f32.mrb[44].mxu1  ;;  %v2090_v41 = vpop.f32.mrb[45].mxu0 }
 0x1a5   : > { %v2091_v42 = vadd.f32 %v2090_v41, %v2089_v38  ;;  %v2202_v43 = vpop.f32.mrb[45].mxu1  ;;  %v2092_v44 = vpop.f32.mrb[46].mxu0  ;;  %v510_v38 = vld [vmem:[#allocation2 + $0xe0] sm:$0xff] }
 0x1a6   : > { %1529 = vst [vmem:[#allocation2 + $0xa8] sm:$0xff] %v1497_v39  ;;  %v2203_v45 = vadd.f32 %v2202_v43, %v2201_v40  ;;  %v2204_v46 = vpop.f32.mrb[46].mxu1  ;;  %v2093_v47 = vpop.f32.mrb[47].mxu0  ;;  %v511_v43 = vld [vmem:[#allocation2 + $0xe8] sm:$0xff] }
 0x1a7   : > { %v2094_v49 = vadd.f32 %v2093_v47, %v2092_v44  ;;  %v2205_v50 = vpop.f32.mrb[47].mxu1 }
 0x1a8   : > { %v1438_v51 = vadd.f32 %v2203_v45, %v2091_v42  ;;  %v2206_v52 = vadd.f32 %v2205_v50, %v2204_v46 }
 0x1aa   : > { %v1498_v54 = vadd.f32 %v1438_v51, %v504_v48  ;;  %v1441_v55 = vadd.f32 %v2206_v52, %v2094_v49 }
 0x1ab   : > { %v2095_v56 = vpop.f32.mrb[48].mxu0 }
 0x1ac   : > { %1530 = vst [vmem:[#allocation2 + $0xb0] sm:$0xff] %v1498_v54  ;;  %v1499_v57 = vadd.f32 %v1441_v55, %v505_v53  ;;  %v2207_v58 = vpop.f32.mrb[48].mxu1  ;;  %v2096_v59 = vpop.f32.mrb[49].mxu0 }
 0x1ad   : > { %v2097_v60 = vadd.f32 %v2096_v59, %v2095_v56  ;;  %v2208_v61 = vpop.f32.mrb[49].mxu1  ;;  %v2098_v62 = vpop.f32.mrb[50].mxu0  ;;  %v512_v56 = vld [vmem:[#allocation2 + $0xf0] sm:$0xff] }
 0x1ae   : > { %1531 = vst [vmem:[#allocation2 + $0xb8] sm:$0xff] %v1499_v57  ;;  %v2209_v63 = vadd.f32 %v2208_v61, %v2207_v58  ;;  %v2210_v0 = vpop.f32.mrb[50].mxu1  ;;  %v2099_v1 = vpop.f32.mrb[51].mxu0  ;;  %v513_v61 = vld [vmem:[#allocation2 + $0xf8] sm:$0xff] }
 0x1af   : > { %v2100_v3 = vadd.f32 %v2099_v1, %v2098_v62  ;;  %v2211_v4 = vpop.f32.mrb[51].mxu1  ;;  %v1544_v1 = vld [vmem:[#allocation2] sm:$0xff] (!%p2003_p0) }
 0x1b0   : > { %v1446_v5 = vadd.f32 %v2209_v63, %v2097_v60  ;;  %v2212_v6 = vadd.f32 %v2211_v4, %v2210_v0  ;;  %1576 = vst [vmem:[%s2707_s7] sm:$0xff] (!%p2003_p0), %v1544_v1  ;;  %v1646_v4 = vmul.f32 (!%p2003_p0), %v1544_v1, %v1544_v1 }
 0x1b2   : > { %v1500_v8 = vadd.f32 %v1446_v5, %v506_v2  ;;  %v1449_v9 = vadd.f32 %v2212_v6, %v2100_v3  ;;  %v1545_v2 = vld [vmem:[#allocation2 + $0x8] sm:$0xff] (!%p2003_p0)  ;;  %v1546_v3 = vld [vmem:[#allocation2 + $0x10] sm:$0xff] (!%p2003_p0) }
 0x1b3   : > { %v2101_v10 = vpop.f32.mrb[52].mxu0  ;;  %1577 = vst [vmem:[%s2707_s7 + $0x8] sm:$0xff] (!%p2003_p0), %v1545_v2  ;;  %v1608_v5 = vadd.f32 (!%p2003_p0), %v1545_v2, %v1544_v1  ;;  %v1647_v6 = vmul.f32 (!%p2003_p0), %v1545_v2, %v1545_v2  ;;  %1578 = vst [vmem:[%s2707_s7 + $0x10] sm:$0xff] (!%p2003_p0), %v1546_v3 }
 0x1b4   : > { %1532 = vst [vmem:[#allocation2 + $0xc0] sm:$0xff] %v1500_v8  ;;  %v1501_v11 = vadd.f32 %v1449_v9, %v507_v7  ;;  %v2213_v12 = vpop.f32.mrb[52].mxu1  ;;  %v2102_v13 = vpop.f32.mrb[53].mxu0  ;;  %v1648_v7 = vmul.f32 (!%p2003_p0), %v1546_v3, %v1546_v3  ;;  %v1547_v8 = vld [vmem:[#allocation2 + $0x18] sm:$0xff] (!%p2003_p0)  ;;  %v1548_v9 = vld [vmem:[#allocation2 + $0x20] sm:$0xff] (!%p2003_p0) }
 0x1b5   : > { %v2103_v14 = vadd.f32 %v2102_v13, %v2101_v10  ;;  %v2214_v15 = vpop.f32.mrb[53].mxu1  ;;  %v2104_v16 = vpop.f32.mrb[54].mxu0  ;;  %v1549_v10 = vld [vmem:[#allocation2 + $0x28] sm:$0xff] (!%p2003_p0)  ;;  %1579 = vst [vmem:[%s2707_s7 + $0x18] sm:$0xff] (!%p2003_p0), %v1547_v8  ;;  %1580 = vst [vmem:[%s2707_s7 + $0x20] sm:$0xff] (!%p2003_p0), %v1548_v9  ;;  %v2827_v13 = vld [vmem:[#allocation2 + $0x40] sm:$0xff] (!%p2003_p0) }
 0x1b6   : > { %1533 = vst [vmem:[#allocation2 + $0xc8] sm:$0xff] %v1501_v11  ;;  %v2215_v17 = vadd.f32 %v2214_v15, %v2213_v12  ;;  %v2216_v18 = vpop.f32.mrb[54].mxu1  ;;  %v2105_v19 = vpop.f32.mrb[55].mxu0  ;;  %1581 = vst [vmem:[%s2707_s7 + $0x28] sm:$0xff] (!%p2003_p0), %v1549_v10  ;;  %v2823_v11 = vld [vmem:[#allocation2 + $0x30] sm:$0xff] (!%p2003_p0)  ;;  %v2825_v12 = vld [vmem:[#allocation2 + $0x38] sm:$0xff] (!%p2003_p0)  ;;  %v1609_v15 = vadd.f32 (!%p2003_p0), %v1608_v5, %v1546_v3 }
 0x1b7   : > { %v2106_v21 = vadd.f32 %v2105_v19, %v2104_v16  ;;  %v2217_v22 = vpop.f32.mrb[55].mxu1  ;;  %v1649_v16 = vmul.f32 (!%p2003_p0), %v1547_v8, %v1547_v8  ;;  %1582 = vst [vmem:[%s2707_s7 + $0x30] sm:$0xff] (!%p2003_p0), %v2823_v11  ;;  %1583 = vst [vmem:[%s2707_s7 + $0x38] sm:$0xff] (!%p2003_p0), %v2825_v12  ;;  %v2839_v19 = vld [vmem:[#allocation2 + $0x58] sm:$0xff] (!%p2003_p0) }
 0x1b8   : > { %v1454_v23 = vadd.f32 %v2215_v17, %v2103_v14  ;;  %v2218_v24 = vadd.f32 %v2217_v22, %v2216_v18  ;;  %v1678_v14 = vadd.f32 (!%p2003_p0), %v1647_v6, %v1646_v4  ;;  %1584 = vst [vmem:[%s2707_s7 + $0x40] sm:$0xff] (!%p2003_p0), %v2827_v13  ;;  %v2835_v17 = vld [vmem:[#allocation2 + $0x48] sm:$0xff] (!%p2003_p0)  ;;  %v2837_v18 = vld [vmem:[#allocation2 + $0x50] sm:$0xff] (!%p2003_p0)  ;;  %1587 = vst [vmem:[%s2707_s7 + $0x58] sm:$0xff] (!%p2003_p0), %v2839_v19 }
 0x1b9   : > { %1585 = vst [vmem:[%s2707_s7 + $0x48] sm:$0xff] (!%p2003_p0), %v2835_v17  ;;  %1586 = vst [vmem:[%s2707_s7 + $0x50] sm:$0xff] (!%p2003_p0), %v2837_v18  ;;  %v2851_v22 = vld [vmem:[#allocation2 + $0x70] sm:$0xff] (!%p2003_p0) }
 0x1ba   : > { %v1502_v26 = vadd.f32 %v1454_v23, %v508_v20  ;;  %v1457_v27 = vadd.f32 %v2218_v24, %v2106_v21  ;;  %v2847_v20 = vld [vmem:[#allocation2 + $0x60] sm:$0xff] (!%p2003_p0)  ;;  %v2849_v21 = vld [vmem:[#allocation2 + $0x68] sm:$0xff] (!%p2003_p0)  ;;  %v1679_v23 = vadd.f32 (!%p2003_p0), %v1678_v14, %v1648_v7  ;;  %v1610_v24 = vadd.f32 (!%p2003_p0), %v1609_v15, %v1547_v8  ;;  %1590 = vst [vmem:[%s2707_s7 + $0x70] sm:$0xff] (!%p2003_p0), %v2851_v22 }
 0x1bb   : > { %v2107_v28 = vpop.f32.mrb[56].mxu0  ;;  %1588 = vst [vmem:[%s2707_s7 + $0x60] sm:$0xff] (!%p2003_p0), %v2847_v20  ;;  %1589 = vst [vmem:[%s2707_s7 + $0x68] sm:$0xff] (!%p2003_p0), %v2849_v21  ;;  %v1658_v2 = vmul.f32 (!%p2003_p0), %v2847_v20, %v2847_v20  ;;  %v1659_v5 = vmul.f32 (!%p2003_p0), %v2849_v21, %v2849_v21  ;;  %v1660_v8 = vmul.f32 (!%p2003_p0), %v2851_v22, %v2851_v22 }
 0x1bc   : > { %1534 = vst [vmem:[#allocation2 + $0xd0] sm:$0xff] %v1502_v26  ;;  %v1503_v29 = vadd.f32 %v1457_v27, %v509_v25  ;;  %v2219_v30 = vpop.f32.mrb[56].mxu1  ;;  %v2108_v31 = vpop.f32.mrb[57].mxu0  ;;  %v1650_v25 = vmul.f32 (!%p2003_p0), %v1548_v9, %v1548_v9  ;;  %v2859_v26 = vld [vmem:[#allocation2 + $0x78] sm:$0xff] (!%p2003_p0)  ;;  %v2861_v27 = vld [vmem:[#allocation2 + $0x80] sm:$0xff] (!%p2003_p0) }
 0x1bd   : > { %v2109_v32 = vadd.f32 %v2108_v31, %v2107_v28  ;;  %v2220_v33 = vpop.f32.mrb[57].mxu1  ;;  %v2110_v34 = vpop.f32.mrb[58].mxu0  ;;  %v2863_v28 = vld [vmem:[#allocation2 + $0x88] sm:$0xff] (!%p2003_p0)  ;;  %1591 = vst [vmem:[%s2707_s7 + $0x78] sm:$0xff] (!%p2003_p0), %v2859_v26  ;;  %1592 = vst [vmem:[%s2707_s7 + $0x80] sm:$0xff] (!%p2003_p0), %v2861_v27  ;;  %v2875_v31 = vld [vmem:[#allocation2 + $0xa0] sm:$0xff] (!%p2003_p0)  ;;  %v1662_v14 = vmul.f32 (!%p2003_p0), %v2861_v27, %v2861_v27 }
 0x1be   : > { %1535 = vst [vmem:[#allocation2 + $0xd8] sm:$0xff] %v1503_v29  ;;  %v2221_v35 = vadd.f32 %v2220_v33, %v2219_v30  ;;  %v2222_v36 = vpop.f32.mrb[58].mxu1  ;;  %v2111_v37 = vpop.f32.mrb[59].mxu0  ;;  %1593 = vst [vmem:[%s2707_s7 + $0x88] sm:$0xff] (!%p2003_p0), %v2863_v28  ;;  %v2871_v29 = vld [vmem:[#allocation2 + $0x90] sm:$0xff] (!%p2003_p0)  ;;  %v2873_v30 = vld [vmem:[#allocation2 + $0x98] sm:$0xff] (!%p2003_p0)  ;;  %v1611_v33 = vadd.f32 (!%p2003_p0), %v1610_v24, %v1548_v9 }
 0x1bf   : > { %v2112_v39 = vadd.f32 %v2111_v37, %v2110_v34  ;;  %v2223_v40 = vpop.f32.mrb[59].mxu1  ;;  %v1651_v34 = vmul.f32 (!%p2003_p0), %v1549_v10, %v1549_v10  ;;  %1594 = vst [vmem:[%s2707_s7 + $0x90] sm:$0xff] (!%p2003_p0), %v2871_v29  ;;  %1595 = vst [vmem:[%s2707_s7 + $0x98] sm:$0xff] (!%p2003_p0), %v2873_v30  ;;  %v2887_v37 = vld [vmem:[#allocation2 + $0xb8] sm:$0xff] (!%p2003_p0) }
 0x1c0   : > { %v1462_v41 = vadd.f32 %v2221_v35, %v2109_v32  ;;  %v2224_v42 = vadd.f32 %v2223_v40, %v2222_v36  ;;  %v1680_v32 = vadd.f32 (!%p2003_p0), %v1679_v23, %v1649_v16  ;;  %1596 = vst [vmem:[%s2707_s7 + $0xa0] sm:$0xff] (!%p2003_p0), %v2875_v31  ;;  %v2883_v35 = vld [vmem:[#allocation2 + $0xa8] sm:$0xff] (!%p2003_p0)  ;;  %v2885_v36 = vld [vmem:[#allocation2 + $0xb0] sm:$0xff] (!%p2003_p0)  ;;  %1599 = vst [vmem:[%s2707_s7 + $0xb8] sm:$0xff] (!%p2003_p0), %v2887_v37 }
 0x1c1   : > { %1597 = vst [vmem:[%s2707_s7 + $0xa8] sm:$0xff] (!%p2003_p0), %v2883_v35  ;;  %1598 = vst [vmem:[%s2707_s7 + $0xb0] sm:$0xff] (!%p2003_p0), %v2885_v36  ;;  %v1665_v23 = vmul.f32 (!%p2003_p0), %v2873_v30, %v2873_v30 }
 0x1c2   : > { %v1504_v44 = vadd.f32 %v1462_v41, %v510_v38  ;;  %v1465_v45 = vadd.f32 %v2224_v42, %v2112_v39  ;;  %v2895_v38 = vld [vmem:[#allocation2 + $0xc0] sm:$0xff] (!%p2003_p0)  ;;  %v2897_v39 = vld [vmem:[#allocation2 + $0xc8] sm:$0xff] (!%p2003_p0)  ;;  %v1681_v41 = vadd.f32 (!%p2003_p0), %v1680_v32, %v1650_v25  ;;  %v1612_v42 = vadd.f32 (!%p2003_p0), %v1611_v33, %v1549_v10 }
 0x1c3   : > { %v2113_v46 = vpop.f32.mrb[60].mxu0  ;;  %v2899_v40 = vld [vmem:[#allocation2 + $0xd0] sm:$0xff] (!%p2003_p0)  ;;  %1600 = vst [vmem:[%s2707_s7 + $0xc0] sm:$0xff] (!%p2003_p0), %v2895_v38  ;;  %1601 = vst [vmem:[%s2707_s7 + $0xc8] sm:$0xff] (!%p2003_p0), %v2897_v39 }
 0x1c4   : > { %1536 = vst [vmem:[#allocation2 + $0xe0] sm:$0xff] %v1504_v44  ;;  %v1505_v47 = vadd.f32 %v1465_v45, %v511_v43  ;;  %v2225_v48 = vpop.f32.mrb[60].mxu1  ;;  %v2114_v49 = vpop.f32.mrb[61].mxu0  ;;  %v1652_v43 = vmul.f32 (!%p2003_p0), %v2823_v11, %v2823_v11  ;;  %1602 = vst [vmem:[%s2707_s7 + $0xd0] sm:$0xff] (!%p2003_p0), %v2899_v40 }
 0x1c5   : > { %v2115_v50 = vadd.f32 %v2114_v49, %v2113_v46  ;;  %v2226_v51 = vpop.f32.mrb[61].mxu1  ;;  %v2116_v52 = vpop.f32.mrb[62].mxu0  ;;  %v2909_v44 = vld [vmem:[#allocation2 + $0xd8] sm:$0xff] (!%p2003_p0)  ;;  %v1682_v49 = vadd.f32 (!%p2003_p0), %v1681_v41, %v1651_v34 }
 0x1c6   : > { %1537 = vst [vmem:[#allocation2 + $0xe8] sm:$0xff] %v1505_v47  ;;  %v2227_v53 = vadd.f32 %v2226_v51, %v2225_v48  ;;  %v2228_v54 = vpop.f32.mrb[62].mxu1  ;;  %v2117_v55 = vpop.f32.mrb[63].mxu0  ;;  %1603 = vst [vmem:[%s2707_s7 + $0xd8] sm:$0xff] (!%p2003_p0), %v2909_v44  ;;  %v1653_v51 = vmul.f32 (!%p2003_p0), %v2825_v12, %v2825_v12 }
 0x1c7   : > { %v2118_v57 = vadd.f32 %v2117_v55, %v2116_v52  ;;  %v2229_v58 = vpop.f32.mrb[63].mxu1  ;;  %v1683_v52 = vadd.f32 (!%p2003_p0), %v1682_v49, %v1652_v43 }
 0x1c8   : > { %v1470_v59 = vadd.f32 %v2227_v53, %v2115_v50  ;;  %v2230_v60 = vadd.f32 %v2229_v58, %v2228_v54  ;;  %1543 = sbr.rel (%p2003_p0) target bundleno = 521 (0x209), region = 59  ;;  %v1613_v50 = vadd.f32 (!%p2003_p0), %v1612_v42, %v2823_v11  ;;  %v1654_v54 = vmul.f32 (!%p2003_p0), %v2827_v13, %v2827_v13 }
 0x1c9   : > { %v1684_v55 = vadd.f32 (!%p2003_p0), %v1683_v52, %v1653_v51  ;;  %v1661_v11 = vmul.f32 (!%p2003_p0), %v2859_v26, %v2859_v26 }
 0x1ca   : > { %v1506_v62 = vadd.f32 %v1470_v59, %v512_v56  ;;  %v1473_v63 = vadd.f32 %v2230_v60, %v2118_v57  ;;  %v1614_v53 = vadd.f32 (!%p2003_p0), %v1613_v50, %v2825_v12  ;;  %v1655_v57 = vmul.f32 (!%p2003_p0), %v2835_v17, %v2835_v17 }
 0x1cb   : > { %v2911_v45 = vld [vmem:[#allocation2 + $0xe0] sm:$0xff] (!%p2003_p0)  ;;  %v1685_v58 = vadd.f32 (!%p2003_p0), %v1684_v55, %v1654_v54  ;;  %v1656_v60 = vmul.f32 (!%p2003_p0), %v2837_v18, %v2837_v18 }
 0x1cc   : > { %1538 = vst [vmem:[#allocation2 + $0xf0] sm:$0xff] %v1506_v62  ;;  %v1507_v0 = vadd.f32 %v1473_v63, %v513_v61  ;;  %1604 = vst [vmem:[%s2707_s7 + $0xe0] sm:$0xff] (!%p2003_p0), %v2911_v45  ;;  %v1615_v56 = vadd.f32 (!%p2003_p0), %v1614_v53, %v2827_v13  ;;  %v1657_v63 = vmul.f32 (!%p2003_p0), %v2839_v19, %v2839_v19 }
 0x1cd   : > { %v2913_v46 = vld [vmem:[#allocation2 + $0xe8] sm:$0xff] (!%p2003_p0)  ;;  %v1686_v61 = vadd.f32 (!%p2003_p0), %v1685_v58, %v1655_v57 }
 0x1ce   : > { %1539 = vst [vmem:[#allocation2 + $0xf8] sm:$0xff] %v1507_v0  ;;  %1605 = vst [vmem:[%s2707_s7 + $0xe8] sm:$0xff] (!%p2003_p0), %v2913_v46  ;;  %v1616_v59 = vadd.f32 (!%p2003_p0), %v1615_v56, %v2835_v17  ;;  %v1663_v17 = vmul.f32 (!%p2003_p0), %v2863_v28, %v2863_v28 }
 0x1cf   : > { %v1687_v0 = vadd.f32 %v1686_v61, %v1656_v60 }
 0x1d0   : > { %v1617_v62 = vadd.f32 %v1616_v59, %v2837_v18 }
 0x1d1   : > { %v1688_v3 = vadd.f32 %v1687_v0, %v1657_v63 }
 0x1d2   : > { %v1618_v1 = vadd.f32 %v1617_v62, %v2839_v19 }
 0x1d3   : > { %v2921_v47 = vld [vmem:[#allocation2 + $0xf0] sm:$0xff]  ;;  %v1689_v6 = vadd.f32 %v1688_v3, %v1658_v2 }
 0x1d4   : > { %1606 = vst [vmem:[%s2707_s7 + $0xf0] sm:$0xff] %v2921_v47  ;;  %v1619_v4 = vadd.f32 %v1618_v1, %v2847_v20  ;;  %v1664_v20 = vmul.f32 %v2871_v29, %v2871_v29 }
 0x1d5   : > { %v2923_v48 = vld [vmem:[#allocation2 + $0xf8] sm:$0xff]  ;;  %v1690_v9 = vadd.f32 %v1689_v6, %v1659_v5 }
 0x1d6   : > { %1607 = vst [vmem:[%s2707_s7 + $0xf8] sm:$0xff] %v2923_v48  ;;  %v1620_v7 = vadd.f32 %v1619_v4, %v2849_v21 }
 0x1d7   : > { %v1691_v12 = vadd.f32 %v1690_v9, %v1660_v8 }
 0x1d8   : > { %v1621_v10 = vadd.f32 %v1620_v7, %v2851_v22 }
 0x1d9   : > { %v1692_v15 = vadd.f32 %v1691_v12, %v1661_v11 }
 0x1da   : > { %v1622_v13 = vadd.f32 %v1621_v10, %v2859_v26  ;;  %v1666_v26 = vmul.f32 %v2875_v31, %v2875_v31 }
 0x1db   : > { %v1693_v18 = vadd.f32 %v1692_v15, %v1662_v14 }
 0x1dc   : > { %v1623_v16 = vadd.f32 %v1622_v13, %v2861_v27 }
 0x1dd   : > { %v1694_v21 = vadd.f32 %v1693_v18, %v1663_v17 }
 0x1de   : > { %v1624_v19 = vadd.f32 %v1623_v16, %v2863_v28  ;;  %v1667_v28 = vmul.f32 %v2883_v35, %v2883_v35 }
 0x1df   : > { %v1695_v24 = vadd.f32 %v1694_v21, %v1664_v20 }
 0x1e0   : > { %v1625_v22 = vadd.f32 %v1624_v19, %v2871_v29  ;;  %v1668_v29 = vmul.f32 %v2885_v36, %v2885_v36 }
 0x1e1   : > { %v1696_v27 = vadd.f32 %v1695_v24, %v1665_v23 }
 0x1e2   : > { %v1626_v25 = vadd.f32 %v1625_v22, %v2873_v30  ;;  %v1669_v30 = vmul.f32 %v2887_v37, %v2887_v37 }
 0x1e3   : > { %v1697_v33 = vadd.f32 %v1696_v27, %v1666_v26 }
 0x1e4   : > { %v1627_v32 = vadd.f32 %v1626_v25, %v2875_v31  ;;  %v1670_v31 = vmul.f32 %v2895_v38, %v2895_v38 }
 0x1e5   : > { %v1698_v41 = vadd.f32 %v1697_v33, %v1667_v28 }
 0x1e6   : > { %v1628_v34 = vadd.f32 %v1627_v32, %v2883_v35  ;;  %v1671_v35 = vmul.f32 %v2897_v39, %v2897_v39 }
 0x1e7   : > { %v1699_v43 = vadd.f32 %v1698_v41, %v1668_v29 }
 0x1e8   : > { %v1629_v42 = vadd.f32 %v1628_v34, %v2885_v36  ;;  %v1672_v36 = vmul.f32 %v2899_v40, %v2899_v40 }
 0x1e9   : > { %v1700_v50 = vadd.f32 %v1699_v43, %v1669_v30 }
 0x1ea   : > { %v1630_v49 = vadd.f32 %v1629_v42, %v2887_v37  ;;  %v1673_v37 = vmul.f32 %v2909_v44, %v2909_v44 }
 0x1eb   : > { %v1701_v52 = vadd.f32 %v1700_v50, %v1670_v31 }
 0x1ec   : > { %v1631_v51 = vadd.f32 %v1630_v49, %v2895_v38  ;;  %v1674_v38 = vmul.f32 %v2911_v45, %v2911_v45 }
 0x1ed   : > { %v1702_v54 = vadd.f32 %v1701_v52, %v1671_v35 }
 0x1ee   : > { %v1632_v53 = vadd.f32 %v1631_v51, %v2897_v39  ;;  %v1675_v39 = vmul.f32 %v2913_v46, %v2913_v46 }
 0x1ef   : > { %v1703_v56 = vadd.f32 %v1702_v54, %v1672_v36 }
 0x1f0   : > { %v1633_v55 = vadd.f32 %v1632_v53, %v2899_v40  ;;  %v1676_v40 = vmul.f32 %v2921_v47, %v2921_v47 }
 0x1f1   : > { %v1704_v58 = vadd.f32 %v1703_v56, %v1673_v37 }
 0x1f2   : > { %v1634_v57 = vadd.f32 %v1633_v55, %v2909_v44  ;;  %v1677_v44 = vmul.f32 %v2923_v48, %v2923_v48 }
 0x1f3   : > { %v1705_v60 = vadd.f32 %v1704_v58, %v1674_v38 }
 0x1f4   : > { %v1635_v59 = vadd.f32 %v1634_v57, %v2911_v45 }
 0x1f5   : > { %v1706_v62 = vadd.f32 %v1705_v60, %v1675_v39 }
 0x1f6   : > { %v1636_v61 = vadd.f32 %v1635_v59, %v2913_v46 }
 0x1f7   : > { %v1707_v0 = vadd.f32 %v1706_v62, %v1676_v40 }
 0x1f8   : > { %v1637_v63 = vadd.f32 %v1636_v61, %v2921_v47 }
 0x1f9   : > { %v1708_v2 = vadd.f32 %v1707_v0, %v1677_v44 }
 0x1fa   : > { %v1638_v45 = vadd.f32 %v1637_v63, %v2923_v48 }
 0x1fb   : > { %v1709_v4 = vrot.slane %v1708_v2, 4 }
 0x1fc   : > { %v1639_v1 = vrot.slane %v1638_v45, 4 }
 0x1fd   : > { %v1710_v46 = vadd.f32 %v1709_v4, %v1708_v2 }
 0x1fe   : > { %v1640_v3 = vadd.f32 %v1639_v1, %v1638_v45 }
 0x1ff   : > { %v1711_v7 = vrot.slane %v1710_v46, 2 }
 0x200   : > { %v1641_v5 = vrot.slane %v1640_v3, 2 }
 0x201   : > { %v1712_v9 = vadd.f32 %v1711_v7, %v1710_v46 }
 0x202   : > { %v1642_v6 = vadd.f32 %v1641_v5, %v1640_v3 }
 0x203   : > { %v1713_v47 = vrot.slane %v1712_v9, 1 }
 0x204   : > { %v1643_v8 = vrot.slane %v1642_v6, 1 }
 0x205   : > { %v1714_v11 = vadd.f32 %v1713_v47, %v1712_v9 }
 0x206   : > { %v1644_v10 = vadd.f32 %v1643_v8, %v1642_v6 }
 0x207   : > { %1715 = vst [vmem:[%s444_s13] sm:$0x1] %v1714_v11 }
 0x208   : > { %1645 = vst [vmem:[%s438_s10] sm:$0x1] %v1644_v10 }
 0x209 PF: > { %s15_s21 = sadd.s32 1, %s2470_s21   ;;  %s3041_s15 = smov %s2450_s16 }
 0x20a   : > { %p12_p1 = scmp.ge.s32.totalorder %s15_s21, 6   ;;  %s3042_s16 = smov %s2549_s28 }
 0x20b   : > { %s3043_s17 = smov %s2462_s19  ;;  %s3044_s18 = smov %s2466_s20 }
 0x20c   : > { %s3045_s19 = smov %s3048_s22  ;;  %s3046_s20 = smov %s3052_s23 }
 0x20d   :  { %14 = sbr.rel (!%p12_p1) target bundleno = 4 (0x4), region = 121 }

// kernel: discriminator_forward.10
= control target key start
LH: loop header
LB: loop body
LE: loop exit
PB: predicated region body
PF: predicated region fallthrough
CT: control target
= control target key end

     0   :  { %s1503_s0 = inlined_call_operand.vmem [shape: f32[512,128], index: 0, kind: input, shape index: {}]   ;;  %s1504_s1 = inlined_call_operand.vmem [shape: f32[1,128], index: 1, kind: input, shape index: {}]   ;;  %s1505_s2 = inlined_call_operand.vmem [shape: f32[1,128], index: 2, kind: input, shape index: {}]   ;;  %s1506_s3 = inlined_call_operand.vmem [shape: bf16[512,128], index: 3, kind: output, shape index: {}]  }
   0x1   :  { %v14_v0 = vld [vmem:[%s1503_s0] sm:$0xff]  ;;  %v15_v1 = vld [vmem:[%s1503_s0 + $0x8] sm:$0xff]  ;;  %v16_v6 = vld [vmem:[%s1503_s0 + $0x10] sm:$0xff] }
   0x2   :  { %v1086_v2 = vld [vmem:[%s1504_s1] ss:$0 sm:$0xff]  ;;  %v17_v7 = vld [vmem:[%s1503_s0 + $0x18] sm:$0xff]  ;;  %v19_v11 = vld [vmem:[%s1503_s0 + $0x28] sm:$0xff] }
   0x3   :  { %v85_v3 = vmul.f32 %v1086_v2, %v14_v0  ;;  %v86_v4 = vmul.f32 %v1086_v2, %v15_v1  ;;  %v1093_v5 = vld [vmem:[%s1505_s2] ss:$0 sm:$0xff]  ;;  %v87_v8 = vmul.f32 %v1086_v2, %v16_v6  ;;  %v88_v9 = vmul.f32 %v1086_v2, %v17_v7  ;;  %v20_v12 = vld [vmem:[%s1503_s0 + $0x30] sm:$0xff]  ;;  %v21_v17 = vld [vmem:[%s1503_s0 + $0x38] sm:$0xff] }
   0x4   :  { %v18_v10 = vld [vmem:[%s1503_s0 + $0x20] sm:$0xff]  ;;  %v90_v16 = vmul.f32 %v1086_v2, %v19_v11  ;;  %v91_v20 = vmul.f32 %v1086_v2, %v20_v12  ;;  %v92_v21 = vmul.f32 %v1086_v2, %v21_v17  ;;  %v23_v35 = vld [vmem:[%s1503_s0 + $0x48] sm:$0xff]  ;;  %v24_v36 = vld [vmem:[%s1503_s0 + $0x50] sm:$0xff] }
   0x5   :  { %v156_v13 = vadd.f32 %v1093_v5, %v85_v3  ;;  %v157_v14 = vadd.f32 %v1093_v5, %v86_v4  ;;  %v89_v15 = vmul.f32 %v1086_v2, %v18_v10  ;;  %v158_v18 = vadd.f32 %v1093_v5, %v87_v8  ;;  %v22_v34 = vld [vmem:[%s1503_s0 + $0x40] sm:$0xff]  ;;  %v25_v42 = vld [vmem:[%s1503_s0 + $0x58] sm:$0xff]  ;;  %v27_v48 = vld [vmem:[%s1503_s0 + $0x68] sm:$0xff] }
   0x6   :  { %v159_v19 = vadd.f32 %v1093_v5, %v88_v9  ;;  %v161_v29 = vadd.f32 %v1093_v5, %v90_v16  ;;  %v162_v33 = vadd.f32 %v1093_v5, %v91_v20  ;;  %v163_v40 = vadd.f32 %v1093_v5, %v92_v21  ;;  %v26_v47 = vld [vmem:[%s1503_s0 + $0x60] sm:$0xff]  ;;  %v28_v60 = vld [vmem:[%s1503_s0 + $0x70] sm:$0xff]  ;;  %v29_v7 = vld [vmem:[%s1503_s0 + $0x78] sm:$0xff] }
   0x7   :  { %vm220_vm0 = vcmp.ge.f32.partialorder %v156_v13, 0.0  ;;  %vm221_vm1 = vcmp.ge.f32.partialorder %v157_v14, 0.0  ;;  %v284_v22 = vmul.f32 0.2, %v156_v13  ;;  %v285_v23 = vmul.f32 0.2, %v157_v14 }
   0x8   :  { %vm222_vm2 = vcmp.ge.f32.partialorder %v158_v18, 0.0  ;;  %vm223_vm3 = vcmp.ge.f32.partialorder %v159_v19, 0.0  ;;  %v286_v24 = vmul.f32 0.2, %v158_v18  ;;  %v287_v25 = vmul.f32 0.2, %v159_v19 }
   0x9   :  { %v348_v26 = vsel %vm220_vm0, %v156_v13, %v284_v22  ;;  %v349_v27 = vsel %vm221_vm1, %v157_v14, %v285_v23  ;;  %v160_v28 = vadd.f32 %v1093_v5, %v89_v15  ;;  %vm225_vm5 = vcmp.ge.f32.partialorder %v161_v29, 0.0  ;;  %v30_v12 = vld [vmem:[%s1503_s0 + $0x80] sm:$0xff]  ;;  %v31_v13 = vld [vmem:[%s1503_s0 + $0x88] sm:$0xff]  ;;  %v32_v20 = vld [vmem:[%s1503_s0 + $0x90] sm:$0xff] }
   0xa   :  { %v869_v30 = vpack.c.bf16 %v349_v27, %v348_v26  ;;  %v350_v31 = vsel %vm222_vm2, %v158_v18, %v286_v24  ;;  %v351_v32 = vsel %vm223_vm3, %v159_v19, %v287_v25  ;;  %v289_v39 = vmul.f32 0.2, %v161_v29  ;;  %v33_v25 = vld [vmem:[%s1503_s0 + $0x98] sm:$0xff] }
   0xb   :  { %v874_v37 = vpack.c.bf16 %v351_v32, %v350_v31  ;;  %vm224_vm4 = vcmp.ge.f32.partialorder %v160_v28, 0.0  ;;  %v288_v38 = vmul.f32 0.2, %v160_v28  ;;  %vm226_vm6 = vcmp.ge.f32.partialorder %v162_v33, 0.0 }
   0xc   :  { %870 = vst [vmem:[%s1506_s3] sm:$0xff] %v869_v30   ;;  %v290_v41 = vmul.f32 0.2, %v162_v33  ;;  %v93_v44 = vmul.f32 %v1086_v2, %v22_v34  ;;  %v94_v45 = vmul.f32 %v1086_v2, %v23_v35  ;;  %v95_v46 = vmul.f32 %v1086_v2, %v24_v36 }
   0xd   :  { %1026 = vst [vmem:[%s1506_s3 + $0x8] sm:$0xff] %v874_v37   ;;  %v352_v43 = vsel %vm224_vm4, %v160_v28, %v288_v38  ;;  %v353_v49 = vsel %vm225_vm5, %v161_v29, %v289_v39  ;;  %vm227_vm7 = vcmp.ge.f32.partialorder %v163_v40, 0.0  ;;  %v291_v50 = vmul.f32 0.2, %v163_v40  ;;  %v35_v37 = vld [vmem:[%s1503_s0 + $0xa8] sm:$0xff] }
   0xe   :  { %v354_v51 = vsel %vm226_vm6, %v162_v33, %v290_v41  ;;  %v879_v52 = vpack.c.bf16 %v353_v49, %v352_v43  ;;  %v164_v53 = vadd.f32 %v1093_v5, %v93_v44  ;;  %v165_v54 = vadd.f32 %v1093_v5, %v94_v45  ;;  %v34_v33 = vld [vmem:[%s1503_s0 + $0xa0] sm:$0xff]  ;;  %v36_v44 = vld [vmem:[%s1503_s0 + $0xb0] sm:$0xff]  ;;  %v37_v49 = vld [vmem:[%s1503_s0 + $0xb8] sm:$0xff] }
   0xf   :  { %v96_v55 = vmul.f32 %v1086_v2, %v25_v42  ;;  %v355_v56 = vsel %vm227_vm7, %v163_v40, %v291_v50  ;;  %v166_v57 = vadd.f32 %v1093_v5, %v95_v46  ;;  %v97_v58 = vmul.f32 %v1086_v2, %v26_v47  ;;  %v38_v50 = vld [vmem:[%s1503_s0 + $0xc0] sm:$0xff] }
  0x10   :  { %v98_v59 = vmul.f32 %v1086_v2, %v27_v48  ;;  %1027 = vst [vmem:[%s1506_s3 + $0x10] sm:$0xff] %v879_v52   ;;  %v884_v61 = vpack.c.bf16 %v355_v56, %v354_v51  ;;  %vm228_vm8 = vcmp.ge.f32.partialorder %v164_v53, 0.0  ;;  %vm229_vm9 = vcmp.ge.f32.partialorder %v165_v54, 0.0  ;;  %v39_v51 = vld [vmem:[%s1503_s0 + $0xc8] sm:$0xff] }
  0x11   :  { %v292_v62 = vmul.f32 0.2, %v164_v53  ;;  %v293_v63 = vmul.f32 0.2, %v165_v54  ;;  %v167_v0 = vadd.f32 %v1093_v5, %v96_v55  ;;  %vm230_vm10 = vcmp.ge.f32.partialorder %v166_v57, 0.0 }
  0x12   :  { %v294_v1 = vmul.f32 0.2, %v166_v57  ;;  %1028 = vst [vmem:[%s1506_s3 + $0x18] sm:$0xff] %v884_v61   ;;  %v168_v4 = vadd.f32 %v1093_v5, %v97_v58  ;;  %v169_v6 = vadd.f32 %v1093_v5, %v98_v59  ;;  %v99_v8 = vmul.f32 %v1086_v2, %v28_v60 }
  0x13   :  { %v356_v3 = vsel %vm228_vm8, %v164_v53, %v292_v62  ;;  %v357_v9 = vsel %vm229_vm9, %v165_v54, %v293_v63  ;;  %vm231_vm11 = vcmp.ge.f32.partialorder %v167_v0, 0.0  ;;  %v295_v10 = vmul.f32 0.2, %v167_v0  ;;  %v40_v62 = vld [vmem:[%s1503_s0 + $0xd0] sm:$0xff] }
  0x14   :  { %v358_v11 = vsel %vm230_vm10, %v166_v57, %v294_v1  ;;  %v889_v14 = vpack.c.bf16 %v357_v9, %v356_v3  ;;  %vm232_vm12 = vcmp.ge.f32.partialorder %v168_v4, 0.0  ;;  %vm233_vm13 = vcmp.ge.f32.partialorder %v169_v6, 0.0 }
  0x15   :  { %v296_v15 = vmul.f32 0.2, %v168_v4  ;;  %v359_v16 = vsel %vm231_vm11, %v167_v0, %v295_v10  ;;  %v297_v17 = vmul.f32 0.2, %v169_v6  ;;  %v100_v18 = vmul.f32 %v1086_v2, %v29_v7  ;;  %v41_v10 = vld [vmem:[%s1503_s0 + $0xd8] sm:$0xff] }
  0x16   :  { %v170_v19 = vadd.f32 %v1093_v5, %v99_v8  ;;  %1029 = vst [vmem:[%s1506_s3 + $0x20] sm:$0xff] %v889_v14   ;;  %v894_v21 = vpack.c.bf16 %v359_v16, %v358_v11  ;;  %v101_v23 = vmul.f32 %v1086_v2, %v30_v12  ;;  %v102_v24 = vmul.f32 %v1086_v2, %v31_v13  ;;  %v42_v14 = vld [vmem:[%s1503_s0 + $0xe0] sm:$0xff] }
  0x17   :  { %v360_v22 = vsel %vm232_vm12, %v168_v4, %v296_v15  ;;  %v361_v26 = vsel %vm233_vm13, %v169_v6, %v297_v17  ;;  %v171_v27 = vadd.f32 %v1093_v5, %v100_v18  ;;  %v103_v32 = vmul.f32 %v1086_v2, %v32_v20  ;;  %v43_v15 = vld [vmem:[%s1503_s0 + $0xe8] sm:$0xff] }
  0x18   :  { %vm234_vm14 = vcmp.ge.f32.partialorder %v170_v19, 0.0  ;;  %v298_v28 = vmul.f32 0.2, %v170_v19  ;;  %1030 = vst [vmem:[%s1506_s3 + $0x28] sm:$0xff] %v894_v21   ;;  %v899_v29 = vpack.c.bf16 %v361_v26, %v360_v22  ;;  %v172_v30 = vadd.f32 %v1093_v5, %v101_v23  ;;  %v44_v26 = vld [vmem:[%s1503_s0 + $0xf0] sm:$0xff] }
  0x19   :  { %v173_v31 = vadd.f32 %v1093_v5, %v102_v24  ;;  %vm235_vm15 = vcmp.ge.f32.partialorder %v171_v27, 0.0  ;;  %v299_v34 = vmul.f32 0.2, %v171_v27  ;;  %v104_v36 = vmul.f32 %v1086_v2, %v33_v25 }
  0x1a   :  { %v362_v35 = vsel %vm234_vm14, %v170_v19, %v298_v28  ;;  %1031 = vst [vmem:[%s1506_s3 + $0x30] sm:$0xff] %v899_v29   ;;  %vm236_vm0 = vcmp.ge.f32.partialorder %v172_v30, 0.0  ;;  %v300_v38 = vmul.f32 0.2, %v172_v30  ;;  %v174_v41 = vadd.f32 %v1093_v5, %v103_v32 }
  0x1b   :  { %vm237_vm1 = vcmp.ge.f32.partialorder %v173_v31, 0.0  ;;  %v301_v39 = vmul.f32 0.2, %v173_v31  ;;  %v363_v40 = vsel %vm235_vm15, %v171_v27, %v299_v34  ;;  %v175_v42 = vadd.f32 %v1093_v5, %v104_v36 }
  0x1c   :  { %v105_v43 = vmul.f32 %v1086_v2, %v34_v33  ;;  %v904_v45 = vpack.c.bf16 %v363_v40, %v362_v35  ;;  %v364_v46 = vsel %vm236_vm0, %v172_v30, %v300_v38  ;;  %v106_v48 = vmul.f32 %v1086_v2, %v35_v37  ;;  %v46_v38 = vld [vmem:[%s1503_s0 + $0x100] sm:$0xff] }
  0x1d   :  { %v365_v47 = vsel %vm237_vm1, %v173_v31, %v301_v39  ;;  %vm238_vm2 = vcmp.ge.f32.partialorder %v174_v41, 0.0  ;;  %vm239_vm3 = vcmp.ge.f32.partialorder %v175_v42, 0.0  ;;  %v302_v53 = vmul.f32 0.2, %v174_v41  ;;  %v45_v31 = vld [vmem:[%s1503_s0 + $0xf8] sm:$0xff] }
  0x1e   :  { %v909_v52 = vpack.c.bf16 %v365_v47, %v364_v46  ;;  %1032 = vst [vmem:[%s1506_s3 + $0x38] sm:$0xff] %v904_v45   ;;  %v303_v54 = vmul.f32 0.2, %v175_v42  ;;  %v176_v55 = vadd.f32 %v1093_v5, %v105_v43  ;;  %v177_v56 = vadd.f32 %v1093_v5, %v106_v48 }
  0x1f   :  { %v107_v57 = vmul.f32 %v1086_v2, %v36_v44  ;;  %v366_v58 = vsel %vm238_vm2, %v174_v41, %v302_v53  ;;  %v108_v59 = vmul.f32 %v1086_v2, %v37_v49  ;;  %v109_v60 = vmul.f32 %v1086_v2, %v38_v50  ;;  %v48_v50 = vld [vmem:[%s1503_s0 + $0x110] sm:$0xff] }
  0x20   :  { %1033 = vst [vmem:[%s1506_s3 + $0x40] sm:$0xff] %v909_v52   ;;  %v110_v61 = vmul.f32 %v1086_v2, %v39_v51  ;;  %v367_v63 = vsel %vm239_vm3, %v175_v42, %v303_v54  ;;  %vm240_vm4 = vcmp.ge.f32.partialorder %v176_v55, 0.0  ;;  %vm241_vm5 = vcmp.ge.f32.partialorder %v177_v56, 0.0  ;;  %v47_v42 = vld [vmem:[%s1503_s0 + $0x108] sm:$0xff]  ;;  %v49_v51 = vld [vmem:[%s1503_s0 + $0x118] sm:$0xff] }
  0x21   :  { %v304_v0 = vmul.f32 0.2, %v176_v55  ;;  %v914_v1 = vpack.c.bf16 %v367_v63, %v366_v58  ;;  %v305_v3 = vmul.f32 0.2, %v177_v56  ;;  %v178_v4 = vadd.f32 %v1093_v5, %v107_v57  ;;  %v51_v63 = vld [vmem:[%s1503_s0 + $0x128] sm:$0xff] }
  0x22   :  { %v179_v6 = vadd.f32 %v1093_v5, %v108_v59  ;;  %v180_v8 = vadd.f32 %v1093_v5, %v109_v60  ;;  %v181_v9 = vadd.f32 %v1093_v5, %v110_v61  ;;  %v111_v11 = vmul.f32 %v1086_v2, %v40_v62 }
  0x23   :  { %v368_v7 = vsel %vm240_vm4, %v176_v55, %v304_v0  ;;  %1034 = vst [vmem:[%s1506_s3 + $0x48] sm:$0xff] %v914_v1   ;;  %v369_v12 = vsel %vm241_vm5, %v177_v56, %v305_v3  ;;  %vm242_vm6 = vcmp.ge.f32.partialorder %v178_v4, 0.0  ;;  %v306_v13 = vmul.f32 0.2, %v178_v4  ;;  %v50_v55 = vld [vmem:[%s1503_s0 + $0x120] sm:$0xff] }
  0x24   :  { %vm243_vm7 = vcmp.ge.f32.partialorder %v179_v6, 0.0  ;;  %v919_v16 = vpack.c.bf16 %v369_v12, %v368_v7  ;;  %v307_v17 = vmul.f32 0.2, %v179_v6  ;;  %vm244_vm8 = vcmp.ge.f32.partialorder %v180_v8, 0.0 }
  0x25   :  { %vm245_vm9 = vcmp.ge.f32.partialorder %v181_v9, 0.0  ;;  %v370_v18 = vsel %vm242_vm6, %v178_v4, %v306_v13  ;;  %v308_v19 = vmul.f32 0.2, %v180_v8  ;;  %v309_v20 = vmul.f32 0.2, %v181_v9  ;;  %v52_v4 = vld [vmem:[%s1503_s0 + $0x130] sm:$0xff] }
  0x26   :  { %v112_v21 = vmul.f32 %v1086_v2, %v41_v10  ;;  %1035 = vst [vmem:[%s1506_s3 + $0x50] sm:$0xff] %v919_v16   ;;  %v371_v22 = vsel %vm243_vm7, %v179_v6, %v307_v17  ;;  %v182_v23 = vadd.f32 %v1093_v5, %v111_v11  ;;  %v113_v24 = vmul.f32 %v1086_v2, %v42_v14  ;;  %v53_v13 = vld [vmem:[%s1503_s0 + $0x138] sm:$0xff] }
  0x27   :  { %v114_v25 = vmul.f32 %v1086_v2, %v43_v15  ;;  %v924_v27 = vpack.c.bf16 %v371_v22, %v370_v18  ;;  %v372_v28 = vsel %vm244_vm8, %v180_v8, %v308_v19  ;;  %v373_v29 = vsel %vm245_vm9, %v181_v9, %v309_v20  ;;  %v54_v20 = vld [vmem:[%s1503_s0 + $0x140] sm:$0xff] }
  0x28   :  { %v183_v30 = vadd.f32 %v1093_v5, %v112_v21  ;;  %v929_v32 = vpack.c.bf16 %v373_v29, %v372_v28  ;;  %vm246_vm10 = vcmp.ge.f32.partialorder %v182_v23, 0.0  ;;  %v310_v33 = vmul.f32 0.2, %v182_v23 }
  0x29   :  { %v184_v34 = vadd.f32 %v1093_v5, %v113_v24  ;;  %1036 = vst [vmem:[%s1506_s3 + $0x58] sm:$0xff] %v924_v27   ;;  %v185_v36 = vadd.f32 %v1093_v5, %v114_v25  ;;  %v115_v37 = vmul.f32 %v1086_v2, %v44_v26  ;;  %v116_v41 = vmul.f32 %v1086_v2, %v45_v31  ;;  %v55_v24 = vld [vmem:[%s1503_s0 + $0x148] sm:$0xff] }
  0x2a   :  { %vm247_vm11 = vcmp.ge.f32.partialorder %v183_v30, 0.0  ;;  %v311_v35 = vmul.f32 0.2, %v183_v30  ;;  %1037 = vst [vmem:[%s1506_s3 + $0x60] sm:$0xff] %v929_v32   ;;  %v374_v39 = vsel %vm246_vm10, %v182_v23, %v310_v33  ;;  %v117_v49 = vmul.f32 %v1086_v2, %v46_v38  ;;  %v56_v32 = vld [vmem:[%s1503_s0 + $0x150] sm:$0xff]  ;;  %v57_v33 = vld [vmem:[%s1503_s0 + $0x158] sm:$0xff] }
  0x2b   :  { %vm248_vm12 = vcmp.ge.f32.partialorder %v184_v34, 0.0  ;;  %v312_v40 = vmul.f32 0.2, %v184_v34  ;;  %vm249_vm13 = vcmp.ge.f32.partialorder %v185_v36, 0.0  ;;  %v313_v44 = vmul.f32 0.2, %v185_v36 }
  0x2c   :  { %v375_v43 = vsel %vm247_vm11, %v183_v30, %v311_v35  ;;  %v186_v45 = vadd.f32 %v1093_v5, %v115_v37  ;;  %v187_v48 = vadd.f32 %v1093_v5, %v116_v41  ;;  %v118_v54 = vmul.f32 %v1086_v2, %v47_v42  ;;  %v58_v37 = vld [vmem:[%s1503_s0 + $0x160] sm:$0xff] }
  0x2d   :  { %v934_v46 = vpack.c.bf16 %v375_v43, %v374_v39  ;;  %v376_v47 = vsel %vm248_vm12, %v184_v34, %v312_v40  ;;  %v377_v52 = vsel %vm249_vm13, %v185_v36, %v313_v44  ;;  %v188_v58 = vadd.f32 %v1093_v5, %v117_v49  ;;  %v60_v49 = vld [vmem:[%s1503_s0 + $0x170] sm:$0xff] }
  0x2e   :  { %vm250_vm14 = vcmp.ge.f32.partialorder %v186_v45, 0.0  ;;  %v314_v53 = vmul.f32 0.2, %v186_v45  ;;  %v939_v56 = vpack.c.bf16 %v377_v52, %v376_v47  ;;  %vm251_vm15 = vcmp.ge.f32.partialorder %v187_v48, 0.0 }
  0x2f   :  { %1038 = vst [vmem:[%s1506_s3 + $0x68] sm:$0xff] %v934_v46   ;;  %v315_v57 = vmul.f32 0.2, %v187_v48  ;;  %v189_v60 = vadd.f32 %v1093_v5, %v118_v54  ;;  %v119_v61 = vmul.f32 %v1086_v2, %v48_v50  ;;  %v120_v62 = vmul.f32 %v1086_v2, %v49_v51 }
  0x30   :  { %v378_v59 = vsel %vm250_vm14, %v186_v45, %v314_v53  ;;  %1039 = vst [vmem:[%s1506_s3 + $0x70] sm:$0xff] %v939_v56   ;;  %vm252_vm0 = vcmp.ge.f32.partialorder %v188_v58, 0.0  ;;  %v316_v1 = vmul.f32 0.2, %v188_v58  ;;  %v121_v3 = vmul.f32 %v1086_v2, %v50_v55  ;;  %v59_v45 = vld [vmem:[%s1503_s0 + $0x168] sm:$0xff] }
  0x31   :  { %v379_v0 = vsel %vm251_vm15, %v187_v48, %v315_v57  ;;  %vm253_vm1 = vcmp.ge.f32.partialorder %v189_v60, 0.0  ;;  %v317_v7 = vmul.f32 0.2, %v189_v60  ;;  %v190_v8 = vadd.f32 %v1093_v5, %v119_v61  ;;  %v61_v57 = vld [vmem:[%s1503_s0 + $0x178] sm:$0xff] }
  0x32   :  { %v944_v6 = vpack.c.bf16 %v379_v0, %v378_v59  ;;  %v380_v9 = vsel %vm252_vm0, %v188_v58, %v316_v1  ;;  %v191_v10 = vadd.f32 %v1093_v5, %v120_v62  ;;  %v122_v11 = vmul.f32 %v1086_v2, %v51_v63  ;;  %v62_v0 = vld [vmem:[%s1503_s0 + $0x180] sm:$0xff] }
  0x33   :  { %v192_v12 = vadd.f32 %v1093_v5, %v121_v3  ;;  %v381_v14 = vsel %vm253_vm1, %v189_v60, %v317_v7  ;;  %vm254_vm2 = vcmp.ge.f32.partialorder %v190_v8, 0.0  ;;  %v318_v15 = vmul.f32 0.2, %v190_v8 }
  0x34   :  { %1040 = vst [vmem:[%s1506_s3 + $0x78] sm:$0xff] %v944_v6   ;;  %v123_v16 = vmul.f32 %v1086_v2, %v52_v4  ;;  %v949_v17 = vpack.c.bf16 %v381_v14, %v380_v9  ;;  %vm255_vm3 = vcmp.ge.f32.partialorder %v191_v10, 0.0  ;;  %v319_v18 = vmul.f32 0.2, %v191_v10  ;;  %v63_v6 = vld [vmem:[%s1503_s0 + $0x188] sm:$0xff]  ;;  %v64_v14 = vld [vmem:[%s1503_s0 + $0x190] sm:$0xff] }
  0x35   :  { %v193_v19 = vadd.f32 %v1093_v5, %v122_v11  ;;  %v382_v21 = vsel %vm254_vm2, %v190_v8, %v318_v15  ;;  %vm256_vm4 = vcmp.ge.f32.partialorder %v192_v12, 0.0  ;;  %v320_v22 = vmul.f32 0.2, %v192_v12  ;;  %v65_v15 = vld [vmem:[%s1503_s0 + $0x198] sm:$0xff] }
  0x36   :  { %v124_v23 = vmul.f32 %v1086_v2, %v53_v13  ;;  %1041 = vst [vmem:[%s1506_s3 + $0x80] sm:$0xff] %v949_v17   ;;  %v383_v25 = vsel %vm255_vm3, %v191_v10, %v319_v18  ;;  %v194_v27 = vadd.f32 %v1093_v5, %v123_v16  ;;  %v125_v31 = vmul.f32 %v1086_v2, %v54_v20 }
  0x37   :  { %vm257_vm5 = vcmp.ge.f32.partialorder %v193_v19, 0.0  ;;  %v321_v26 = vmul.f32 0.2, %v193_v19  ;;  %v954_v28 = vpack.c.bf16 %v383_v25, %v382_v21  ;;  %v384_v29 = vsel %vm256_vm4, %v192_v12, %v320_v22 }
  0x38   :  { %v195_v30 = vadd.f32 %v1093_v5, %v124_v23  ;;  %vm258_vm6 = vcmp.ge.f32.partialorder %v194_v27, 0.0  ;;  %v322_v35 = vmul.f32 0.2, %v194_v27  ;;  %v126_v36 = vmul.f32 %v1086_v2, %v55_v24 }
  0x39   :  { %v385_v34 = vsel %vm257_vm5, %v193_v19, %v321_v26  ;;  %1042 = vst [vmem:[%s1506_s3 + $0x88] sm:$0xff] %v954_v28   ;;  %v196_v40 = vadd.f32 %v1093_v5, %v125_v31  ;;  %v127_v43 = vmul.f32 %v1086_v2, %v56_v32  ;;  %v128_v44 = vmul.f32 %v1086_v2, %v57_v33  ;;  %v66_v19 = vld [vmem:[%s1503_s0 + $0x1a0] sm:$0xff]  ;;  %v68_v31 = vld [vmem:[%s1503_s0 + $0x1b0] sm:$0xff] }
  0x3a   :  { %v959_v38 = vpack.c.bf16 %v385_v34, %v384_v29  ;;  %vm259_vm7 = vcmp.ge.f32.partialorder %v195_v30, 0.0  ;;  %v323_v39 = vmul.f32 0.2, %v195_v30  ;;  %v386_v41 = vsel %vm258_vm6, %v194_v27, %v322_v35  ;;  %v67_v27 = vld [vmem:[%s1503_s0 + $0x1a8] sm:$0xff] }
  0x3b   :  { %v197_v42 = vadd.f32 %v1093_v5, %v126_v36  ;;  %vm260_vm8 = vcmp.ge.f32.partialorder %v196_v40, 0.0  ;;  %v324_v47 = vmul.f32 0.2, %v196_v40  ;;  %v129_v48 = vmul.f32 %v1086_v2, %v58_v37 }
  0x3c   :  { %1043 = vst [vmem:[%s1506_s3 + $0x90] sm:$0xff] %v959_v38   ;;  %v387_v46 = vsel %vm259_vm7, %v195_v30, %v323_v39  ;;  %v198_v52 = vadd.f32 %v1093_v5, %v127_v43  ;;  %v199_v54 = vadd.f32 %v1093_v5, %v128_v44  ;;  %v130_v55 = vmul.f32 %v1086_v2, %v59_v45  ;;  %v69_v39 = vld [vmem:[%s1503_s0 + $0x1b8] sm:$0xff] }
  0x3d   :  { %v964_v50 = vpack.c.bf16 %v387_v46, %v386_v41  ;;  %vm261_vm9 = vcmp.ge.f32.partialorder %v197_v42, 0.0  ;;  %v325_v51 = vmul.f32 0.2, %v197_v42  ;;  %v388_v53 = vsel %vm260_vm8, %v196_v40, %v324_v47  ;;  %v70_v46 = vld [vmem:[%s1503_s0 + $0x1c0] sm:$0xff] }
  0x3e   :  { %v200_v56 = vadd.f32 %v1093_v5, %v129_v48  ;;  %vm262_vm10 = vcmp.ge.f32.partialorder %v198_v52, 0.0  ;;  %v326_v59 = vmul.f32 0.2, %v198_v52  ;;  %v131_v60 = vmul.f32 %v1086_v2, %v60_v49 }
  0x3f   :  { %1044 = vst [vmem:[%s1506_s3 + $0x98] sm:$0xff] %v964_v50   ;;  %v389_v58 = vsel %vm261_vm9, %v197_v42, %v325_v51  ;;  %vm263_vm11 = vcmp.ge.f32.partialorder %v199_v54, 0.0  ;;  %v327_v62 = vmul.f32 0.2, %v199_v54  ;;  %v201_v63 = vadd.f32 %v1093_v5, %v130_v55  ;;  %v71_v50 = vld [vmem:[%s1503_s0 + $0x1c8] sm:$0xff] }
  0x40   :  { %v969_v61 = vpack.c.bf16 %v389_v58, %v388_v53  ;;  %v390_v1 = vsel %vm262_vm10, %v198_v52, %v326_v59  ;;  %vm264_vm12 = vcmp.ge.f32.partialorder %v200_v56, 0.0  ;;  %v328_v3 = vmul.f32 0.2, %v200_v56  ;;  %v72_v58 = vld [vmem:[%s1503_s0 + $0x1d0] sm:$0xff]  ;;  %v73_v59 = vld [vmem:[%s1503_s0 + $0x1d8] sm:$0xff] }
  0x41   :  { %v132_v4 = vmul.f32 %v1086_v2, %v61_v57  ;;  %v391_v7 = vsel %vm263_vm11, %v199_v54, %v327_v62  ;;  %vm265_vm13 = vcmp.ge.f32.partialorder %v201_v63, 0.0  ;;  %v329_v8 = vmul.f32 0.2, %v201_v63 }
  0x42   :  { %1045 = vst [vmem:[%s1506_s3 + $0xa0] sm:$0xff] %v969_v61   ;;  %v202_v9 = vadd.f32 %v1093_v5, %v131_v60  ;;  %v974_v10 = vpack.c.bf16 %v391_v7, %v390_v1  ;;  %v392_v11 = vsel %vm264_vm12, %v200_v56, %v328_v3  ;;  %v133_v13 = vmul.f32 %v1086_v2, %v62_v0 }
  0x43   :  { %v203_v12 = vadd.f32 %v1093_v5, %v132_v4  ;;  %v393_v16 = vsel %vm265_vm13, %v201_v63, %v329_v8  ;;  %v134_v18 = vmul.f32 %v1086_v2, %v63_v6  ;;  %v135_v25 = vmul.f32 %v1086_v2, %v64_v14  ;;  %v74_v63 = vld [vmem:[%s1503_s0 + $0x1e0] sm:$0xff] }
  0x44   :  { %vm266_vm14 = vcmp.ge.f32.partialorder %v202_v9, 0.0  ;;  %v330_v17 = vmul.f32 0.2, %v202_v9  ;;  %1046 = vst [vmem:[%s1506_s3 + $0xa8] sm:$0xff] %v974_v10   ;;  %v979_v20 = vpack.c.bf16 %v393_v16, %v392_v11  ;;  %v204_v22 = vadd.f32 %v1093_v5, %v133_v13  ;;  %v76_v13 = vld [vmem:[%s1503_s0 + $0x1f0] sm:$0xff] }
  0x45   :  { %vm267_vm15 = vcmp.ge.f32.partialorder %v203_v12, 0.0  ;;  %v331_v21 = vmul.f32 0.2, %v203_v12  ;;  %v205_v24 = vadd.f32 %v1093_v5, %v134_v18  ;;  %v136_v26 = vmul.f32 %v1086_v2, %v65_v15 }
  0x46   :  { %v394_v23 = vsel %vm266_vm14, %v202_v9, %v330_v17  ;;  %1047 = vst [vmem:[%s1506_s3 + $0xb0] sm:$0xff] %v979_v20   ;;  %vm268_vm0 = vcmp.ge.f32.partialorder %v204_v22, 0.0  ;;  %v332_v29 = vmul.f32 0.2, %v204_v22  ;;  %v137_v30 = vmul.f32 %v1086_v2, %v66_v19  ;;  %v75_v9 = vld [vmem:[%s1503_s0 + $0x1e8] sm:$0xff] }
  0x47   :  { %v395_v28 = vsel %vm267_vm15, %v203_v12, %v331_v21  ;;  %vm269_vm1 = vcmp.ge.f32.partialorder %v205_v24, 0.0  ;;  %v333_v33 = vmul.f32 0.2, %v205_v24  ;;  %v206_v34 = vadd.f32 %v1093_v5, %v135_v25  ;;  %v77_v21 = vld [vmem:[%s1503_s0 + $0x1f8] sm:$0xff] }
  0x48   :  { %v984_v32 = vpack.c.bf16 %v395_v28, %v394_v23  ;;  %v396_v35 = vsel %vm268_vm0, %v204_v22, %v332_v29  ;;  %v207_v36 = vadd.f32 %v1093_v5, %v136_v26  ;;  %v138_v37 = vmul.f32 %v1086_v2, %v67_v27 }
  0x49   :  { %v208_v38 = vadd.f32 %v1093_v5, %v137_v30  ;;  %v397_v40 = vsel %vm269_vm1, %v205_v24, %v333_v33  ;;  %vm270_vm2 = vcmp.ge.f32.partialorder %v206_v34, 0.0  ;;  %v334_v41 = vmul.f32 0.2, %v206_v34 }
  0x4a   :  { %1048 = vst [vmem:[%s1506_s3 + $0xb8] sm:$0xff] %v984_v32   ;;  %v139_v42 = vmul.f32 %v1086_v2, %v68_v31  ;;  %v989_v43 = vpack.c.bf16 %v397_v40, %v396_v35  ;;  %vm271_vm3 = vcmp.ge.f32.partialorder %v207_v36, 0.0  ;;  %v335_v44 = vmul.f32 0.2, %v207_v36 }
  0x4b   :  { %v209_v45 = vadd.f32 %v1093_v5, %v138_v37  ;;  %v398_v47 = vsel %vm270_vm2, %v206_v34, %v334_v41  ;;  %vm272_vm4 = vcmp.ge.f32.partialorder %v208_v38, 0.0  ;;  %v336_v48 = vmul.f32 0.2, %v208_v38 }
  0x4c   :  { %v140_v49 = vmul.f32 %v1086_v2, %v69_v39  ;;  %1049 = vst [vmem:[%s1506_s3 + $0xc0] sm:$0xff] %v989_v43   ;;  %v399_v51 = vsel %vm271_vm3, %v207_v36, %v335_v44  ;;  %v210_v53 = vadd.f32 %v1093_v5, %v139_v42  ;;  %v141_v57 = vmul.f32 %v1086_v2, %v70_v46 }
  0x4d   :  { %vm273_vm5 = vcmp.ge.f32.partialorder %v209_v45, 0.0  ;;  %v337_v52 = vmul.f32 0.2, %v209_v45  ;;  %v994_v54 = vpack.c.bf16 %v399_v51, %v398_v47  ;;  %v400_v55 = vsel %vm272_vm4, %v208_v38, %v336_v48 }
  0x4e   :  { %v211_v56 = vadd.f32 %v1093_v5, %v140_v49  ;;  %vm274_vm6 = vcmp.ge.f32.partialorder %v210_v53, 0.0  ;;  %v338_v61 = vmul.f32 0.2, %v210_v53  ;;  %v142_v62 = vmul.f32 %v1086_v2, %v71_v50 }
  0x4f   :  { %v401_v60 = vsel %vm273_vm5, %v209_v45, %v337_v52  ;;  %1050 = vst [vmem:[%s1506_s3 + $0xc8] sm:$0xff] %v994_v54   ;;  %v212_v3 = vadd.f32 %v1093_v5, %v141_v57  ;;  %v143_v7 = vmul.f32 %v1086_v2, %v72_v58  ;;  %v144_v8 = vmul.f32 %v1086_v2, %v73_v59 }
  0x50   :  { %v999_v0 = vpack.c.bf16 %v401_v60, %v400_v55  ;;  %vm275_vm7 = vcmp.ge.f32.partialorder %v211_v56, 0.0  ;;  %v339_v1 = vmul.f32 0.2, %v211_v56  ;;  %v402_v4 = vsel %vm274_vm6, %v210_v53, %v338_v61 }
  0x51   :  { %v213_v6 = vadd.f32 %v1093_v5, %v142_v62  ;;  %vm276_vm8 = vcmp.ge.f32.partialorder %v212_v3, 0.0  ;;  %v340_v11 = vmul.f32 0.2, %v212_v3  ;;  %v145_v12 = vmul.f32 %v1086_v2, %v74_v63 }
  0x52   :  { %1051 = vst [vmem:[%s1506_s3 + $0xd0] sm:$0xff] %v999_v0   ;;  %v403_v10 = vsel %vm275_vm7, %v211_v56, %v339_v1  ;;  %v214_v16 = vadd.f32 %v1093_v5, %v143_v7  ;;  %v215_v18 = vadd.f32 %v1093_v5, %v144_v8  ;;  %v146_v19 = vmul.f32 %v1086_v2, %v75_v9 }
  0x53   :  { %v1004_v14 = vpack.c.bf16 %v403_v10, %v402_v4  ;;  %vm277_vm9 = vcmp.ge.f32.partialorder %v213_v6, 0.0  ;;  %v341_v15 = vmul.f32 0.2, %v213_v6  ;;  %v404_v17 = vsel %vm276_vm8, %v212_v3, %v340_v11 }
  0x54   :  { %v216_v20 = vadd.f32 %v1093_v5, %v145_v12  ;;  %vm278_vm10 = vcmp.ge.f32.partialorder %v214_v16, 0.0  ;;  %v342_v23 = vmul.f32 0.2, %v214_v16  ;;  %v147_v24 = vmul.f32 %v1086_v2, %v76_v13 }
  0x55   :  { %1052 = vst [vmem:[%s1506_s3 + $0xd8] sm:$0xff] %v1004_v14   ;;  %v405_v22 = vsel %vm277_vm9, %v213_v6, %v341_v15  ;;  %vm279_vm11 = vcmp.ge.f32.partialorder %v215_v18, 0.0  ;;  %v343_v26 = vmul.f32 0.2, %v215_v18  ;;  %v217_v27 = vadd.f32 %v1093_v5, %v146_v19 }
  0x56   :  { %v1009_v25 = vpack.c.bf16 %v405_v22, %v404_v17  ;;  %v406_v28 = vsel %vm278_vm10, %v214_v16, %v342_v23  ;;  %vm280_vm12 = vcmp.ge.f32.partialorder %v216_v20, 0.0  ;;  %v344_v29 = vmul.f32 0.2, %v216_v20 }
  0x57   :  { %v148_v30 = vmul.f32 %v1086_v2, %v77_v21  ;;  %v407_v31 = vsel %vm279_vm11, %v215_v18, %v343_v26  ;;  %vm281_vm13 = vcmp.ge.f32.partialorder %v217_v27, 0.0  ;;  %v345_v32 = vmul.f32 0.2, %v217_v27 }
  0x58   :  { %1053 = vst [vmem:[%s1506_s3 + $0xe0] sm:$0xff] %v1009_v25   ;;  %v218_v33 = vadd.f32 %v1093_v5, %v147_v24  ;;  %v1014_v34 = vpack.c.bf16 %v407_v31, %v406_v28  ;;  %v408_v35 = vsel %vm280_vm12, %v216_v20, %v344_v29 }
  0x59   :  { %v219_v36 = vadd.f32 %v1093_v5, %v148_v30  ;;  %v409_v37 = vsel %vm281_vm13, %v217_v27, %v345_v32 }
  0x5a   :  { %vm282_vm14 = vcmp.ge.f32.partialorder %v218_v33, 0.0  ;;  %v346_v38 = vmul.f32 0.2, %v218_v33  ;;  %1054 = vst [vmem:[%s1506_s3 + $0xe8] sm:$0xff] %v1014_v34   ;;  %v1019_v2 = vpack.c.bf16 %v409_v37, %v408_v35 }
  0x5b   :  { %vm283_vm15 = vcmp.ge.f32.partialorder %v219_v36, 0.0  ;;  %v347_v39 = vmul.f32 0.2, %v219_v36 }
  0x5c   :  { %v410_v40 = vsel %vm282_vm14, %v218_v33, %v346_v38  ;;  %1055 = vst [vmem:[%s1506_s3 + $0xf0] sm:$0xff] %v1019_v2  }
  0x5d   :  { %v411_v41 = vsel %vm283_vm15, %v219_v36, %v347_v39 }
  0x5e   :  { %v1024_v42 = vpack.c.bf16 %v411_v41, %v410_v40 }
  0x60   :  { %1056 = vst [vmem:[%s1506_s3 + $0xf8] sm:$0xff] %v1024_v42  }

// kernel: discriminator_forward.11
= control target key start
LH: loop header
LB: loop body
LE: loop exit
PB: predicated region body
PF: predicated region fallthrough
CT: control target
= control target key end

     0   :  { %s2161_s15 = smov 0   ;;  %s2163_s16 = smov 0   ;;  %s2534_s0 = inlined_call_operand.vmem [shape: bf16[128,2048], index: 0, kind: input, shape index: {}]   ;;  %s2535_s1 = inlined_call_operand.vmem [shape: bf16[2048,256], index: 1, kind: input, shape index: {}]   ;;  %s2536_s2 = inlined_call_operand.vmem [shape: f32[128,256], index: 2, kind: output, shape index: {0}]   ;;  %s2537_s3 = inlined_call_operand.vmem [shape: f32[1,1,256], index: 3, kind: output, shape index: {1}]   ;;  %s2538_s4 = inlined_call_operand.vmem [shape: f32[1,1,256], index: 4, kind: output, shape index: {2}]  }
   0x1   :  { %s2165_s17 = smov 0   ;;  %s2167_s18 = smov 0  }
   0x2   :  { %s2169_s19 = smov 0  }
   0x3 LB: > { %s27_s20 = sadd.s32 1, %s2128_s18  ;;  %p50_p1 = scmp.ne.s32.totalorder %s2120_s16, %s2116_s15  ;;  %s2132_s19 = sphi %s2169_s19, %s15_s19   ;;  %s2128_s18 = sphi %s2167_s18, %s2542_s18   ;;  %s2124_s17 = sphi %s2165_s17, %s2541_s17   ;;  %s2120_s16 = sphi %s2163_s16, %s2540_s16   ;;  %s2116_s15 = sphi %s2161_s15, %s2539_s15  }
   0x4   : > { %p28_p0 = scmp.ge.s32.totalorder %s27_s20, 4  ;;  %p51_p2 = scmp.eq.s32.totalorder %s2132_s19, 0 }
   0x5   : > { %s43_s22 = sadd.s32 1, %s2120_s16  ;;  %p1759_p5 = scmp.ge.s32.totalorder %s2132_s19, 4 }
   0x6   : > { %s2544_s20 = smov (%p28_p0, %s27_s20), 0  ;;  %p52_p3 = por %p51_p2, %p50_p1 }
   0x7   : > { %s39_s21 = ssub.s32 %s2128_s18, %s2544_s20  ;;  %188 = sbr.rel (%p1759_p5) target bundleno = 34 (0x22), region = 16 }
   0x8   : > { %p41_p4 = scmp.eq.s32.totalorder %s39_s21, 0 }
   0xa   : > { %s2196_s23 = scalar_select %p41_p4, %s2120_s16, %s43_s22  }
   0xe   : > { %191 = sbr.rel (!%p52_p3) target bundleno = 34 (0x22), region = 20  ;;  %s193_s24 = sand.u32 (%p52_p3), 1, %s2120_s16  }
   0xf   : > { %s1874_s25 = sshll.u32 (%p52_p3), %s2128_s18, 4  ;;  %s1760_s26 = sshll.u32 (%p52_p3), %s193_s24, 8 }
  0x10   : > { %s2204_s29 = scalar_lea.vmem (%p52_p3), %s2534_s0, %s1874_s25  ;;  %s2209_s30 = scalar_lea.vmem (%p52_p3), [#allocation3], %s1760_s26 }
  0x11   : > { %v214_v0 = vld [vmem:[%s2204_s29] sm:$0xff] (%p52_p3)  ;;  %v216_v1 = vld [vmem:[%s2204_s29 + $0x8] sm:$0xff] (%p52_p3) }
  0x12   : > { %v218_v2 = vld [vmem:[%s2204_s29 + $0x40] sm:$0xff] (%p52_p3)  ;;  %215 = vst [vmem:[%s2209_s30] sm:$0xff] (%p52_p3), %v214_v0  ;;  %217 = vst [vmem:[%s2209_s30 + $0x8] sm:$0xff] (%p52_p3), %v216_v1  ;;  %v220_v3 = vld [vmem:[%s2204_s29 + $0x48] sm:$0xff] (%p52_p3) }
  0x13   : > { %219 = vst [vmem:[%s2209_s30 + $0x10] sm:$0xff] (%p52_p3), %v218_v2  ;;  %v222_v4 = vld [vmem:[%s2204_s29 + $0x80] sm:$0xff] (%p52_p3)  ;;  %v224_v5 = vld [vmem:[%s2204_s29 + $0x88] sm:$0xff] (%p52_p3)  ;;  %221 = vst [vmem:[%s2209_s30 + $0x18] sm:$0xff] (%p52_p3), %v220_v3 }
  0x14   : > { %223 = vst [vmem:[%s2209_s30 + $0x20] sm:$0xff] (%p52_p3), %v222_v4  ;;  %225 = vst [vmem:[%s2209_s30 + $0x28] sm:$0xff] (%p52_p3), %v224_v5  ;;  %v226_v6 = vld [vmem:[%s2204_s29 + $0xc0] sm:$0xff] (%p52_p3)  ;;  %v228_v7 = vld [vmem:[%s2204_s29 + $0xc8] sm:$0xff] (%p52_p3) }
  0x15   : > { %v230_v8 = vld [vmem:[%s2204_s29 + $0x100] sm:$0xff]  ;;  %227 = vst [vmem:[%s2209_s30 + $0x30] sm:$0xff] %v226_v6  ;;  %229 = vst [vmem:[%s2209_s30 + $0x38] sm:$0xff] %v228_v7  ;;  %v232_v9 = vld [vmem:[%s2204_s29 + $0x108] sm:$0xff] }
  0x16   : > { %231 = vst [vmem:[%s2209_s30 + $0x40] sm:$0xff] %v230_v8  ;;  %v234_v10 = vld [vmem:[%s2204_s29 + $0x140] sm:$0xff]  ;;  %v236_v11 = vld [vmem:[%s2204_s29 + $0x148] sm:$0xff]  ;;  %233 = vst [vmem:[%s2209_s30 + $0x48] sm:$0xff] %v232_v9 }
  0x17   : > { %235 = vst [vmem:[%s2209_s30 + $0x50] sm:$0xff] %v234_v10  ;;  %237 = vst [vmem:[%s2209_s30 + $0x58] sm:$0xff] %v236_v11  ;;  %v238_v12 = vld [vmem:[%s2204_s29 + $0x180] sm:$0xff]  ;;  %v240_v13 = vld [vmem:[%s2204_s29 + $0x188] sm:$0xff] }
  0x18   : > { %v242_v14 = vld [vmem:[%s2204_s29 + $0x1c0] sm:$0xff]  ;;  %239 = vst [vmem:[%s2209_s30 + $0x60] sm:$0xff] %v238_v12  ;;  %241 = vst [vmem:[%s2209_s30 + $0x68] sm:$0xff] %v240_v13  ;;  %v244_v15 = vld [vmem:[%s2204_s29 + $0x1c8] sm:$0xff] }
  0x19   : > { %243 = vst [vmem:[%s2209_s30 + $0x70] sm:$0xff] %v242_v14  ;;  %v246_v16 = vld [vmem:[%s2204_s29 + $0x200] sm:$0xff]  ;;  %v248_v17 = vld [vmem:[%s2204_s29 + $0x208] sm:$0xff]  ;;  %245 = vst [vmem:[%s2209_s30 + $0x78] sm:$0xff] %v244_v15 }
  0x1a   : > { %247 = vst [vmem:[%s2209_s30 + $0x80] sm:$0xff] %v246_v16  ;;  %249 = vst [vmem:[%s2209_s30 + $0x88] sm:$0xff] %v248_v17  ;;  %v250_v18 = vld [vmem:[%s2204_s29 + $0x240] sm:$0xff]  ;;  %v252_v19 = vld [vmem:[%s2204_s29 + $0x248] sm:$0xff] }
  0x1b   : > { %v254_v20 = vld [vmem:[%s2204_s29 + $0x280] sm:$0xff]  ;;  %251 = vst [vmem:[%s2209_s30 + $0x90] sm:$0xff] %v250_v18  ;;  %253 = vst [vmem:[%s2209_s30 + $0x98] sm:$0xff] %v252_v19  ;;  %v256_v21 = vld [vmem:[%s2204_s29 + $0x288] sm:$0xff] }
  0x1c   : > { %255 = vst [vmem:[%s2209_s30 + $0xa0] sm:$0xff] %v254_v20  ;;  %v258_v22 = vld [vmem:[%s2204_s29 + $0x2c0] sm:$0xff]  ;;  %v260_v23 = vld [vmem:[%s2204_s29 + $0x2c8] sm:$0xff]  ;;  %257 = vst [vmem:[%s2209_s30 + $0xa8] sm:$0xff] %v256_v21 }
  0x1d   : > { %259 = vst [vmem:[%s2209_s30 + $0xb0] sm:$0xff] %v258_v22  ;;  %261 = vst [vmem:[%s2209_s30 + $0xb8] sm:$0xff] %v260_v23  ;;  %v262_v24 = vld [vmem:[%s2204_s29 + $0x300] sm:$0xff]  ;;  %v264_v25 = vld [vmem:[%s2204_s29 + $0x308] sm:$0xff] }
  0x1e   : > { %v266_v26 = vld [vmem:[%s2204_s29 + $0x340] sm:$0xff]  ;;  %263 = vst [vmem:[%s2209_s30 + $0xc0] sm:$0xff] %v262_v24  ;;  %265 = vst [vmem:[%s2209_s30 + $0xc8] sm:$0xff] %v264_v25  ;;  %v268_v27 = vld [vmem:[%s2204_s29 + $0x348] sm:$0xff] }
  0x1f   : > { %267 = vst [vmem:[%s2209_s30 + $0xd0] sm:$0xff] %v266_v26  ;;  %v270_v28 = vld [vmem:[%s2204_s29 + $0x380] sm:$0xff]  ;;  %v272_v29 = vld [vmem:[%s2204_s29 + $0x388] sm:$0xff]  ;;  %269 = vst [vmem:[%s2209_s30 + $0xd8] sm:$0xff] %v268_v27 }
  0x20   : > { %271 = vst [vmem:[%s2209_s30 + $0xe0] sm:$0xff] %v270_v28  ;;  %273 = vst [vmem:[%s2209_s30 + $0xe8] sm:$0xff] %v272_v29  ;;  %v274_v30 = vld [vmem:[%s2204_s29 + $0x3c0] sm:$0xff]  ;;  %v276_v31 = vld [vmem:[%s2204_s29 + $0x3c8] sm:$0xff] }
  0x21   : > { %275 = vst [vmem:[%s2209_s30 + $0xf0] sm:$0xff] %v274_v30  ;;  %277 = vst [vmem:[%s2209_s30 + $0xf8] sm:$0xff] %v276_v31 }
  0x22 PF: > { %p1763_p6 = scmp.ge.s32.totalorder %s2132_s19, 1  ;;  %p297_p7 = scmp.lt.s32.totalorder %s2132_s19, 5 }
  0x24   : > { %p298_p8 = pnand %p1763_p6, %p297_p7 }
  0x25   : > { %s304_s5 = sand.u32 (!%p298_p8), 1, %s2116_s15   ;;  %s1765_s6 = sshll.u32 (!%p298_p8), %s2124_s17, 6 }
  0x26   : > { %301 = sbr.rel (%p298_p8) target bundleno = 445 (0x1bd), region = 47  ;;  %s1764_s7 = sshll.u32 (!%p298_p8), %s304_s5, 8 }
  0x27   : > { %p364_p9 = scmp.lt.s32.totalorder (!%p298_p8), %s1765_s6, 255  ;;  %s2281_s12 = scalar_lea.vmem (!%p298_p8), [#allocation3], %s1764_s7 }
  0x28   : > { %p1768_p10 = scmp.ne.s32.totalorder (!%p298_p8), %s2124_s17, 0 }
  0x2d   : > { %s2546_s6 = smov (!%p364_p9, %s1765_s6), 255  ;;  %407 = sbr.rel (%p1768_p10) target bundleno = 63 (0x3f), region = 55 }
  0x2e   : > { %s1875_s8 = sshll.u32 %s2546_s6, 3  ;;  %v2134_v32 = vmov (!%p1768_p10), 0.0  }
  0x2f   : > { %s2279_s11 = scalar_lea.vmem %s2535_s1, %s1875_s8  ;;  %408 = vst [vmem:[#allocation2] sm:$0xff] (!%p1768_p10), %v2134_v32  ;;  %409 = vst [vmem:[#allocation2 + $0x8] sm:$0xff] (!%p1768_p10), %v2134_v32 }
  0x30   : > { %410 = vst [vmem:[#allocation2 + $0x10] sm:$0xff] (!%p1768_p10), %v2134_v32  ;;  %411 = vst [vmem:[#allocation2 + $0x18] sm:$0xff] (!%p1768_p10), %v2134_v32 }
  0x31   : > { %412 = vst [vmem:[#allocation2 + $0x20] sm:$0xff] (!%p1768_p10), %v2134_v32  ;;  %413 = vst [vmem:[#allocation2 + $0x28] sm:$0xff] (!%p1768_p10), %v2134_v32 }
  0x32   : > { %414 = vst [vmem:[#allocation2 + $0x30] sm:$0xff] (!%p1768_p10), %v2134_v32  ;;  %415 = vst [vmem:[#allocation2 + $0x38] sm:$0xff] (!%p1768_p10), %v2134_v32 }
  0x33   : > { %416 = vst [vmem:[#allocation2 + $0x40] sm:$0xff] (!%p1768_p10), %v2134_v32  ;;  %417 = vst [vmem:[#allocation2 + $0x48] sm:$0xff] (!%p1768_p10), %v2134_v32 }
  0x34   : > { %418 = vst [vmem:[#allocation2 + $0x50] sm:$0xff] %v2134_v32  ;;  %419 = vst [vmem:[#allocation2 + $0x58] sm:$0xff] %v2134_v32 }
  0x35   : > { %420 = vst [vmem:[#allocation2 + $0x60] sm:$0xff] %v2134_v32  ;;  %421 = vst [vmem:[#allocation2 + $0x68] sm:$0xff] %v2134_v32 }
  0x36   : > { %422 = vst [vmem:[#allocation2 + $0x70] sm:$0xff] %v2134_v32  ;;  %423 = vst [vmem:[#allocation2 + $0x78] sm:$0xff] %v2134_v32 }
  0x37   : > { %424 = vst [vmem:[#allocation2 + $0x80] sm:$0xff] %v2134_v32  ;;  %425 = vst [vmem:[#allocation2 + $0x88] sm:$0xff] %v2134_v32 }
  0x38   : > { %426 = vst [vmem:[#allocation2 + $0x90] sm:$0xff] %v2134_v32  ;;  %427 = vst [vmem:[#allocation2 + $0x98] sm:$0xff] %v2134_v32 }
  0x39   : > { %428 = vst [vmem:[#allocation2 + $0xa0] sm:$0xff] %v2134_v32  ;;  %429 = vst [vmem:[#allocation2 + $0xa8] sm:$0xff] %v2134_v32 }
  0x3a   : > { %430 = vst [vmem:[#allocation2 + $0xb0] sm:$0xff] %v2134_v32  ;;  %431 = vst [vmem:[#allocation2 + $0xb8] sm:$0xff] %v2134_v32 }
  0x3b   : > { %432 = vst [vmem:[#allocation2 + $0xc0] sm:$0xff] %v2134_v32  ;;  %433 = vst [vmem:[#allocation2 + $0xc8] sm:$0xff] %v2134_v32 }
  0x3c   : > { %434 = vst [vmem:[#allocation2 + $0xd0] sm:$0xff] %v2134_v32  ;;  %435 = vst [vmem:[#allocation2 + $0xd8] sm:$0xff] %v2134_v32 }
  0x3d   : > { %436 = vst [vmem:[#allocation2 + $0xe0] sm:$0xff] %v2134_v32  ;;  %437 = vst [vmem:[#allocation2 + $0xe8] sm:$0xff] %v2134_v32 }
  0x3e   : > { %438 = vst [vmem:[#allocation2 + $0xf0] sm:$0xff] %v2134_v32  ;;  %439 = vst [vmem:[#allocation2 + $0xf8] sm:$0xff] %v2134_v32 }
  0x3f PF: > { %v1950_v33 = vld [vmem:[%s2279_s11 + $0x4] ss:$8 sps:$4 sm:$0xff]   ;;  %v1954_v35 = vld [vmem:[%s2279_s11] ss:$8 sps:$4 sm:$0xff]   ;;  %v1956_v37 = vld [vmem:[%s2279_s11 + $0x14] ss:$8 sps:$4 sm:$0xff]  }
  0x40   : > { %v1952_v34 = vld [vmem:[%s2279_s11 + $0x104] ss:$8 sps:$4 sm:$0xff]   ;;  %1048 = vmatprep.subr.bf16.mxu1 %v1950_v33  ;;  %v1955_v36 = vld [vmem:[%s2279_s11 + $0x100] ss:$8 sps:$4 sm:$0xff]   ;;  %v1958_v38 = vld [vmem:[%s2279_s11 + $0x114] ss:$8 sps:$4 sm:$0xff]  }
  0x41   : > { %1161 = vmatprep.subr.bf16.mxu0 %v1952_v34  ;;  %1049 = vmatpush1.bf16.msra.mxu1 %v1954_v35  ;;  %v1960_v39 = vld [vmem:[%s2279_s11 + $0x10] ss:$8 sps:$4 sm:$0xff]   ;;  %v1962_v41 = vld [vmem:[%s2279_s11 + $0x24] ss:$8 sps:$4 sm:$0xff]   ;;  %v1966_v43 = vld [vmem:[%s2279_s11 + $0x20] ss:$8 sps:$4 sm:$0xff]  }
  0x42   : > { %1162 = vmatpush1.bf16.msra.mxu0 %v1955_v36  ;;  %1050 = vmatprep.subr.bf16.mxu1 %v1956_v37  ;;  %v1961_v40 = vld [vmem:[%s2279_s11 + $0x110] ss:$8 sps:$4 sm:$0xff]   ;;  %v1964_v42 = vld [vmem:[%s2279_s11 + $0x124] ss:$8 sps:$4 sm:$0xff]   ;;  %v1967_v44 = vld [vmem:[%s2279_s11 + $0x120] ss:$8 sps:$4 sm:$0xff]  }
  0x43   : > { %1163 = vmatprep.subr.bf16.mxu0 %v1958_v38  ;;  %v1968_v45 = vld [vmem:[%s2279_s11 + $0x34] ss:$8 sps:$4 sm:$0xff]   ;;  %v1972_v47 = vld [vmem:[%s2279_s11 + $0x30] ss:$8 sps:$4 sm:$0xff]   ;;  %v1974_v49 = vld [vmem:[%s2279_s11 + $0x44] ss:$8 sps:$4 sm:$0xff]  }
  0x44   : > { %v1970_v46 = vld [vmem:[%s2279_s11 + $0x134] ss:$8 sps:$4 sm:$0xff]   ;;  %v1973_v48 = vld [vmem:[%s2279_s11 + $0x130] ss:$8 sps:$4 sm:$0xff]   ;;  %v1976_v50 = vld [vmem:[%s2279_s11 + $0x144] ss:$8 sps:$4 sm:$0xff]  }
  0x45   : > { %1051 = vmatpush1.bf16.msra.mxu1 %v1960_v39  ;;  %v1978_v51 = vld [vmem:[%s2279_s11 + $0x40] ss:$8 sps:$4 sm:$0xff]   ;;  %v1980_v53 = vld [vmem:[%s2279_s11 + $0x54] ss:$8 sps:$4 sm:$0xff]   ;;  %v1984_v55 = vld [vmem:[%s2279_s11 + $0x50] ss:$8 sps:$4 sm:$0xff]  }
  0x46   : > { %1164 = vmatpush1.bf16.msra.mxu0 %v1961_v40  ;;  %1052 = vmatprep.subr.bf16.mxu1 %v1962_v41  ;;  %v1979_v52 = vld [vmem:[%s2279_s11 + $0x140] ss:$8 sps:$4 sm:$0xff]   ;;  %v1982_v54 = vld [vmem:[%s2279_s11 + $0x154] ss:$8 sps:$4 sm:$0xff]   ;;  %v1985_v56 = vld [vmem:[%s2279_s11 + $0x150] ss:$8 sps:$4 sm:$0xff]  }
  0x47   : > { %1165 = vmatprep.subr.bf16.mxu0 %v1964_v42  ;;  %v1986_v57 = vld [vmem:[%s2279_s11 + $0x64] ss:$8 sps:$4 sm:$0xff]   ;;  %v1990_v59 = vld [vmem:[%s2279_s11 + $0x60] ss:$8 sps:$4 sm:$0xff]   ;;  %v1992_v61 = vld [vmem:[%s2279_s11 + $0x74] ss:$8 sps:$4 sm:$0xff]  }
  0x48   : > { %v1988_v58 = vld [vmem:[%s2279_s11 + $0x164] ss:$8 sps:$4 sm:$0xff]   ;;  %v1991_v60 = vld [vmem:[%s2279_s11 + $0x160] ss:$8 sps:$4 sm:$0xff]   ;;  %v1994_v62 = vld [vmem:[%s2279_s11 + $0x174] ss:$8 sps:$4 sm:$0xff]  }
  0x49   : > { %1053 = vmatpush1.bf16.msra.mxu1 %v1966_v43  ;;  %v1996_v63 = vld [vmem:[%s2279_s11 + $0x70] ss:$8 sps:$4 sm:$0xff]   ;;  %v1998_v1 = vld [vmem:[%s2279_s11 + $0x84] ss:$8 sps:$4 sm:$0xff]   ;;  %v2002_v3 = vld [vmem:[%s2279_s11 + $0x80] ss:$8 sps:$4 sm:$0xff]  }
  0x4a   : > { %1166 = vmatpush1.bf16.msra.mxu0 %v1967_v44  ;;  %1054 = vmatprep.subr.bf16.mxu1 %v1968_v45  ;;  %v1997_v0 = vld [vmem:[%s2279_s11 + $0x170] ss:$8 sps:$4 sm:$0xff]   ;;  %v2000_v2 = vld [vmem:[%s2279_s11 + $0x184] ss:$8 sps:$4 sm:$0xff]   ;;  %v2003_v4 = vld [vmem:[%s2279_s11 + $0x180] ss:$8 sps:$4 sm:$0xff]  }
  0x4b   : > { %1167 = vmatprep.subr.bf16.mxu0 %v1970_v46  ;;  %v2004_v5 = vld [vmem:[%s2279_s11 + $0x94] ss:$8 sps:$4 sm:$0xff]   ;;  %v2008_v7 = vld [vmem:[%s2279_s11 + $0x90] ss:$8 sps:$4 sm:$0xff]   ;;  %v2010_v9 = vld [vmem:[%s2279_s11 + $0xa4] ss:$8 sps:$4 sm:$0xff]  }
  0x4c   : > { %v2006_v6 = vld [vmem:[%s2279_s11 + $0x194] ss:$8 sps:$4 sm:$0xff]   ;;  %v2009_v8 = vld [vmem:[%s2279_s11 + $0x190] ss:$8 sps:$4 sm:$0xff]   ;;  %v2012_v10 = vld [vmem:[%s2279_s11 + $0x1a4] ss:$8 sps:$4 sm:$0xff]  }
  0x4d   : > { %1055 = vmatpush1.bf16.msra.mxu1 %v1972_v47  ;;  %v2014_v11 = vld [vmem:[%s2279_s11 + $0xa0] ss:$8 sps:$4 sm:$0xff]   ;;  %v2016_v13 = vld [vmem:[%s2279_s11 + $0xb4] ss:$8 sps:$4 sm:$0xff]   ;;  %v2020_v15 = vld [vmem:[%s2279_s11 + $0xb0] ss:$8 sps:$4 sm:$0xff]  }
  0x4e   : > { %1168 = vmatpush1.bf16.msra.mxu0 %v1973_v48  ;;  %1056 = vmatprep.subr.bf16.mxu1 %v1974_v49  ;;  %v2015_v12 = vld [vmem:[%s2279_s11 + $0x1a0] ss:$8 sps:$4 sm:$0xff]   ;;  %v2018_v14 = vld [vmem:[%s2279_s11 + $0x1b4] ss:$8 sps:$4 sm:$0xff]   ;;  %v2021_v16 = vld [vmem:[%s2279_s11 + $0x1b0] ss:$8 sps:$4 sm:$0xff]  }
  0x4f   : > { %1169 = vmatprep.subr.bf16.mxu0 %v1976_v50  ;;  %v2022_v17 = vld [vmem:[%s2279_s11 + $0xc4] ss:$8 sps:$4 sm:$0xff]   ;;  %v2026_v21 = vld [vmem:[%s2279_s11 + $0xc0] ss:$8 sps:$4 sm:$0xff]   ;;  %v2028_v23 = vld [vmem:[%s2279_s11 + $0xd4] ss:$8 sps:$4 sm:$0xff]  }
  0x50   : > { %v2048_v18 = vld [vmem:[%s2281_s12 + $0x4] ss:$16 sps:$4 sm:$0xff]   ;;  %v2051_v20 = vld [vmem:[%s2281_s12 + $0xc] ss:$16 sps:$4 sm:$0xff]   ;;  %v2027_v22 = vld [vmem:[%s2279_s11 + $0x1c0] ss:$8 sps:$4 sm:$0xff]  }
  0x51   : > { %1057 = vmatpush1.bf16.msra.mxu1 %v1978_v51  ;;  %v2024_v19 = vld [vmem:[%s2279_s11 + $0x1c4] ss:$8 sps:$4 sm:$0xff]   ;;  %1080 = vmatprep.mubr.bf16.mxu1 %v2048_v18  ;;  %v2030_v24 = vld [vmem:[%s2279_s11 + $0x1d4] ss:$8 sps:$4 sm:$0xff]   ;;  %v2032_v25 = vld [vmem:[%s2279_s11 + $0xd0] ss:$8 sps:$4 sm:$0xff]  }
  0x52   : > { %1170 = vmatpush1.bf16.msra.mxu0 %v1979_v52  ;;  %1058 = vmatprep.subr.bf16.mxu1 %v1980_v53  ;;  %v2033_v26 = vld [vmem:[%s2279_s11 + $0x1d0] ss:$8 sps:$4 sm:$0xff]   ;;  %v2034_v27 = vld [vmem:[%s2279_s11 + $0xe4] ss:$8 sps:$4 sm:$0xff]   ;;  %v2038_v29 = vld [vmem:[%s2279_s11 + $0xe0] ss:$8 sps:$4 sm:$0xff]  }
  0x53   : > { %1171 = vmatprep.subr.bf16.mxu0 %v1982_v54  ;;  %1193 = vmatprep.mubr.bf16.mxu0 %v2051_v20  ;;  %v2036_v28 = vld [vmem:[%s2279_s11 + $0x1e4] ss:$8 sps:$4 sm:$0xff]   ;;  %v2039_v30 = vld [vmem:[%s2279_s11 + $0x1e0] ss:$8 sps:$4 sm:$0xff]   ;;  %v2040_v31 = vld [vmem:[%s2279_s11 + $0xf4] ss:$8 sps:$4 sm:$0xff]  }
  0x54   : > { %v2042_v32 = vld [vmem:[%s2279_s11 + $0x1f4] ss:$8 sps:$4 sm:$0xff]   ;;  %v2044_v33 = vld [vmem:[%s2279_s11 + $0xf0] ss:$8 sps:$4 sm:$0xff]   ;;  %p1865_p11 = scmp.ne.s32.totalorder %s2124_s17, 3 }
  0x55   : > { %1059 = vmatpush1.bf16.msra.mxu1 %v1984_v55  ;;  %v2045_v34 = vld [vmem:[%s2279_s11 + $0x1f0] ss:$8 sps:$4 sm:$0xff]   ;;  %v2052_v37 = vld [vmem:[%s2281_s12 + $0x24] ss:$16 sps:$4 sm:$0xff]   ;;  %v2054_v38 = vld [vmem:[%s2281_s12 + $0x2c] ss:$16 sps:$4 sm:$0xff]  }
  0x56   : > { %1172 = vmatpush1.bf16.msra.mxu0 %v1985_v56  ;;  %1060 = vmatprep.subr.bf16.mxu1 %v1986_v57  ;;  %v2046_v35 = vld [vmem:[%s2281_s12] ss:$16 sps:$4 sm:$0xff]   ;;  %v2049_v36 = vld [vmem:[%s2281_s12 + $0x8] ss:$16 sps:$4 sm:$0xff]   ;;  %v2058_v41 = vld [vmem:[%s2281_s12 + $0x44] ss:$16 sps:$4 sm:$0xff]  }
  0x57   : > { %1173 = vmatprep.subr.bf16.mxu0 %v1988_v58  ;;  %v2056_v39 = vld [vmem:[%s2281_s12 + $0x20] ss:$16 sps:$4 sm:$0xff]   ;;  %v2057_v40 = vld [vmem:[%s2281_s12 + $0x28] ss:$16 sps:$4 sm:$0xff]   ;;  %v2060_v42 = vld [vmem:[%s2281_s12 + $0x4c] ss:$16 sps:$4 sm:$0xff]  }
  0x58   : > { %v2062_v43 = vld [vmem:[%s2281_s12 + $0x40] ss:$16 sps:$4 sm:$0xff]   ;;  %v2063_v44 = vld [vmem:[%s2281_s12 + $0x48] ss:$16 sps:$4 sm:$0xff]   ;;  %v2064_v45 = vld [vmem:[%s2281_s12 + $0x64] ss:$16 sps:$4 sm:$0xff]  }
  0x59   : > { %1061 = vmatpush1.bf16.msra.mxu1 %v1990_v59  ;;  %v2066_v46 = vld [vmem:[%s2281_s12 + $0x6c] ss:$16 sps:$4 sm:$0xff]   ;;  %v2068_v47 = vld [vmem:[%s2281_s12 + $0x60] ss:$16 sps:$4 sm:$0xff]   ;;  %v2069_v48 = vld [vmem:[%s2281_s12 + $0x68] ss:$16 sps:$4 sm:$0xff]  }
  0x5a   : > { %1174 = vmatpush1.bf16.msra.mxu0 %v1991_v60  ;;  %1062 = vmatprep.subr.bf16.mxu1 %v1992_v61  ;;  %v2070_v49 = vld [vmem:[%s2281_s12 + $0x84] ss:$16 sps:$4 sm:$0xff]   ;;  %v2072_v50 = vld [vmem:[%s2281_s12 + $0x8c] ss:$16 sps:$4 sm:$0xff]   ;;  %v2074_v51 = vld [vmem:[%s2281_s12 + $0x80] ss:$16 sps:$4 sm:$0xff]  }
  0x5b   : > { %1175 = vmatprep.subr.bf16.mxu0 %v1994_v62  ;;  %v2075_v52 = vld [vmem:[%s2281_s12 + $0x88] ss:$16 sps:$4 sm:$0xff]   ;;  %v2076_v53 = vld [vmem:[%s2281_s12 + $0xa4] ss:$16 sps:$4 sm:$0xff]   ;;  %v2078_v54 = vld [vmem:[%s2281_s12 + $0xac] ss:$16 sps:$4 sm:$0xff]  }
  0x5c   : > { %v2080_v55 = vld [vmem:[%s2281_s12 + $0xa0] ss:$16 sps:$4 sm:$0xff]   ;;  %v2081_v56 = vld [vmem:[%s2281_s12 + $0xa8] ss:$16 sps:$4 sm:$0xff]   ;;  %v2082_v57 = vld [vmem:[%s2281_s12 + $0xc4] ss:$16 sps:$4 sm:$0xff]  }
  0x5d   : > { %1063 = vmatpush1.bf16.msra.mxu1 %v1996_v63  ;;  %v2084_v58 = vld [vmem:[%s2281_s12 + $0xcc] ss:$16 sps:$4 sm:$0xff]   ;;  %v2086_v59 = vld [vmem:[%s2281_s12 + $0xc0] ss:$16 sps:$4 sm:$0xff]   ;;  %v2087_v60 = vld [vmem:[%s2281_s12 + $0xc8] ss:$16 sps:$4 sm:$0xff]  }
  0x5e   : > { %1176 = vmatpush1.bf16.msra.mxu0 %v1997_v0  ;;  %1064 = vmatprep.subr.bf16.mxu1 %v1998_v1  ;;  %v2088_v61 = vld [vmem:[%s2281_s12 + $0xe4] ss:$16 sps:$4 sm:$0xff]   ;;  %v2090_v62 = vld [vmem:[%s2281_s12 + $0xec] ss:$16 sps:$4 sm:$0xff]   ;;  %v2092_v63 = vld [vmem:[%s2281_s12 + $0xe0] ss:$16 sps:$4 sm:$0xff]  }
  0x5f   : > { %1177 = vmatprep.subr.bf16.mxu0 %v2000_v2  ;;  %v2093_v0 = vld [vmem:[%s2281_s12 + $0xe8] ss:$16 sps:$4 sm:$0xff]   ;;  %v440_v2 = vld [vmem:[#allocation2] sm:$0xff] }
  0x61   : > { %1065 = vmatpush1.bf16.msra.mxu1 %v2002_v3 }
  0x62   : > { %1178 = vmatpush1.bf16.msra.mxu0 %v2003_v4  ;;  %1066 = vmatprep.subr.bf16.mxu1 %v2004_v5 }
  0x63   : > { %1179 = vmatprep.subr.bf16.mxu0 %v2006_v6  ;;  %v441_v6 = vld [vmem:[#allocation2 + $0x8] sm:$0xff] }
  0x65   : > { %1067 = vmatpush1.bf16.msra.mxu1 %v2008_v7 }
  0x66   : > { %1180 = vmatpush1.bf16.msra.mxu0 %v2009_v8  ;;  %1068 = vmatprep.subr.bf16.mxu1 %v2010_v9 }
  0x67   : > { %1181 = vmatprep.subr.bf16.mxu0 %v2012_v10  ;;  %v442_v10 = vld [vmem:[#allocation2 + $0x10] sm:$0xff] }
  0x69   : > { %1069 = vmatpush1.bf16.msra.mxu1 %v2014_v11 }
  0x6a   : > { %1182 = vmatpush1.bf16.msra.mxu0 %v2015_v12  ;;  %1070 = vmatprep.subr.bf16.mxu1 %v2016_v13 }
  0x6b   : > { %1183 = vmatprep.subr.bf16.mxu0 %v2018_v14 }
  0x6d   : > { %1071 = vmatpush1.bf16.msra.mxu1 %v2020_v15  ;;  %v443_v15 = vld [vmem:[#allocation2 + $0x18] sm:$0xff] }
  0x6e   : > { %1184 = vmatpush1.bf16.msra.mxu0 %v2021_v16  ;;  %1072 = vmatprep.subr.bf16.mxu1 %v2022_v17 }
  0x6f   : > { %1185 = vmatprep.subr.bf16.mxu0 %v2024_v19 }
  0x71   : > { %1073 = vmatpush1.bf16.msra.mxu1 %v2026_v21 }
  0x72   : > { %1186 = vmatpush1.bf16.msra.mxu0 %v2027_v22  ;;  %1074 = vmatprep.subr.bf16.mxu1 %v2028_v23  ;;  %v444_v22 = vld [vmem:[#allocation2 + $0x20] sm:$0xff] }
  0x73   : > { %1187 = vmatprep.subr.bf16.mxu0 %v2030_v24 }
  0x75   : > { %1075 = vmatpush1.bf16.msra.mxu1 %v2032_v25 }
  0x76   : > { %1188 = vmatpush1.bf16.msra.mxu0 %v2033_v26  ;;  %1076 = vmatprep.subr.bf16.mxu1 %v2034_v27  ;;  %v445_v26 = vld [vmem:[#allocation2 + $0x28] sm:$0xff] }
  0x77   : > { %1189 = vmatprep.subr.bf16.mxu0 %v2036_v28 }
  0x79   : > { %1077 = vmatpush1.bf16.msra.mxu1 %v2038_v29 }
  0x7a   : > { %1190 = vmatpush1.bf16.msra.mxu0 %v2039_v30  ;;  %1078 = vmatprep.subr.bf16.mxu1 %v2040_v31  ;;  %v446_v30 = vld [vmem:[#allocation2 + $0x30] sm:$0xff] }
  0x7b   : > { %1191 = vmatprep.subr.bf16.mxu0 %v2042_v32 }
  0x7d   : > { %1079 = vmatpush1.bf16.msra.mxu1 %v2044_v33 }
  0x7e   : > { %1192 = vmatpush1.bf16.msra.mxu0 %v2045_v34 }
  0x80   : > { %1081 = vmatmul.mubr.bf16.vlgmr.msra.gmra.mrb[0].mxu1 %v2046_v35  ;;  %v447_v35 = vld [vmem:[#allocation2 + $0x38] sm:$0xff] }
  0x81   : > { %1194 = vmatmul.mubr.bf16.vlgmr.msra.gmra.mrb[0].mxu0 %v2049_v36  ;;  %1090 = vmatprep.mubr.bf16.mxu1 %v2052_v37 }
  0x82   : > { %1203 = vmatprep.mubr.bf16.mxu0 %v2054_v38 }
  0x88   : > { %1091 = vmatmul.mubr.bf16.gmra.mrb[4].mxu1 %v2056_v39 }
  0x89   : > { %1204 = vmatmul.mubr.bf16.gmra.mrb[4].mxu0 %v2057_v40  ;;  %1100 = vmatprep.mubr.bf16.mxu1 %v2058_v41 }
  0x8a   : > { %1213 = vmatprep.mubr.bf16.mxu0 %v2060_v42  ;;  %v448_v42 = vld [vmem:[#allocation2 + $0x40] sm:$0xff] }
  0x90   : > { %1101 = vmatmul.mubr.bf16.gmra.mrb[8].mxu1 %v2062_v43 }
  0x91   : > { %1214 = vmatmul.mubr.bf16.gmra.mrb[8].mxu0 %v2063_v44  ;;  %1110 = vmatprep.mubr.bf16.mxu1 %v2064_v45 }
  0x92   : > { %1223 = vmatprep.mubr.bf16.mxu0 %v2066_v46  ;;  %v449_v46 = vld [vmem:[#allocation2 + $0x48] sm:$0xff] }
  0x98   : > { %1111 = vmatmul.mubr.bf16.gmra.mrb[12].mxu1 %v2068_v47 }
  0x99   : > { %1224 = vmatmul.mubr.bf16.gmra.mrb[12].mxu0 %v2069_v48  ;;  %1120 = vmatprep.mubr.bf16.mxu1 %v2070_v49 }
  0x9a   : > { %1233 = vmatprep.mubr.bf16.mxu0 %v2072_v50  ;;  %v450_v50 = vld [vmem:[#allocation2 + $0x50] sm:$0xff] }
  0xa0   : > { %1121 = vmatmul.mubr.bf16.gmra.mrb[16].mxu1 %v2074_v51 }
  0xa1   : > { %1234 = vmatmul.mubr.bf16.gmra.mrb[16].mxu0 %v2075_v52  ;;  %1130 = vmatprep.mubr.bf16.mxu1 %v2076_v53 }
  0xa2   : > { %1243 = vmatprep.mubr.bf16.mxu0 %v2078_v54 }
  0xa8   : > { %1131 = vmatmul.mubr.bf16.gmra.mrb[20].mxu1 %v2080_v55  ;;  %v451_v55 = vld [vmem:[#allocation2 + $0x58] sm:$0xff] }
  0xa9   : > { %1244 = vmatmul.mubr.bf16.gmra.mrb[20].mxu0 %v2081_v56  ;;  %1140 = vmatprep.mubr.bf16.mxu1 %v2082_v57 }
  0xaa   : > { %1253 = vmatprep.mubr.bf16.mxu0 %v2084_v58 }
  0xb0   : > { %1141 = vmatmul.mubr.bf16.gmra.mrb[24].mxu1 %v2086_v59 }
  0xb1   : > { %1254 = vmatmul.mubr.bf16.gmra.mrb[24].mxu0 %v2087_v60  ;;  %1150 = vmatprep.mubr.bf16.mxu1 %v2088_v61 }
  0xb2   : > { %1263 = vmatprep.mubr.bf16.mxu0 %v2090_v62  ;;  %v452_v62 = vld [vmem:[#allocation2 + $0x60] sm:$0xff] }
  0xb8   : > { %1151 = vmatmul.mubr.bf16.gmra.mrb[28].mxu1 %v2092_v63 }
  0xb9   : > { %1264 = vmatmul.mubr.bf16.gmra.mrb[28].mxu0 %v2093_v0 }
 0x153   : > { %v1082_v1 = vpop.f32.mrb[0].mxu1 }
 0x154   : > { %v1195_v3 = vpop.f32.mrb[0].mxu0  ;;  %v1084_v5 = vpop.f32.mrb[1].mxu1 }
 0x155   : > { %v1196_v4 = vadd.f32 %v1195_v3, %v1082_v1  ;;  %v1197_v7 = vpop.f32.mrb[1].mxu0  ;;  %v1086_v9 = vpop.f32.mrb[2].mxu1 }
 0x156   : > { %v1198_v8 = vadd.f32 %v1197_v7, %v1084_v5  ;;  %v1199_v11 = vpop.f32.mrb[2].mxu0  ;;  %v1088_v14 = vpop.f32.mrb[3].mxu1 }
 0x157   : > { %v1274_v12 = vadd.f32 %v1196_v4, %v440_v2  ;;  %v1200_v13 = vadd.f32 %v1199_v11, %v1086_v9  ;;  %v1201_v16 = vpop.f32.mrb[3].mxu0  ;;  %v453_v2 = vld [vmem:[#allocation2 + $0x68] sm:$0xff]  ;;  %v455_v11 = vld [vmem:[#allocation2 + $0x78] sm:$0xff] }
 0x158   : > { %v1275_v17 = vadd.f32 %v1198_v8, %v441_v6  ;;  %v1202_v18 = vadd.f32 %v1201_v16, %v1088_v14  ;;  %v454_v6 = vld [vmem:[#allocation2 + $0x70] sm:$0xff] }
 0x159   : > { %1306 = vst [vmem:[#allocation2] sm:$0xff] %v1274_v12  ;;  %v1276_v19 = vadd.f32 %v1200_v13, %v442_v10 }
 0x15a   : > { %1307 = vst [vmem:[#allocation2 + $0x8] sm:$0xff] %v1275_v17  ;;  %v1277_v20 = vadd.f32 %v1202_v18, %v443_v15  ;;  %v456_v18 = vld [vmem:[#allocation2 + $0x80] sm:$0xff] }
 0x15b   : > { %1308 = vst [vmem:[#allocation2 + $0x10] sm:$0xff] %v1276_v19  ;;  %v1092_v21 = vpop.f32.mrb[4].mxu1 }
 0x15c   : > { %1309 = vst [vmem:[#allocation2 + $0x18] sm:$0xff] %v1277_v20  ;;  %v1205_v23 = vpop.f32.mrb[4].mxu0  ;;  %v1094_v25 = vpop.f32.mrb[5].mxu1 }
 0x15d   : > { %v1206_v24 = vadd.f32 %v1205_v23, %v1092_v21  ;;  %v1207_v27 = vpop.f32.mrb[5].mxu0  ;;  %v1096_v29 = vpop.f32.mrb[6].mxu1 }
 0x15e   : > { %v1208_v28 = vadd.f32 %v1207_v27, %v1094_v25  ;;  %v1209_v31 = vpop.f32.mrb[6].mxu0  ;;  %v1098_v34 = vpop.f32.mrb[7].mxu1 }
 0x15f   : > { %v1278_v32 = vadd.f32 %v1206_v24, %v444_v22  ;;  %v1210_v33 = vadd.f32 %v1209_v31, %v1096_v29  ;;  %v1211_v36 = vpop.f32.mrb[7].mxu0  ;;  %v457_v22 = vld [vmem:[#allocation2 + $0x88] sm:$0xff]  ;;  %v459_v31 = vld [vmem:[#allocation2 + $0x98] sm:$0xff] }
 0x160   : > { %v1279_v37 = vadd.f32 %v1208_v28, %v445_v26  ;;  %v1212_v38 = vadd.f32 %v1211_v36, %v1098_v34  ;;  %v458_v26 = vld [vmem:[#allocation2 + $0x90] sm:$0xff] }
 0x161   : > { %1310 = vst [vmem:[#allocation2 + $0x20] sm:$0xff] %v1278_v32  ;;  %v1280_v39 = vadd.f32 %v1210_v33, %v446_v30 }
 0x162   : > { %1311 = vst [vmem:[#allocation2 + $0x28] sm:$0xff] %v1279_v37  ;;  %v1281_v40 = vadd.f32 %v1212_v38, %v447_v35  ;;  %v460_v38 = vld [vmem:[#allocation2 + $0xa0] sm:$0xff] }
 0x163   : > { %1312 = vst [vmem:[#allocation2 + $0x30] sm:$0xff] %v1280_v39  ;;  %v1102_v41 = vpop.f32.mrb[8].mxu1 }
 0x164   : > { %1313 = vst [vmem:[#allocation2 + $0x38] sm:$0xff] %v1281_v40  ;;  %v1215_v43 = vpop.f32.mrb[8].mxu0  ;;  %v1104_v45 = vpop.f32.mrb[9].mxu1 }
 0x165   : > { %v1216_v44 = vadd.f32 %v1215_v43, %v1102_v41  ;;  %v1217_v47 = vpop.f32.mrb[9].mxu0  ;;  %v1106_v49 = vpop.f32.mrb[10].mxu1 }
 0x166   : > { %v1218_v48 = vadd.f32 %v1217_v47, %v1104_v45  ;;  %v1219_v51 = vpop.f32.mrb[10].mxu0  ;;  %v1108_v54 = vpop.f32.mrb[11].mxu1 }
 0x167   : > { %v1282_v52 = vadd.f32 %v1216_v44, %v448_v42  ;;  %v1220_v53 = vadd.f32 %v1219_v51, %v1106_v49  ;;  %v1221_v56 = vpop.f32.mrb[11].mxu0  ;;  %v461_v42 = vld [vmem:[#allocation2 + $0xa8] sm:$0xff]  ;;  %v463_v51 = vld [vmem:[#allocation2 + $0xb8] sm:$0xff] }
 0x168   : > { %v1283_v57 = vadd.f32 %v1218_v48, %v449_v46  ;;  %v1222_v58 = vadd.f32 %v1221_v56, %v1108_v54  ;;  %v462_v46 = vld [vmem:[#allocation2 + $0xb0] sm:$0xff] }
 0x169   : > { %1314 = vst [vmem:[#allocation2 + $0x40] sm:$0xff] %v1282_v52  ;;  %v1284_v59 = vadd.f32 %v1220_v53, %v450_v50 }
 0x16a   : > { %1315 = vst [vmem:[#allocation2 + $0x48] sm:$0xff] %v1283_v57  ;;  %v1285_v60 = vadd.f32 %v1222_v58, %v451_v55  ;;  %v464_v58 = vld [vmem:[#allocation2 + $0xc0] sm:$0xff] }
 0x16b   : > { %1316 = vst [vmem:[#allocation2 + $0x50] sm:$0xff] %v1284_v59  ;;  %v1112_v61 = vpop.f32.mrb[12].mxu1 }
 0x16c   : > { %1317 = vst [vmem:[#allocation2 + $0x58] sm:$0xff] %v1285_v60  ;;  %v1225_v63 = vpop.f32.mrb[12].mxu0  ;;  %v1114_v1 = vpop.f32.mrb[13].mxu1 }
 0x16d   : > { %v1226_v0 = vadd.f32 %v1225_v63, %v1112_v61  ;;  %v1227_v3 = vpop.f32.mrb[13].mxu0  ;;  %v1116_v5 = vpop.f32.mrb[14].mxu1 }
 0x16e   : > { %v1228_v4 = vadd.f32 %v1227_v3, %v1114_v1  ;;  %v1229_v7 = vpop.f32.mrb[14].mxu0  ;;  %v1118_v10 = vpop.f32.mrb[15].mxu1 }
 0x16f   : > { %v1286_v8 = vadd.f32 %v1226_v0, %v452_v62  ;;  %v1230_v9 = vadd.f32 %v1229_v7, %v1116_v5  ;;  %v1231_v12 = vpop.f32.mrb[15].mxu0  ;;  %v465_v62 = vld [vmem:[#allocation2 + $0xc8] sm:$0xff]  ;;  %v467_v7 = vld [vmem:[#allocation2 + $0xd8] sm:$0xff] }
 0x170   : > { %v1287_v13 = vadd.f32 %v1228_v4, %v453_v2  ;;  %v1232_v14 = vadd.f32 %v1231_v12, %v1118_v10  ;;  %v466_v2 = vld [vmem:[#allocation2 + $0xd0] sm:$0xff] }
 0x171   : > { %1318 = vst [vmem:[#allocation2 + $0x60] sm:$0xff] %v1286_v8  ;;  %v1288_v15 = vadd.f32 %v1230_v9, %v454_v6 }
 0x172   : > { %1319 = vst [vmem:[#allocation2 + $0x68] sm:$0xff] %v1287_v13  ;;  %v1289_v16 = vadd.f32 %v1232_v14, %v455_v11  ;;  %v468_v14 = vld [vmem:[#allocation2 + $0xe0] sm:$0xff] }
 0x173   : > { %1320 = vst [vmem:[#allocation2 + $0x70] sm:$0xff] %v1288_v15  ;;  %v1122_v17 = vpop.f32.mrb[16].mxu1 }
 0x174   : > { %1321 = vst [vmem:[#allocation2 + $0x78] sm:$0xff] %v1289_v16  ;;  %v1235_v19 = vpop.f32.mrb[16].mxu0  ;;  %v1124_v21 = vpop.f32.mrb[17].mxu1 }
 0x175   : > { %v1236_v20 = vadd.f32 %v1235_v19, %v1122_v17  ;;  %v1237_v23 = vpop.f32.mrb[17].mxu0  ;;  %v1126_v25 = vpop.f32.mrb[18].mxu1 }
 0x176   : > { %v1238_v24 = vadd.f32 %v1237_v23, %v1124_v21  ;;  %v1239_v27 = vpop.f32.mrb[18].mxu0  ;;  %v1128_v30 = vpop.f32.mrb[19].mxu1 }
 0x177   : > { %v1290_v28 = vadd.f32 %v1236_v20, %v456_v18  ;;  %v1240_v29 = vadd.f32 %v1239_v27, %v1126_v25  ;;  %v1241_v32 = vpop.f32.mrb[19].mxu0  ;;  %v469_v18 = vld [vmem:[#allocation2 + $0xe8] sm:$0xff]  ;;  %v471_v27 = vld [vmem:[#allocation2 + $0xf8] sm:$0xff] }
 0x178   : > { %v1291_v33 = vadd.f32 %v1238_v24, %v457_v22  ;;  %v1242_v34 = vadd.f32 %v1241_v32, %v1128_v30  ;;  %v470_v22 = vld [vmem:[#allocation2 + $0xf0] sm:$0xff] }
 0x179   : > { %1322 = vst [vmem:[#allocation2 + $0x80] sm:$0xff] %v1290_v28  ;;  %v1292_v35 = vadd.f32 %v1240_v29, %v458_v26 }
 0x17a   : > { %1323 = vst [vmem:[#allocation2 + $0x88] sm:$0xff] %v1291_v33  ;;  %v1293_v36 = vadd.f32 %v1242_v34, %v459_v31  ;;  %v1342_v33 = vld [vmem:[#allocation2] sm:$0xff] (!%p1865_p11)  ;;  %v1343_v34 = vld [vmem:[#allocation2 + $0x8] sm:$0xff] (!%p1865_p11) }
 0x17b   : > { %1324 = vst [vmem:[#allocation2 + $0x90] sm:$0xff] %v1292_v35  ;;  %v1132_v37 = vpop.f32.mrb[20].mxu1  ;;  %v1344_v35 = vld [vmem:[#allocation2 + $0x10] sm:$0xff] (!%p1865_p11)  ;;  %1374 = vst [vmem:[%s2536_s2] sm:$0xff] (!%p1865_p11), %v1342_v33 }
 0x17c   : > { %1325 = vst [vmem:[#allocation2 + $0x98] sm:$0xff] %v1293_v36  ;;  %v1245_v39 = vpop.f32.mrb[20].mxu0  ;;  %v1134_v41 = vpop.f32.mrb[21].mxu1  ;;  %v1471_v36 = vmul.f32 (!%p1865_p11), %v1342_v33, %v1342_v33  ;;  %1375 = vst [vmem:[%s2536_s2 + $0x8] sm:$0xff] (!%p1865_p11), %v1343_v34 }
 0x17d   : > { %v1246_v40 = vadd.f32 %v1245_v39, %v1132_v37  ;;  %v1247_v43 = vpop.f32.mrb[21].mxu0  ;;  %v1136_v45 = vpop.f32.mrb[22].mxu1  ;;  %v1472_v37 = vmul.f32 (!%p1865_p11), %v1343_v34, %v1343_v34  ;;  %1376 = vst [vmem:[%s2536_s2 + $0x10] sm:$0xff] (!%p1865_p11), %v1344_v35  ;;  %v1473_v39 = vmul.f32 (!%p1865_p11), %v1344_v35, %v1344_v35 }
 0x17e   : > { %v1248_v44 = vadd.f32 %v1247_v43, %v1134_v41  ;;  %v1249_v47 = vpop.f32.mrb[22].mxu0  ;;  %v1138_v50 = vpop.f32.mrb[23].mxu1  ;;  %v1346_v41 = vld [vmem:[#allocation2 + $0x20] sm:$0xff] (!%p1865_p11) }
 0x17f   : > { %v1294_v48 = vadd.f32 %v1246_v40, %v460_v38  ;;  %v1250_v49 = vadd.f32 %v1249_v47, %v1136_v45  ;;  %v1251_v52 = vpop.f32.mrb[23].mxu0  ;;  %v1406_v38 = vadd.f32 (!%p1865_p11), %v1344_v35, %v1342_v33  ;;  %v1345_v40 = vld [vmem:[#allocation2 + $0x18] sm:$0xff] (!%p1865_p11)  ;;  %1378 = vst [vmem:[%s2536_s2 + $0x20] sm:$0xff] (!%p1865_p11), %v1346_v41  ;;  %v1475_v45 = vmul.f32 (!%p1865_p11), %v1346_v41, %v1346_v41  ;;  %v1348_v47 = vld [vmem:[#allocation2 + $0x30] sm:$0xff] (!%p1865_p11) }
 0x180   : > { %v1295_v53 = vadd.f32 %v1248_v44, %v461_v42  ;;  %v1252_v54 = vadd.f32 %v1251_v52, %v1138_v50  ;;  %v1347_v42 = vld [vmem:[#allocation2 + $0x28] sm:$0xff] (!%p1865_p11)  ;;  %1377 = vst [vmem:[%s2536_s2 + $0x18] sm:$0xff] (!%p1865_p11), %v1345_v40  ;;  %v1427_v43 = vadd.f32 (!%p1865_p11), %v1345_v40, %v1343_v34  ;;  %v1474_v44 = vmul.f32 (!%p1865_p11), %v1345_v40, %v1345_v40 }
 0x181   : > { %1326 = vst [vmem:[#allocation2 + $0xa0] sm:$0xff] %v1294_v48  ;;  %v1296_v55 = vadd.f32 %v1250_v49, %v462_v46  ;;  %1379 = vst [vmem:[%s2536_s2 + $0x28] sm:$0xff] (!%p1865_p11), %v1347_v42  ;;  %v1476_v46 = vmul.f32 (!%p1865_p11), %v1347_v42, %v1347_v42  ;;  %v1349_v48 = vld [vmem:[#allocation2 + $0x38] sm:$0xff] (!%p1865_p11)  ;;  %v1350_v49 = vld [vmem:[#allocation2 + $0x40] sm:$0xff] (!%p1865_p11)  ;;  %v1503_v50 = vadd.f32 (!%p1865_p11), %v1473_v39, %v1471_v36 }
 0x182   : > { %1327 = vst [vmem:[#allocation2 + $0xa8] sm:$0xff] %v1295_v53  ;;  %v1297_v56 = vadd.f32 %v1252_v54, %v463_v51  ;;  %v1407_v51 = vadd.f32 (!%p1865_p11), %v1406_v38, %v1346_v41  ;;  %1380 = vst [vmem:[%s2536_s2 + $0x30] sm:$0xff] (!%p1865_p11), %v1348_v47  ;;  %v1477_v52 = vmul.f32 (!%p1865_p11), %v1348_v47, %v1348_v47  ;;  %v1351_v53 = vld [vmem:[#allocation2 + $0x48] sm:$0xff] (!%p1865_p11)  ;;  %v1352_v54 = vld [vmem:[#allocation2 + $0x50] sm:$0xff] (!%p1865_p11) }
 0x183   : > { %1328 = vst [vmem:[#allocation2 + $0xb0] sm:$0xff] %v1296_v55  ;;  %v1142_v57 = vpop.f32.mrb[24].mxu1  ;;  %1381 = vst [vmem:[%s2536_s2 + $0x38] sm:$0xff] (!%p1865_p11), %v1349_v48  ;;  %v1353_v55 = vld [vmem:[#allocation2 + $0x58] sm:$0xff] (!%p1865_p11) }
 0x184   : > { %1329 = vst [vmem:[#allocation2 + $0xb8] sm:$0xff] %v1297_v56  ;;  %v1255_v59 = vpop.f32.mrb[24].mxu0  ;;  %v1144_v61 = vpop.f32.mrb[25].mxu1  ;;  %1382 = vst [vmem:[%s2536_s2 + $0x40] sm:$0xff] (!%p1865_p11), %v1350_v49  ;;  %v1524_v56 = vadd.f32 (!%p1865_p11), %v1474_v44, %v1472_v37 }
 0x185   : > { %v1256_v60 = vadd.f32 %v1255_v59, %v1142_v57  ;;  %v1257_v63 = vpop.f32.mrb[25].mxu0  ;;  %v1146_v1 = vpop.f32.mrb[26].mxu1  ;;  %v1428_v57 = vadd.f32 (!%p1865_p11), %v1427_v43, %v1347_v42  ;;  %1383 = vst [vmem:[%s2536_s2 + $0x48] sm:$0xff] (!%p1865_p11), %v1351_v53  ;;  %1384 = vst [vmem:[%s2536_s2 + $0x50] sm:$0xff] (!%p1865_p11), %v1352_v54  ;;  %v1354_v59 = vld [vmem:[#allocation2 + $0x60] sm:$0xff] (!%p1865_p11) }
 0x186   : > { %v1258_v0 = vadd.f32 %v1257_v63, %v1144_v61  ;;  %v1259_v3 = vpop.f32.mrb[26].mxu0  ;;  %v1148_v6 = vpop.f32.mrb[27].mxu1  ;;  %1385 = vst [vmem:[%s2536_s2 + $0x58] sm:$0xff] (!%p1865_p11), %v1353_v55  ;;  %v2417_v61 = vld [vmem:[#allocation2 + $0x70] sm:$0xff] (!%p1865_p11)  ;;  %v1408_v63 = vadd.f32 (!%p1865_p11), %v1407_v51, %v1348_v47  ;;  %1386 = vst [vmem:[%s2536_s2 + $0x60] sm:$0xff] (!%p1865_p11), %v1354_v59 }
 0x187   : > { %v1298_v4 = vadd.f32 %v1256_v60, %v464_v58  ;;  %v1260_v5 = vadd.f32 %v1259_v3, %v1146_v1  ;;  %v1261_v8 = vpop.f32.mrb[27].mxu0  ;;  %v1478_v58 = vmul.f32 (!%p1865_p11), %v1349_v48, %v1349_v48  ;;  %v1355_v60 = vld [vmem:[#allocation2 + $0x68] sm:$0xff] (!%p1865_p11)  ;;  %1388 = vst [vmem:[%s2536_s2 + $0x70] sm:$0xff] (!%p1865_p11), %v2417_v61  ;;  %v1357_v1 = vld [vmem:[#allocation2 + $0x78] sm:$0xff] (!%p1865_p11)  ;;  %v1485_v35 = vmul.f32 (!%p1865_p11), %v2417_v61, %v2417_v61 }
 0x188   : > { %v1299_v9 = vadd.f32 %v1258_v0, %v465_v62  ;;  %v1262_v10 = vadd.f32 %v1261_v8, %v1148_v6  ;;  %v1504_v62 = vadd.f32 (!%p1865_p11), %v1503_v50, %v1475_v45  ;;  %v1479_v0 = vmul.f32 (!%p1865_p11), %v1350_v49, %v1350_v49  ;;  %1387 = vst [vmem:[%s2536_s2 + $0x68] sm:$0xff] (!%p1865_p11), %v1355_v60  ;;  %v2429_v3 = vld [vmem:[#allocation2 + $0x88] sm:$0xff] (!%p1865_p11)  ;;  %v1361_v8 = vld [vmem:[#allocation2 + $0x98] sm:$0xff] (!%p1865_p11) }
 0x189   : > { %1330 = vst [vmem:[#allocation2 + $0xc0] sm:$0xff] %v1298_v4  ;;  %v1300_v11 = vadd.f32 %v1260_v5, %v466_v2  ;;  %v1358_v2 = vld [vmem:[#allocation2 + $0x80] sm:$0xff] (!%p1865_p11)  ;;  %v1525_v4 = vadd.f32 (!%p1865_p11), %v1524_v56, %v1476_v46  ;;  %v1429_v5 = vadd.f32 (!%p1865_p11), %v1428_v57, %v1349_v48  ;;  %v1480_v6 = vmul.f32 (!%p1865_p11), %v1351_v53, %v1351_v53 }
 0x18a   : > { %1331 = vst [vmem:[#allocation2 + $0xc8] sm:$0xff] %v1299_v9  ;;  %v1301_v12 = vadd.f32 %v1262_v10, %v467_v7  ;;  %1389 = vst [vmem:[%s2536_s2 + $0x78] sm:$0xff] (!%p1865_p11), %v1357_v1  ;;  %v1360_v7 = vld [vmem:[#allocation2 + $0x90] sm:$0xff] (!%p1865_p11)  ;;  %v2441_v9 = vld [vmem:[#allocation2 + $0xa0] sm:$0xff] (!%p1865_p11)  ;;  %v1505_v10 = vadd.f32 (!%p1865_p11), %v1504_v62, %v1477_v52  ;;  %v1486_v38 = vmul.f32 (!%p1865_p11), %v1357_v1, %v1357_v1 }
 0x18b   : > { %1332 = vst [vmem:[#allocation2 + $0xd0] sm:$0xff] %v1300_v11  ;;  %v1152_v13 = vpop.f32.mrb[28].mxu1  ;;  %1390 = vst [vmem:[%s2536_s2 + $0x80] sm:$0xff] (!%p1865_p11), %v1358_v2  ;;  %v1409_v11 = vadd.f32 (!%p1865_p11), %v1408_v63, %v1350_v49  ;;  %v1487_v41 = vmul.f32 (!%p1865_p11), %v1358_v2, %v1358_v2  ;;  %v1488_v44 = vmul.f32 (!%p1865_p11), %v2429_v3, %v2429_v3 }
 0x18c   : > { %1333 = vst [vmem:[#allocation2 + $0xd8] sm:$0xff] %v1301_v12  ;;  %v1265_v15 = vpop.f32.mrb[28].mxu0  ;;  %v1154_v17 = vpop.f32.mrb[29].mxu1  ;;  %1391 = vst [vmem:[%s2536_s2 + $0x88] sm:$0xff] (!%p1865_p11), %v2429_v3  ;;  %v1481_v12 = vmul.f32 (!%p1865_p11), %v1352_v54, %v1352_v54  ;;  %v1489_v47 = vmul.f32 (!%p1865_p11), %v1360_v7, %v1360_v7  ;;  %v1490_v50 = vmul.f32 (!%p1865_p11), %v1361_v8, %v1361_v8 }
 0x18d   : > { %v1266_v16 = vadd.f32 %v1265_v15, %v1152_v13  ;;  %v1267_v19 = vpop.f32.mrb[29].mxu0  ;;  %v1156_v21 = vpop.f32.mrb[30].mxu1  ;;  %1392 = vst [vmem:[%s2536_s2 + $0x90] sm:$0xff] (!%p1865_p11), %v1360_v7  ;;  %1393 = vst [vmem:[%s2536_s2 + $0x98] sm:$0xff] (!%p1865_p11), %v1361_v8  ;;  %v1363_v13 = vld [vmem:[#allocation2 + $0xa8] sm:$0xff] (!%p1865_p11)  ;;  %v2453_v15 = vld [vmem:[#allocation2 + $0xb8] sm:$0xff] (!%p1865_p11) }
 0x18e   : > { %v1268_v20 = vadd.f32 %v1267_v19, %v1154_v17  ;;  %v1269_v23 = vpop.f32.mrb[30].mxu0  ;;  %v1158_v26 = vpop.f32.mrb[31].mxu1  ;;  %1341 = sbr.rel (%p1865_p11) target bundleno = 445 (0x1bd), region = 59  ;;  %1394 = vst [vmem:[%s2536_s2 + $0xa0] sm:$0xff] (!%p1865_p11), %v2441_v9  ;;  %v1430_v17 = vadd.f32 (!%p1865_p11), %v1429_v5, %v1351_v53  ;;  %1395 = vst [vmem:[%s2536_s2 + $0xa8] sm:$0xff] (!%p1865_p11), %v1363_v13  ;;  %v1491_v53 = vmul.f32 (!%p1865_p11), %v2441_v9, %v2441_v9 }
 0x18f   : > { %v1302_v24 = vadd.f32 %v1266_v16, %v468_v14  ;;  %v1270_v25 = vadd.f32 %v1269_v23, %v1156_v21  ;;  %v1271_v28 = vpop.f32.mrb[31].mxu0  ;;  %v1364_v14 = vld [vmem:[#allocation2 + $0xb0] sm:$0xff] (!%p1865_p11)  ;;  %v1526_v16 = vadd.f32 (!%p1865_p11), %v1525_v4, %v1478_v58  ;;  %1397 = vst [vmem:[%s2536_s2 + $0xb8] sm:$0xff] (!%p1865_p11), %v2453_v15  ;;  %v1410_v23 = vadd.f32 (!%p1865_p11), %v1409_v11, %v1352_v54 }
 0x190   : > { %v1303_v29 = vadd.f32 %v1268_v20, %v469_v18  ;;  %v1272_v30 = vadd.f32 %v1271_v28, %v1158_v26  ;;  %v1482_v18 = vmul.f32 (!%p1865_p11), %v1353_v55, %v1353_v55  ;;  %1396 = vst [vmem:[%s2536_s2 + $0xb0] sm:$0xff] (!%p1865_p11), %v1364_v14  ;;  %v1366_v19 = vld [vmem:[#allocation2 + $0xc0] sm:$0xff] (!%p1865_p11)  ;;  %v1492_v56 = vmul.f32 (!%p1865_p11), %v1363_v13, %v1363_v13 }
 0x191   : > { %1334 = vst [vmem:[#allocation2 + $0xe0] sm:$0xff] %v1302_v24  ;;  %v1304_v31 = vadd.f32 %v1270_v25, %v470_v22  ;;  %v1367_v20 = vld [vmem:[#allocation2 + $0xc8] sm:$0xff] (!%p1865_p11)  ;;  %v1506_v22 = vadd.f32 (!%p1865_p11), %v1505_v10, %v1479_v0  ;;  %v1483_v24 = vmul.f32 (!%p1865_p11), %v1354_v59, %v1354_v59  ;;  %1398 = vst [vmem:[%s2536_s2 + $0xc0] sm:$0xff] (!%p1865_p11), %v1366_v19 }
 0x192   : > { %1335 = vst [vmem:[#allocation2 + $0xe8] sm:$0xff] %v1303_v29  ;;  %v1305_v32 = vadd.f32 %v1272_v30, %v471_v27  ;;  %v2465_v21 = vld [vmem:[#allocation2 + $0xd0] sm:$0xff] (!%p1865_p11)  ;;  %1399 = vst [vmem:[%s2536_s2 + $0xc8] sm:$0xff] (!%p1865_p11), %v1367_v20  ;;  %v1527_v28 = vadd.f32 (!%p1865_p11), %v1526_v16, %v1480_v6  ;;  %v1431_v29 = vadd.f32 (!%p1865_p11), %v1430_v17, %v1353_v55 }
 0x193   : > { %1336 = vst [vmem:[#allocation2 + $0xf0] sm:$0xff] %v1304_v31  ;;  %1400 = vst [vmem:[%s2536_s2 + $0xd0] sm:$0xff] (!%p1865_p11), %v2465_v21  ;;  %v1369_v25 = vld [vmem:[#allocation2 + $0xd8] sm:$0xff] (!%p1865_p11)  ;;  %v1484_v30 = vmul.f32 (!%p1865_p11), %v1355_v60, %v1355_v60  ;;  %v1507_v33 = vadd.f32 (!%p1865_p11), %v1506_v22, %v1481_v12  ;;  %v1411_v34 = vadd.f32 (!%p1865_p11), %v1410_v23, %v1354_v59 }
 0x194   : > { %1337 = vst [vmem:[#allocation2 + $0xf8] sm:$0xff] %v1305_v32  ;;  %1401 = vst [vmem:[%s2536_s2 + $0xd8] sm:$0xff] (!%p1865_p11), %v1369_v25  ;;  %v1528_v36 = vadd.f32 (!%p1865_p11), %v1527_v28, %v1482_v18  ;;  %v1432_v37 = vadd.f32 (!%p1865_p11), %v1431_v29, %v1355_v60  ;;  %v1493_v59 = vmul.f32 (!%p1865_p11), %v1364_v14, %v1364_v14 }
 0x195   : > { %v1508_v39 = vadd.f32 %v1507_v33, %v1483_v24  ;;  %v1412_v40 = vadd.f32 %v1411_v34, %v2417_v61  ;;  %v1494_v62 = vmul.f32 %v2453_v15, %v2453_v15  ;;  %v1496_v4 = vmul.f32 %v1367_v20, %v1367_v20 }
 0x196   : > { %v1529_v42 = vadd.f32 %v1528_v36, %v1484_v30  ;;  %v1433_v43 = vadd.f32 %v1432_v37, %v1357_v1  ;;  %v1495_v1 = vmul.f32 %v1366_v19, %v1366_v19  ;;  %v1498_v10 = vmul.f32 %v1369_v25, %v1369_v25 }
 0x197   : > { %v1509_v45 = vadd.f32 %v1508_v39, %v1485_v35  ;;  %v1413_v46 = vadd.f32 %v1412_v40, %v1358_v2  ;;  %v2135_v39 = vmov 1966171168  }
 0x198   : > { %v1370_v26 = vld [vmem:[#allocation2 + $0xe0] sm:$0xff]  ;;  %v1530_v48 = vadd.f32 %v1529_v42, %v1486_v38  ;;  %v1434_v49 = vadd.f32 %v1433_v43, %v2429_v3  ;;  %v1452_v40 = vunpack.c.l.s4 %v2135_v39 }
 0x199   : > { %v2477_v27 = vld [vmem:[#allocation2 + $0xe8] sm:$0xff]  ;;  %1402 = vst [vmem:[%s2536_s2 + $0xe0] sm:$0xff] %v1370_v26  ;;  %v1510_v51 = vadd.f32 %v1509_v45, %v1487_v41  ;;  %v1414_v52 = vadd.f32 %v1413_v46, %v1360_v7  ;;  %v1497_v7 = vmul.f32 %v2465_v21, %v2465_v21 }
 0x19a   : > { %1403 = vst [vmem:[%s2536_s2 + $0xe8] sm:$0xff] %v2477_v27  ;;  %v1372_v31 = vld [vmem:[#allocation2 + $0xf0] sm:$0xff]  ;;  %v1531_v54 = vadd.f32 %v1530_v48, %v1488_v44  ;;  %v1435_v55 = vadd.f32 %v1434_v49, %v1361_v8 }
 0x19b   : > { %v1373_v32 = vld [vmem:[#allocation2 + $0xf8] sm:$0xff]  ;;  %1404 = vst [vmem:[%s2536_s2 + $0xf0] sm:$0xff] %v1372_v31  ;;  %v1511_v57 = vadd.f32 %v1510_v51, %v1489_v47  ;;  %v1415_v58 = vadd.f32 %v1414_v52, %v2441_v9  ;;  %v1501_v22 = vmul.f32 %v1372_v31, %v1372_v31 }
 0x19c   : > { %1405 = vst [vmem:[%s2536_s2 + $0xf8] sm:$0xff] %v1373_v32  ;;  %v1532_v60 = vadd.f32 %v1531_v54, %v1490_v50  ;;  %v1436_v61 = vadd.f32 %v1435_v55, %v1363_v13  ;;  %v1499_v13 = vmul.f32 %v1370_v26, %v1370_v26  ;;  %v1502_v24 = vmul.f32 %v1373_v32, %v1373_v32 }
 0x19d   : > { %v1512_v63 = vadd.f32 %v1511_v57, %v1491_v53  ;;  %v1416_v0 = vadd.f32 %v1415_v58, %v1364_v14  ;;  %v1500_v14 = vmul.f32 %v2477_v27, %v2477_v27 }
 0x19e   : > { %v1533_v2 = vadd.f32 %v1532_v60, %v1492_v56  ;;  %v1437_v3 = vadd.f32 %v1436_v61, %v2453_v15 }
 0x19f   : > { %v1513_v5 = vadd.f32 %v1512_v63, %v1493_v59  ;;  %v1417_v6 = vadd.f32 %v1416_v0, %v1366_v19 }
 0x1a0   : > { %v1534_v8 = vadd.f32 %v1533_v2, %v1494_v62  ;;  %v1438_v9 = vadd.f32 %v1437_v3, %v1367_v20 }
 0x1a1   : > { %v1514_v11 = vadd.f32 %v1513_v5, %v1495_v1  ;;  %v1418_v12 = vadd.f32 %v1417_v6, %v2465_v21 }
 0x1a2   : > { %v1535_v16 = vadd.f32 %v1534_v8, %v1496_v4  ;;  %v1439_v17 = vadd.f32 %v1438_v9, %v1369_v25 }
 0x1a3   : > { %v1515_v18 = vadd.f32 %v1514_v11, %v1497_v7  ;;  %v1419_v15 = vadd.f32 %v1418_v12, %v1370_v26  ;;  %v1454_v26 = vlaneseq }
 0x1a4   : > { %v1536_v23 = vadd.f32 %v1535_v16, %v1498_v10  ;;  %v1440_v19 = vadd.f32 %v1439_v17, %v2477_v27 }
 0x1a5   : > { %v1516_v28 = vadd.f32 %v1515_v18, %v1499_v13  ;;  %v1420_v29 = vadd.f32 %v1419_v15, %v1372_v31  ;;  %v1455_v47 = vshrl.u32 %v1454_v26, 7  ;;  %vm1468_vm0 = vcmp.lt.s32.totalorder %v1454_v26, 256 }
 0x1a6   : > { %v1537_v20 = vadd.f32 %v1536_v23, %v1500_v14  ;;  %v1441_v30 = vadd.f32 %v1440_v19, %v1373_v32  ;;  %v1453_v32 = vunpack.c.0.s8 %v1452_v40 }
 0x1a7   : > { %v1421_v33 = vrot.slane %v1420_v29, 4  ;;  %v1517_v34 = vadd.f32 %v1516_v28, %v1501_v22 }
 0x1a8   : > { %v1442_v21 = vrot.slane %v1441_v30, 4  ;;  %v1538_v35 = vadd.f32 %v1537_v20, %v1502_v24  ;;  %v1456_v55 = vsub.s32 %v1453_v32, %v1455_v47 }
 0x1a9   : > { %v1422_v36 = vadd.f32 %v1421_v33, %v1420_v29  ;;  %v1518_v25 = vrot.slane %v1517_v34, 4 }
 0x1aa   : > { %v1443_v37 = vadd.f32 %v1442_v21, %v1441_v30  ;;  %v1539_v38 = vrot.slane %v1538_v35, 4 }
 0x1ab   : > { %v1423_v41 = vrot.slane %v1422_v36, 2  ;;  %v1519_v42 = vadd.f32 %v1518_v25, %v1517_v34 }
 0x1ac   : > { %v1444_v43 = vrot.slane %v1443_v37, 2  ;;  %v1540_v27 = vadd.f32 %v1539_v38, %v1538_v35 }
 0x1ad   : > { %v1424_v44 = vadd.f32 %v1423_v41, %v1422_v36  ;;  %v1520_v45 = vrot.slane %v1519_v42, 2 }
 0x1ae   : > { %v1445_v31 = vadd.f32 %v1444_v43, %v1443_v37  ;;  %v1541_v46 = vrot.slane %v1540_v27, 2 }
 0x1af   : > { %v1425_v48 = vrot.slane %v1424_v44, 1  ;;  %v1521_v49 = vadd.f32 %v1520_v45, %v1519_v42 }
 0x1b0   : > { %v1446_v50 = vrot.slane %v1445_v31, 1  ;;  %v1542_v51 = vadd.f32 %v1541_v46, %v1540_v27 }
 0x1b1   : > { %v1426_v52 = vadd.f32 %v1425_v48, %v1424_v44  ;;  %v1522_v53 = vrot.slane %v1521_v49, 1 }
 0x1b2   : > { %v1447_v54 = vadd.f32 %v1446_v50, %v1445_v31  ;;  %v1543_v56 = vrot.slane %v1542_v51, 1 }
 0x1b3   : > { %v1523_v57 = vadd.f32 %v1522_v53, %v1521_v49 }
 0x1b4   : > { %v1450_v58 = vcombine.low %v1426_v52, %v1447_v54  ;;  %v1544_v59 = vadd.f32 %v1543_v56, %v1542_v51 }
 0x1b6   : > { %v1457_v60 = vrot.slane %v1450_v58, %v1456_v55  ;;  %v1547_v61 = vcombine.low %v1523_v57, %v1544_v59 }
 0x1b8   : > { %v1464_v62 = vrot.slane %v1457_v60, %v1456_v55  ;;  %v1554_v63 = vrot.slane %v1547_v61, %v1456_v55 }
 0x1ba   : > { %1470 = vst.msk [vmem:[%s2537_s3] sm:$0x3] %vm1468_vm0, %v1464_v62  ;;  %v1561_v0 = vrot.slane %v1554_v63, %v1456_v55 }
 0x1bc   : > { %1563 = vst.msk [vmem:[%s2538_s4] sm:$0x3] %vm1468_vm0, %v1561_v0 }
 0x1bd PF: > { %s15_s19 = sadd.s32 1, %s2132_s19   ;;  %s2539_s15 = smov %s2120_s16 }
 0x1be   : > { %p12_p12 = scmp.ge.s32.totalorder %s15_s19, 6   ;;  %s2540_s16 = smov %s2196_s23 }
 0x1bf   : > { %s2541_s17 = smov %s2128_s18  ;;  %s2542_s18 = smov %s2544_s20 }
 0x1c0   :  { %14 = sbr.rel (!%p12_p12) target bundleno = 3 (0x3), region = 121 }

// kernel: discriminator_forward.12
= control target key start
LH: loop header
LB: loop body
LE: loop exit
PB: predicated region body
PF: predicated region fallthrough
CT: control target
= control target key end

     0   :  { %v48_v0 = vlaneseq  ;;  %s621_s1 = inlined_call_operand.vmem [shape: f32[1,256], index: 1, kind: input, shape index: {}]   ;;  %s622_s2 = inlined_call_operand.vmem [shape: f32[1,256], index: 2, kind: input, shape index: {}]   ;;  %s623_s0 = inlined_call_operand.vmem [shape: f32[128,256], index: 0, kind: input, shape index: {}]   ;;  %s624_s3 = inlined_call_operand.vmem [shape: bf16[128,256], index: 3, kind: output, shape index: {}]  }
   0x1   :  { %v46_v2 = vld [vmem:[%s621_s1] sm:$0x3]  ;;  %v15_v5 = vld [vmem:[%s623_s0 + $0x8] sm:$0xff]  ;;  %v16_v8 = vld [vmem:[%s623_s0 + $0x10] sm:$0xff] }
   0x2   :  { %v49_v1 = vshrl.u32 %v48_v0, 7  ;;  %v90_v3 = vld [vmem:[%s622_s2] sm:$0x3]  ;;  %v17_v9 = vld [vmem:[%s623_s0 + $0x18] sm:$0xff]  ;;  %v19_v15 = vld [vmem:[%s623_s0 + $0x28] sm:$0xff] }
   0x3   :  { %v14_v4 = vld [vmem:[%s623_s0] sm:$0xff]  ;;  %v20_v16 = vld [vmem:[%s623_s0 + $0x30] sm:$0xff]  ;;  %v21_v17 = vld [vmem:[%s623_s0 + $0x38] sm:$0xff] }
   0x4   :  { %v50_v6 = vsub.s32 0, %v49_v1  ;;  %v54_v7 = vsub.s32 1, %v49_v1  ;;  %v18_v10 = vld [vmem:[%s623_s0 + $0x20] sm:$0xff]  ;;  %v23_v45 = vld [vmem:[%s623_s0 + $0x48] sm:$0xff]  ;;  %v24_v46 = vld [vmem:[%s623_s0 + $0x50] sm:$0xff] }
   0x5   :  { %v22_v40 = vld [vmem:[%s623_s0 + $0x40] sm:$0xff]  ;;  %v25_v47 = vld [vmem:[%s623_s0 + $0x58] sm:$0xff]  ;;  %v27_v59 = vld [vmem:[%s623_s0 + $0x68] sm:$0xff] }
   0x6   :  { %v419_v11 = vrot.slane %v46_v2, %v50_v6  ;;  %v421_v12 = vrot.slane %v46_v2, %v54_v7  ;;  %v423_v13 = vrot.slane %v90_v3, %v50_v6  ;;  %v425_v14 = vrot.slane %v90_v3, %v54_v7  ;;  %v26_v58 = vld [vmem:[%s623_s0 + $0x60] sm:$0xff]  ;;  %v28_v7 = vld [vmem:[%s623_s0 + $0x70] sm:$0xff] }
   0x8   :  { %v58_v18 = vmul.f32 %v419_v11, %v14_v4  ;;  %v59_v19 = vmul.f32 %v421_v12, %v15_v5  ;;  %v60_v20 = vmul.f32 %v419_v11, %v16_v8  ;;  %v61_v21 = vmul.f32 %v421_v12, %v17_v9  ;;  %v29_v8 = vld [vmem:[%s623_s0 + $0x78] sm:$0xff] }
   0x9   :  { %v62_v22 = vmul.f32 %v419_v11, %v18_v10  ;;  %v63_v23 = vmul.f32 %v421_v12, %v19_v15  ;;  %v64_v24 = vmul.f32 %v419_v11, %v20_v16  ;;  %v65_v25 = vmul.f32 %v421_v12, %v21_v17 }
   0xa   :  { %v102_v26 = vadd.f32 %v423_v13, %v58_v18  ;;  %v103_v27 = vadd.f32 %v425_v14, %v59_v19  ;;  %v104_v28 = vadd.f32 %v423_v13, %v60_v20  ;;  %v105_v29 = vadd.f32 %v425_v14, %v61_v21 }
   0xb   :  { %v106_v30 = vadd.f32 %v423_v13, %v62_v22  ;;  %v107_v31 = vadd.f32 %v425_v14, %v63_v23  ;;  %v108_v32 = vadd.f32 %v423_v13, %v64_v24  ;;  %v109_v33 = vadd.f32 %v425_v14, %v65_v25  ;;  %v30_v22 = vld [vmem:[%s623_s0 + $0x80] sm:$0xff]  ;;  %v31_v23 = vld [vmem:[%s623_s0 + $0x88] sm:$0xff] }
   0xc   :  { %vm134_vm0 = vcmp.ge.f32.partialorder %v102_v26, 0.0  ;;  %vm135_vm1 = vcmp.ge.f32.partialorder %v103_v27, 0.0  ;;  %v166_v34 = vmul.f32 0.2, %v102_v26  ;;  %v167_v35 = vmul.f32 0.2, %v103_v27 }
   0xd   :  { %vm136_vm2 = vcmp.ge.f32.partialorder %v104_v28, 0.0  ;;  %vm137_vm3 = vcmp.ge.f32.partialorder %v105_v29, 0.0  ;;  %v168_v36 = vmul.f32 0.2, %v104_v28  ;;  %v169_v37 = vmul.f32 0.2, %v105_v29 }
   0xe   :  { %v198_v38 = vsel %vm134_vm0, %v102_v26, %v166_v34  ;;  %v199_v39 = vsel %vm135_vm1, %v103_v27, %v167_v35  ;;  %vm138_vm4 = vcmp.ge.f32.partialorder %v106_v30, 0.0  ;;  %vm139_vm5 = vcmp.ge.f32.partialorder %v107_v31, 0.0  ;;  %v32_v27 = vld [vmem:[%s623_s0 + $0x90] sm:$0xff] }
   0xf   :  { %v362_v41 = vpack.c.bf16 %v199_v39, %v198_v38  ;;  %v200_v42 = vsel %vm136_vm2, %v104_v28, %v168_v36  ;;  %v201_v43 = vsel %vm137_vm3, %v105_v29, %v169_v37  ;;  %v170_v44 = vmul.f32 0.2, %v106_v30  ;;  %v33_v28 = vld [vmem:[%s623_s0 + $0x98] sm:$0xff] }
  0x10   :  { %v363_v48 = vpack.c.bf16 %v201_v43, %v200_v42  ;;  %v171_v49 = vmul.f32 0.2, %v107_v31  ;;  %vm140_vm6 = vcmp.ge.f32.partialorder %v108_v32, 0.0  ;;  %vm141_vm7 = vcmp.ge.f32.partialorder %v109_v33, 0.0 }
  0x11   :  { %326 = vst [vmem:[%s624_s3] sm:$0xff] %v362_v41  ;;  %v202_v50 = vsel %vm138_vm4, %v106_v30, %v170_v44  ;;  %v172_v51 = vmul.f32 0.2, %v108_v32  ;;  %v173_v52 = vmul.f32 0.2, %v109_v33  ;;  %v66_v53 = vmul.f32 %v419_v11, %v22_v40  ;;  %v34_v40 = vld [vmem:[%s623_s0 + $0xa0] sm:$0xff]  ;;  %v35_v41 = vld [vmem:[%s623_s0 + $0xa8] sm:$0xff] }
  0x12   :  { %327 = vst [vmem:[%s624_s3 + $0x8] sm:$0xff] %v363_v48  ;;  %v203_v54 = vsel %vm139_vm5, %v107_v31, %v171_v49  ;;  %v67_v55 = vmul.f32 %v421_v12, %v23_v45  ;;  %v68_v56 = vmul.f32 %v419_v11, %v24_v46  ;;  %v69_v57 = vmul.f32 %v421_v12, %v25_v47 }
  0x13   :  { %v364_v60 = vpack.c.bf16 %v203_v54, %v202_v50  ;;  %v204_v61 = vsel %vm140_vm6, %v108_v32, %v172_v51  ;;  %v205_v62 = vsel %vm141_vm7, %v109_v33, %v173_v52  ;;  %v110_v63 = vadd.f32 %v423_v13, %v66_v53  ;;  %v36_v54 = vld [vmem:[%s623_s0 + $0xb0] sm:$0xff] }
  0x14   :  { %v365_v0 = vpack.c.bf16 %v205_v62, %v204_v61  ;;  %v111_v1 = vadd.f32 %v425_v14, %v67_v55  ;;  %v112_v2 = vadd.f32 %v423_v13, %v68_v56  ;;  %v113_v3 = vadd.f32 %v425_v14, %v69_v57  ;;  %v37_v55 = vld [vmem:[%s623_s0 + $0xb8] sm:$0xff] }
  0x15   :  { %328 = vst [vmem:[%s624_s3 + $0x10] sm:$0xff] %v364_v60  ;;  %vm142_vm8 = vcmp.ge.f32.partialorder %v110_v63, 0.0  ;;  %v174_v4 = vmul.f32 0.2, %v110_v63  ;;  %v70_v5 = vmul.f32 %v419_v11, %v26_v58  ;;  %v71_v6 = vmul.f32 %v421_v12, %v27_v59 }
  0x16   :  { %329 = vst [vmem:[%s624_s3 + $0x18] sm:$0xff] %v365_v0  ;;  %vm143_vm9 = vcmp.ge.f32.partialorder %v111_v1, 0.0  ;;  %v175_v9 = vmul.f32 0.2, %v111_v1  ;;  %vm144_vm10 = vcmp.ge.f32.partialorder %v112_v2, 0.0  ;;  %vm145_vm11 = vcmp.ge.f32.partialorder %v113_v3, 0.0 }
  0x17   :  { %v206_v10 = vsel %vm142_vm8, %v110_v63, %v174_v4  ;;  %v176_v15 = vmul.f32 0.2, %v112_v2  ;;  %v177_v16 = vmul.f32 0.2, %v113_v3  ;;  %v114_v17 = vadd.f32 %v423_v13, %v70_v5 }
  0x18   :  { %v207_v18 = vsel %vm143_vm9, %v111_v1, %v175_v9  ;;  %v115_v19 = vadd.f32 %v425_v14, %v71_v6  ;;  %v72_v20 = vmul.f32 %v419_v11, %v28_v7  ;;  %v73_v21 = vmul.f32 %v421_v12, %v29_v8  ;;  %v40_v7 = vld [vmem:[%s623_s0 + $0xd0] sm:$0xff]  ;;  %v41_v8 = vld [vmem:[%s623_s0 + $0xd8] sm:$0xff] }
  0x19   :  { %v366_v24 = vpack.c.bf16 %v207_v18, %v206_v10  ;;  %v208_v25 = vsel %vm144_vm10, %v112_v2, %v176_v15  ;;  %v209_v26 = vsel %vm145_vm11, %v113_v3, %v177_v16  ;;  %vm146_vm12 = vcmp.ge.f32.partialorder %v114_v17, 0.0  ;;  %v38_v2 = vld [vmem:[%s623_s0 + $0xc0] sm:$0xff]  ;;  %v39_v3 = vld [vmem:[%s623_s0 + $0xc8] sm:$0xff] }
  0x1a   :  { %v367_v29 = vpack.c.bf16 %v209_v26, %v208_v25  ;;  %vm147_vm13 = vcmp.ge.f32.partialorder %v115_v19, 0.0  ;;  %v178_v30 = vmul.f32 0.2, %v114_v17  ;;  %v179_v31 = vmul.f32 0.2, %v115_v19  ;;  %v43_v25 = vld [vmem:[%s623_s0 + $0xe8] sm:$0xff] }
  0x1b   :  { %330 = vst [vmem:[%s624_s3 + $0x20] sm:$0xff] %v366_v24  ;;  %v116_v32 = vadd.f32 %v423_v13, %v72_v20  ;;  %v117_v33 = vadd.f32 %v425_v14, %v73_v21  ;;  %v74_v34 = vmul.f32 %v419_v11, %v30_v22  ;;  %v75_v35 = vmul.f32 %v421_v12, %v31_v23  ;;  %v42_v24 = vld [vmem:[%s623_s0 + $0xe0] sm:$0xff] }
  0x1c   :  { %331 = vst [vmem:[%s624_s3 + $0x28] sm:$0xff] %v367_v29  ;;  %v210_v36 = vsel %vm146_vm12, %v114_v17, %v178_v30  ;;  %v211_v37 = vsel %vm147_vm13, %v115_v19, %v179_v31  ;;  %v76_v38 = vmul.f32 %v419_v11, %v32_v27  ;;  %v77_v39 = vmul.f32 %v421_v12, %v33_v28 }
  0x1d   :  { %v368_v42 = vpack.c.bf16 %v211_v37, %v210_v36  ;;  %vm148_vm14 = vcmp.ge.f32.partialorder %v116_v32, 0.0  ;;  %vm149_vm15 = vcmp.ge.f32.partialorder %v117_v33, 0.0  ;;  %v180_v43 = vmul.f32 0.2, %v116_v32 }
  0x1e   :  { %v181_v44 = vmul.f32 0.2, %v117_v33  ;;  %v118_v45 = vadd.f32 %v423_v13, %v74_v34  ;;  %v119_v46 = vadd.f32 %v425_v14, %v75_v35  ;;  %v120_v47 = vadd.f32 %v423_v13, %v76_v38  ;;  %v44_v38 = vld [vmem:[%s623_s0 + $0xf0] sm:$0xff] }
  0x1f   :  { %332 = vst [vmem:[%s624_s3 + $0x30] sm:$0xff] %v368_v42  ;;  %v212_v48 = vsel %vm148_vm14, %v116_v32, %v180_v43  ;;  %v121_v49 = vadd.f32 %v425_v14, %v77_v39  ;;  %v78_v50 = vmul.f32 %v419_v11, %v34_v40  ;;  %v79_v51 = vmul.f32 %v421_v12, %v35_v41  ;;  %v45_v39 = vld [vmem:[%s623_s0 + $0xf8] sm:$0xff] }
  0x20   :  { %v213_v52 = vsel %vm149_vm15, %v117_v33, %v181_v44  ;;  %vm150_vm0 = vcmp.ge.f32.partialorder %v118_v45, 0.0  ;;  %vm151_vm1 = vcmp.ge.f32.partialorder %v119_v46, 0.0  ;;  %v182_v53 = vmul.f32 0.2, %v118_v45 }
  0x21   :  { %v369_v56 = vpack.c.bf16 %v213_v52, %v212_v48  ;;  %v183_v57 = vmul.f32 0.2, %v119_v46  ;;  %vm152_vm2 = vcmp.ge.f32.partialorder %v120_v47, 0.0  ;;  %vm153_vm3 = vcmp.ge.f32.partialorder %v121_v49, 0.0 }
  0x22   :  { %v214_v58 = vsel %vm150_vm0, %v118_v45, %v182_v53  ;;  %v184_v59 = vmul.f32 0.2, %v120_v47  ;;  %v185_v60 = vmul.f32 0.2, %v121_v49  ;;  %v122_v61 = vadd.f32 %v423_v13, %v78_v50 }
  0x23   :  { %333 = vst [vmem:[%s624_s3 + $0x38] sm:$0xff] %v369_v56  ;;  %v215_v62 = vsel %vm151_vm1, %v119_v46, %v183_v57  ;;  %v123_v63 = vadd.f32 %v425_v14, %v79_v51  ;;  %v80_v0 = vmul.f32 %v419_v11, %v36_v54  ;;  %v81_v1 = vmul.f32 %v421_v12, %v37_v55 }
  0x24   :  { %v370_v4 = vpack.c.bf16 %v215_v62, %v214_v58  ;;  %v216_v5 = vsel %vm152_vm2, %v120_v47, %v184_v59  ;;  %v217_v6 = vsel %vm153_vm3, %v121_v49, %v185_v60  ;;  %vm154_vm4 = vcmp.ge.f32.partialorder %v122_v61, 0.0 }
  0x25   :  { %v371_v9 = vpack.c.bf16 %v217_v6, %v216_v5  ;;  %vm155_vm5 = vcmp.ge.f32.partialorder %v123_v63, 0.0  ;;  %v186_v10 = vmul.f32 0.2, %v122_v61  ;;  %v187_v15 = vmul.f32 0.2, %v123_v63 }
  0x26   :  { %334 = vst [vmem:[%s624_s3 + $0x40] sm:$0xff] %v370_v4  ;;  %v124_v16 = vadd.f32 %v423_v13, %v80_v0  ;;  %v125_v17 = vadd.f32 %v425_v14, %v81_v1  ;;  %v82_v18 = vmul.f32 %v419_v11, %v38_v2  ;;  %v83_v19 = vmul.f32 %v421_v12, %v39_v3 }
  0x27   :  { %335 = vst [vmem:[%s624_s3 + $0x48] sm:$0xff] %v371_v9  ;;  %v218_v20 = vsel %vm154_vm4, %v122_v61, %v186_v10  ;;  %v219_v21 = vsel %vm155_vm5, %v123_v63, %v187_v15  ;;  %v84_v22 = vmul.f32 %v419_v11, %v40_v7  ;;  %v85_v23 = vmul.f32 %v421_v12, %v41_v8 }
  0x28   :  { %v372_v26 = vpack.c.bf16 %v219_v21, %v218_v20  ;;  %vm156_vm6 = vcmp.ge.f32.partialorder %v124_v16, 0.0  ;;  %vm157_vm7 = vcmp.ge.f32.partialorder %v125_v17, 0.0  ;;  %v188_v27 = vmul.f32 0.2, %v124_v16 }
  0x29   :  { %v189_v28 = vmul.f32 0.2, %v125_v17  ;;  %v126_v29 = vadd.f32 %v423_v13, %v82_v18  ;;  %v127_v30 = vadd.f32 %v425_v14, %v83_v19  ;;  %v128_v31 = vadd.f32 %v423_v13, %v84_v22 }
  0x2a   :  { %336 = vst [vmem:[%s624_s3 + $0x50] sm:$0xff] %v372_v26  ;;  %v220_v32 = vsel %vm156_vm6, %v124_v16, %v188_v27  ;;  %v129_v33 = vadd.f32 %v425_v14, %v85_v23  ;;  %v86_v34 = vmul.f32 %v419_v11, %v42_v24  ;;  %v87_v35 = vmul.f32 %v421_v12, %v43_v25 }
  0x2b   :  { %v221_v36 = vsel %vm157_vm7, %v125_v17, %v189_v28  ;;  %vm158_vm8 = vcmp.ge.f32.partialorder %v126_v29, 0.0  ;;  %vm159_vm9 = vcmp.ge.f32.partialorder %v127_v30, 0.0  ;;  %v190_v37 = vmul.f32 0.2, %v126_v29 }
  0x2c   :  { %v373_v40 = vpack.c.bf16 %v221_v36, %v220_v32  ;;  %v191_v41 = vmul.f32 0.2, %v127_v30  ;;  %vm160_vm10 = vcmp.ge.f32.partialorder %v128_v31, 0.0  ;;  %vm161_vm11 = vcmp.ge.f32.partialorder %v129_v33, 0.0 }
  0x2d   :  { %v222_v42 = vsel %vm158_vm8, %v126_v29, %v190_v37  ;;  %v192_v43 = vmul.f32 0.2, %v128_v31  ;;  %v193_v44 = vmul.f32 0.2, %v129_v33  ;;  %v130_v45 = vadd.f32 %v423_v13, %v86_v34 }
  0x2e   :  { %337 = vst [vmem:[%s624_s3 + $0x58] sm:$0xff] %v373_v40  ;;  %v223_v46 = vsel %vm159_vm9, %v127_v30, %v191_v41  ;;  %v131_v47 = vadd.f32 %v425_v14, %v87_v35  ;;  %v88_v48 = vmul.f32 %v419_v11, %v44_v38  ;;  %v89_v49 = vmul.f32 %v421_v12, %v45_v39 }
  0x2f   :  { %v374_v50 = vpack.c.bf16 %v223_v46, %v222_v42  ;;  %v224_v51 = vsel %vm160_vm10, %v128_v31, %v192_v43  ;;  %v225_v52 = vsel %vm161_vm11, %v129_v33, %v193_v44  ;;  %vm162_vm12 = vcmp.ge.f32.partialorder %v130_v45, 0.0 }
  0x30   :  { %v375_v53 = vpack.c.bf16 %v225_v52, %v224_v51  ;;  %vm163_vm13 = vcmp.ge.f32.partialorder %v131_v47, 0.0  ;;  %v194_v54 = vmul.f32 0.2, %v130_v45  ;;  %v195_v55 = vmul.f32 0.2, %v131_v47 }
  0x31   :  { %338 = vst [vmem:[%s624_s3 + $0x60] sm:$0xff] %v374_v50  ;;  %v132_v56 = vadd.f32 %v423_v13, %v88_v48  ;;  %v133_v57 = vadd.f32 %v425_v14, %v89_v49 }
  0x32   :  { %339 = vst [vmem:[%s624_s3 + $0x68] sm:$0xff] %v375_v53  ;;  %v226_v11 = vsel %vm162_vm12, %v130_v45, %v194_v54  ;;  %v227_v12 = vsel %vm163_vm13, %v131_v47, %v195_v55 }
  0x33   :  { %v376_v58 = vpack.c.bf16 %v227_v12, %v226_v11  ;;  %vm164_vm14 = vcmp.ge.f32.partialorder %v132_v56, 0.0  ;;  %vm165_vm15 = vcmp.ge.f32.partialorder %v133_v57, 0.0  ;;  %v196_v59 = vmul.f32 0.2, %v132_v56 }
  0x34   :  { %v197_v60 = vmul.f32 0.2, %v133_v57 }
  0x35   :  { %340 = vst [vmem:[%s624_s3 + $0x70] sm:$0xff] %v376_v58  ;;  %v228_v61 = vsel %vm164_vm14, %v132_v56, %v196_v59 }
  0x36   :  { %v229_v62 = vsel %vm165_vm15, %v133_v57, %v197_v60 }
  0x37   :  { %v377_v13 = vpack.c.bf16 %v229_v62, %v228_v61 }
  0x39   :  { %341 = vst [vmem:[%s624_s3 + $0x78] sm:$0xff] %v377_v13 }

// kernel: discriminator_forward.13
= control target key start
LH: loop header
LB: loop body
LE: loop exit
PB: predicated region body
PF: predicated region fallthrough
CT: control target
= control target key end

     0   :  { %s2351_s0 = inlined_call_operand.vmem [shape: bf16[32,4096], index: 0, kind: input, shape index: {}]   ;;  %s2352_s1 = inlined_call_operand.vmem [shape: bf16[4096,512], index: 1, kind: input, shape index: {}]   ;;  %s2353_s2 = inlined_call_operand.vmem [shape: f32[32,512], index: 2, kind: output, shape index: {0}]   ;;  %s2354_s3 = inlined_call_operand.vmem [shape: f32[1,1,512], index: 3, kind: output, shape index: {1}]   ;;  %s2355_s4 = inlined_call_operand.vmem [shape: f32[1,1,512], index: 4, kind: output, shape index: {2}]  }
   0x1   :  { %2358 = sst [smem:[#allocation8_spill]] %s2351_s0 }
   0x2   :  { %2359 = sst [smem:[#allocation9_spill]] %s2352_s1 }
   0x3   :  { %s1944_s15 = smov 0   ;;  %s1946_s16 = smov 0  }
   0x4   :  { %s1948_s17 = smov 0   ;;  %s1950_s18 = smov 0  }
   0x5   :  { %s1952_s19 = smov 0   ;;  %s1954_s20 = smov 0  }
   0x6   :  { %s1956_s21 = smov 0   ;;  %s1958_s22 = smov 0  }
   0x7   :  { %s1960_s23 = smov 0   ;;  %s1962_s24 = smov 0  }
   0x8   :  { %s1964_s25 = smov 0  }
   0x9 LB: > { %s1523_s26 = sadd.s32 4294967295, %s1915_s25   ;;  %s27_s27 = sadd.s32 1, %s1907_s23  ;;  %s1915_s25 = sphi %s1964_s25, %s15_s25   ;;  %s1911_s24 = sphi %s1962_s24, %s2378_s24   ;;  %s1907_s23 = sphi %s1960_s23, %s2377_s23   ;;  %s1903_s22 = sphi %s1958_s22, %s2376_s22   ;;  %s1899_s21 = sphi %s1956_s21, %s2375_s21   ;;  %s1895_s20 = sphi %s1954_s20, %s2374_s20   ;;  %s1891_s19 = sphi %s1952_s19, %s2373_s19   ;;  %s1887_s18 = sphi %s1950_s18, %s2372_s18   ;;  %s1883_s17 = sphi %s1948_s17, %s2371_s17   ;;  %s1879_s16 = sphi %s1946_s16, %s2370_s16   ;;  %s1875_s15 = sphi %s1944_s15, %s2369_s15  }
   0xa   : > { %p28_p0 = scmp.ge.s32.totalorder %s27_s27, 8  ;;  %s30_s28 = sadd.s32 1, %s1911_s24 }
   0xb   : > { %s43_s29 = sadd.s32 1, %s1895_s20  ;;  %p50_p1 = scmp.ne.s32.totalorder %s1895_s20, %s1891_s19 }
   0xc   : > { %s2380_s27 = smov (%p28_p0, %s27_s27), 0  ;;  %s2382_s28 = smov (!%p28_p0, %s30_s28), %s1911_s24 }
   0xd   : > { %2360 = sst [smem:[#allocation6_spill]] %s2380_s27  ;;  %s39_s30 = ssub.s32 %s1907_s23, %s2380_s27 }
   0xe   : > { %p51_p2 = scmp.eq.s32.totalorder %s1915_s25, 0  ;;  %p32_p3 = scmp.ge.s32.totalorder %s2382_s28, 2 }
   0xf   : > { %p41_p4 = scmp.eq.s32.totalorder %s39_s30, 0  ;;  %s71_s6 = sadd.s32 1, %s1887_s18 }
  0x10   : > { %p2011_p5 = por %p51_p2, %p50_p1  ;;  %s2384_s28 = smov (%p32_p3, %s2382_s28), 0 }
  0x11   : > { %2362 = sst [smem:[#allocation7_spill]] %s2384_s28  ;;  %s67_s8 = ssub.s32 %s1911_s24, %s2384_s28 }
  0x12   : > { %s2019_s7 = scalar_select %p41_p4, %s1895_s20, %s43_s29  }
  0x13   : > { %p78_p6 = scmp.ne.s32.totalorder %s1887_s18, %s1883_s17  ;;  %s68_s9 = sor.u32 %s67_s8, %s39_s30 }
  0x14   : > { %p97_p7 = scmp.eq.s32.totalorder %s67_s8, 0  ;;  %p69_p8 = scmp.eq.s32.totalorder %s68_s9, 0 }
  0x15   : > { %p2025_p9 = por %p78_p6, %p51_p2  ;;  %s99_s11 = sadd.s32 1, %s1879_s16 }
  0x16   : > { %p109_p10 = scmp.ne.s32.totalorder %s1879_s16, %s1875_s15  ;;  %p110_p11 = scmp.eq.s32.totalorder %s1523_s26, 15 }
  0x17   : > { %s2033_s12 = scalar_select %p69_p8, %s1887_s18, %s71_s6  }
  0x18   : > { %s2036_s13 = scalar_select %p97_p7, %s1879_s16, %s99_s11  }
  0x19   : > { %p2038_p12 = por %p110_p11, %p109_p10  ;;  %p1526_p13 = scmp.ge.s32.totalorder %s1915_s25, 16 }
  0x1b   : > { %188 = sbr.rel (%p1526_p13) target bundleno = 90 (0x5a), region = 16 }
  0x22   : > { %191 = sbr.rel (!%p2011_p5) target bundleno = 48 (0x30), region = 20  ;;  %s193_s29 = sand.u32 (%p2011_p5), 1, %s1895_s20  }
  0x23   : > { %s1620_s30 = sshll.u32 (%p2011_p5), %s1907_s23, 4  ;;  %s1527_s8 = sshll.u32 (%p2011_p5), %s193_s29, 6 }
  0x24   : > { %s2365_s0 = sld [smem:[#allocation8_spill]] (%p2011_p5)  ;;  %s195_s26 = scalar_lea.vmem (%p2011_p5), [#allocation3], %s1527_s8 }
  0x2a   : > { %s201_s11 = scalar_lea.vmem %s2365_s0, %s1620_s30 }
  0x2b   : > { %v214_v0 = vld [vmem:[%s201_s11] sm:$0xff]  ;;  %v216_v1 = vld [vmem:[%s201_s11 + $0x8] sm:$0xff] }
  0x2c   : > { %v218_v2 = vld [vmem:[%s201_s11 + $0x80] sm:$0xff]  ;;  %215 = vst [vmem:[%s195_s26] sm:$0xff] %v214_v0  ;;  %217 = vst [vmem:[%s195_s26 + $0x8] sm:$0xff] %v216_v1  ;;  %v220_v3 = vld [vmem:[%s201_s11 + $0x88] sm:$0xff] }
  0x2d   : > { %219 = vst [vmem:[%s195_s26 + $0x10] sm:$0xff] %v218_v2  ;;  %v222_v4 = vld [vmem:[%s201_s11 + $0x100] sm:$0xff]  ;;  %v224_v5 = vld [vmem:[%s201_s11 + $0x108] sm:$0xff]  ;;  %221 = vst [vmem:[%s195_s26 + $0x18] sm:$0xff] %v220_v3 }
  0x2e   : > { %223 = vst [vmem:[%s195_s26 + $0x20] sm:$0xff] %v222_v4  ;;  %225 = vst [vmem:[%s195_s26 + $0x28] sm:$0xff] %v224_v5  ;;  %v226_v6 = vld [vmem:[%s201_s11 + $0x180] sm:$0xff]  ;;  %v228_v7 = vld [vmem:[%s201_s11 + $0x188] sm:$0xff] }
  0x2f   : > { %227 = vst [vmem:[%s195_s26 + $0x30] sm:$0xff] %v226_v6  ;;  %229 = vst [vmem:[%s195_s26 + $0x38] sm:$0xff] %v228_v7 }
  0x30 PF: > { %235 = sbr.rel (!%p2025_p9) target bundleno = 90 (0x5a), region = 43  ;;  %s237_s5 = sand.u32 (%p2025_p9), 1, %s1887_s18  }
  0x31   : > { %s1532_s29 = sshll.u32 (%p2025_p9), %s1911_s24, 1  ;;  %s1530_s30 = sshll.u32 (%p2025_p9), %s237_s5, 9 }
  0x32   : > { %s1621_s8 = sshll.u32 (%p2025_p9), %s1907_s23, 8  ;;  %s2366_s1 = sld [smem:[#allocation9_spill]] (%p2025_p9) }
  0x33   : > { %s243_s6 = sadd.s32 (%p2025_p9), %s1621_s8, %s1532_s29  ;;  %s2063_s10 = scalar_lea.vmem (%p2025_p9), [#allocation4], %s1530_s30 }
  0x34   : > { %s1534_s9 = sshll.u32 (%p2025_p9), %s243_s6, 2 }
  0x38   : > { %s2058_s27 = scalar_lea.vmem %s2366_s1, %s1534_s9 }
  0x39   : > { %v399_v8 = vld [vmem:[%s2058_s27] sm:$0xff]  ;;  %v401_v9 = vld [vmem:[%s2058_s27 + $0x10] sm:$0xff] }
  0x3a   : > { %v403_v10 = vld [vmem:[%s2058_s27 + $0x20] sm:$0xff]  ;;  %400 = vst [vmem:[%s2063_s10] sm:$0xff] %v399_v8  ;;  %402 = vst [vmem:[%s2063_s10 + $0x8] sm:$0xff] %v401_v9  ;;  %v405_v11 = vld [vmem:[%s2058_s27 + $0x30] sm:$0xff] }
  0x3b   : > { %404 = vst [vmem:[%s2063_s10 + $0x10] sm:$0xff] %v403_v10  ;;  %v407_v12 = vld [vmem:[%s2058_s27 + $0x40] sm:$0xff]  ;;  %v409_v13 = vld [vmem:[%s2058_s27 + $0x50] sm:$0xff]  ;;  %406 = vst [vmem:[%s2063_s10 + $0x18] sm:$0xff] %v405_v11 }
  0x3c   : > { %408 = vst [vmem:[%s2063_s10 + $0x20] sm:$0xff] %v407_v12  ;;  %410 = vst [vmem:[%s2063_s10 + $0x28] sm:$0xff] %v409_v13  ;;  %v411_v14 = vld [vmem:[%s2058_s27 + $0x60] sm:$0xff]  ;;  %v413_v15 = vld [vmem:[%s2058_s27 + $0x70] sm:$0xff] }
  0x3d   : > { %v415_v16 = vld [vmem:[%s2058_s27 + $0x80] sm:$0xff]  ;;  %412 = vst [vmem:[%s2063_s10 + $0x30] sm:$0xff] %v411_v14  ;;  %414 = vst [vmem:[%s2063_s10 + $0x38] sm:$0xff] %v413_v15  ;;  %v417_v17 = vld [vmem:[%s2058_s27 + $0x90] sm:$0xff] }
  0x3e   : > { %416 = vst [vmem:[%s2063_s10 + $0x40] sm:$0xff] %v415_v16  ;;  %v419_v18 = vld [vmem:[%s2058_s27 + $0xa0] sm:$0xff]  ;;  %v421_v19 = vld [vmem:[%s2058_s27 + $0xb0] sm:$0xff]  ;;  %418 = vst [vmem:[%s2063_s10 + $0x48] sm:$0xff] %v417_v17 }
  0x3f   : > { %420 = vst [vmem:[%s2063_s10 + $0x50] sm:$0xff] %v419_v18  ;;  %422 = vst [vmem:[%s2063_s10 + $0x58] sm:$0xff] %v421_v19  ;;  %v423_v20 = vld [vmem:[%s2058_s27 + $0xc0] sm:$0xff]  ;;  %v425_v21 = vld [vmem:[%s2058_s27 + $0xd0] sm:$0xff] }
  0x40   : > { %v427_v22 = vld [vmem:[%s2058_s27 + $0xe0] sm:$0xff]  ;;  %424 = vst [vmem:[%s2063_s10 + $0x60] sm:$0xff] %v423_v20  ;;  %426 = vst [vmem:[%s2063_s10 + $0x68] sm:$0xff] %v425_v21  ;;  %v429_v23 = vld [vmem:[%s2058_s27 + $0xf0] sm:$0xff] }
  0x41   : > { %428 = vst [vmem:[%s2063_s10 + $0x70] sm:$0xff] %v427_v22  ;;  %v431_v24 = vld [vmem:[%s2058_s27 + $0x100] sm:$0xff]  ;;  %v433_v25 = vld [vmem:[%s2058_s27 + $0x110] sm:$0xff]  ;;  %430 = vst [vmem:[%s2063_s10 + $0x78] sm:$0xff] %v429_v23 }
  0x42   : > { %432 = vst [vmem:[%s2063_s10 + $0x80] sm:$0xff] %v431_v24  ;;  %434 = vst [vmem:[%s2063_s10 + $0x88] sm:$0xff] %v433_v25  ;;  %v435_v26 = vld [vmem:[%s2058_s27 + $0x120] sm:$0xff]  ;;  %v437_v27 = vld [vmem:[%s2058_s27 + $0x130] sm:$0xff] }
  0x43   : > { %v439_v28 = vld [vmem:[%s2058_s27 + $0x140] sm:$0xff]  ;;  %436 = vst [vmem:[%s2063_s10 + $0x90] sm:$0xff] %v435_v26  ;;  %438 = vst [vmem:[%s2063_s10 + $0x98] sm:$0xff] %v437_v27  ;;  %v441_v29 = vld [vmem:[%s2058_s27 + $0x150] sm:$0xff] }
  0x44   : > { %440 = vst [vmem:[%s2063_s10 + $0xa0] sm:$0xff] %v439_v28  ;;  %v443_v30 = vld [vmem:[%s2058_s27 + $0x160] sm:$0xff]  ;;  %v445_v31 = vld [vmem:[%s2058_s27 + $0x170] sm:$0xff]  ;;  %442 = vst [vmem:[%s2063_s10 + $0xa8] sm:$0xff] %v441_v29 }
  0x45   : > { %444 = vst [vmem:[%s2063_s10 + $0xb0] sm:$0xff] %v443_v30  ;;  %446 = vst [vmem:[%s2063_s10 + $0xb8] sm:$0xff] %v445_v31  ;;  %v447_v32 = vld [vmem:[%s2058_s27 + $0x180] sm:$0xff]  ;;  %v449_v33 = vld [vmem:[%s2058_s27 + $0x190] sm:$0xff] }
  0x46   : > { %v451_v34 = vld [vmem:[%s2058_s27 + $0x1a0] sm:$0xff]  ;;  %448 = vst [vmem:[%s2063_s10 + $0xc0] sm:$0xff] %v447_v32  ;;  %450 = vst [vmem:[%s2063_s10 + $0xc8] sm:$0xff] %v449_v33  ;;  %v453_v35 = vld [vmem:[%s2058_s27 + $0x1b0] sm:$0xff] }
  0x47   : > { %452 = vst [vmem:[%s2063_s10 + $0xd0] sm:$0xff] %v451_v34  ;;  %v455_v36 = vld [vmem:[%s2058_s27 + $0x1c0] sm:$0xff]  ;;  %v457_v37 = vld [vmem:[%s2058_s27 + $0x1d0] sm:$0xff]  ;;  %454 = vst [vmem:[%s2063_s10 + $0xd8] sm:$0xff] %v453_v35 }
  0x48   : > { %456 = vst [vmem:[%s2063_s10 + $0xe0] sm:$0xff] %v455_v36  ;;  %458 = vst [vmem:[%s2063_s10 + $0xe8] sm:$0xff] %v457_v37  ;;  %v459_v38 = vld [vmem:[%s2058_s27 + $0x1e0] sm:$0xff]  ;;  %v461_v39 = vld [vmem:[%s2058_s27 + $0x1f0] sm:$0xff] }
  0x49   : > { %v463_v40 = vld [vmem:[%s2058_s27 + $0x200] sm:$0xff]  ;;  %460 = vst [vmem:[%s2063_s10 + $0xf0] sm:$0xff] %v459_v38  ;;  %462 = vst [vmem:[%s2063_s10 + $0xf8] sm:$0xff] %v461_v39  ;;  %v465_v41 = vld [vmem:[%s2058_s27 + $0x210] sm:$0xff] }
  0x4a   : > { %464 = vst [vmem:[%s2063_s10 + $0x100] sm:$0xff] %v463_v40  ;;  %v467_v42 = vld [vmem:[%s2058_s27 + $0x220] sm:$0xff]  ;;  %v469_v43 = vld [vmem:[%s2058_s27 + $0x230] sm:$0xff]  ;;  %466 = vst [vmem:[%s2063_s10 + $0x108] sm:$0xff] %v465_v41 }
  0x4b   : > { %468 = vst [vmem:[%s2063_s10 + $0x110] sm:$0xff] %v467_v42  ;;  %470 = vst [vmem:[%s2063_s10 + $0x118] sm:$0xff] %v469_v43  ;;  %v471_v44 = vld [vmem:[%s2058_s27 + $0x240] sm:$0xff]  ;;  %v473_v45 = vld [vmem:[%s2058_s27 + $0x250] sm:$0xff] }
  0x4c   : > { %v475_v46 = vld [vmem:[%s2058_s27 + $0x260] sm:$0xff]  ;;  %472 = vst [vmem:[%s2063_s10 + $0x120] sm:$0xff] %v471_v44  ;;  %474 = vst [vmem:[%s2063_s10 + $0x128] sm:$0xff] %v473_v45  ;;  %v477_v47 = vld [vmem:[%s2058_s27 + $0x270] sm:$0xff] }
  0x4d   : > { %476 = vst [vmem:[%s2063_s10 + $0x130] sm:$0xff] %v475_v46  ;;  %v479_v48 = vld [vmem:[%s2058_s27 + $0x280] sm:$0xff]  ;;  %v481_v49 = vld [vmem:[%s2058_s27 + $0x290] sm:$0xff]  ;;  %478 = vst [vmem:[%s2063_s10 + $0x138] sm:$0xff] %v477_v47 }
  0x4e   : > { %480 = vst [vmem:[%s2063_s10 + $0x140] sm:$0xff] %v479_v48  ;;  %482 = vst [vmem:[%s2063_s10 + $0x148] sm:$0xff] %v481_v49  ;;  %v483_v50 = vld [vmem:[%s2058_s27 + $0x2a0] sm:$0xff]  ;;  %v485_v51 = vld [vmem:[%s2058_s27 + $0x2b0] sm:$0xff] }
  0x4f   : > { %v487_v52 = vld [vmem:[%s2058_s27 + $0x2c0] sm:$0xff]  ;;  %484 = vst [vmem:[%s2063_s10 + $0x150] sm:$0xff] %v483_v50  ;;  %486 = vst [vmem:[%s2063_s10 + $0x158] sm:$0xff] %v485_v51  ;;  %v489_v53 = vld [vmem:[%s2058_s27 + $0x2d0] sm:$0xff] }
  0x50   : > { %488 = vst [vmem:[%s2063_s10 + $0x160] sm:$0xff] %v487_v52  ;;  %v491_v54 = vld [vmem:[%s2058_s27 + $0x2e0] sm:$0xff]  ;;  %v493_v55 = vld [vmem:[%s2058_s27 + $0x2f0] sm:$0xff]  ;;  %490 = vst [vmem:[%s2063_s10 + $0x168] sm:$0xff] %v489_v53 }
  0x51   : > { %492 = vst [vmem:[%s2063_s10 + $0x170] sm:$0xff] %v491_v54  ;;  %494 = vst [vmem:[%s2063_s10 + $0x178] sm:$0xff] %v493_v55  ;;  %v495_v56 = vld [vmem:[%s2058_s27 + $0x300] sm:$0xff]  ;;  %v497_v57 = vld [vmem:[%s2058_s27 + $0x310] sm:$0xff] }
  0x52   : > { %v499_v58 = vld [vmem:[%s2058_s27 + $0x320] sm:$0xff]  ;;  %496 = vst [vmem:[%s2063_s10 + $0x180] sm:$0xff] %v495_v56  ;;  %498 = vst [vmem:[%s2063_s10 + $0x188] sm:$0xff] %v497_v57  ;;  %v501_v59 = vld [vmem:[%s2058_s27 + $0x330] sm:$0xff] }
  0x53   : > { %500 = vst [vmem:[%s2063_s10 + $0x190] sm:$0xff] %v499_v58  ;;  %v503_v60 = vld [vmem:[%s2058_s27 + $0x340] sm:$0xff]  ;;  %v505_v61 = vld [vmem:[%s2058_s27 + $0x350] sm:$0xff]  ;;  %502 = vst [vmem:[%s2063_s10 + $0x198] sm:$0xff] %v501_v59 }
  0x54   : > { %504 = vst [vmem:[%s2063_s10 + $0x1a0] sm:$0xff] %v503_v60  ;;  %506 = vst [vmem:[%s2063_s10 + $0x1a8] sm:$0xff] %v505_v61  ;;  %v507_v62 = vld [vmem:[%s2058_s27 + $0x360] sm:$0xff]  ;;  %v509_v63 = vld [vmem:[%s2058_s27 + $0x370] sm:$0xff] }
  0x55   : > { %v511_v0 = vld [vmem:[%s2058_s27 + $0x380] sm:$0xff]  ;;  %508 = vst [vmem:[%s2063_s10 + $0x1b0] sm:$0xff] %v507_v62  ;;  %510 = vst [vmem:[%s2063_s10 + $0x1b8] sm:$0xff] %v509_v63  ;;  %v513_v1 = vld [vmem:[%s2058_s27 + $0x390] sm:$0xff] }
  0x56   : > { %512 = vst [vmem:[%s2063_s10 + $0x1c0] sm:$0xff] %v511_v0  ;;  %v515_v2 = vld [vmem:[%s2058_s27 + $0x3a0] sm:$0xff]  ;;  %v517_v3 = vld [vmem:[%s2058_s27 + $0x3b0] sm:$0xff]  ;;  %514 = vst [vmem:[%s2063_s10 + $0x1c8] sm:$0xff] %v513_v1 }
  0x57   : > { %516 = vst [vmem:[%s2063_s10 + $0x1d0] sm:$0xff] %v515_v2  ;;  %518 = vst [vmem:[%s2063_s10 + $0x1d8] sm:$0xff] %v517_v3  ;;  %v519_v4 = vld [vmem:[%s2058_s27 + $0x3c0] sm:$0xff]  ;;  %v521_v5 = vld [vmem:[%s2058_s27 + $0x3d0] sm:$0xff] }
  0x58   : > { %v523_v6 = vld [vmem:[%s2058_s27 + $0x3e0] sm:$0xff]  ;;  %520 = vst [vmem:[%s2063_s10 + $0x1e0] sm:$0xff] %v519_v4  ;;  %522 = vst [vmem:[%s2063_s10 + $0x1e8] sm:$0xff] %v521_v5  ;;  %v525_v7 = vld [vmem:[%s2058_s27 + $0x3f0] sm:$0xff] }
  0x59   : > { %524 = vst [vmem:[%s2063_s10 + $0x1f0] sm:$0xff] %v523_v6  ;;  %526 = vst [vmem:[%s2063_s10 + $0x1f8] sm:$0xff] %v525_v7 }
  0x5a PF: > { %p1535_p0 = scmp.ge.s32.totalorder %s1915_s25, 1  ;;  %p531_p1 = scmp.lt.s32.totalorder %s1915_s25, 17 }
  0x5c   : > { %p532_p2 = pnand %p1535_p0, %p531_p1 }
  0x5d   : > { %s538_s0 = sand.u32 (!%p532_p2), 1, %s1891_s19   ;;  %s545_s28 = sand.u32 (!%p532_p2), 1, %s1883_s17  }
  0x5e   : > { %535 = sbr.rel (%p532_p2) target bundleno = 440 (0x1b8), region = 81  ;;  %s1536_s11 = sshll.u32 (!%p532_p2), %s538_s0, 6 }
  0x5f   : > { %s1537_s26 = sshll.u32 (!%p532_p2), %s545_s28, 9  ;;  %s566_s5 = sand.u32 (!%p532_p2), 1, %s1875_s15  }
  0x60   : > { %s1539_s29 = sshll.u32 (!%p532_p2), %s1903_s22, 1  ;;  %s1538_s27 = sshll.u32 (!%p532_p2), %s566_s5, 6 }
  0x61   : > { %p598_p3 = scmp.lt.s32.totalorder (!%p532_p2), %s1539_s29, 3  ;;  %s2206_s19 = scalar_lea.vmem (!%p532_p2), [#allocation3], %s1536_s11 }
  0x62   : > { %s2208_s17 = scalar_lea.vmem (!%p532_p2), [#allocation4], %s1537_s26  ;;  %s2210_s15 = scalar_lea.vmem (!%p532_p2), [#allocation5], %s1538_s27 }
  0x63   : > { %p1541_p4 = scmp.ne.s32.totalorder (!%p532_p2), %s1899_s21, 0 }
  0x65   : > { %s2386_s29 = smov (!%p598_p3, %s1539_s29), 3  ;;  %616 = sbr.rel (%p1541_p4) target bundleno = 108 (0x6c), region = 93 }
  0x66   : > { %s602_s6 = scalar_lea.vmem %s2354_s3, %s2386_s29  ;;  %s611_s1 = scalar_lea.vmem %s2355_s4, %s2386_s29  ;;  %v1917_v8 = vmov (!%p1541_p4), 0.0  }
  0x67   : > { %617 = vst [vmem:[#allocation2] sm:$0xff] (!%p1541_p4), %v1917_v8  ;;  %618 = vst [vmem:[#allocation2 + $0x8] sm:$0xff] (!%p1541_p4), %v1917_v8 }
  0x68   : > { %619 = vst [vmem:[#allocation2 + $0x10] sm:$0xff] (!%p1541_p4), %v1917_v8  ;;  %620 = vst [vmem:[#allocation2 + $0x18] sm:$0xff] (!%p1541_p4), %v1917_v8 }
  0x69   : > { %621 = vst [vmem:[#allocation2 + $0x20] sm:$0xff] (!%p1541_p4), %v1917_v8  ;;  %622 = vst [vmem:[#allocation2 + $0x28] sm:$0xff] (!%p1541_p4), %v1917_v8 }
  0x6a   : > { %623 = vst [vmem:[#allocation2 + $0x30] sm:$0xff] (!%p1541_p4), %v1917_v8  ;;  %624 = vst [vmem:[#allocation2 + $0x38] sm:$0xff] (!%p1541_p4), %v1917_v8 }
  0x6c PF: > { %v1721_v9 = vld [vmem:[%s2208_s17 + $0x4] ss:$8 sps:$4 sm:$0xff]   ;;  %v1725_v11 = vld [vmem:[%s2208_s17] ss:$8 sps:$4 sm:$0xff]   ;;  %v1727_v13 = vld [vmem:[%s2208_s17 + $0x14] ss:$8 sps:$4 sm:$0xff]  }
  0x6d   : > { %v1723_v10 = vld [vmem:[%s2208_s17 + $0x104] ss:$8 sps:$4 sm:$0xff]   ;;  %1065 = vmatprep.subr.bf16.mxu1 %v1721_v9  ;;  %v1726_v12 = vld [vmem:[%s2208_s17 + $0x100] ss:$8 sps:$4 sm:$0xff]   ;;  %v1729_v14 = vld [vmem:[%s2208_s17 + $0x114] ss:$8 sps:$4 sm:$0xff]  }
  0x6e   : > { %1118 = vmatprep.subr.bf16.mxu0 %v1723_v10  ;;  %1066 = vmatpush1.bf16.msra.mxu1 %v1725_v11  ;;  %v1731_v15 = vld [vmem:[%s2208_s17 + $0x10] ss:$8 sps:$4 sm:$0xff]   ;;  %v1733_v17 = vld [vmem:[%s2208_s17 + $0x24] ss:$8 sps:$4 sm:$0xff]   ;;  %v1737_v19 = vld [vmem:[%s2208_s17 + $0x20] ss:$8 sps:$4 sm:$0xff]  }
  0x6f   : > { %1119 = vmatpush1.bf16.msra.mxu0 %v1726_v12  ;;  %1067 = vmatprep.subr.bf16.mxu1 %v1727_v13  ;;  %v1732_v16 = vld [vmem:[%s2208_s17 + $0x110] ss:$8 sps:$4 sm:$0xff]   ;;  %v1735_v18 = vld [vmem:[%s2208_s17 + $0x124] ss:$8 sps:$4 sm:$0xff]   ;;  %v1738_v20 = vld [vmem:[%s2208_s17 + $0x120] ss:$8 sps:$4 sm:$0xff]  }
  0x70   : > { %1120 = vmatprep.subr.bf16.mxu0 %v1729_v14  ;;  %v1739_v21 = vld [vmem:[%s2208_s17 + $0x34] ss:$8 sps:$4 sm:$0xff]   ;;  %v1743_v23 = vld [vmem:[%s2208_s17 + $0x30] ss:$8 sps:$4 sm:$0xff]   ;;  %v1745_v25 = vld [vmem:[%s2208_s17 + $0x44] ss:$8 sps:$4 sm:$0xff]  }
  0x71   : > { %v1741_v22 = vld [vmem:[%s2208_s17 + $0x134] ss:$8 sps:$4 sm:$0xff]   ;;  %v1744_v24 = vld [vmem:[%s2208_s17 + $0x130] ss:$8 sps:$4 sm:$0xff]   ;;  %v1747_v26 = vld [vmem:[%s2208_s17 + $0x144] ss:$8 sps:$4 sm:$0xff]  }
  0x72   : > { %1068 = vmatpush1.bf16.msra.mxu1 %v1731_v15  ;;  %v1749_v27 = vld [vmem:[%s2208_s17 + $0x40] ss:$8 sps:$4 sm:$0xff]   ;;  %v1751_v29 = vld [vmem:[%s2208_s17 + $0x54] ss:$8 sps:$4 sm:$0xff]   ;;  %v1755_v31 = vld [vmem:[%s2208_s17 + $0x50] ss:$8 sps:$4 sm:$0xff]  }
  0x73   : > { %1121 = vmatpush1.bf16.msra.mxu0 %v1732_v16  ;;  %1069 = vmatprep.subr.bf16.mxu1 %v1733_v17  ;;  %v1750_v28 = vld [vmem:[%s2208_s17 + $0x140] ss:$8 sps:$4 sm:$0xff]   ;;  %v1753_v30 = vld [vmem:[%s2208_s17 + $0x154] ss:$8 sps:$4 sm:$0xff]   ;;  %v1756_v32 = vld [vmem:[%s2208_s17 + $0x150] ss:$8 sps:$4 sm:$0xff]  }
  0x74   : > { %1122 = vmatprep.subr.bf16.mxu0 %v1735_v18  ;;  %v1757_v33 = vld [vmem:[%s2208_s17 + $0x64] ss:$8 sps:$4 sm:$0xff]   ;;  %v1761_v35 = vld [vmem:[%s2208_s17 + $0x60] ss:$8 sps:$4 sm:$0xff]   ;;  %v1763_v37 = vld [vmem:[%s2208_s17 + $0x74] ss:$8 sps:$4 sm:$0xff]  }
  0x75   : > { %v1759_v34 = vld [vmem:[%s2208_s17 + $0x164] ss:$8 sps:$4 sm:$0xff]   ;;  %v1762_v36 = vld [vmem:[%s2208_s17 + $0x160] ss:$8 sps:$4 sm:$0xff]   ;;  %v1765_v38 = vld [vmem:[%s2208_s17 + $0x174] ss:$8 sps:$4 sm:$0xff]  }
  0x76   : > { %1070 = vmatpush1.bf16.msra.mxu1 %v1737_v19  ;;  %v1767_v39 = vld [vmem:[%s2208_s17 + $0x70] ss:$8 sps:$4 sm:$0xff]   ;;  %v1769_v41 = vld [vmem:[%s2208_s17 + $0x84] ss:$8 sps:$4 sm:$0xff]   ;;  %v1773_v43 = vld [vmem:[%s2208_s17 + $0x80] ss:$8 sps:$4 sm:$0xff]  }
  0x77   : > { %1123 = vmatpush1.bf16.msra.mxu0 %v1738_v20  ;;  %1071 = vmatprep.subr.bf16.mxu1 %v1739_v21  ;;  %v1768_v40 = vld [vmem:[%s2208_s17 + $0x170] ss:$8 sps:$4 sm:$0xff]   ;;  %v1771_v42 = vld [vmem:[%s2208_s17 + $0x184] ss:$8 sps:$4 sm:$0xff]   ;;  %v1774_v44 = vld [vmem:[%s2208_s17 + $0x180] ss:$8 sps:$4 sm:$0xff]  }
  0x78   : > { %1124 = vmatprep.subr.bf16.mxu0 %v1741_v22  ;;  %v1775_v45 = vld [vmem:[%s2208_s17 + $0x94] ss:$8 sps:$4 sm:$0xff]   ;;  %v1779_v47 = vld [vmem:[%s2208_s17 + $0x90] ss:$8 sps:$4 sm:$0xff]   ;;  %v1781_v49 = vld [vmem:[%s2208_s17 + $0xa4] ss:$8 sps:$4 sm:$0xff]  }
  0x79   : > { %v1777_v46 = vld [vmem:[%s2208_s17 + $0x194] ss:$8 sps:$4 sm:$0xff]   ;;  %v1780_v48 = vld [vmem:[%s2208_s17 + $0x190] ss:$8 sps:$4 sm:$0xff]   ;;  %v1783_v50 = vld [vmem:[%s2208_s17 + $0x1a4] ss:$8 sps:$4 sm:$0xff]  }
  0x7a   : > { %1072 = vmatpush1.bf16.msra.mxu1 %v1743_v23  ;;  %v1785_v51 = vld [vmem:[%s2208_s17 + $0xa0] ss:$8 sps:$4 sm:$0xff]   ;;  %v1787_v53 = vld [vmem:[%s2208_s17 + $0xb4] ss:$8 sps:$4 sm:$0xff]   ;;  %v1791_v55 = vld [vmem:[%s2208_s17 + $0xb0] ss:$8 sps:$4 sm:$0xff]  }
  0x7b   : > { %1125 = vmatpush1.bf16.msra.mxu0 %v1744_v24  ;;  %1073 = vmatprep.subr.bf16.mxu1 %v1745_v25  ;;  %v1786_v52 = vld [vmem:[%s2208_s17 + $0x1a0] ss:$8 sps:$4 sm:$0xff]   ;;  %v1789_v54 = vld [vmem:[%s2208_s17 + $0x1b4] ss:$8 sps:$4 sm:$0xff]   ;;  %v1792_v56 = vld [vmem:[%s2208_s17 + $0x1b0] ss:$8 sps:$4 sm:$0xff]  }
  0x7c   : > { %1126 = vmatprep.subr.bf16.mxu0 %v1747_v26  ;;  %v1793_v57 = vld [vmem:[%s2208_s17 + $0xc4] ss:$8 sps:$4 sm:$0xff]   ;;  %v1797_v61 = vld [vmem:[%s2208_s17 + $0xc0] ss:$8 sps:$4 sm:$0xff]   ;;  %v1799_v63 = vld [vmem:[%s2208_s17 + $0xd4] ss:$8 sps:$4 sm:$0xff]  }
  0x7d   : > { %v1819_v58 = vld [vmem:[%s2206_s19 + $0x4] ss:$16 sps:$4 sm:$0xff]   ;;  %v1822_v60 = vld [vmem:[%s2206_s19 + $0xc] ss:$16 sps:$4 sm:$0xff]   ;;  %v1798_v62 = vld [vmem:[%s2208_s17 + $0x1c0] ss:$8 sps:$4 sm:$0xff]  }
  0x7e   : > { %1074 = vmatpush1.bf16.msra.mxu1 %v1749_v27  ;;  %v1795_v59 = vld [vmem:[%s2208_s17 + $0x1c4] ss:$8 sps:$4 sm:$0xff]   ;;  %1097 = vmatprep.mubr.bf16.mxu1 %v1819_v58  ;;  %v1801_v0 = vld [vmem:[%s2208_s17 + $0x1d4] ss:$8 sps:$4 sm:$0xff]   ;;  %v1803_v1 = vld [vmem:[%s2208_s17 + $0xd0] ss:$8 sps:$4 sm:$0xff]  }
  0x7f   : > { %1127 = vmatpush1.bf16.msra.mxu0 %v1750_v28  ;;  %1075 = vmatprep.subr.bf16.mxu1 %v1751_v29  ;;  %v1804_v2 = vld [vmem:[%s2208_s17 + $0x1d0] ss:$8 sps:$4 sm:$0xff]   ;;  %v1805_v3 = vld [vmem:[%s2208_s17 + $0xe4] ss:$8 sps:$4 sm:$0xff]   ;;  %v1809_v5 = vld [vmem:[%s2208_s17 + $0xe0] ss:$8 sps:$4 sm:$0xff]  }
  0x80   : > { %1128 = vmatprep.subr.bf16.mxu0 %v1753_v30  ;;  %1150 = vmatprep.mubr.bf16.mxu0 %v1822_v60  ;;  %v1807_v4 = vld [vmem:[%s2208_s17 + $0x1e4] ss:$8 sps:$4 sm:$0xff]   ;;  %v1810_v6 = vld [vmem:[%s2208_s17 + $0x1e0] ss:$8 sps:$4 sm:$0xff]   ;;  %v1811_v7 = vld [vmem:[%s2208_s17 + $0xf4] ss:$8 sps:$4 sm:$0xff]  }
  0x81   : > { %v1813_v8 = vld [vmem:[%s2208_s17 + $0x1f4] ss:$8 sps:$4 sm:$0xff]   ;;  %v1815_v9 = vld [vmem:[%s2208_s17 + $0xf0] ss:$8 sps:$4 sm:$0xff]   ;;  %v625_v18 = vld [vmem:[#allocation2] sm:$0xff]  ;;  %p1614_p5 = scmp.ne.s32.totalorder %s1899_s21, 7 }
  0x82   : > { %1076 = vmatpush1.bf16.msra.mxu1 %v1755_v31  ;;  %v1816_v10 = vld [vmem:[%s2208_s17 + $0x1f0] ss:$8 sps:$4 sm:$0xff]   ;;  %v1823_v13 = vld [vmem:[%s2206_s19 + $0x24] ss:$16 sps:$4 sm:$0xff]   ;;  %v1825_v14 = vld [vmem:[%s2206_s19 + $0x2c] ss:$16 sps:$4 sm:$0xff]  }
  0x83   : > { %1129 = vmatpush1.bf16.msra.mxu0 %v1756_v32  ;;  %1077 = vmatprep.subr.bf16.mxu1 %v1757_v33  ;;  %v1817_v11 = vld [vmem:[%s2206_s19] ss:$16 sps:$4 sm:$0xff]   ;;  %v1820_v12 = vld [vmem:[%s2206_s19 + $0x8] ss:$16 sps:$4 sm:$0xff]  }
  0x84   : > { %1130 = vmatprep.subr.bf16.mxu0 %v1759_v34  ;;  %v1827_v15 = vld [vmem:[%s2206_s19 + $0x20] ss:$16 sps:$4 sm:$0xff]   ;;  %v1828_v16 = vld [vmem:[%s2206_s19 + $0x28] ss:$16 sps:$4 sm:$0xff]  }
  0x85   : > { %v626_v22 = vld [vmem:[#allocation2 + $0x8] sm:$0xff]  ;;  %v627_v26 = vld [vmem:[#allocation2 + $0x10] sm:$0xff]  ;;  %v628_v31 = vld [vmem:[#allocation2 + $0x18] sm:$0xff] }
  0x86   : > { %1078 = vmatpush1.bf16.msra.mxu1 %v1761_v35 }
  0x87   : > { %1131 = vmatpush1.bf16.msra.mxu0 %v1762_v36  ;;  %1079 = vmatprep.subr.bf16.mxu1 %v1763_v37 }
  0x88   : > { %1132 = vmatprep.subr.bf16.mxu0 %v1765_v38  ;;  %v629_v38 = vld [vmem:[#allocation2 + $0x20] sm:$0xff] }
  0x8a   : > { %1080 = vmatpush1.bf16.msra.mxu1 %v1767_v39 }
  0x8b   : > { %1133 = vmatpush1.bf16.msra.mxu0 %v1768_v40  ;;  %1081 = vmatprep.subr.bf16.mxu1 %v1769_v41 }
  0x8c   : > { %1134 = vmatprep.subr.bf16.mxu0 %v1771_v42  ;;  %v630_v42 = vld [vmem:[#allocation2 + $0x28] sm:$0xff] }
  0x8e   : > { %1082 = vmatpush1.bf16.msra.mxu1 %v1773_v43 }
  0x8f   : > { %1135 = vmatpush1.bf16.msra.mxu0 %v1774_v44  ;;  %1083 = vmatprep.subr.bf16.mxu1 %v1775_v45 }
  0x90   : > { %1136 = vmatprep.subr.bf16.mxu0 %v1777_v46  ;;  %v631_v46 = vld [vmem:[#allocation2 + $0x30] sm:$0xff] }
  0x92   : > { %1084 = vmatpush1.bf16.msra.mxu1 %v1779_v47 }
  0x93   : > { %1137 = vmatpush1.bf16.msra.mxu0 %v1780_v48  ;;  %1085 = vmatprep.subr.bf16.mxu1 %v1781_v49 }
  0x94   : > { %1138 = vmatprep.subr.bf16.mxu0 %v1783_v50 }
  0x96   : > { %1086 = vmatpush1.bf16.msra.mxu1 %v1785_v51  ;;  %v632_v51 = vld [vmem:[#allocation2 + $0x38] sm:$0xff] }
  0x97   : > { %1139 = vmatpush1.bf16.msra.mxu0 %v1786_v52  ;;  %1087 = vmatprep.subr.bf16.mxu1 %v1787_v53 }
  0x98   : > { %1140 = vmatprep.subr.bf16.mxu0 %v1789_v54 }
  0x9a   : > { %1088 = vmatpush1.bf16.msra.mxu1 %v1791_v55 }
  0x9b   : > { %1141 = vmatpush1.bf16.msra.mxu0 %v1792_v56  ;;  %1089 = vmatprep.subr.bf16.mxu1 %v1793_v57 }
  0x9c   : > { %1142 = vmatprep.subr.bf16.mxu0 %v1795_v59 }
  0x9e   : > { %1090 = vmatpush1.bf16.msra.mxu1 %v1797_v61 }
  0x9f   : > { %1143 = vmatpush1.bf16.msra.mxu0 %v1798_v62  ;;  %1091 = vmatprep.subr.bf16.mxu1 %v1799_v63 }
  0xa0   : > { %1144 = vmatprep.subr.bf16.mxu0 %v1801_v0 }
  0xa2   : > { %1092 = vmatpush1.bf16.msra.mxu1 %v1803_v1 }
  0xa3   : > { %1145 = vmatpush1.bf16.msra.mxu0 %v1804_v2  ;;  %1093 = vmatprep.subr.bf16.mxu1 %v1805_v3 }
  0xa4   : > { %1146 = vmatprep.subr.bf16.mxu0 %v1807_v4 }
  0xa6   : > { %1094 = vmatpush1.bf16.msra.mxu1 %v1809_v5 }
  0xa7   : > { %1147 = vmatpush1.bf16.msra.mxu0 %v1810_v6  ;;  %1095 = vmatprep.subr.bf16.mxu1 %v1811_v7 }
  0xa8   : > { %1148 = vmatprep.subr.bf16.mxu0 %v1813_v8 }
  0xaa   : > { %1096 = vmatpush1.bf16.msra.mxu1 %v1815_v9 }
  0xab   : > { %1149 = vmatpush1.bf16.msra.mxu0 %v1816_v10 }
  0xad   : > { %1098 = vmatmul.mubr.bf16.vlgmr.msra.gmra.mrb[0].mxu1 %v1817_v11 }
  0xae   : > { %1151 = vmatmul.mubr.bf16.vlgmr.msra.gmra.mrb[0].mxu0 %v1820_v12  ;;  %1107 = vmatprep.mubr.bf16.mxu1 %v1823_v13 }
  0xaf   : > { %1160 = vmatprep.mubr.bf16.mxu0 %v1825_v14 }
  0xb5   : > { %1108 = vmatmul.mubr.bf16.gmra.mrb[4].mxu1 %v1827_v15 }
  0xb6   : > { %1161 = vmatmul.mubr.bf16.gmra.mrb[4].mxu0 %v1828_v16 }
 0x180   : > { %v1099_v17 = vpop.f32.mrb[0].mxu1 }
 0x181   : > { %v1152_v19 = vpop.f32.mrb[0].mxu0  ;;  %v1101_v21 = vpop.f32.mrb[1].mxu1 }
 0x182   : > { %v1153_v20 = vadd.f32 %v1152_v19, %v1099_v17  ;;  %v1154_v23 = vpop.f32.mrb[1].mxu0  ;;  %v1103_v25 = vpop.f32.mrb[2].mxu1 }
 0x183   : > { %v1155_v24 = vadd.f32 %v1154_v23, %v1101_v21  ;;  %v1156_v27 = vpop.f32.mrb[2].mxu0  ;;  %v1105_v30 = vpop.f32.mrb[3].mxu1 }
 0x184   : > { %v1171_v28 = vadd.f32 %v1153_v20, %v625_v18  ;;  %v1157_v29 = vadd.f32 %v1156_v27, %v1103_v25  ;;  %v1158_v32 = vpop.f32.mrb[3].mxu0  ;;  %v1918_v27 = vmov (!%p1614_p5), 1966171168  }
 0x185   : > { %v1172_v33 = vadd.f32 %v1155_v24, %v626_v22  ;;  %v1159_v34 = vadd.f32 %v1158_v32, %v1105_v30 }
 0x186   : > { %1179 = vst [vmem:[#allocation2] sm:$0xff] %v1171_v28  ;;  %v1173_v35 = vadd.f32 %v1157_v29, %v627_v26  ;;  %v1229_v28 = vunpack.c.l.s4 (!%p1614_p5), %v1918_v27  ;;  %v1231_v29 = vlaneseq (!%p1614_p5) }
 0x187   : > { %1180 = vst [vmem:[#allocation2 + $0x8] sm:$0xff] %v1172_v33  ;;  %v1174_v36 = vadd.f32 %v1159_v34, %v628_v31 }
 0x188   : > { %1181 = vst [vmem:[#allocation2 + $0x10] sm:$0xff] %v1173_v35  ;;  %v1109_v37 = vpop.f32.mrb[4].mxu1  ;;  %vm1245_vm0 = vcmp.lt.s32.totalorder (!%p1614_p5), %v1231_v29, 256 }
 0x189   : > { %1182 = vst [vmem:[#allocation2 + $0x18] sm:$0xff] %v1174_v36  ;;  %v1162_v39 = vpop.f32.mrb[4].mxu0  ;;  %v1111_v41 = vpop.f32.mrb[5].mxu1 }
 0x18a   : > { %v1163_v40 = vadd.f32 %v1162_v39, %v1109_v37  ;;  %v1164_v43 = vpop.f32.mrb[5].mxu0  ;;  %v1113_v45 = vpop.f32.mrb[6].mxu1  ;;  %v1232_v39 = vshrl.u32 (!%p1614_p5), %v1231_v29, 7 }
 0x18b   : > { %v1165_v44 = vadd.f32 %v1164_v43, %v1111_v41  ;;  %v1166_v47 = vpop.f32.mrb[6].mxu0  ;;  %v1115_v50 = vpop.f32.mrb[7].mxu1  ;;  %1190 = sbr.rel (%p1614_p5) target bundleno = 432 (0x1b0), region = 97 }
 0x18c   : > { %v1175_v48 = vadd.f32 %v1163_v40, %v629_v38  ;;  %v1167_v49 = vadd.f32 %v1166_v47, %v1113_v45  ;;  %v1168_v52 = vpop.f32.mrb[7].mxu0  ;;  %v1230_v38 = vunpack.c.0.s8 (!%p1614_p5), %v1229_v28 }
 0x18d   : > { %v1176_v53 = vadd.f32 %v1165_v44, %v630_v42  ;;  %v1169_v54 = vadd.f32 %v1168_v52, %v1115_v50  ;;  %v1191_v57 = vld [vmem:[#allocation2] sm:$0xff] (!%p1614_p5) }
 0x18e   : > { %1183 = vst [vmem:[#allocation2 + $0x20] sm:$0xff] %v1175_v48  ;;  %v1177_v55 = vadd.f32 %v1167_v49, %v631_v46  ;;  %v1192_v58 = vld [vmem:[#allocation2 + $0x8] sm:$0xff] (!%p1614_p5)  ;;  %1199 = vst [vmem:[%s2210_s15] sm:$0xff] (!%p1614_p5), %v1191_v57  ;;  %v1248_v60 = vmul.f32 (!%p1614_p5), %v1191_v57, %v1191_v57  ;;  %v1233_v47 = vsub.s32 (!%p1614_p5), %v1230_v38, %v1232_v39 }
 0x18f   : > { %1184 = vst [vmem:[#allocation2 + $0x28] sm:$0xff] %v1176_v53  ;;  %v1178_v56 = vadd.f32 %v1169_v54, %v632_v51  ;;  %v1193_v59 = vld [vmem:[#allocation2 + $0x10] sm:$0xff] (!%p1614_p5)  ;;  %1200 = vst [vmem:[%s2210_s15 + $0x8] sm:$0xff] (!%p1614_p5), %v1192_v58  ;;  %v1249_v61 = vmul.f32 (!%p1614_p5), %v1192_v58, %v1192_v58 }
 0x190   : > { %1185 = vst [vmem:[#allocation2 + $0x30] sm:$0xff] %v1177_v55  ;;  %1201 = vst [vmem:[%s2210_s15 + $0x10] sm:$0xff] (!%p1614_p5), %v1193_v59  ;;  %v1207_v62 = vadd.f32 (!%p1614_p5), %v1193_v59, %v1191_v57  ;;  %v1250_v63 = vmul.f32 (!%p1614_p5), %v1193_v59, %v1193_v59  ;;  %v1194_v0 = vld [vmem:[#allocation2 + $0x18] sm:$0xff] (!%p1614_p5) }
 0x191   : > { %1186 = vst [vmem:[#allocation2 + $0x38] sm:$0xff] %v1178_v56  ;;  %1202 = vst [vmem:[%s2210_s15 + $0x18] sm:$0xff] (!%p1614_p5), %v1194_v0  ;;  %v1216_v3 = vadd.f32 (!%p1614_p5), %v1194_v0, %v1192_v58  ;;  %v1251_v4 = vmul.f32 (!%p1614_p5), %v1194_v0, %v1194_v0 }
 0x192   : > { %v1256_v9 = vadd.f32 %v1250_v63, %v1248_v60 }
 0x193   : > { %v1265_v12 = vadd.f32 %v1251_v4, %v1249_v61 }
 0x195   : > { %v1195_v1 = vld [vmem:[#allocation2 + $0x20] sm:$0xff] }
 0x196   : > { %v1196_v2 = vld [vmem:[#allocation2 + $0x28] sm:$0xff]  ;;  %1203 = vst [vmem:[%s2210_s15 + $0x20] sm:$0xff] %v1195_v1  ;;  %v1252_v5 = vmul.f32 %v1195_v1, %v1195_v1  ;;  %v1208_v10 = vadd.f32 %v1207_v62, %v1195_v1 }
 0x197   : > { %1204 = vst [vmem:[%s2210_s15 + $0x28] sm:$0xff] %v1196_v2  ;;  %v1253_v6 = vmul.f32 %v1196_v2, %v1196_v2  ;;  %v1197_v7 = vld [vmem:[#allocation2 + $0x30] sm:$0xff]  ;;  %v1217_v13 = vadd.f32 %v1216_v3, %v1196_v2 }
 0x198   : > { %v1198_v8 = vld [vmem:[#allocation2 + $0x38] sm:$0xff]  ;;  %1205 = vst [vmem:[%s2210_s15 + $0x30] sm:$0xff] %v1197_v7  ;;  %v1254_v11 = vmul.f32 %v1197_v7, %v1197_v7  ;;  %v1257_v15 = vadd.f32 %v1256_v9, %v1252_v5  ;;  %v1209_v16 = vadd.f32 %v1208_v10, %v1197_v7 }
 0x199   : > { %1206 = vst [vmem:[%s2210_s15 + $0x38] sm:$0xff] %v1198_v8  ;;  %v1255_v14 = vmul.f32 %v1198_v8, %v1198_v8  ;;  %v1266_v17 = vadd.f32 %v1265_v12, %v1253_v6  ;;  %v1218_v18 = vadd.f32 %v1217_v13, %v1198_v8 }
 0x19a   : > { %v1210_v19 = vrot.slane %v1209_v16, 4  ;;  %v1258_v20 = vadd.f32 %v1257_v15, %v1254_v11 }
 0x19b   : > { %v1219_v21 = vrot.slane %v1218_v18, 4  ;;  %v1267_v22 = vadd.f32 %v1266_v17, %v1255_v14 }
 0x19c   : > { %v1211_v23 = vadd.f32 %v1210_v19, %v1209_v16  ;;  %v1259_v24 = vrot.slane %v1258_v20, 4 }
 0x19d   : > { %v1220_v25 = vadd.f32 %v1219_v21, %v1218_v18  ;;  %v1268_v26 = vrot.slane %v1267_v22, 4 }
 0x19e   : > { %v1212_v30 = vrot.slane %v1211_v23, 2  ;;  %v1260_v31 = vadd.f32 %v1259_v24, %v1258_v20 }
 0x19f   : > { %v1221_v32 = vrot.slane %v1220_v25, 2  ;;  %v1269_v33 = vadd.f32 %v1268_v26, %v1267_v22 }
 0x1a0   : > { %v1213_v34 = vadd.f32 %v1212_v30, %v1211_v23  ;;  %v1261_v35 = vrot.slane %v1260_v31, 2 }
 0x1a1   : > { %v1222_v36 = vadd.f32 %v1221_v32, %v1220_v25  ;;  %v1270_v37 = vrot.slane %v1269_v33, 2 }
 0x1a2   : > { %v1214_v40 = vrot.slane %v1213_v34, 1  ;;  %v1262_v41 = vadd.f32 %v1261_v35, %v1260_v31 }
 0x1a3   : > { %v1223_v42 = vrot.slane %v1222_v36, 1  ;;  %v1271_v43 = vadd.f32 %v1270_v37, %v1269_v33 }
 0x1a4   : > { %v1215_v44 = vadd.f32 %v1214_v40, %v1213_v34  ;;  %v1263_v45 = vrot.slane %v1262_v41, 1 }
 0x1a5   : > { %v1224_v46 = vadd.f32 %v1223_v42, %v1222_v36  ;;  %v1272_v48 = vrot.slane %v1271_v43, 1 }
 0x1a6   : > { %v1264_v49 = vadd.f32 %v1263_v45, %v1262_v41 }
 0x1a7   : > { %v1227_v50 = vcombine.low %v1215_v44, %v1224_v46  ;;  %v1273_v51 = vadd.f32 %v1272_v48, %v1271_v43 }
 0x1a9   : > { %v1234_v52 = vrot.slane %v1227_v50, %v1233_v47  ;;  %v1276_v53 = vcombine.low %v1264_v49, %v1273_v51 }
 0x1ab   : > { %v1241_v54 = vrot.slane %v1234_v52, %v1233_v47  ;;  %v1283_v55 = vrot.slane %v1276_v53, %v1233_v47 }
 0x1ad   : > { %1247 = vst.msk [vmem:[%s602_s6] sm:$0x3] %vm1245_vm0, %v1241_v54  ;;  %v1290_v56 = vrot.slane %v1283_v55, %v1233_v47 }
 0x1af   : > { %1292 = vst.msk [vmem:[%s611_s1] sm:$0x3] %vm1245_vm0, %v1290_v56 }
 0x1b0 PF: > { %1315 = sbr.rel (!%p2038_p12) target bundleno = 440 (0x1b8), region = 101  ;;  %s1622_s26 = sshll.u32 (%p2038_p12), %s1903_s22, 4  ;;  %v1342_v61 = vld [vmem:[%s2210_s15 + $0x20] sm:$0xff] (%p2038_p12)  ;;  %v1344_v62 = vld [vmem:[%s2210_s15 + $0x28] sm:$0xff] (%p2038_p12)  ;;  %v1346_v63 = vld [vmem:[%s2210_s15 + $0x30] sm:$0xff] (%p2038_p12) }
 0x1b1   : > { %s1321_s1 = scalar_lea.vmem (%p2038_p12), %s2353_s2, %s1622_s26  ;;  %v1348_v0 = vld [vmem:[%s2210_s15 + $0x38] sm:$0xff] (%p2038_p12) }
 0x1b2   : > { %1343 = vst [vmem:[%s1321_s1 + $0x40] sm:$0xff] (%p2038_p12), %v1342_v61  ;;  %1345 = vst [vmem:[%s1321_s1 + $0x48] sm:$0xff] (%p2038_p12), %v1344_v62 }
 0x1b3   : > { %v1334_v57 = vld [vmem:[%s2210_s15] sm:$0xff] (%p2038_p12)  ;;  %1347 = vst [vmem:[%s1321_s1 + $0x60] sm:$0xff] (%p2038_p12), %v1346_v63  ;;  %1349 = vst [vmem:[%s1321_s1 + $0x68] sm:$0xff] (%p2038_p12), %v1348_v0 }
 0x1b4   : > { %v1336_v58 = vld [vmem:[%s2210_s15 + $0x8] sm:$0xff] (%p2038_p12)  ;;  %1335 = vst [vmem:[%s1321_s1] sm:$0xff] (%p2038_p12), %v1334_v57 }
 0x1b5   : > { %v1338_v59 = vld [vmem:[%s2210_s15 + $0x10] sm:$0xff] (%p2038_p12)  ;;  %1337 = vst [vmem:[%s1321_s1 + $0x8] sm:$0xff] (%p2038_p12), %v1336_v58 }
 0x1b6   : > { %v1340_v60 = vld [vmem:[%s2210_s15 + $0x18] sm:$0xff] (%p2038_p12)  ;;  %1339 = vst [vmem:[%s1321_s1 + $0x20] sm:$0xff] (%p2038_p12), %v1338_v59 }
 0x1b7   : > { %1341 = vst [vmem:[%s1321_s1 + $0x28] sm:$0xff] %v1340_v60 }
 0x1b8 PF: > { %s15_s25 = sadd.s32 1, %s1915_s25   ;;  %s2367_s14 = sld [smem:[#allocation6_spill]] }
 0x1b9   : > { %p12_p6 = scmp.ge.s32.totalorder %s15_s25, 18   ;;  %s2368_s27 = sld [smem:[#allocation7_spill]] }
 0x1ba   : > { %s2369_s15 = smov %s1879_s16  ;;  %s2370_s16 = smov %s2036_s13 }
 0x1bb   : > { %s2371_s17 = smov %s1887_s18  ;;  %s2372_s18 = smov %s2033_s12 }
 0x1bc   : > { %s2373_s19 = smov %s1895_s20  ;;  %s2374_s20 = smov %s2019_s7 }
 0x1bd   : > { %s2375_s21 = smov %s1907_s23  ;;  %s2376_s22 = smov %s1911_s24 }
 0x1be   : > { %s2377_s23 = smov %s2367_s14  ;;  %14 = sbr.rel (!%p12_p6) target bundleno = 9 (0x9), region = 187 }
 0x1bf   : > { %s2378_s24 = smov %s2368_s27 }

// kernel: discriminator_forward.14
= control target key start
LH: loop header
LB: loop body
LE: loop exit
PB: predicated region body
PF: predicated region fallthrough
CT: control target
= control target key end

     0   :  { %v32_v0 = vlaneseq  ;;  %s377_s1 = inlined_call_operand.vmem [shape: f32[1,512], index: 1, kind: input, shape index: {}]   ;;  %s378_s2 = inlined_call_operand.vmem [shape: f32[1,512], index: 2, kind: input, shape index: {}]   ;;  %s379_s0 = inlined_call_operand.vmem [shape: f32[32,512], index: 0, kind: input, shape index: {}]   ;;  %s380_s3 = inlined_call_operand.vmem [shape: bf16[32,512], index: 3, kind: output, shape index: {}]  }
   0x1   :  { %v30_v2 = vld [vmem:[%s377_s1] sm:$0xf]  ;;  %v15_v5 = vld [vmem:[%s379_s0 + $0x8] sm:$0xff]  ;;  %v16_v10 = vld [vmem:[%s379_s0 + $0x10] sm:$0xff] }
   0x2   :  { %v33_v1 = vshrl.u32 %v32_v0, 7  ;;  %v68_v3 = vld [vmem:[%s378_s2] sm:$0xf]  ;;  %v19_v12 = vld [vmem:[%s379_s0 + $0x28] sm:$0xff]  ;;  %v17_v17 = vld [vmem:[%s379_s0 + $0x18] sm:$0xff] }
   0x3   :  { %v14_v4 = vld [vmem:[%s379_s0] sm:$0xff]  ;;  %v20_v18 = vld [vmem:[%s379_s0 + $0x30] sm:$0xff]  ;;  %v21_v19 = vld [vmem:[%s379_s0 + $0x38] sm:$0xff] }
   0x4   :  { %v34_v6 = vsub.s32 0, %v33_v1  ;;  %v38_v7 = vsub.s32 1, %v33_v1  ;;  %v42_v8 = vsub.s32 2, %v33_v1  ;;  %v46_v9 = vsub.s32 3, %v33_v1  ;;  %v18_v11 = vld [vmem:[%s379_s0 + $0x20] sm:$0xff]  ;;  %v23_v51 = vld [vmem:[%s379_s0 + $0x48] sm:$0xff] }
   0x5   :  { %v22_v46 = vld [vmem:[%s379_s0 + $0x40] sm:$0xff]  ;;  %v24_v52 = vld [vmem:[%s379_s0 + $0x50] sm:$0xff]  ;;  %v25_v53 = vld [vmem:[%s379_s0 + $0x58] sm:$0xff] }
   0x6   :  { %v271_v13 = vrot.slane %v30_v2, %v34_v6  ;;  %v273_v14 = vrot.slane %v30_v2, %v38_v7  ;;  %v275_v15 = vrot.slane %v68_v3, %v34_v6  ;;  %v277_v16 = vrot.slane %v68_v3, %v38_v7  ;;  %v26_v0 = vld [vmem:[%s379_s0 + $0x60] sm:$0xff]  ;;  %v27_v1 = vld [vmem:[%s379_s0 + $0x68] sm:$0xff] }
   0x7   :  { %v288_v20 = vrot.slane %v30_v2, %v42_v8  ;;  %v290_v21 = vrot.slane %v30_v2, %v46_v9  ;;  %v292_v22 = vrot.slane %v68_v3, %v42_v8  ;;  %v294_v23 = vrot.slane %v68_v3, %v46_v9 }
   0x8   :  { %v52_v24 = vmul.f32 %v271_v13, %v14_v4  ;;  %v53_v25 = vmul.f32 %v273_v14, %v15_v5  ;;  %v56_v26 = vmul.f32 %v271_v13, %v18_v11  ;;  %v57_v27 = vmul.f32 %v273_v14, %v19_v12 }
   0x9   :  { %v54_v28 = vmul.f32 %v288_v20, %v16_v10  ;;  %v55_v29 = vmul.f32 %v290_v21, %v17_v17  ;;  %v58_v30 = vmul.f32 %v288_v20, %v20_v18  ;;  %v59_v31 = vmul.f32 %v290_v21, %v21_v19  ;;  %v28_v17 = vld [vmem:[%s379_s0 + $0x70] sm:$0xff]  ;;  %v29_v18 = vld [vmem:[%s379_s0 + $0x78] sm:$0xff] }
   0xa   :  { %v90_v32 = vadd.f32 %v275_v15, %v52_v24  ;;  %v91_v33 = vadd.f32 %v277_v16, %v53_v25  ;;  %v94_v34 = vadd.f32 %v275_v15, %v56_v26  ;;  %v95_v35 = vadd.f32 %v277_v16, %v57_v27 }
   0xb   :  { %v92_v36 = vadd.f32 %v292_v22, %v54_v28  ;;  %v93_v37 = vadd.f32 %v294_v23, %v55_v29  ;;  %v96_v38 = vadd.f32 %v292_v22, %v58_v30  ;;  %v97_v39 = vadd.f32 %v294_v23, %v59_v31 }
   0xc   :  { %vm106_vm0 = vcmp.ge.f32.partialorder %v90_v32, 0.0  ;;  %vm107_vm1 = vcmp.ge.f32.partialorder %v91_v33, 0.0  ;;  %v122_v40 = vmul.f32 0.2, %v90_v32  ;;  %v123_v41 = vmul.f32 0.2, %v91_v33 }
   0xd   :  { %vm108_vm2 = vcmp.ge.f32.partialorder %v92_v36, 0.0  ;;  %vm109_vm3 = vcmp.ge.f32.partialorder %v93_v37, 0.0  ;;  %v124_v42 = vmul.f32 0.2, %v92_v36  ;;  %v125_v43 = vmul.f32 0.2, %v93_v37 }
   0xe   :  { %v138_v44 = vsel %vm106_vm0, %v90_v32, %v122_v40  ;;  %v139_v45 = vsel %vm107_vm1, %v91_v33, %v123_v41  ;;  %vm110_vm4 = vcmp.ge.f32.partialorder %v94_v34, 0.0  ;;  %vm111_vm5 = vcmp.ge.f32.partialorder %v95_v35, 0.0 }
   0xf   :  { %v222_v47 = vpack.c.bf16 %v139_v45, %v138_v44  ;;  %v140_v48 = vsel %vm108_vm2, %v92_v36, %v124_v42  ;;  %v141_v49 = vsel %vm109_vm3, %v93_v37, %v125_v43  ;;  %v126_v50 = vmul.f32 0.2, %v94_v34 }
  0x10   :  { %v223_v54 = vpack.c.bf16 %v141_v49, %v140_v48  ;;  %v127_v55 = vmul.f32 0.2, %v95_v35  ;;  %vm112_vm6 = vcmp.ge.f32.partialorder %v96_v38, 0.0  ;;  %vm113_vm7 = vcmp.ge.f32.partialorder %v97_v39, 0.0 }
  0x11   :  { %202 = vst [vmem:[%s380_s3] sm:$0xff] %v222_v47  ;;  %v142_v56 = vsel %vm110_vm4, %v94_v34, %v126_v50  ;;  %v128_v57 = vmul.f32 0.2, %v96_v38  ;;  %v129_v58 = vmul.f32 0.2, %v97_v39  ;;  %v60_v59 = vmul.f32 %v271_v13, %v22_v46 }
  0x12   :  { %203 = vst [vmem:[%s380_s3 + $0x8] sm:$0xff] %v223_v54  ;;  %v143_v60 = vsel %vm111_vm5, %v95_v35, %v127_v55  ;;  %v61_v61 = vmul.f32 %v273_v14, %v23_v51  ;;  %v62_v62 = vmul.f32 %v288_v20, %v24_v52  ;;  %v63_v63 = vmul.f32 %v290_v21, %v25_v53 }
  0x13   :  { %v224_v2 = vpack.c.bf16 %v143_v60, %v142_v56  ;;  %v144_v3 = vsel %vm112_vm6, %v96_v38, %v128_v57  ;;  %v145_v4 = vsel %vm113_vm7, %v97_v39, %v129_v58  ;;  %v98_v5 = vadd.f32 %v275_v15, %v60_v59 }
  0x14   :  { %v225_v6 = vpack.c.bf16 %v145_v4, %v144_v3  ;;  %v99_v7 = vadd.f32 %v277_v16, %v61_v61  ;;  %v100_v8 = vadd.f32 %v292_v22, %v62_v62  ;;  %v101_v9 = vadd.f32 %v294_v23, %v63_v63 }
  0x15   :  { %204 = vst [vmem:[%s380_s3 + $0x10] sm:$0xff] %v224_v2  ;;  %vm114_vm8 = vcmp.ge.f32.partialorder %v98_v5, 0.0  ;;  %v130_v10 = vmul.f32 0.2, %v98_v5  ;;  %v64_v11 = vmul.f32 %v271_v13, %v26_v0  ;;  %v65_v12 = vmul.f32 %v273_v14, %v27_v1 }
  0x16   :  { %205 = vst [vmem:[%s380_s3 + $0x18] sm:$0xff] %v225_v6  ;;  %vm115_vm9 = vcmp.ge.f32.partialorder %v99_v7, 0.0  ;;  %v131_v19 = vmul.f32 0.2, %v99_v7  ;;  %vm116_vm10 = vcmp.ge.f32.partialorder %v100_v8, 0.0  ;;  %vm117_vm11 = vcmp.ge.f32.partialorder %v101_v9, 0.0 }
  0x17   :  { %v146_v24 = vsel %vm114_vm8, %v98_v5, %v130_v10  ;;  %v132_v13 = vmul.f32 0.2, %v100_v8  ;;  %v133_v25 = vmul.f32 0.2, %v101_v9  ;;  %v102_v14 = vadd.f32 %v275_v15, %v64_v11 }
  0x18   :  { %v147_v26 = vsel %vm115_vm9, %v99_v7, %v131_v19  ;;  %v103_v27 = vadd.f32 %v277_v16, %v65_v12  ;;  %v66_v28 = vmul.f32 %v288_v20, %v28_v17  ;;  %v67_v29 = vmul.f32 %v290_v21, %v29_v18 }
  0x19   :  { %v226_v30 = vpack.c.bf16 %v147_v26, %v146_v24  ;;  %v148_v31 = vsel %vm116_vm10, %v100_v8, %v132_v13  ;;  %v149_v32 = vsel %vm117_vm11, %v101_v9, %v133_v25  ;;  %vm118_vm12 = vcmp.ge.f32.partialorder %v102_v14, 0.0 }
  0x1a   :  { %v227_v33 = vpack.c.bf16 %v149_v32, %v148_v31  ;;  %vm119_vm13 = vcmp.ge.f32.partialorder %v103_v27, 0.0  ;;  %v134_v34 = vmul.f32 0.2, %v102_v14  ;;  %v135_v35 = vmul.f32 0.2, %v103_v27 }
  0x1b   :  { %206 = vst [vmem:[%s380_s3 + $0x20] sm:$0xff] %v226_v30  ;;  %v104_v15 = vadd.f32 %v292_v22, %v66_v28  ;;  %v105_v16 = vadd.f32 %v294_v23, %v67_v29 }
  0x1c   :  { %207 = vst [vmem:[%s380_s3 + $0x28] sm:$0xff] %v227_v33  ;;  %v150_v20 = vsel %vm118_vm12, %v102_v14, %v134_v34  ;;  %v151_v21 = vsel %vm119_vm13, %v103_v27, %v135_v35 }
  0x1d   :  { %v228_v36 = vpack.c.bf16 %v151_v21, %v150_v20  ;;  %vm120_vm14 = vcmp.ge.f32.partialorder %v104_v15, 0.0  ;;  %vm121_vm15 = vcmp.ge.f32.partialorder %v105_v16, 0.0  ;;  %v136_v37 = vmul.f32 0.2, %v104_v15 }
  0x1e   :  { %v137_v38 = vmul.f32 0.2, %v105_v16 }
  0x1f   :  { %208 = vst [vmem:[%s380_s3 + $0x30] sm:$0xff] %v228_v36  ;;  %v152_v39 = vsel %vm120_vm14, %v104_v15, %v136_v37 }
  0x20   :  { %v153_v40 = vsel %vm121_vm15, %v105_v16, %v137_v38 }
  0x21   :  { %v229_v22 = vpack.c.bf16 %v153_v40, %v152_v39 }
  0x23   :  { %209 = vst [vmem:[%s380_s3 + $0x38] sm:$0xff] %v229_v22 }

// kernel: discriminator_forward.15
= control target key start
LH: loop header
LB: loop body
LE: loop exit
PB: predicated region body
PF: predicated region fallthrough
CT: control target
= control target key end

     0   :  { %v123_v0 = vlaneseq  ;;  %vm578_vm0 = vcmask 7168   ;;  %s1112_s0 = inlined_call_operand.vmem [shape: bf16[8,8192], index: 0, kind: input, shape index: {}]   ;;  %s1113_s1 = inlined_call_operand.vmem [shape: f32[1,8192], index: 1, kind: input, shape index: {}]   ;;  %s1114_s2 = inlined_call_operand.vmem [shape: f32[8,1], index: 2, kind: output, shape index: {}]  }
   0x1   :  { %v606_v1 = vld [vmem:[%s1112_s0] sm:$0xff]  ;;  %v611_v2 = vld [vmem:[%s1112_s0 + $0x8] sm:$0xff]  ;;  %v616_v3 = vld [vmem:[%s1112_s0 + $0x10] sm:$0xff] }
   0x2   :  { %v621_v4 = vld [vmem:[%s1112_s0 + $0x88] sm:$0xff]  ;;  %v626_v5 = vld [vmem:[%s1112_s0 + $0x90] sm:$0xff]  ;;  %v631_v6 = vld [vmem:[%s1112_s0 + $0x98] sm:$0xff]  ;;  %v43_v9 = vunpack.c.l.bf16 %v606_v1  ;;  %v44_v10 = vunpack.c.h.bf16 %v606_v1  ;;  %v45_v11 = vunpack.c.l.bf16 %v611_v2  ;;  %v124_v12 = vshrl.u32 %v123_v0, 7 }
   0x3   :  { %v636_v7 = vld [vmem:[%s1112_s0 + $0xa0] sm:$0xff]  ;;  %v641_v8 = vld [vmem:[%s1112_s0 + $0xa8] sm:$0xff]  ;;  %v77_v15 = vunpack.c.l.bf16 %v621_v4  ;;  %v78_v16 = vunpack.c.h.bf16 %v621_v4  ;;  %v79_v17 = vunpack.c.l.bf16 %v626_v5  ;;  %v674_v30 = vld [vmem:[%s1113_s1 + $0x30] sm:$0xff]  ;;  %v1116_v1 = vunpack.c.l.bf16 %v631_v6 }
   0x4   :  { %v661_v25 = vld [vmem:[%s1113_s1 + $0x28] sm:$0xff]  ;;  %v663_v26 = vsub.s32 0, %v124_v12  ;;  %v665_v27 = vsub.s32 1, %v124_v12  ;;  %v667_v28 = vsub.s32 2, %v124_v12  ;;  %v669_v29 = vsub.s32 3, %v124_v12  ;;  %v695_v39 = vld [vmem:[%s1113_s1 + $0x38] sm:$0xff] }
   0x5   :  { %v676_v31 = vsub.s32 4, %v124_v12  ;;  %v678_v32 = vsub.s32 5, %v124_v12  ;;  %v680_v33 = vsub.s32 6, %v124_v12  ;;  %v682_v34 = vsub.s32 7, %v124_v12  ;;  %v716_v48 = vld [vmem:[%s1112_s0 + $0xb0] sm:$0xff]  ;;  %v721_v49 = vld [vmem:[%s1112_s0 + $0xb8] sm:$0xff] }
   0x6   :  { %v734_v54 = vld [vmem:[%s1112_s0 + $0xc0] sm:$0xff]  ;;  %v739_v55 = vld [vmem:[%s1112_s0 + $0xc8] sm:$0xff]  ;;  %v752_v60 = vld [vmem:[%s1112_s0 + $0xd0] sm:$0xff]  ;;  %v87_v62 = vunpack.c.l.bf16 %v716_v48  ;;  %v88_v63 = vunpack.c.h.bf16 %v716_v48  ;;  %v89_v59 = vunpack.c.l.bf16 %v721_v49  ;;  %v90_v0 = vunpack.c.h.bf16 %v721_v49 }
   0x7   :  { %v757_v61 = vld [vmem:[%s1112_s0 + $0xd8] sm:$0xff]  ;;  %v770_v14 = vld [vmem:[%s1112_s0 + $0xe0] sm:$0xff]  ;;  %v775_v13 = vld [vmem:[%s1112_s0 + $0xe8] sm:$0xff]  ;;  %v91_v58 = vunpack.c.l.bf16 %v734_v54  ;;  %v92_v57 = vunpack.c.h.bf16 %v734_v54  ;;  %v93_v56 = vunpack.c.l.bf16 %v739_v55  ;;  %v94_v53 = vunpack.c.h.bf16 %v739_v55 }
   0x8   :  { %v784_v12 = vld [vmem:[%s1113_s1] sm:$0xff]  ;;  %v95_v52 = vunpack.c.l.bf16 %v752_v60  ;;  %v96_v48 = vunpack.c.h.bf16 %v752_v60  ;;  %v97_v51 = vunpack.c.l.bf16 %v757_v61  ;;  %v98_v49 = vunpack.c.h.bf16 %v757_v61  ;;  %v41_v50 = vld [vmem:[%s1112_s0 + $0xf0] sm:$0xff]  ;;  %v42_v54 = vld [vmem:[%s1112_s0 + $0xf8] sm:$0xff] }
   0x9   :  { %v99_v47 = vunpack.c.l.bf16 %v770_v14  ;;  %v100_v55 = vunpack.c.h.bf16 %v770_v14  ;;  %v101_v46 = vunpack.c.l.bf16 %v775_v13  ;;  %v806_v60 = vld [vmem:[%s1113_s1 + $0x20] sm:$0xff]  ;;  %v126_v61 = vrot.slane %v784_v12, %v663_v26 }
   0xa   :  { %v130_v45 = vrot.slane %v784_v12, %v665_v27  ;;  %v134_v44 = vrot.slane %v784_v12, %v667_v28  ;;  %v262_v43 = vrot.slane %v806_v60, %v667_v28  ;;  %v266_v14 = vrot.slane %v806_v60, %v669_v29 }
   0xb   :  { %v270_v42 = vrot.slane %v806_v60, %v676_v31  ;;  %v274_v41 = vrot.slane %v806_v60, %v678_v32  ;;  %v278_v40 = vrot.slane %v806_v60, %v680_v33  ;;  %v282_v38 = vrot.slane %v806_v60, %v682_v34 }
   0xc   :  { %v102_v24 = vunpack.c.h.bf16 %v775_v13  ;;  %v103_v37 = vunpack.c.l.bf16 %v41_v50  ;;  %v104_v23 = vunpack.c.h.bf16 %v41_v50  ;;  %v105_v36 = vunpack.c.l.bf16 %v42_v54 }
   0xd   :  { %v106_v22 = vunpack.c.h.bf16 %v42_v54  ;;  %v138_v35 = vrot.slane %v784_v12, %v669_v29  ;;  %v142_v21 = vrot.slane %v784_v12, %v676_v31  ;;  %v443_v20 = vmul.f32 %v126_v61, %v43_v9 }
   0xe   :  { %v444_v19 = vmul.f32 %v130_v45, %v44_v10  ;;  %v445_v18 = vmul.f32 %v134_v44, %v45_v11  ;;  %v839_v13 = vmul.f32 %v262_v43, %v77_v15  ;;  %v843_v50 = vmul.f32 %v266_v14, %v78_v16 }
   0xf   :  { %v847_v54 = vmul.f32 %v270_v42, %v79_v17  ;;  %v1115_v9 = vunpack.c.h.bf16 %v626_v5  ;;  %v855_v10 = vmul.f32 %v278_v40, %v1116_v1  ;;  %v1117_v11 = vunpack.c.h.bf16 %v631_v6 }
  0x10   :  { %v1118_v4 = vunpack.c.l.bf16 %v636_v7  ;;  %v1119_v16 = vrot.slane %v661_v25, %v663_v26  ;;  %v1120_v17 = vunpack.c.h.bf16 %v636_v7  ;;  %v1121_v5 = vrot.slane %v661_v25, %v665_v27 }
  0x11   :  { %v851_v61 = vmul.f32 %v274_v41, %v1115_v9  ;;  %v859_v15 = vmul.f32 %v282_v38, %v1117_v11  ;;  %v1122_v40 = vunpack.c.l.bf16 %v641_v8  ;;  %v1123_v6 = vrot.slane %v661_v25, %v667_v28 }
  0x12   :  { %v866_v43 = vmul.f32 %v1119_v16, %v1118_v4  ;;  %v873_v41 = vmul.f32 %v1121_v5, %v1120_v17  ;;  %v1124_v42 = vunpack.c.h.bf16 %v641_v8  ;;  %v1125_v44 = vrot.slane %v661_v25, %v669_v29 }
  0x13   :  { %v880_v38 = vmul.f32 %v1123_v6, %v1122_v40  ;;  %v1126_v7 = vrot.slane %v661_v25, %v676_v31  ;;  %v1127_v9 = vrot.slane %v661_v25, %v678_v32  ;;  %v1128_v11 = vrot.slane %v661_v25, %v680_v33 }
  0x14   :  { %v887_v45 = vmul.f32 %v1125_v44, %v1124_v42  ;;  %v1129_v8 = vrot.slane %v661_v25, %v682_v34  ;;  %v1130_v17 = vrot.slane %v674_v30, %v663_v26  ;;  %v1131_v5 = vrot.slane %v674_v30, %v665_v27 }
  0x15   :  { %v892_v14 = vmul.f32 %v1126_v7, %v87_v62  ;;  %v897_v1 = vmul.f32 %v1127_v9, %v88_v63  ;;  %v902_v4 = vmul.f32 %v1128_v11, %v89_v59  ;;  %v1132_v40 = vrot.slane %v674_v30, %v667_v28 }
  0x16   :  { %v907_v16 = vmul.f32 %v1129_v8, %v90_v0  ;;  %v912_v62 = vmul.f32 %v1130_v17, %v91_v58  ;;  %v917_v63 = vmul.f32 %v1131_v5, %v92_v57  ;;  %v1133_v25 = vrot.slane %v674_v30, %v669_v29 }
  0x17   :  { %v922_v59 = vmul.f32 %v1132_v40, %v93_v56  ;;  %v1134_v6 = vrot.slane %v674_v30, %v676_v31  ;;  %v1135_v42 = vrot.slane %v674_v30, %v678_v32  ;;  %v1136_v44 = vrot.slane %v674_v30, %v680_v33 }
  0x18   :  { %v927_v0 = vmul.f32 %v1133_v25, %v94_v53  ;;  %v1137_v7 = vrot.slane %v674_v30, %v682_v34  ;;  %v1138_v9 = vrot.slane %v695_v39, %v663_v26  ;;  %v1139_v11 = vrot.slane %v695_v39, %v665_v27 }
  0x19   :  { %v932_v58 = vmul.f32 %v1134_v6, %v95_v52  ;;  %v937_v57 = vmul.f32 %v1135_v42, %v96_v48  ;;  %v942_v56 = vmul.f32 %v1136_v44, %v97_v51  ;;  %v1140_v8 = vrot.slane %v695_v39, %v667_v28 }
  0x1a   :  { %v947_v53 = vmul.f32 %v1137_v7, %v98_v49  ;;  %v952_v52 = vmul.f32 %v1138_v9, %v99_v47  ;;  %v957_v48 = vmul.f32 %v1139_v11, %v100_v55  ;;  %v1141_v30 = vrot.slane %v695_v39, %v669_v29  ;;  %v14_v47 = vld [vmem:[%s1112_s0 + $0x18] sm:$0xff] }
  0x1b   :  { %v962_v51 = vmul.f32 %v1140_v8, %v101_v46  ;;  %v1142_v17 = vrot.slane %v695_v39, %v676_v31  ;;  %v1143_v55 = vrot.slane %v695_v39, %v678_v32  ;;  %v1144_v46 = vrot.slane %v695_v39, %v680_v33 }
  0x1c   :  { %v967_v49 = vmul.f32 %v1141_v30, %v102_v24  ;;  %v1145_v24 = vrot.slane %v695_v39, %v682_v34  ;;  %v48_v42 = vunpack.c.h.bf16 %v616_v3  ;;  %v1146_v44 = vunpack.c.h.bf16 %v611_v2  ;;  %v108_v39 = vld [vmem:[%s1113_s1 + $0x8] sm:$0xff] }
  0x1d   :  { %v975_v5 = vmul.f32 %v1142_v17, %v103_v37  ;;  %v980_v40 = vmul.f32 %v1143_v55, %v104_v23  ;;  %v985_v25 = vmul.f32 %v1144_v46, %v105_v36  ;;  %v146_v37 = vrot.slane %v784_v12, %v678_v32 }
  0x1e   :  { %v990_v6 = vmul.f32 %v1145_v24, %v106_v22  ;;  %v446_v7 = vmul.f32 %v138_v35, %v1146_v44  ;;  %v507_v23 = vadd.f32 %v444_v19, %v443_v20  ;;  %v49_v9 = vunpack.c.l.bf16 %v14_v47  ;;  %v15_v22 = vld [vmem:[%s1112_s0 + $0x20] sm:$0xff] }
  0x1f   :  { %v150_v11 = vrot.slane %v784_v12, %v680_v33  ;;  %v1147_v36 = vunpack.c.l.bf16 %v616_v3  ;;  %v50_v17 = vunpack.c.h.bf16 %v14_v47  ;;  %v154_v2 = vrot.slane %v784_v12, %v682_v34 }
  0x20   :  { %v508_v30 = vadd.f32 %v507_v23, %v445_v18  ;;  %v448_v19 = vmul.f32 %v146_v37, %v48_v42  ;;  %v51_v35 = vunpack.c.l.bf16 %v15_v22  ;;  %v158_v55 = vrot.slane %v108_v39, %v663_v26  ;;  %v16_v18 = vld [vmem:[%s1112_s0 + $0x28] sm:$0xff]  ;;  %v17_v37 = vld [vmem:[%s1112_s0 + $0x30] sm:$0xff] }
  0x21   :  { %v447_v8 = vmul.f32 %v142_v21, %v1147_v36  ;;  %v449_v3 = vmul.f32 %v150_v11, %v49_v9  ;;  %v52_v46 = vunpack.c.h.bf16 %v15_v22  ;;  %v162_v24 = vrot.slane %v108_v39, %v665_v27 }
  0x22   :  { %v509_v20 = vadd.f32 %v508_v30, %v446_v7  ;;  %v450_v44 = vmul.f32 %v154_v2, %v50_v17  ;;  %v53_v47 = vunpack.c.l.bf16 %v16_v18  ;;  %v166_v36 = vrot.slane %v108_v39, %v667_v28  ;;  %v18_v2 = vld [vmem:[%s1112_s0 + $0x38] sm:$0xff] }
  0x23   :  { %v451_v12 = vmul.f32 %v158_v55, %v51_v35  ;;  %v54_v7 = vunpack.c.h.bf16 %v16_v18  ;;  %v170_v9 = vrot.slane %v108_v39, %v669_v29  ;;  %v452_v11 = vmul.f32 %v162_v24, %v52_v46  ;;  %v19_v24 = vld [vmem:[%s1112_s0 + $0x40] sm:$0xff] }
  0x24   :  { %v510_v21 = vadd.f32 %v509_v20, %v447_v8  ;;  %v55_v30 = vunpack.c.l.bf16 %v17_v37  ;;  %v174_v22 = vrot.slane %v108_v39, %v676_v31  ;;  %v453_v20 = vmul.f32 %v166_v36, %v53_v47 }
  0x25   :  { %v178_v35 = vrot.slane %v108_v39, %v678_v32  ;;  %v454_v55 = vmul.f32 %v170_v9, %v54_v7  ;;  %v182_v18 = vrot.slane %v108_v39, %v680_v33  ;;  %v58_v47 = vunpack.c.h.bf16 %v18_v2 }
  0x26   :  { %v511_v23 = vadd.f32 %v510_v21, %v448_v19  ;;  %v56_v19 = vunpack.c.h.bf16 %v17_v37  ;;  %v57_v21 = vunpack.c.l.bf16 %v18_v2  ;;  %v186_v36 = vrot.slane %v108_v39, %v682_v34 }
  0x27   :  { %v59_v37 = vunpack.c.l.bf16 %v19_v24 }
  0x28   :  { %v512_v42 = vadd.f32 %v511_v23, %v449_v3  ;;  %v455_v23 = vmul.f32 %v174_v22, %v55_v30  ;;  %v457_v9 = vmul.f32 %v182_v18, %v57_v21  ;;  %v60_v30 = vunpack.c.h.bf16 %v19_v24 }
  0x2a   :  { %v513_v8 = vadd.f32 %v512_v42, %v450_v44  ;;  %v109_v44 = vld [vmem:[%s1113_s1 + $0x10] sm:$0xff] }
  0x2b   :  { %v190_v7 = vrot.slane %v109_v44, %v663_v26  ;;  %v194_v22 = vrot.slane %v109_v44, %v665_v27  ;;  %v198_v2 = vrot.slane %v109_v44, %v667_v28  ;;  %v202_v21 = vrot.slane %v109_v44, %v669_v29 }
  0x2c   :  { %v514_v17 = vadd.f32 %v513_v8, %v451_v12  ;;  %v456_v12 = vmul.f32 %v178_v35, %v56_v19  ;;  %v20_v8 = vld [vmem:[%s1112_s0 + $0x48] sm:$0xff]  ;;  %v21_v35 = vld [vmem:[%s1112_s0 + $0x50] sm:$0xff]  ;;  %v206_v24 = vrot.slane %v109_v44, %v676_v31 }
  0x2d   :  { %v459_v39 = vmul.f32 %v190_v7, %v59_v37  ;;  %v460_v18 = vmul.f32 %v194_v22, %v60_v30  ;;  %v210_v37 = vrot.slane %v109_v44, %v678_v32  ;;  %v23_v22 = vld [vmem:[%s1112_s0 + $0x60] sm:$0xff] }
  0x2e   :  { %v515_v3 = vadd.f32 %v514_v17, %v452_v11 }
  0x30   :  { %v516_v46 = vadd.f32 %v515_v3, %v453_v20  ;;  %v458_v20 = vmul.f32 %v186_v36, %v58_v47  ;;  %v61_v3 = vunpack.c.l.bf16 %v20_v8  ;;  %v22_v36 = vld [vmem:[%s1112_s0 + $0x58] sm:$0xff] }
  0x32   :  { %v517_v42 = vadd.f32 %v516_v46, %v454_v55  ;;  %v62_v55 = vunpack.c.h.bf16 %v20_v8  ;;  %v63_v46 = vunpack.c.l.bf16 %v21_v35  ;;  %v214_v8 = vrot.slane %v109_v44, %v680_v33 }
  0x34   :  { %v518_v11 = vadd.f32 %v517_v42, %v455_v23  ;;  %v461_v42 = vmul.f32 %v198_v2, %v61_v3  ;;  %v462_v7 = vmul.f32 %v202_v21, %v62_v55  ;;  %v66_v3 = vunpack.c.h.bf16 %v22_v36 }
  0x35   :  { %v218_v2 = vrot.slane %v109_v44, %v682_v34 }
  0x36   :  { %v519_v17 = vadd.f32 %v518_v11, %v456_v12  ;;  %v64_v12 = vunpack.c.h.bf16 %v21_v35  ;;  %v65_v11 = vunpack.c.l.bf16 %v22_v36  ;;  %v67_v35 = vunpack.c.l.bf16 %v23_v22 }
  0x38   :  { %v520_v19 = vadd.f32 %v519_v17, %v457_v9  ;;  %v463_v17 = vmul.f32 %v206_v24, %v63_v46  ;;  %v465_v21 = vmul.f32 %v214_v8, %v65_v11  ;;  %v68_v46 = vunpack.c.h.bf16 %v23_v22 }
  0x3a   :  { %v521_v23 = vadd.f32 %v520_v19, %v458_v20  ;;  %v110_v20 = vld [vmem:[%s1113_s1 + $0x18] sm:$0xff] }
  0x3b   :  { %v222_v55 = vrot.slane %v110_v20, %v663_v26  ;;  %v226_v24 = vrot.slane %v110_v20, %v665_v27  ;;  %v230_v36 = vrot.slane %v110_v20, %v667_v28  ;;  %v234_v11 = vrot.slane %v110_v20, %v669_v29  ;;  %v26_v28 = vld [vmem:[%s1112_s0 + $0x78] sm:$0xff] }
  0x3c   :  { %v522_v47 = vadd.f32 %v521_v23, %v459_v39  ;;  %v464_v39 = vmul.f32 %v210_v37, %v64_v12  ;;  %v24_v23 = vld [vmem:[%s1112_s0 + $0x68] sm:$0xff]  ;;  %v25_v37 = vld [vmem:[%s1112_s0 + $0x70] sm:$0xff]  ;;  %v238_v22 = vrot.slane %v110_v20, %v676_v31  ;;  %v27_v31 = vld [vmem:[%s1112_s0 + $0x80] sm:$0xff] }
  0x3d   :  { %v467_v44 = vmul.f32 %v222_v55, %v67_v35  ;;  %v468_v8 = vmul.f32 %v226_v24, %v68_v46  ;;  %v74_v46 = vunpack.c.h.bf16 %v26_v28  ;;  %v250_v24 = vrot.slane %v110_v20, %v682_v34 }
  0x3e   :  { %v523_v9 = vadd.f32 %v522_v47, %v460_v18 }
  0x40   :  { %v524_v30 = vadd.f32 %v523_v9, %v461_v42  ;;  %v466_v42 = vmul.f32 %v218_v2, %v66_v3  ;;  %v69_v9 = vunpack.c.l.bf16 %v24_v23  ;;  %v72_v2 = vunpack.c.h.bf16 %v25_v37 }
  0x42   :  { %v525_v19 = vadd.f32 %v524_v30, %v462_v7  ;;  %v70_v7 = vunpack.c.h.bf16 %v24_v23  ;;  %v71_v30 = vunpack.c.l.bf16 %v25_v37  ;;  %v474_v37 = vmul.f32 %v250_v24, %v74_v46 }
  0x44   :  { %v526_v18 = vadd.f32 %v525_v19, %v463_v17  ;;  %v469_v19 = vmul.f32 %v230_v36, %v69_v9  ;;  %v470_v35 = vmul.f32 %v234_v11, %v70_v7  ;;  %v471_v29 = vmul.f32 %v238_v22, %v71_v30 }
  0x45   :  { %v75_v9 = vunpack.c.l.bf16 %v27_v31 }
  0x46   :  { %v527_v47 = vadd.f32 %v526_v18, %v464_v39  ;;  %v242_v39 = vrot.slane %v110_v20, %v678_v32  ;;  %v246_v18 = vrot.slane %v110_v20, %v680_v33  ;;  %v254_v32 = vrot.slane %v806_v60, %v663_v26 }
  0x47   :  { %v258_v33 = vrot.slane %v806_v60, %v665_v27 }
  0x48   :  { %v528_v12 = vadd.f32 %v527_v47, %v465_v21  ;;  %v73_v21 = vunpack.c.l.bf16 %v26_v28  ;;  %v475_v11 = vmul.f32 %v254_v32, %v75_v9 }
  0x4a   :  { %v529_v17 = vadd.f32 %v528_v12, %v466_v42  ;;  %v472_v42 = vmul.f32 %v242_v39, %v72_v2  ;;  %v473_v36 = vmul.f32 %v246_v18, %v73_v21  ;;  %v76_v12 = vunpack.c.h.bf16 %v27_v31 }
  0x4c   :  { %v530_v3 = vadd.f32 %v529_v17, %v467_v44  ;;  %v476_v17 = vmul.f32 %v258_v33, %v76_v12 }
  0x4e   :  { %v531_v55 = vadd.f32 %v530_v3, %v468_v8 }
  0x50   :  { %v532_v23 = vadd.f32 %v531_v55, %v469_v19 }
  0x52   :  { %v533_v47 = vadd.f32 %v532_v23, %v470_v35 }
  0x54   :  { %v534_v44 = vadd.f32 %v533_v47, %v471_v29 }
  0x56   :  { %v535_v7 = vadd.f32 %v534_v44, %v472_v42 }
  0x58   :  { %v536_v8 = vadd.f32 %v535_v7, %v473_v36 }
  0x5a   :  { %v537_v30 = vadd.f32 %v536_v8, %v474_v37 }
  0x5c   :  { %v538_v22 = vadd.f32 %v537_v30, %v475_v11 }
  0x5e   :  { %v539_v34 = vadd.f32 %v538_v22, %v476_v17 }
  0x60   :  { %v540_v20 = vadd.f32 %v539_v34, %v839_v13 }
  0x62   :  { %v541_v19 = vadd.f32 %v540_v20, %v843_v50 }
  0x64   :  { %v542_v26 = vadd.f32 %v541_v19, %v847_v54 }
  0x66   :  { %v543_v3 = vadd.f32 %v542_v26, %v851_v61 }
  0x68   :  { %v544_v28 = vadd.f32 %v543_v3, %v855_v10 }
  0x6a   :  { %v545_v27 = vadd.f32 %v544_v28, %v859_v15 }
  0x6c   :  { %v546_v60 = vadd.f32 %v545_v27, %v866_v43 }
  0x6e   :  { %v547_v2 = vadd.f32 %v546_v60, %v873_v41 }
  0x70   :  { %v548_v39 = vadd.f32 %v547_v2, %v880_v38 }
  0x72   :  { %v549_v35 = vadd.f32 %v548_v39, %v887_v45 }
  0x74   :  { %v550_v13 = vadd.f32 %v549_v35, %v892_v14 }
  0x76   :  { %v551_v50 = vadd.f32 %v550_v13, %v897_v1 }
  0x78   :  { %v552_v54 = vadd.f32 %v551_v50, %v902_v4 }
  0x7a   :  { %v553_v61 = vadd.f32 %v552_v54, %v907_v16 }
  0x7c   :  { %v554_v10 = vadd.f32 %v553_v61, %v912_v62 }
  0x7e   :  { %v555_v15 = vadd.f32 %v554_v10, %v917_v63 }
  0x80   :  { %v556_v43 = vadd.f32 %v555_v15, %v922_v59 }
  0x82   :  { %v557_v41 = vadd.f32 %v556_v43, %v927_v0 }
  0x84   :  { %v558_v38 = vadd.f32 %v557_v41, %v932_v58 }
  0x86   :  { %v559_v45 = vadd.f32 %v558_v38, %v937_v57 }
  0x88   :  { %v560_v14 = vadd.f32 %v559_v45, %v942_v56 }
  0x8a   :  { %v561_v1 = vadd.f32 %v560_v14, %v947_v53 }
  0x8c   :  { %v562_v4 = vadd.f32 %v561_v1, %v952_v52 }
  0x8e   :  { %v563_v16 = vadd.f32 %v562_v4, %v957_v48 }
  0x90   :  { %v564_v62 = vadd.f32 %v563_v16, %v962_v51 }
  0x92   :  { %v565_v63 = vadd.f32 %v564_v62, %v967_v49 }
  0x94   :  { %v566_v59 = vadd.f32 %v565_v63, %v975_v5 }
  0x96   :  { %v567_v0 = vadd.f32 %v566_v59, %v980_v40 }
  0x98   :  { %v568_v58 = vadd.f32 %v567_v0, %v985_v25 }
  0x9a   :  { %v569_v57 = vadd.f32 %v568_v58, %v990_v6 }
  0x9c   :  { %570 = vadd.xlane.f32.xlu0 %v569_v57 }
 0x129   :  { %v571_v56 = vpop.xlane.xlu0 %570 }
 0x12a   :  { %v572_v55 = vsub.f32 0.0, %v571_v56 }
 0x12c   :  { %v573_v53 = vmul.f32 1.442695, %v572_v55 }
 0x12e   :  { %584 = vpow2.f32 %v573_v53 }
 0x138   :  { %v585_v52 = vpop.eup %584 }
 0x139   :  { %v575_v21 = vadd.f32 1.0, %v585_v52 }
 0x13b   :  { %586 = vrcp.f32 %v575_v21 }
 0x145   :  { %v587_v48 = vpop.eup %586 }
 0x146   :  { %579 = vst.msk [vmem:[%s1114_s2] sm:$0xff] %vm578_vm0, %v587_v48 }

</bundles_post_ra>
